<compile_context>
chip_gen: v5e
topology: v5e:2x2
jax: 0.10.0
libtpu: 0.0.40
codegen_flags: <defaults>
</compile_context>

<pallas_src>
import functools

import jax
import jax.numpy as jnp
from jax import lax
from jax.experimental import pallas as pl
from jax.experimental.pallas import tpu as pltpu

EPS = 1e-5
TILE_TARGET = 2048                 # lane-tile target (multiple of 128)
VMEM_LIMIT = 32 * 1024 * 1024      # explicit scoped-VMEM budget (v7x-safe)
SCRATCH_BUDGET = 4 * 1024 * 1024   # cap for the in-kernel im2col scratch (bytes)


def _round_up(x, m):
    return (x + m - 1) // m * m


def _cdiv(a, b):
    return (a + b - 1) // b


# ----------------------------- Pallas kernels ------------------------------ #

def _conv_bn_relu_pool_kernel(x_lo_ref, x_hi_ref, w_ref, shift_ref, o_ref,
                              win_ref, patch_ref, *,
                              tap_offsets, pool_offsets, cin, k_rows, k_pad,
                              conv_len, tile_m, halo):
    """Fused Conv3d + BatchNorm(eval) + ReLU [+ MaxPool3d(2,2)] on one lane tile.

    x_lo (Cin, tile_m) + x_hi (Cin, halo)  bf16 : contiguous window of the
        (n,z,y,x)-flattened activation covering the tile plus its right halo.
    w (Cout_pad, K_pad) bf16 : conv weights with BN scale pre-folded, columns
        ordered (kz, ky, kx, cin) to match the patch rows below.
    shift (Cout_pad, 1) f32  : folded BN shift (+ conv bias).
    o (Cout_pad, tile_m) bf16: full-grid conv(+pool) output tile (lane-dense).
    """
    # Contiguous window in VMEM.
    win_ref[:, 0:tile_m] = x_lo_ref[...]
    win_ref[:, tile_m:tile_m + halo] = x_hi_ref[...]

    # In-kernel im2col: K = cin*k^3 rows, each a shifted lane slice of the window.
    for t, off in enumerate(tap_offsets):
        patch_ref[t * cin:(t + 1) * cin, :] = win_ref[:, off:off + conv_len]
    if k_pad > k_rows:                       # keep zero-padded K rows NaN-free
        patch_ref[k_rows:k_pad, :] = jnp.zeros((k_pad - k_rows, conv_len),
                                               jnp.bfloat16)

    # Single MXU pass per grid step (BN scale already folded into w).
    conv = jnp.dot(w_ref[...], patch_ref[...], preferred_element_type=jnp.float32)
    conv = jnp.maximum(conv + shift_ref[...], 0.0)

    # Fused 2x2x2 MaxPool: max over the 8 window positions, expressed as shifted
    # lane slices of the conv result (pure VPU work, no extra matmul / HBM trip).
    y = conv[:, 0:tile_m]
    for p in pool_offsets:
        if p:
            y = jnp.maximum(y, conv[:, p:p + tile_m])
    o_ref[...] = y.astype(o_ref.dtype)


def _dense_kernel(x_ref, w_ref, b_ref, o_ref, acc_ref):
    """(N_pad, F) bf16 @ (F, O_pad) bf16 + b, F tiled over the grid, f32 accumulate."""
    @pl.when(pl.program_id(0) == 0)
    def _():
        acc_ref[...] = jnp.zeros_like(acc_ref)

    acc_ref[...] += jnp.dot(x_ref[...], w_ref[...],
                            preferred_element_type=jnp.float32)

    @pl.when(pl.program_id(0) == pl.num_programs(0) - 1)
    def _():
        o_ref[...] = acc_ref[...] + b_ref[...]


# ------------------------------- JAX glue ----------------------------------- #

def conv_block_pallas(act5, cp, do_pool):
    """Conv3d -> BatchNorm3d(eval) -> ReLU -> [MaxPool3d(2,2)], fused.

    act5: (Cin, N, D, H, W) bf16  ->  (Cout, N, D', H', W') bf16 (CNDHW)."""
    Cin, N, D, H, W = act5.shape
    Cout = cp["w"].shape[0]
    k = cp["w"].shape[2]
    Do, Ho, Wo = D - k + 1, H - k + 1, W - k + 1
    HW = H * W
    M = N * D * H * W

    # Tap / pool-parity offsets in the flattened (n, z, y, x) full-grid layout.
    taps = tuple(dz * HW + dy * W + dx
                 for dz in range(k) for dy in range(k) for dx in range(k))
    pools = (tuple(pz * HW + py * W + px
                   for pz in (0, 1) for py in (0, 1) for px in (0, 1))
             if do_pool else (0,))
    pool_ext = _round_up(max(pools), 128) if do_pool else 0
    K = Cin * k ** 3
    K_pad = _round_up(K, 16)
    C_pad = _round_up(Cout, 8)

    # Right halo needed by the pool parities + conv taps; the lane tile is an
    # integer multiple of it so the halo block index is simply (i+1)*r.
    halo = _round_up(pool_ext + max(taps), 128)
    budget_lanes = max(128, (SCRATCH_BUDGET // (2 * K_pad)) // 128 * 128)
    target = min(TILE_TARGET, budget_lanes)
    if M < 2 * target:                       # keep >=2 grid steps (v7x megacore)
        target = max(128, _round_up(_cdiv(M, 2), 128))
    r = max(1, target // halo)
    tile_m = r * halo
    conv_len = tile_m + pool_ext
    grid = _cdiv(M, tile_m)
    m_out = grid * tile_m
    m_in = m_out + halo

    # bf16 glue only: flatten + zero-pad the tail (no k^3 expansion, no transpose).
    x2 = jnp.pad(act5.reshape(Cin, M), ((0, 0), (0, m_in - M)))

    # Fold BN (eval):  y = conv(x, w*s) + ((b - mean)*s + beta),  s = gamma/sqrt(var+eps)
    scale = cp["gamma"] / jnp.sqrt(cp["var"] + EPS)
    shift = (cp["b"] - cp["mean"]) * scale + cp["beta"]
    wmat = (cp["w"] * scale[:, None, None, None, None])
    wmat = wmat.transpose(0, 2, 3, 4, 1).reshape(Cout, K)          # (kz, ky, kx, cin)
    wmat = jnp.pad(wmat, ((0, C_pad - Cout), (0, K_pad - K))).astype(jnp.bfloat16)
    shift_col = jnp.pad(shift, (0, C_pad - Cout)).reshape(C_pad, 1).astype(jnp.float32)

    kernel = functools.partial(
        _conv_bn_relu_pool_kernel,
        tap_offsets=taps, pool_offsets=pools, cin=Cin, k_rows=K, k_pad=K_pad,
        conv_len=conv_len, tile_m=tile_m, halo=halo)

    flops = 2 * C_pad * K_pad * conv_len * grid
    bytes_accessed = (x2.size * 2 + grid * Cin * halo * 2
                      + wmat.size * 2 + C_pad * m_out * 2)

    out = pl.pallas_call(
        kernel,
        out_shape=jax.ShapeDtypeStruct((C_pad, m_out), jnp.bfloat16),
        grid=(grid,),
        in_specs=[
            pl.BlockSpec((Cin, tile_m), lambda i: (0, i)),            # tile body
            pl.BlockSpec((Cin, halo), lambda i: (0, (i + 1) * r)),    # right halo
            pl.BlockSpec((C_pad, K_pad), lambda i: (0, 0)),           # folded weights
            pl.BlockSpec((C_pad, 1), lambda i: (0, 0)),               # BN shift (+bias)
        ],
        out_specs=pl.BlockSpec((C_pad, tile_m), lambda i: (0, i)),
        scratch_shapes=[pltpu.VMEM((Cin, tile_m + halo), jnp.bfloat16),
                        pltpu.VMEM((K_pad, conv_len), jnp.bfloat16)],
        compiler_params=pltpu.CompilerParams(
            dimension_semantics=("parallel",),
            vmem_limit_bytes=VMEM_LIMIT),
        cost_estimate=pl.CostEstimate(flops=flops, transcendentals=0,
                                      bytes_accessed=bytes_accessed),
    )(x2, x2, wmat, shift_col)

    # Select the valid region (and pooled anchors) from the full-grid slab.
    out5 = out[:Cout, :M].reshape(Cout, N, D, H, W)
    if do_pool:
        Dp, Hp, Wp = Do // 2, Ho // 2, Wo // 2
        return out5[:, :, 0:2 * Dp:2, 0:2 * Hp:2, 0:2 * Wp:2]
    return out5[:, :, :Do, :Ho, :Wo]


def dense_block_pallas(x2d, dp):
    """Flatten (already 2D) -> Linear; lane-dense padded output, F tiled with an
    accumulator."""
    N, F = x2d.shape
    O = dp["w"].shape[0]
    N_pad = _round_up(max(N, 8), 8)
    O_pad = _round_up(max(O, 128), 128)
    tile_f = min(1024, _round_up(F, 128))
    F_pad = _round_up(F, tile_f)
    grid = F_pad // tile_f

    xb = jnp.pad(x2d.astype(jnp.bfloat16), ((0, N_pad - N), (0, F_pad - F)))
    wt = jnp.pad(dp["w"].astype(jnp.bfloat16).T, ((0, F_pad - F), (0, O_pad - O)))
    b = jnp.pad(dp["b"], (0, O_pad - O)).reshape(1, O_pad).astype(jnp.float32)

    out = pl.pallas_call(
        _dense_kernel,
        out_shape=jax.ShapeDtypeStruct((N_pad, O_pad), jnp.float32),
        grid=(grid,),
        in_specs=[pl.BlockSpec((N_pad, tile_f), lambda j: (0, j)),
                  pl.BlockSpec((tile_f, O_pad), lambda j: (j, 0)),
                  pl.BlockSpec((1, O_pad), lambda j: (0, 0))],
        out_specs=pl.BlockSpec((N_pad, O_pad), lambda j: (0, 0)),
        scratch_shapes=[pltpu.VMEM((N_pad, O_pad), jnp.float32)],
        compiler_params=pltpu.CompilerParams(
            dimension_semantics=("arbitrary",),
            vmem_limit_bytes=VMEM_LIMIT),
        cost_estimate=pl.CostEstimate(flops=2 * N_pad * F_pad * O_pad,
                                      transcendentals=0,
                                      bytes_accessed=(xb.size * 2 + wt.size * 2
                                                      + N_pad * O_pad * 4)),
    )(xb, wt, b)
    return out[:N, :O]


def regress_convnet_forward(x, params, depth):
    # bf16 CNDHW activations throughout (cast once, before any layout glue).
    act = jnp.transpose(x.astype(jnp.bfloat16), (1, 0, 2, 3, 4))   # NCDHW -> CNDHW
    for i, cp in enumerate(params["conv"]):
        act = conv_block_pallas(act, cp, do_pool=(i < depth - 1))
    # torch Flatten order (c, d, h, w): one transpose of the tiny final activation.
    N = act.shape[1]
    x2d = jnp.transpose(act, (1, 0, 2, 3, 4)).reshape(N, -1)
    for dp in params["dense"]:
        x2d = dense_block_pallas(x2d, dp)
    return x2d


# ---------------------------- parameter init -------------------------------- #

def init_params(key, in_channels, convsizes, filters, dense_layers):
    params = {"conv": [], "dense": []}
    chs = (in_channels, *filters)
    for i, (k, f) in enumerate(zip(convsizes, filters)):
        key, k0, k1, k2, k3, k4, k5 = jax.random.split(key, 7)
        fan_in = chs[i] * k ** 3
        params["conv"].append(dict(
            w=jax.random.normal(k0, (f, chs[i], k, k, k), jnp.float32)
              * (2.0 / fan_in) ** 0.5,
            b=0.01 * jax.random.normal(k1, (f,), jnp.float32),
            gamma=1.0 + 0.1 * jax.random.normal(k2, (f,), jnp.float32),
            beta=0.1 * jax.random.normal(k3, (f,), jnp.float32),
            mean=0.1 * jax.random.normal(k4, (f,), jnp.float32),
            var=1.0 + 0.1 * jax.random.uniform(k5, (f,), jnp.float32),
        ))
    for (din, dout) in dense_layers:
        key, k0, k1 = jax.random.split(key, 3)
        params["dense"].append(dict(
            w=jax.random.normal(k0, (dout, din), jnp.float32) * (1.0 / din) ** 0.5,
            b=0.01 * jax.random.normal(k1, (dout,), jnp.float32),
        ))
    return params


# ------------------------------ pure-JAX ref -------------------------------- #

def reference_forward(x, params, depth, match_kernel=False):
    """XLA reference.  match_kernel=True applies the same roundings the Pallas path
    uses (bf16 matmul operands AND bf16 activation storage, f32 accumulation, BN
    scale folded into the weights) so it can be compared with a tight tolerance;
    match_kernel=False is the exact f32 reference."""
    cast = (lambda a: a.astype(jnp.bfloat16)) if match_kernel else (lambda a: a)
    prec = lax.Precision.HIGHEST
    act = cast(x)
    for i, cp in enumerate(params["conv"]):
        scale = cp["gamma"] / jnp.sqrt(cp["var"] + EPS)
        shift = (cp["b"] - cp["mean"]) * scale + cp["beta"]
        wfold = cp["w"] * scale[:, None, None, None, None]
        z = lax.conv_general_dilated(
            cast(act), cast(wfold), window_strides=(1, 1, 1), padding="VALID",
            dimension_numbers=("NCDHW", "OIDHW", "NCDHW"),
            preferred_element_type=jnp.float32, precision=prec)
        z = jnp.maximum(z + shift[None, :, None, None, None], 0.0)
        if i < depth - 1:
            z = lax.reduce_window(z, -jnp.inf, lax.max,
                                  (1, 1, 2, 2, 2), (1, 1, 2, 2, 2), "VALID")
        act = cast(z)
    out = act.reshape(act.shape[0], -1)
    for dp in params["dense"]:
        out = jnp.dot(cast(out), cast(dp["w"].T),
                      preferred_element_type=jnp.float32, precision=prec) + dp["b"]
    return out


# ---------------------------------- main ------------------------------------ #

if __name__ == "__main__":
    # Small instantiation of RegressConvNet:
    #   in_channels=1, convsizes=[3,3], filters=[4,8], dense_layers=[(1000,1)]
    # Input (N=2, C=1, D=H=W=16): conv k=3 -> 14 -> pool -> 7 -> conv k=3 -> 5
    # flatten 8*5^3 = 1000 -> 1
    in_channels = 1
    convsizes = [3, 3]
    filters = [4, 8]
    dense_layers = [(filters[-1] * 5 * 5 * 5, 1)]
    depth = len(filters)

    key = jax.random.PRNGKey(0)
    key, kx, kp = jax.random.split(key, 3)
    x = jax.random.normal(kx, (2, in_channels, 16, 16, 16), jnp.float32)
    params = init_params(kp, in_channels, convsizes, filters, dense_layers)

    fwd = jax.jit(functools.partial(regress_convnet_forward, depth=depth))
    out = jax.block_until_ready(fwd(x, params))
    assert out.shape == (2, 1), out.shape

    # Tight check vs. a precision-matched reference (bf16 operands + bf16 activation
    # storage, f32 accumulation, BN folded into W) -> validates the in-kernel im2col
    # indexing, BN folding and the fused pooling.
    ref_m = jax.block_until_ready(
        reference_forward(x, params, depth, match_kernel=True))
    assert jnp.allclose(out, ref_m, rtol=2e-2, atol=2e-2), (out, ref_m)

    # Loose check vs. the exact f32 reference: tolerance sized for bf16 matmul
    # operands AND bf16 activation storage between blocks.
    ref_f32 = jax.block_until_ready(
        reference_forward(x, params, depth, match_kernel=False))
    assert jnp.allclose(out, ref_f32, rtol=1e-1, atol=1e-1), (out, ref_f32)

    print("KERNEL_OK")
</pallas_src>

<mosaic_0001>
module attributes {stable_mosaic.version = 11 : i64} {
  func.func @_conv_bn_relu_pool_kernel(%arg0: i32, %arg1: memref<1x2048xbf16, #tpu.memory_space<vmem>>, %arg2: memref<1x1024xbf16, #tpu.memory_space<vmem>>, %arg3: memref<8x32xbf16, #tpu.memory_space<vmem>>, %arg4: memref<8x1xf32, #tpu.memory_space<vmem>>, %arg5: memref<8x2048xbf16, #tpu.memory_space<vmem>>, %arg6: memref<1x3072xbf16, #tpu.memory_space<vmem>>, %arg7: memref<32x2432xbf16, #tpu.memory_space<vmem>>) attributes {dimension_semantics = [#tpu.dimension_semantics<parallel>], iteration_bounds = array<i64: 4>, scalar_prefetch = 0 : i64, scratch_operands = 2 : i64, tpu.core_type = #tpu.core_type<tc>, window_params = [{transform_indices = @transform_0, window_bounds = array<i64: 1, 2048>}, {transform_indices = @transform_1, window_bounds = array<i64: 1, 1024>}, {pipeline_mode = #tpu.pipeline_mode<synchronous>, transform_indices = @transform_2, window_bounds = array<i64: 8, 32>}, {pipeline_mode = #tpu.pipeline_mode<synchronous>, transform_indices = @transform_3, window_bounds = array<i64: 8, 1>}, {transform_indices = @transform_4, window_bounds = array<i64: 8, 2048>}]} {
    %c0 = arith.constant 0 : index
    %c0_0 = arith.constant 0 : index
    %0 = vector.load %arg1[%c0, %c0_0] : memref<1x2048xbf16, #tpu.memory_space<vmem>>, vector<1x2048xbf16>
    %c0_1 = arith.constant 0 : index
    %c0_2 = arith.constant 0 : index
    %1 = vector.load %arg6[%c0_1, %c0_2] : memref<1x3072xbf16, #tpu.memory_space<vmem>>, vector<1x2048xbf16>
    tpu.vector_store %arg6[%c0_1, %c0_2], %0 {strides = array<i32>} : memref<1x3072xbf16, #tpu.memory_space<vmem>>, vector<1x2048xbf16>,
    %c0_3 = arith.constant 0 : index
    %c0_4 = arith.constant 0 : index
    %2 = vector.load %arg2[%c0_3, %c0_4] : memref<1x1024xbf16, #tpu.memory_space<vmem>>, vector<1x1024xbf16>
    %c0_5 = arith.constant 0 : index
    %c2048 = arith.constant 2048 : index
    %3 = vector.load %arg6[%c0_5, %c2048] : memref<1x3072xbf16, #tpu.memory_space<vmem>>, vector<1x1024xbf16>
    tpu.vector_store %arg6[%c0_5, %c2048], %2 {strides = array<i32>} : memref<1x3072xbf16, #tpu.memory_space<vmem>>, vector<1x1024xbf16>,
    %c0_6 = arith.constant 0 : index
    %c0_7 = arith.constant 0 : index
    %4 = vector.load %arg6[%c0_6, %c0_7] : memref<1x3072xbf16, #tpu.memory_space<vmem>>, vector<1x2432xbf16>
    %c0_8 = arith.constant 0 : index
    %c0_9 = arith.constant 0 : index
    %5 = vector.load %arg7[%c0_8, %c0_9] : memref<32x2432xbf16, #tpu.memory_space<vmem>>, vector<1x2432xbf16>
    tpu.vector_store %arg7[%c0_8, %c0_9], %4 {strides = array<i32>} : memref<32x2432xbf16, #tpu.memory_space<vmem>>, vector<1x2432xbf16>,
    %c0_10 = arith.constant 0 : index
    %c1 = arith.constant 1 : index
    %6 = vector.load %arg6[%c0_10, %c1] : memref<1x3072xbf16, #tpu.memory_space<vmem>>, vector<1x2432xbf16>
    %c1_11 = arith.constant 1 : index
    %c0_12 = arith.constant 0 : index
    %7 = vector.load %arg7[%c1_11, %c0_12] : memref<32x2432xbf16, #tpu.memory_space<vmem>>, vector<1x2432xbf16>
    tpu.vector_store %arg7[%c1_11, %c0_12], %6 {strides = array<i32>} : memref<32x2432xbf16, #tpu.memory_space<vmem>>, vector<1x2432xbf16>,
    %c0_13 = arith.constant 0 : index
    %c2 = arith.constant 2 : index
    %8 = vector.load %arg6[%c0_13, %c2] : memref<1x3072xbf16, #tpu.memory_space<vmem>>, vector<1x2432xbf16>
    %c2_14 = arith.constant 2 : index
    %c0_15 = arith.constant 0 : index
    %9 = vector.load %arg7[%c2_14, %c0_15] : memref<32x2432xbf16, #tpu.memory_space<vmem>>, vector<1x2432xbf16>
    tpu.vector_store %arg7[%c2_14, %c0_15], %8 {strides = array<i32>} : memref<32x2432xbf16, #tpu.memory_space<vmem>>, vector<1x2432xbf16>,
    %c0_16 = arith.constant 0 : index
    %c16 = arith.constant 16 : index
    %10 = vector.load %arg6[%c0_16, %c16] : memref<1x3072xbf16, #tpu.memory_space<vmem>>, vector<1x2432xbf16>
    %c3 = arith.constant 3 : index
    %c0_17 = arith.constant 0 : index
    %11 = vector.load %arg7[%c3, %c0_17] : memref<32x2432xbf16, #tpu.memory_space<vmem>>, vector<1x2432xbf16>
    tpu.vector_store %arg7[%c3, %c0_17], %10 {strides = array<i32>} : memref<32x2432xbf16, #tpu.memory_space<vmem>>, vector<1x2432xbf16>,
    %c0_18 = arith.constant 0 : index
    %c17 = arith.constant 17 : index
    %12 = vector.load %arg6[%c0_18, %c17] : memref<1x3072xbf16, #tpu.memory_space<vmem>>, vector<1x2432xbf16>
    %c4 = arith.constant 4 : index
    %c0_19 = arith.constant 0 : index
    %13 = vector.load %arg7[%c4, %c0_19] : memref<32x2432xbf16, #tpu.memory_space<vmem>>, vector<1x2432xbf16>
    tpu.vector_store %arg7[%c4, %c0_19], %12 {strides = array<i32>} : memref<32x2432xbf16, #tpu.memory_space<vmem>>, vector<1x2432xbf16>,
    %c0_20 = arith.constant 0 : index
    %c18 = arith.constant 18 : index
    %14 = vector.load %arg6[%c0_20, %c18] : memref<1x3072xbf16, #tpu.memory_space<vmem>>, vector<1x2432xbf16>
    %c5 = arith.constant 5 : index
    %c0_21 = arith.constant 0 : index
    %15 = vector.load %arg7[%c5, %c0_21] : memref<32x2432xbf16, #tpu.memory_space<vmem>>, vector<1x2432xbf16>
    tpu.vector_store %arg7[%c5, %c0_21], %14 {strides = array<i32>} : memref<32x2432xbf16, #tpu.memory_space<vmem>>, vector<1x2432xbf16>,
    %c0_22 = arith.constant 0 : index
    %c32 = arith.constant 32 : index
    %16 = vector.load %arg6[%c0_22, %c32] : memref<1x3072xbf16, #tpu.memory_space<vmem>>, vector<1x2432xbf16>
    %c6 = arith.constant 6 : index
    %c0_23 = arith.constant 0 : index
    %17 = vector.load %arg7[%c6, %c0_23] : memref<32x2432xbf16, #tpu.memory_space<vmem>>, vector<1x2432xbf16>
    tpu.vector_store %arg7[%c6, %c0_23], %16 {strides = array<i32>} : memref<32x2432xbf16, #tpu.memory_space<vmem>>, vector<1x2432xbf16>,
    %c0_24 = arith.constant 0 : index
    %c33 = arith.constant 33 : index
    %18 = vector.load %arg6[%c0_24, %c33] : memref<1x3072xbf16, #tpu.memory_space<vmem>>, vector<1x2432xbf16>
    %c7 = arith.constant 7 : index
    %c0_25 = arith.constant 0 : index
    %19 = vector.load %arg7[%c7, %c0_25] : memref<32x2432xbf16, #tpu.memory_space<vmem>>, vector<1x2432xbf16>
    tpu.vector_store %arg7[%c7, %c0_25], %18 {strides = array<i32>} : memref<32x2432xbf16, #tpu.memory_space<vmem>>, vector<1x2432xbf16>,
    %c0_26 = arith.constant 0 : index
    %c34 = arith.constant 34 : index
    %20 = vector.load %arg6[%c0_26, %c34] : memref<1x3072xbf16, #tpu.memory_space<vmem>>, vector<1x2432xbf16>
    %c8 = arith.constant 8 : index
    %c0_27 = arith.constant 0 : index
    %21 = vector.load %arg7[%c8, %c0_27] : memref<32x2432xbf16, #tpu.memory_space<vmem>>, vector<1x2432xbf16>
    tpu.vector_store %arg7[%c8, %c0_27], %20 {strides = array<i32>} : memref<32x2432xbf16, #tpu.memory_space<vmem>>, vector<1x2432xbf16>,
    %c0_28 = arith.constant 0 : index
    %c256 = arith.constant 256 : index
    %22 = vector.load %arg6[%c0_28, %c256] : memref<1x3072xbf16, #tpu.memory_space<vmem>>, vector<1x2432xbf16>
    %c9 = arith.constant 9 : index
    %c0_29 = arith.constant 0 : index
    %23 = vector.load %arg7[%c9, %c0_29] : memref<32x2432xbf16, #tpu.memory_space<vmem>>, vector<1x2432xbf16>
    tpu.vector_store %arg7[%c9, %c0_29], %22 {strides = array<i32>} : memref<32x2432xbf16, #tpu.memory_space<vmem>>, vector<1x2432xbf16>,
    %c0_30 = arith.constant 0 : index
    %c257 = arith.constant 257 : index
    %24 = vector.load %arg6[%c0_30, %c257] : memref<1x3072xbf16, #tpu.memory_space<vmem>>, vector<1x2432xbf16>
    %c10 = arith.constant 10 : index
    %c0_31 = arith.constant 0 : index
    %25 = vector.load %arg7[%c10, %c0_31] : memref<32x2432xbf16, #tpu.memory_space<vmem>>, vector<1x2432xbf16>
    tpu.vector_store %arg7[%c10, %c0_31], %24 {strides = array<i32>} : memref<32x2432xbf16, #tpu.memory_space<vmem>>, vector<1x2432xbf16>,
    %c0_32 = arith.constant 0 : index
    %c258 = arith.constant 258 : index
    %26 = vector.load %arg6[%c0_32, %c258] : memref<1x3072xbf16, #tpu.memory_space<vmem>>, vector<1x2432xbf16>
    %c11 = arith.constant 11 : index
    %c0_33 = arith.constant 0 : index
    %27 = vector.load %arg7[%c11, %c0_33] : memref<32x2432xbf16, #tpu.memory_space<vmem>>, vector<1x2432xbf16>
    tpu.vector_store %arg7[%c11, %c0_33], %26 {strides = array<i32>} : memref<32x2432xbf16, #tpu.memory_space<vmem>>, vector<1x2432xbf16>,
    %c0_34 = arith.constant 0 : index
    %c272 = arith.constant 272 : index
    %28 = vector.load %arg6[%c0_34, %c272] : memref<1x3072xbf16, #tpu.memory_space<vmem>>, vector<1x2432xbf16>
    %c12 = arith.constant 12 : index
    %c0_35 = arith.constant 0 : index
    %29 = vector.load %arg7[%c12, %c0_35] : memref<32x2432xbf16, #tpu.memory_space<vmem>>, vector<1x2432xbf16>
    tpu.vector_store %arg7[%c12, %c0_35], %28 {strides = array<i32>} : memref<32x2432xbf16, #tpu.memory_space<vmem>>, vector<1x2432xbf16>,
    %c0_36 = arith.constant 0 : index
    %c273 = arith.constant 273 : index
    %30 = vector.load %arg6[%c0_36, %c273] : memref<1x3072xbf16, #tpu.memory_space<vmem>>, vector<1x2432xbf16>
    %c13 = arith.constant 13 : index
    %c0_37 = arith.constant 0 : index
    %31 = vector.load %arg7[%c13, %c0_37] : memref<32x2432xbf16, #tpu.memory_space<vmem>>, vector<1x2432xbf16>
    tpu.vector_store %arg7[%c13, %c0_37], %30 {strides = array<i32>} : memref<32x2432xbf16, #tpu.memory_space<vmem>>, vector<1x2432xbf16>,
    %c0_38 = arith.constant 0 : index
    %c274 = arith.constant 274 : index
    %32 = vector.load %arg6[%c0_38, %c274] : memref<1x3072xbf16, #tpu.memory_space<vmem>>, vector<1x2432xbf16>
    %c14 = arith.constant 14 : index
    %c0_39 = arith.constant 0 : index
    %33 = vector.load %arg7[%c14, %c0_39] : memref<32x2432xbf16, #tpu.memory_space<vmem>>, vector<1x2432xbf16>
    tpu.vector_store %arg7[%c14, %c0_39], %32 {strides = array<i32>} : memref<32x2432xbf16, #tpu.memory_space<vmem>>, vector<1x2432xbf16>,
    %c0_40 = arith.constant 0 : index
    %c288 = arith.constant 288 : index
    %34 = vector.load %arg6[%c0_40, %c288] : memref<1x3072xbf16, #tpu.memory_space<vmem>>, vector<1x2432xbf16>
    %c15 = arith.constant 15 : index
    %c0_41 = arith.constant 0 : index
    %35 = vector.load %arg7[%c15, %c0_41] : memref<32x2432xbf16, #tpu.memory_space<vmem>>, vector<1x2432xbf16>
    tpu.vector_store %arg7[%c15, %c0_41], %34 {strides = array<i32>} : memref<32x2432xbf16, #tpu.memory_space<vmem>>, vector<1x2432xbf16>,
    %c0_42 = arith.constant 0 : index
    %c289 = arith.constant 289 : index
    %36 = vector.load %arg6[%c0_42, %c289] : memref<1x3072xbf16, #tpu.memory_space<vmem>>, vector<1x2432xbf16>
    %c16_43 = arith.constant 16 : index
    %c0_44 = arith.constant 0 : index
    %37 = vector.load %arg7[%c16_43, %c0_44] : memref<32x2432xbf16, #tpu.memory_space<vmem>>, vector<1x2432xbf16>
    tpu.vector_store %arg7[%c16_43, %c0_44], %36 {strides = array<i32>} : memref<32x2432xbf16, #tpu.memory_space<vmem>>, vector<1x2432xbf16>,
    %c0_45 = arith.constant 0 : index
    %c290 = arith.constant 290 : index
    %38 = vector.load %arg6[%c0_45, %c290] : memref<1x3072xbf16, #tpu.memory_space<vmem>>, vector<1x2432xbf16>
    %c17_46 = arith.constant 17 : index
    %c0_47 = arith.constant 0 : index
    %39 = vector.load %arg7[%c17_46, %c0_47] : memref<32x2432xbf16, #tpu.memory_space<vmem>>, vector<1x2432xbf16>
    tpu.vector_store %arg7[%c17_46, %c0_47], %38 {strides = array<i32>} : memref<32x2432xbf16, #tpu.memory_space<vmem>>, vector<1x2432xbf16>,
    %c0_48 = arith.constant 0 : index
    %c512 = arith.constant 512 : index
    %40 = vector.load %arg6[%c0_48, %c512] : memref<1x3072xbf16, #tpu.memory_space<vmem>>, vector<1x2432xbf16>
    %c18_49 = arith.constant 18 : index
    %c0_50 = arith.constant 0 : index
    %41 = vector.load %arg7[%c18_49, %c0_50] : memref<32x2432xbf16, #tpu.memory_space<vmem>>, vector<1x2432xbf16>
    tpu.vector_store %arg7[%c18_49, %c0_50], %40 {strides = array<i32>} : memref<32x2432xbf16, #tpu.memory_space<vmem>>, vector<1x2432xbf16>,
    %c0_51 = arith.constant 0 : index
    %c513 = arith.constant 513 : index
    %42 = vector.load %arg6[%c0_51, %c513] : memref<1x3072xbf16, #tpu.memory_space<vmem>>, vector<1x2432xbf16>
    %c19 = arith.constant 19 : index
    %c0_52 = arith.constant 0 : index
    %43 = vector.load %arg7[%c19, %c0_52] : memref<32x2432xbf16, #tpu.memory_space<vmem>>, vector<1x2432xbf16>
    tpu.vector_store %arg7[%c19, %c0_52], %42 {strides = array<i32>} : memref<32x2432xbf16, #tpu.memory_space<vmem>>, vector<1x2432xbf16>,
    %c0_53 = arith.constant 0 : index
    %c514 = arith.constant 514 : index
    %44 = vector.load %arg6[%c0_53, %c514] : memref<1x3072xbf16, #tpu.memory_space<vmem>>, vector<1x2432xbf16>
    %c20 = arith.constant 20 : index
    %c0_54 = arith.constant 0 : index
    %45 = vector.load %arg7[%c20, %c0_54] : memref<32x2432xbf16, #tpu.memory_space<vmem>>, vector<1x2432xbf16>
    tpu.vector_store %arg7[%c20, %c0_54], %44 {strides = array<i32>} : memref<32x2432xbf16, #tpu.memory_space<vmem>>, vector<1x2432xbf16>,
    %c0_55 = arith.constant 0 : index
    %c528 = arith.constant 528 : index
    %46 = vector.load %arg6[%c0_55, %c528] : memref<1x3072xbf16, #tpu.memory_space<vmem>>, vector<1x2432xbf16>
    %c21 = arith.constant 21 : index
    %c0_56 = arith.constant 0 : index
    %47 = vector.load %arg7[%c21, %c0_56] : memref<32x2432xbf16, #tpu.memory_space<vmem>>, vector<1x2432xbf16>
    tpu.vector_store %arg7[%c21, %c0_56], %46 {strides = array<i32>} : memref<32x2432xbf16, #tpu.memory_space<vmem>>, vector<1x2432xbf16>,
    %c0_57 = arith.constant 0 : index
    %c529 = arith.constant 529 : index
    %48 = vector.load %arg6[%c0_57, %c529] : memref<1x3072xbf16, #tpu.memory_space<vmem>>, vector<1x2432xbf16>
    %c22 = arith.constant 22 : index
    %c0_58 = arith.constant 0 : index
    %49 = vector.load %arg7[%c22, %c0_58] : memref<32x2432xbf16, #tpu.memory_space<vmem>>, vector<1x2432xbf16>
    tpu.vector_store %arg7[%c22, %c0_58], %48 {strides = array<i32>} : memref<32x2432xbf16, #tpu.memory_space<vmem>>, vector<1x2432xbf16>,
    %c0_59 = arith.constant 0 : index
    %c530 = arith.constant 530 : index
    %50 = vector.load %arg6[%c0_59, %c530] : memref<1x3072xbf16, #tpu.memory_space<vmem>>, vector<1x2432xbf16>
    %c23 = arith.constant 23 : index
    %c0_60 = arith.constant 0 : index
    %51 = vector.load %arg7[%c23, %c0_60] : memref<32x2432xbf16, #tpu.memory_space<vmem>>, vector<1x2432xbf16>
    tpu.vector_store %arg7[%c23, %c0_60], %50 {strides = array<i32>} : memref<32x2432xbf16, #tpu.memory_space<vmem>>, vector<1x2432xbf16>,
    %c0_61 = arith.constant 0 : index
    %c544 = arith.constant 544 : index
    %52 = vector.load %arg6[%c0_61, %c544] : memref<1x3072xbf16, #tpu.memory_space<vmem>>, vector<1x2432xbf16>
    %c24 = arith.constant 24 : index
    %c0_62 = arith.constant 0 : index
    %53 = vector.load %arg7[%c24, %c0_62] : memref<32x2432xbf16, #tpu.memory_space<vmem>>, vector<1x2432xbf16>
    tpu.vector_store %arg7[%c24, %c0_62], %52 {strides = array<i32>} : memref<32x2432xbf16, #tpu.memory_space<vmem>>, vector<1x2432xbf16>,
    %c0_63 = arith.constant 0 : index
    %c545 = arith.constant 545 : index
    %54 = vector.load %arg6[%c0_63, %c545] : memref<1x3072xbf16, #tpu.memory_space<vmem>>, vector<1x2432xbf16>
    %c25 = arith.constant 25 : index
    %c0_64 = arith.constant 0 : index
    %55 = vector.load %arg7[%c25, %c0_64] : memref<32x2432xbf16, #tpu.memory_space<vmem>>, vector<1x2432xbf16>
    tpu.vector_store %arg7[%c25, %c0_64], %54 {strides = array<i32>} : memref<32x2432xbf16, #tpu.memory_space<vmem>>, vector<1x2432xbf16>,
    %c0_65 = arith.constant 0 : index
    %c546 = arith.constant 546 : index
    %56 = vector.load %arg6[%c0_65, %c546] : memref<1x3072xbf16, #tpu.memory_space<vmem>>, vector<1x2432xbf16>
    %c26 = arith.constant 26 : index
    %c0_66 = arith.constant 0 : index
    %57 = vector.load %arg7[%c26, %c0_66] : memref<32x2432xbf16, #tpu.memory_space<vmem>>, vector<1x2432xbf16>
    tpu.vector_store %arg7[%c26, %c0_66], %56 {strides = array<i32>} : memref<32x2432xbf16, #tpu.memory_space<vmem>>, vector<1x2432xbf16>,
    %cst = arith.constant 0.000000e+00 : bf16
    %58 = vector.broadcast %cst : bf16 to vector<5x2432xbf16>
    %c27 = arith.constant 27 : index
    %c0_67 = arith.constant 0 : index
    %59 = vector.load %arg7[%c27, %c0_67] : memref<32x2432xbf16, #tpu.memory_space<vmem>>, vector<5x2432xbf16>
    tpu.vector_store %arg7[%c27, %c0_67], %58 {strides = array<i32>} : memref<32x2432xbf16, #tpu.memory_space<vmem>>, vector<5x2432xbf16>,
    %c0_68 = arith.constant 0 : index
    %c0_69 = arith.constant 0 : index
    %60 = vector.load %arg3[%c0_68, %c0_69] : memref<8x32xbf16, #tpu.memory_space<vmem>>, vector<8x32xbf16>
    %c0_70 = arith.constant 0 : index
    %c0_71 = arith.constant 0 : index
    %61 = vector.load %arg7[%c0_70, %c0_71] : memref<32x2432xbf16, #tpu.memory_space<vmem>>, vector<32x2432xbf16>
    %cst_72 = arith.constant dense<0.000000e+00> : vector<8x2432xf32>
    %62 = tpu.matmul %60, %61, %cst_72 {dimension_numbers = #tpu.dot_dimension_numbers<[1], [0], [0], [1], [0, 0, 1, 1], [], []>} : vector<8x32xbf16>, vector<32x2432xbf16>, vector<8x2432xf32> -> vector<8x2432xf32>
    %c0_73 = arith.constant 0 : index
    %c0_74 = arith.constant 0 : index
    %63 = vector.load %arg4[%c0_73, %c0_74] : memref<8x1xf32, #tpu.memory_space<vmem>>, vector<8x1xf32>
    %64 = vector.broadcast %63 : vector<8x1xf32> to vector<8x2432xf32>
    %65 = arith.addf %62, %64 : vector<8x2432xf32>
    %cst_75 = arith.constant 0.000000e+00 : f32
    %66 = vector.broadcast %cst_75 : f32 to vector<8x2432xf32>
    %67 = arith.maximumf %65, %66 : vector<8x2432xf32>
    %68 = vector.extract_strided_slice %67 {offsets = [0, 0], sizes = [8, 2048], strides = [1, 1]} : vector<8x2432xf32> to vector<8x2048xf32>
    %69 = vector.extract_strided_slice %67 {offsets = [0, 1], sizes = [8, 2048], strides = [1, 1]} : vector<8x2432xf32> to vector<8x2048xf32>
    %70 = arith.maximumf %68, %69 : vector<8x2048xf32>
    %71 = vector.extract_strided_slice %67 {offsets = [0, 16], sizes = [8, 2048], strides = [1, 1]} : vector<8x2432xf32> to vector<8x2048xf32>
    %72 = arith.maximumf %70, %71 : vector<8x2048xf32>
    %73 = vector.extract_strided_slice %67 {offsets = [0, 17], sizes = [8, 2048], strides = [1, 1]} : vector<8x2432xf32> to vector<8x2048xf32>
    %74 = arith.maximumf %72, %73 : vector<8x2048xf32>
    %75 = vector.extract_strided_slice %67 {offsets = [0, 256], sizes = [8, 2048], strides = [1, 1]} : vector<8x2432xf32> to vector<8x2048xf32>
    %76 = arith.maximumf %74, %75 : vector<8x2048xf32>
    %77 = vector.extract_strided_slice %67 {offsets = [0, 257], sizes = [8, 2048], strides = [1, 1]} : vector<8x2432xf32> to vector<8x2048xf32>
    %78 = arith.maximumf %76, %77 : vector<8x2048xf32>
    %79 = vector.extract_strided_slice %67 {offsets = [0, 272], sizes = [8, 2048], strides = [1, 1]} : vector<8x2432xf32> to vector<8x2048xf32>
    %80 = arith.maximumf %78, %79 : vector<8x2048xf32>
    %81 = vector.extract_strided_slice %67 {offsets = [0, 273], sizes = [8, 2048], strides = [1, 1]} : vector<8x2432xf32> to vector<8x2048xf32>
    %82 = arith.maximumf %80, %81 : vector<8x2048xf32>
    %83 = arith.truncf %82 : vector<8x2048xf32> to vector<8x2048xbf16>
    %c0_76 = arith.constant 0 : index
    %c0_77 = arith.constant 0 : index
    %84 = vector.load %arg5[%c0_76, %c0_77] : memref<8x2048xbf16, #tpu.memory_space<vmem>>, vector<8x2048xbf16>
    tpu.vector_store %arg5[%c0_76, %c0_77], %83 {strides = array<i32>} : memref<8x2048xbf16, #tpu.memory_space<vmem>>, vector<8x2048xbf16>,
    return
  }
  func.func @transform_0(%arg0: i32) -> (i32, i32) {
    %c0_i32 = arith.constant 0 : i32
    %c0_i32_0 = arith.constant 0 : i32
    return %c0_i32, %arg0 : i32, i32
  }
  func.func @transform_1(%arg0: i32) -> (i32, i32) {
    %c1_i32 = arith.constant 1 : i32
    %0 = arith.addi %arg0, %c1_i32 : i32
    %c2_i32 = arith.constant 2 : i32
    %1 = arith.muli %0, %c2_i32 : i32
    %c0_i32 = arith.constant 0 : i32
    %c0_i32_0 = arith.constant 0 : i32
    return %c0_i32, %1 : i32, i32
  }
  func.func @transform_2(%arg0: i32) -> (i32, i32) {
    %c0_i32 = arith.constant 0 : i32
    %c0_i32_0 = arith.constant 0 : i32
    %c0_i32_1 = arith.constant 0 : i32
    return %c0_i32, %c0_i32_0 : i32, i32
  }
  func.func @transform_3(%arg0: i32) -> (i32, i32) {
    %c0_i32 = arith.constant 0 : i32
    %c0_i32_0 = arith.constant 0 : i32
    %c0_i32_1 = arith.constant 0 : i32
    return %c0_i32, %c0_i32_0 : i32, i32
  }
  func.func @transform_4(%arg0: i32) -> (i32, i32) {
    %c0_i32 = arith.constant 0 : i32
    %c0_i32_0 = arith.constant 0 : i32
    return %c0_i32, %arg0 : i32, i32
  }
}

module attributes {stable_mosaic.version = 11 : i64} {
  func.func @_conv_bn_relu_pool_kernel(%arg0: i32, %arg1: memref<4x384xbf16, #tpu.memory_space<vmem>>, %arg2: memref<4x128xbf16, #tpu.memory_space<vmem>>, %arg3: memref<8x112xbf16, #tpu.memory_space<vmem>>, %arg4: memref<8x1xf32, #tpu.memory_space<vmem>>, %arg5: memref<8x384xbf16, #tpu.memory_space<vmem>>, %arg6: memref<4x512xbf16, #tpu.memory_space<vmem>>, %arg7: memref<112x384xbf16, #tpu.memory_space<vmem>>) attributes {dimension_semantics = [#tpu.dimension_semantics<parallel>], iteration_bounds = array<i64: 2>, scalar_prefetch = 0 : i64, scratch_operands = 2 : i64, tpu.core_type = #tpu.core_type<tc>, window_params = [{transform_indices = @transform_0, window_bounds = array<i64: 4, 384>}, {transform_indices = @transform_1, window_bounds = array<i64: 4, 128>}, {pipeline_mode = #tpu.pipeline_mode<synchronous>, transform_indices = @transform_2, window_bounds = array<i64: 8, 112>}, {pipeline_mode = #tpu.pipeline_mode<synchronous>, transform_indices = @transform_3, window_bounds = array<i64: 8, 1>}, {transform_indices = @transform_4, window_bounds = array<i64: 8, 384>}]} {
    %c0 = arith.constant 0 : index
    %c0_0 = arith.constant 0 : index
    %0 = vector.load %arg1[%c0, %c0_0] : memref<4x384xbf16, #tpu.memory_space<vmem>>, vector<4x384xbf16>
    %c0_1 = arith.constant 0 : index
    %c0_2 = arith.constant 0 : index
    %1 = vector.load %arg6[%c0_1, %c0_2] : memref<4x512xbf16, #tpu.memory_space<vmem>>, vector<4x384xbf16>
    tpu.vector_store %arg6[%c0_1, %c0_2], %0 {strides = array<i32>} : memref<4x512xbf16, #tpu.memory_space<vmem>>, vector<4x384xbf16>,
    %c0_3 = arith.constant 0 : index
    %c0_4 = arith.constant 0 : index
    %2 = vector.load %arg2[%c0_3, %c0_4] : memref<4x128xbf16, #tpu.memory_space<vmem>>, vector<4x128xbf16>
    %c0_5 = arith.constant 0 : index
    %c384 = arith.constant 384 : index
    %3 = vector.load %arg6[%c0_5, %c384] : memref<4x512xbf16, #tpu.memory_space<vmem>>, vector<4x128xbf16>
    tpu.vector_store %arg6[%c0_5, %c384], %2 {strides = array<i32>} : memref<4x512xbf16, #tpu.memory_space<vmem>>, vector<4x128xbf16>,
    %c0_6 = arith.constant 0 : index
    %c0_7 = arith.constant 0 : index
    %4 = vector.load %arg6[%c0_6, %c0_7] : memref<4x512xbf16, #tpu.memory_space<vmem>>, vector<4x384xbf16>
    %c0_8 = arith.constant 0 : index
    %c0_9 = arith.constant 0 : index
    %5 = vector.load %arg7[%c0_8, %c0_9] : memref<112x384xbf16, #tpu.memory_space<vmem>>, vector<4x384xbf16>
    tpu.vector_store %arg7[%c0_8, %c0_9], %4 {strides = array<i32>} : memref<112x384xbf16, #tpu.memory_space<vmem>>, vector<4x384xbf16>,
    %c0_10 = arith.constant 0 : index
    %c1 = arith.constant 1 : index
    %6 = vector.load %arg6[%c0_10, %c1] : memref<4x512xbf16, #tpu.memory_space<vmem>>, vector<4x384xbf16>
    %c4 = arith.constant 4 : index
    %c0_11 = arith.constant 0 : index
    %7 = vector.load %arg7[%c4, %c0_11] : memref<112x384xbf16, #tpu.memory_space<vmem>>, vector<4x384xbf16>
    tpu.vector_store %arg7[%c4, %c0_11], %6 {strides = array<i32>} : memref<112x384xbf16, #tpu.memory_space<vmem>>, vector<4x384xbf16>,
    %c0_12 = arith.constant 0 : index
    %c2 = arith.constant 2 : index
    %8 = vector.load %arg6[%c0_12, %c2] : memref<4x512xbf16, #tpu.memory_space<vmem>>, vector<4x384xbf16>
    %c8 = arith.constant 8 : index
    %c0_13 = arith.constant 0 : index
    %9 = vector.load %arg7[%c8, %c0_13] : memref<112x384xbf16, #tpu.memory_space<vmem>>, vector<4x384xbf16>
    tpu.vector_store %arg7[%c8, %c0_13], %8 {strides = array<i32>} : memref<112x384xbf16, #tpu.memory_space<vmem>>, vector<4x384xbf16>,
    %c0_14 = arith.constant 0 : index
    %c7 = arith.constant 7 : index
    %10 = vector.load %arg6[%c0_14, %c7] : memref<4x512xbf16, #tpu.memory_space<vmem>>, vector<4x384xbf16>
    %c12 = arith.constant 12 : index
    %c0_15 = arith.constant 0 : index
    %11 = vector.load %arg7[%c12, %c0_15] : memref<112x384xbf16, #tpu.memory_space<vmem>>, vector<4x384xbf16>
    tpu.vector_store %arg7[%c12, %c0_15], %10 {strides = array<i32>} : memref<112x384xbf16, #tpu.memory_space<vmem>>, vector<4x384xbf16>,
    %c0_16 = arith.constant 0 : index
    %c8_17 = arith.constant 8 : index
    %12 = vector.load %arg6[%c0_16, %c8_17] : memref<4x512xbf16, #tpu.memory_space<vmem>>, vector<4x384xbf16>
    %c16 = arith.constant 16 : index
    %c0_18 = arith.constant 0 : index
    %13 = vector.load %arg7[%c16, %c0_18] : memref<112x384xbf16, #tpu.memory_space<vmem>>, vector<4x384xbf16>
    tpu.vector_store %arg7[%c16, %c0_18], %12 {strides = array<i32>} : memref<112x384xbf16, #tpu.memory_space<vmem>>, vector<4x384xbf16>,
    %c0_19 = arith.constant 0 : index
    %c9 = arith.constant 9 : index
    %14 = vector.load %arg6[%c0_19, %c9] : memref<4x512xbf16, #tpu.memory_space<vmem>>, vector<4x384xbf16>
    %c20 = arith.constant 20 : index
    %c0_20 = arith.constant 0 : index
    %15 = vector.load %arg7[%c20, %c0_20] : memref<112x384xbf16, #tpu.memory_space<vmem>>, vector<4x384xbf16>
    tpu.vector_store %arg7[%c20, %c0_20], %14 {strides = array<i32>} : memref<112x384xbf16, #tpu.memory_space<vmem>>, vector<4x384xbf16>,
    %c0_21 = arith.constant 0 : index
    %c14 = arith.constant 14 : index
    %16 = vector.load %arg6[%c0_21, %c14] : memref<4x512xbf16, #tpu.memory_space<vmem>>, vector<4x384xbf16>
    %c24 = arith.constant 24 : index
    %c0_22 = arith.constant 0 : index
    %17 = vector.load %arg7[%c24, %c0_22] : memref<112x384xbf16, #tpu.memory_space<vmem>>, vector<4x384xbf16>
    tpu.vector_store %arg7[%c24, %c0_22], %16 {strides = array<i32>} : memref<112x384xbf16, #tpu.memory_space<vmem>>, vector<4x384xbf16>,
    %c0_23 = arith.constant 0 : index
    %c15 = arith.constant 15 : index
    %18 = vector.load %arg6[%c0_23, %c15] : memref<4x512xbf16, #tpu.memory_space<vmem>>, vector<4x384xbf16>
    %c28 = arith.constant 28 : index
    %c0_24 = arith.constant 0 : index
    %19 = vector.load %arg7[%c28, %c0_24] : memref<112x384xbf16, #tpu.memory_space<vmem>>, vector<4x384xbf16>
    tpu.vector_store %arg7[%c28, %c0_24], %18 {strides = array<i32>} : memref<112x384xbf16, #tpu.memory_space<vmem>>, vector<4x384xbf16>,
    %c0_25 = arith.constant 0 : index
    %c16_26 = arith.constant 16 : index
    %20 = vector.load %arg6[%c0_25, %c16_26] : memref<4x512xbf16, #tpu.memory_space<vmem>>, vector<4x384xbf16>
    %c32 = arith.constant 32 : index
    %c0_27 = arith.constant 0 : index
    %21 = vector.load %arg7[%c32, %c0_27] : memref<112x384xbf16, #tpu.memory_space<vmem>>, vector<4x384xbf16>
    tpu.vector_store %arg7[%c32, %c0_27], %20 {strides = array<i32>} : memref<112x384xbf16, #tpu.memory_space<vmem>>, vector<4x384xbf16>,
    %c0_28 = arith.constant 0 : index
    %c49 = arith.constant 49 : index
    %22 = vector.load %arg6[%c0_28, %c49] : memref<4x512xbf16, #tpu.memory_space<vmem>>, vector<4x384xbf16>
    %c36 = arith.constant 36 : index
    %c0_29 = arith.constant 0 : index
    %23 = vector.load %arg7[%c36, %c0_29] : memref<112x384xbf16, #tpu.memory_space<vmem>>, vector<4x384xbf16>
    tpu.vector_store %arg7[%c36, %c0_29], %22 {strides = array<i32>} : memref<112x384xbf16, #tpu.memory_space<vmem>>, vector<4x384xbf16>,
    %c0_30 = arith.constant 0 : index
    %c50 = arith.constant 50 : index
    %24 = vector.load %arg6[%c0_30, %c50] : memref<4x512xbf16, #tpu.memory_space<vmem>>, vector<4x384xbf16>
    %c40 = arith.constant 40 : index
    %c0_31 = arith.constant 0 : index
    %25 = vector.load %arg7[%c40, %c0_31] : memref<112x384xbf16, #tpu.memory_space<vmem>>, vector<4x384xbf16>
    tpu.vector_store %arg7[%c40, %c0_31], %24 {strides = array<i32>} : memref<112x384xbf16, #tpu.memory_space<vmem>>, vector<4x384xbf16>,
    %c0_32 = arith.constant 0 : index
    %c51 = arith.constant 51 : index
    %26 = vector.load %arg6[%c0_32, %c51] : memref<4x512xbf16, #tpu.memory_space<vmem>>, vector<4x384xbf16>
    %c44 = arith.constant 44 : index
    %c0_33 = arith.constant 0 : index
    %27 = vector.load %arg7[%c44, %c0_33] : memref<112x384xbf16, #tpu.memory_space<vmem>>, vector<4x384xbf16>
    tpu.vector_store %arg7[%c44, %c0_33], %26 {strides = array<i32>} : memref<112x384xbf16, #tpu.memory_space<vmem>>, vector<4x384xbf16>,
    %c0_34 = arith.constant 0 : index
    %c56 = arith.constant 56 : index
    %28 = vector.load %arg6[%c0_34, %c56] : memref<4x512xbf16, #tpu.memory_space<vmem>>, vector<4x384xbf16>
    %c48 = arith.constant 48 : index
    %c0_35 = arith.constant 0 : index
    %29 = vector.load %arg7[%c48, %c0_35] : memref<112x384xbf16, #tpu.memory_space<vmem>>, vector<4x384xbf16>
    tpu.vector_store %arg7[%c48, %c0_35], %28 {strides = array<i32>} : memref<112x384xbf16, #tpu.memory_space<vmem>>, vector<4x384xbf16>,
    %c0_36 = arith.constant 0 : index
    %c57 = arith.constant 57 : index
    %30 = vector.load %arg6[%c0_36, %c57] : memref<4x512xbf16, #tpu.memory_space<vmem>>, vector<4x384xbf16>
    %c52 = arith.constant 52 : index
    %c0_37 = arith.constant 0 : index
    %31 = vector.load %arg7[%c52, %c0_37] : memref<112x384xbf16, #tpu.memory_space<vmem>>, vector<4x384xbf16>
    tpu.vector_store %arg7[%c52, %c0_37], %30 {strides = array<i32>} : memref<112x384xbf16, #tpu.memory_space<vmem>>, vector<4x384xbf16>,
    %c0_38 = arith.constant 0 : index
    %c58 = arith.constant 58 : index
    %32 = vector.load %arg6[%c0_38, %c58] : memref<4x512xbf16, #tpu.memory_space<vmem>>, vector<4x384xbf16>
    %c56_39 = arith.constant 56 : index
    %c0_40 = arith.constant 0 : index
    %33 = vector.load %arg7[%c56_39, %c0_40] : memref<112x384xbf16, #tpu.memory_space<vmem>>, vector<4x384xbf16>
    tpu.vector_store %arg7[%c56_39, %c0_40], %32 {strides = array<i32>} : memref<112x384xbf16, #tpu.memory_space<vmem>>, vector<4x384xbf16>,
    %c0_41 = arith.constant 0 : index
    %c63 = arith.constant 63 : index
    %34 = vector.load %arg6[%c0_41, %c63] : memref<4x512xbf16, #tpu.memory_space<vmem>>, vector<4x384xbf16>
    %c60 = arith.constant 60 : index
    %c0_42 = arith.constant 0 : index
    %35 = vector.load %arg7[%c60, %c0_42] : memref<112x384xbf16, #tpu.memory_space<vmem>>, vector<4x384xbf16>
    tpu.vector_store %arg7[%c60, %c0_42], %34 {strides = array<i32>} : memref<112x384xbf16, #tpu.memory_space<vmem>>, vector<4x384xbf16>,
    %c0_43 = arith.constant 0 : index
    %c64 = arith.constant 64 : index
    %36 = vector.load %arg6[%c0_43, %c64] : memref<4x512xbf16, #tpu.memory_space<vmem>>, vector<4x384xbf16>
    %c64_44 = arith.constant 64 : index
    %c0_45 = arith.constant 0 : index
    %37 = vector.load %arg7[%c64_44, %c0_45] : memref<112x384xbf16, #tpu.memory_space<vmem>>, vector<4x384xbf16>
    tpu.vector_store %arg7[%c64_44, %c0_45], %36 {strides = array<i32>} : memref<112x384xbf16, #tpu.memory_space<vmem>>, vector<4x384xbf16>,
    %c0_46 = arith.constant 0 : index
    %c65 = arith.constant 65 : index
    %38 = vector.load %arg6[%c0_46, %c65] : memref<4x512xbf16, #tpu.memory_space<vmem>>, vector<4x384xbf16>
    %c68 = arith.constant 68 : index
    %c0_47 = arith.constant 0 : index
    %39 = vector.load %arg7[%c68, %c0_47] : memref<112x384xbf16, #tpu.memory_space<vmem>>, vector<4x384xbf16>
    tpu.vector_store %arg7[%c68, %c0_47], %38 {strides = array<i32>} : memref<112x384xbf16, #tpu.memory_space<vmem>>, vector<4x384xbf16>,
    %c0_48 = arith.constant 0 : index
    %c98 = arith.constant 98 : index
    %40 = vector.load %arg6[%c0_48, %c98] : memref<4x512xbf16, #tpu.memory_space<vmem>>, vector<4x384xbf16>
    %c72 = arith.constant 72 : index
    %c0_49 = arith.constant 0 : index
    %41 = vector.load %arg7[%c72, %c0_49] : memref<112x384xbf16, #tpu.memory_space<vmem>>, vector<4x384xbf16>
    tpu.vector_store %arg7[%c72, %c0_49], %40 {strides = array<i32>} : memref<112x384xbf16, #tpu.memory_space<vmem>>, vector<4x384xbf16>,
    %c0_50 = arith.constant 0 : index
    %c99 = arith.constant 99 : index
    %42 = vector.load %arg6[%c0_50, %c99] : memref<4x512xbf16, #tpu.memory_space<vmem>>, vector<4x384xbf16>
    %c76 = arith.constant 76 : index
    %c0_51 = arith.constant 0 : index
    %43 = vector.load %arg7[%c76, %c0_51] : memref<112x384xbf16, #tpu.memory_space<vmem>>, vector<4x384xbf16>
    tpu.vector_store %arg7[%c76, %c0_51], %42 {strides = array<i32>} : memref<112x384xbf16, #tpu.memory_space<vmem>>, vector<4x384xbf16>,
    %c0_52 = arith.constant 0 : index
    %c100 = arith.constant 100 : index
    %44 = vector.load %arg6[%c0_52, %c100] : memref<4x512xbf16, #tpu.memory_space<vmem>>, vector<4x384xbf16>
    %c80 = arith.constant 80 : index
    %c0_53 = arith.constant 0 : index
    %45 = vector.load %arg7[%c80, %c0_53] : memref<112x384xbf16, #tpu.memory_space<vmem>>, vector<4x384xbf16>
    tpu.vector_store %arg7[%c80, %c0_53], %44 {strides = array<i32>} : memref<112x384xbf16, #tpu.memory_space<vmem>>, vector<4x384xbf16>,
    %c0_54 = arith.constant 0 : index
    %c105 = arith.constant 105 : index
    %46 = vector.load %arg6[%c0_54, %c105] : memref<4x512xbf16, #tpu.memory_space<vmem>>, vector<4x384xbf16>
    %c84 = arith.constant 84 : index
    %c0_55 = arith.constant 0 : index
    %47 = vector.load %arg7[%c84, %c0_55] : memref<112x384xbf16, #tpu.memory_space<vmem>>, vector<4x384xbf16>
    tpu.vector_store %arg7[%c84, %c0_55], %46 {strides = array<i32>} : memref<112x384xbf16, #tpu.memory_space<vmem>>, vector<4x384xbf16>,
    %c0_56 = arith.constant 0 : index
    %c106 = arith.constant 106 : index
    %48 = vector.load %arg6[%c0_56, %c106] : memref<4x512xbf16, #tpu.memory_space<vmem>>, vector<4x384xbf16>
    %c88 = arith.constant 88 : index
    %c0_57 = arith.constant 0 : index
    %49 = vector.load %arg7[%c88, %c0_57] : memref<112x384xbf16, #tpu.memory_space<vmem>>, vector<4x384xbf16>
    tpu.vector_store %arg7[%c88, %c0_57], %48 {strides = array<i32>} : memref<112x384xbf16, #tpu.memory_space<vmem>>, vector<4x384xbf16>,
    %c0_58 = arith.constant 0 : index
    %c107 = arith.constant 107 : index
    %50 = vector.load %arg6[%c0_58, %c107] : memref<4x512xbf16, #tpu.memory_space<vmem>>, vector<4x384xbf16>
    %c92 = arith.constant 92 : index
    %c0_59 = arith.constant 0 : index
    %51 = vector.load %arg7[%c92, %c0_59] : memref<112x384xbf16, #tpu.memory_space<vmem>>, vector<4x384xbf16>
    tpu.vector_store %arg7[%c92, %c0_59], %50 {strides = array<i32>} : memref<112x384xbf16, #tpu.memory_space<vmem>>, vector<4x384xbf16>,
    %c0_60 = arith.constant 0 : index
    %c112 = arith.constant 112 : index
    %52 = vector.load %arg6[%c0_60, %c112] : memref<4x512xbf16, #tpu.memory_space<vmem>>, vector<4x384xbf16>
    %c96 = arith.constant 96 : index
    %c0_61 = arith.constant 0 : index
    %53 = vector.load %arg7[%c96, %c0_61] : memref<112x384xbf16, #tpu.memory_space<vmem>>, vector<4x384xbf16>
    tpu.vector_store %arg7[%c96, %c0_61], %52 {strides = array<i32>} : memref<112x384xbf16, #tpu.memory_space<vmem>>, vector<4x384xbf16>,
    %c0_62 = arith.constant 0 : index
    %c113 = arith.constant 113 : index
    %54 = vector.load %arg6[%c0_62, %c113] : memref<4x512xbf16, #tpu.memory_space<vmem>>, vector<4x384xbf16>
    %c100_63 = arith.constant 100 : index
    %c0_64 = arith.constant 0 : index
    %55 = vector.load %arg7[%c100_63, %c0_64] : memref<112x384xbf16, #tpu.memory_space<vmem>>, vector<4x384xbf16>
    tpu.vector_store %arg7[%c100_63, %c0_64], %54 {strides = array<i32>} : memref<112x384xbf16, #tpu.memory_space<vmem>>, vector<4x384xbf16>,
    %c0_65 = arith.constant 0 : index
    %c114 = arith.constant 114 : index
    %56 = vector.load %arg6[%c0_65, %c114] : memref<4x512xbf16, #tpu.memory_space<vmem>>, vector<4x384xbf16>
    %c104 = arith.constant 104 : index
    %c0_66 = arith.constant 0 : index
    %57 = vector.load %arg7[%c104, %c0_66] : memref<112x384xbf16, #tpu.memory_space<vmem>>, vector<4x384xbf16>
    tpu.vector_store %arg7[%c104, %c0_66], %56 {strides = array<i32>} : memref<112x384xbf16, #tpu.memory_space<vmem>>, vector<4x384xbf16>,
    %cst = arith.constant 0.000000e+00 : bf16
    %58 = vector.broadcast %cst : bf16 to vector<4x384xbf16>
    %c108 = arith.constant 108 : index
    %c0_67 = arith.constant 0 : index
    %59 = vector.load %arg7[%c108, %c0_67] : memref<112x384xbf16, #tpu.memory_space<vmem>>, vector<4x384xbf16>
    tpu.vector_store %arg7[%c108, %c0_67], %58 {strides = array<i32>} : memref<112x384xbf16, #tpu.memory_space<vmem>>, vector<4x384xbf16>,
    %c0_68 = arith.constant 0 : index
    %c0_69 = arith.constant 0 : index
    %60 = vector.load %arg3[%c0_68, %c0_69] : memref<8x112xbf16, #tpu.memory_space<vmem>>, vector<8x112xbf16>
    %c0_70 = arith.constant 0 : index
    %c0_71 = arith.constant 0 : index
    %61 = vector.load %arg7[%c0_70, %c0_71] : memref<112x384xbf16, #tpu.memory_space<vmem>>, vector<112x384xbf16>
    %cst_72 = arith.constant dense<0.000000e+00> : vector<8x384xf32>
    %62 = tpu.matmul %60, %61, %cst_72 {dimension_numbers = #tpu.dot_dimension_numbers<[1], [0], [0], [1], [0, 0, 1, 1], [], []>} : vector<8x112xbf16>, vector<112x384xbf16>, vector<8x384xf32> -> vector<8x384xf32>
    %c0_73 = arith.constant 0 : index
    %c0_74 = arith.constant 0 : index
    %63 = vector.load %arg4[%c0_73, %c0_74] : memref<8x1xf32, #tpu.memory_space<vmem>>, vector<8x1xf32>
    %64 = vector.broadcast %63 : vector<8x1xf32> to vector<8x384xf32>
    %65 = arith.addf %62, %64 : vector<8x384xf32>
    %cst_75 = arith.constant 0.000000e+00 : f32
    %66 = vector.broadcast %cst_75 : f32 to vector<8x384xf32>
    %67 = arith.maximumf %65, %66 : vector<8x384xf32>
    %68 = arith.truncf %67 : vector<8x384xf32> to vector<8x384xbf16>
    %c0_76 = arith.constant 0 : index
    %c0_77 = arith.constant 0 : index
    %69 = vector.load %arg5[%c0_76, %c0_77] : memref<8x384xbf16, #tpu.memory_space<vmem>>, vector<8x384xbf16>
    tpu.vector_store %arg5[%c0_76, %c0_77], %68 {strides = array<i32>} : memref<8x384xbf16, #tpu.memory_space<vmem>>, vector<8x384xbf16>,
    return
  }
  func.func @transform_0(%arg0: i32) -> (i32, i32) {
    %c0_i32 = arith.constant 0 : i32
    %c0_i32_0 = arith.constant 0 : i32
    return %c0_i32, %arg0 : i32, i32
  }
  func.func @transform_1(%arg0: i32) -> (i32, i32) {
    %c1_i32 = arith.constant 1 : i32
    %0 = arith.addi %arg0, %c1_i32 : i32
    %c3_i32 = arith.constant 3 : i32
    %1 = arith.muli %0, %c3_i32 : i32
    %c0_i32 = arith.constant 0 : i32
    %c0_i32_0 = arith.constant 0 : i32
    return %c0_i32, %1 : i32, i32
  }
  func.func @transform_2(%arg0: i32) -> (i32, i32) {
    %c0_i32 = arith.constant 0 : i32
    %c0_i32_0 = arith.constant 0 : i32
    %c0_i32_1 = arith.constant 0 : i32
    return %c0_i32, %c0_i32_0 : i32, i32
  }
  func.func @transform_3(%arg0: i32) -> (i32, i32) {
    %c0_i32 = arith.constant 0 : i32
    %c0_i32_0 = arith.constant 0 : i32
    %c0_i32_1 = arith.constant 0 : i32
    return %c0_i32, %c0_i32_0 : i32, i32
  }
  func.func @transform_4(%arg0: i32) -> (i32, i32) {
    %c0_i32 = arith.constant 0 : i32
    %c0_i32_0 = arith.constant 0 : i32
    return %c0_i32, %arg0 : i32, i32
  }
}

module attributes {stable_mosaic.version = 11 : i64} {
  func.func @_dense_kernel(%arg0: i32, %arg1: memref<8x1024xbf16, #tpu.memory_space<vmem>>, %arg2: memref<1024x128xbf16, #tpu.memory_space<vmem>>, %arg3: memref<1x128xf32, #tpu.memory_space<vmem>>, %arg4: memref<8x128xf32, #tpu.memory_space<vmem>>, %arg5: memref<8x128xf32, #tpu.memory_space<vmem>>) attributes {dimension_semantics = [#tpu.dimension_semantics<arbitrary>], iteration_bounds = array<i64: 1>, scalar_prefetch = 0 : i64, scratch_operands = 1 : i64, tpu.core_type = #tpu.core_type<tc>, window_params = [{transform_indices = @transform_0, window_bounds = array<i64: 8, 1024>}, {transform_indices = @transform_1, window_bounds = array<i64: 1024, 128>}, {pipeline_mode = #tpu.pipeline_mode<synchronous>, transform_indices = @transform_2, window_bounds = array<i64: 1, 128>}, {pipeline_mode = #tpu.pipeline_mode<synchronous>, transform_indices = @transform_3, window_bounds = array<i64: 8, 128>}]} {
    %c0_i32 = arith.constant 0 : i32
    %0 = arith.cmpi eq, %arg0, %c0_i32 : i32
    %1 = arith.extui %0 : i1 to i32
    %c0_i32_0 = arith.constant 0 : i32
    %2 = arith.cmpi ne, %1, %c0_i32_0 : i32
    scf.if %2 {
      %cst_10 = arith.constant 0.000000e+00 : f32
      %12 = vector.broadcast %cst_10 : f32 to vector<8x128xf32>
      %c0_11 = arith.constant 0 : index
      %c0_12 = arith.constant 0 : index
      %13 = vector.load %arg5[%c0_11, %c0_12] : memref<8x128xf32, #tpu.memory_space<vmem>>, vector<8x128xf32>
      tpu.vector_store %arg5[%c0_11, %c0_12], %12 {strides = array<i32>} : memref<8x128xf32, #tpu.memory_space<vmem>>, vector<8x128xf32>,
    } else {
    }
    %c0 = arith.constant 0 : index
    %c0_1 = arith.constant 0 : index
    %3 = vector.load %arg5[%c0, %c0_1] : memref<8x128xf32, #tpu.memory_space<vmem>>, vector<8x128xf32>
    %c0_2 = arith.constant 0 : index
    %c0_3 = arith.constant 0 : index
    %4 = vector.load %arg1[%c0_2, %c0_3] : memref<8x1024xbf16, #tpu.memory_space<vmem>>, vector<8x1024xbf16>
    %c0_4 = arith.constant 0 : index
    %c0_5 = arith.constant 0 : index
    %5 = vector.load %arg2[%c0_4, %c0_5] : memref<1024x128xbf16, #tpu.memory_space<vmem>>, vector<1024x128xbf16>
    %cst = arith.constant dense<0.000000e+00> : vector<8x128xf32>
    %6 = tpu.matmul %4, %5, %cst {dimension_numbers = #tpu.dot_dimension_numbers<[1], [0], [0], [1], [0, 0, 1, 1], [], []>} : vector<8x1024xbf16>, vector<1024x128xbf16>, vector<8x128xf32> -> vector<8x128xf32>
    %7 = arith.addf %3, %6 : vector<8x128xf32>
    %c0_6 = arith.constant 0 : index
    %c0_7 = arith.constant 0 : index
    %8 = vector.load %arg5[%c0_6, %c0_7] : memref<8x128xf32, #tpu.memory_space<vmem>>, vector<8x128xf32>
    tpu.vector_store %arg5[%c0_6, %c0_7], %7 {strides = array<i32>} : memref<8x128xf32, #tpu.memory_space<vmem>>, vector<8x128xf32>,
    %c0_i32_8 = arith.constant 0 : i32
    %9 = arith.cmpi eq, %arg0, %c0_i32_8 : i32
    %10 = arith.extui %9 : i1 to i32
    %c0_i32_9 = arith.constant 0 : i32
    %11 = arith.cmpi ne, %10, %c0_i32_9 : i32
    scf.if %11 {
      %c0_10 = arith.constant 0 : index
      %c0_11 = arith.constant 0 : index
      %12 = vector.load %arg5[%c0_10, %c0_11] : memref<8x128xf32, #tpu.memory_space<vmem>>, vector<8x128xf32>
      %c0_12 = arith.constant 0 : index
      %c0_13 = arith.constant 0 : index
      %13 = vector.load %arg3[%c0_12, %c0_13] : memref<1x128xf32, #tpu.memory_space<vmem>>, vector<1x128xf32>
      %14 = vector.broadcast %13 : vector<1x128xf32> to vector<8x128xf32>
      %15 = arith.addf %12, %14 : vector<8x128xf32>
      %c0_14 = arith.constant 0 : index
      %c0_15 = arith.constant 0 : index
      %16 = vector.load %arg4[%c0_14, %c0_15] : memref<8x128xf32, #tpu.memory_space<vmem>>, vector<8x128xf32>
      tpu.vector_store %arg4[%c0_14, %c0_15], %15 {strides = array<i32>} : memref<8x128xf32, #tpu.memory_space<vmem>>, vector<8x128xf32>,
    } else {
    }
    return
  }
  func.func @transform_0(%arg0: i32) -> (i32, i32) {
    %c0_i32 = arith.constant 0 : i32
    %c0_i32_0 = arith.constant 0 : i32
    return %c0_i32, %arg0 : i32, i32
  }
  func.func @transform_1(%arg0: i32) -> (i32, i32) {
    %c0_i32 = arith.constant 0 : i32
    %c0_i32_0 = arith.constant 0 : i32
    return %arg0, %c0_i32 : i32, i32
  }
  func.func @transform_2(%arg0: i32) -> (i32, i32) {
    %c0_i32 = arith.constant 0 : i32
    %c0_i32_0 = arith.constant 0 : i32
    %c0_i32_1 = arith.constant 0 : i32
    return %c0_i32, %c0_i32_0 : i32, i32
  }
  func.func @transform_3(%arg0: i32) -> (i32, i32) {
    %c0_i32 = arith.constant 0 : i32
    %c0_i32_0 = arith.constant 0 : i32
    %c0_i32_1 = arith.constant 0 : i32
    return %c0_i32, %c0_i32_0 : i32, i32
  }
}

</mosaic_0001>

<bundles_post_ra>
// kernel: regress_convnet_forward.4
= control target key start
LH: loop header
LB: loop body
LE: loop exit
PB: predicated region body
PF: predicated region fallthrough
CT: control target
= control target key end

     0   :  { %s1308_s15 = smov 0   ;;  %s1553_s0 = inlined_call_operand.vmem [shape: bf16[4,896], index: 0, kind: input, shape index: {}, may-alias: {0,1}]   ;;  %s1554_s1 = inlined_call_operand.vmem [shape: bf16[4,896], index: 1, kind: input, shape index: {}, may-alias: {0,1}]   ;;  %s1555_s2 = inlined_call_operand.vmem [shape: bf16[8,112], index: 2, kind: input, shape index: {}]   ;;  %s1556_s3 = inlined_call_operand.vmem [shape: f32[8,1], index: 3, kind: input, shape index: {}]   ;;  %s1557_s4 = inlined_call_operand.vmem [shape: bf16[8,768], index: 4, kind: output, shape index: {}]  }
   0x1 LB: > { %s1093_s16 = sadd.s32 4294967295, %s1254_s15   ;;  %p1097_p0 = scmp.ge.s32.totalorder %s1254_s15, 1  ;;  %s1254_s15 = sphi %s1308_s15, %s14_s15  }
   0x2   : > { %p188_p1 = scmp.lt.s32.totalorder %s1254_s15, 3 }
   0x4   : > { %p189_p2 = pnand %p1097_p0, %p188_p1 }
   0x5   : > { %s1316_s17 = smul.u32 (!%p189_p2), 3, %s1093_s16  ;;  %s238_s18 = sadd.s32 (!%p189_p2), 1, %s1093_s16 }
   0x6   : > { %192 = sbr.rel (%p189_p2) target bundleno = 539 (0x21b), region = 36  ;;  %s1256_s29 = smov (!%p189_p2), 120  }
   0x7   : > { %s239_s19 = smul.u32 (!%p189_p2), 3, %s238_s18  ;;  %p229_p3 = scmp.lt.s32.totalorder (!%p189_p2), %s1316_s17, 6 }
   0x8   : > { %s1257_s30 = smov (!%p189_p2), 119   ;;  %s1258_s5 = smov (!%p189_p2), 114  }
   0x9   : > { %p240_p4 = scmp.lt.s32.totalorder (!%p189_p2), %s239_s19, 6  ;;  %s1259_s6 = smov (!%p189_p2), 113  }
   0xa   : > { %s1260_s7 = smov (!%p189_p2), 112   ;;  %s1261_s8 = smov (!%p189_p2), 79  }
   0xb   : > { %s230_s20 = scalar_select %p229_p3, %s1316_s17, 6  ;;  %vm368_vm0 = vcmask 973824   ;;  %vm389_vm1 = vcmask 932864   ;;  %vm432_vm2 = vcmask 916480   ;;  %vm346_vm3 = vcmask 982016  }
   0xc   : > { %s1559_s19 = smov (!%p240_p4, %s239_s19), 6  ;;  %s1262_s9 = smov 78   ;;  %vm280_vm4 = vcmask 1043456   ;;  %vm411_vm5 = vcmask 924672   ;;  %vm497_vm6 = vcmask 629760   ;;  %vm454_vm7 = vcmask 646144  }
   0xd   : > { %s1098_s21 = sshll.u32 %s230_s20, 1  ;;  %s1099_s25 = sshll.u32 %s1559_s19, 1  ;;  %vm475_vm8 = vcmask 637952   ;;  %vm561_vm9 = vcmask 572416   ;;  %vm518_vm10 = vcmask 588800   ;;  %vm540_vm11 = vcmask 580608  }
   0xe   : > { %s232_s24 = scalar_lea.vmem %s1553_s0, %s1098_s21  ;;  %s243_s28 = scalar_lea.vmem %s1554_s1, %s1099_s25  ;;  %vm626_vm12 = vcmask 515072   ;;  %vm583_vm13 = vcmask 531456   ;;  %vm604_vm14 = vcmask 523264   ;;  %vm647_vm15 = vcmask 244736  }
   0xf   : > { %v253_v0 = vld [vmem:[%s232_s24] sm:$0x3f]  ;;  %s1263_s10 = smov 77   ;;  %s1264_s11 = smov 72  }
  0x10   : > { %254 = vst [vmem:[#allocation2] sm:$0x3f] %v253_v0  ;;  %v255_v1 = vld [vmem:[%s243_s28] sm:$0x3]  ;;  %s1265_s12 = smov 71   ;;  %s1266_s13 = smov 70  }
  0x11   : > { %256 = vst [vmem:[#allocation2 + $0x6] sm:$0x3] %v255_v1  ;;  %s1267_s14 = smov 65   ;;  %s1268_s16 = smov 64  }
  0x12   : > { %s1269_s18 = smov 63   ;;  %s1270_s19 = smov 30  }
  0x13   : > { %s1271_s20 = smov 29   ;;  %s1272_s21 = smov 28  }
  0x14   : > { %s1273_s22 = smov 23   ;;  %s1274_s23 = smov 22  }
  0x15   : > { %s1275_s24 = smov 21   ;;  %s1276_s25 = smov 16  }
  0x16   : > { %s1277_s26 = smov 15   ;;  %s1278_s27 = smov 127  }
  0x17   : > { %v257_v2 = vld [vmem:[#allocation2] sm:$0x3f]  ;;  %s1279_s28 = smov 14   ;;  %p247_p5 = scmp.lt.s32.totalorder %s1316_s17, 5 }
  0x18   : > { %259 = vst [vmem:[#allocation1] ss:$2 sm:$0xff] %v257_v2  ;;  %v1326_v3 = vld [vmem:[#allocation2] sm:$0xff] }
  0x19   : > { %s1561_s17 = smov (!%p247_p5, %s1316_s17), 5 }
  0x1f   : > { %v260_v4 = vld.sshfl [vmem:[#allocation1] sm:$0xff pattern:$0x75643120]  ;;  %v261_v5 = vld.sshfl [vmem:[#allocation1 + $0x8] sm:$0xff pattern:$0x75643120] }
  0x20   : > { %269 = vst [vmem:[#allocation1 + $0x1] ss:$2 sm:$0xff] %v1326_v3 }
  0x21   : > { %264 = vst [vmem:[#allocation3] sm:$0x33] %v260_v4 }
  0x22   : > { %265 = vst [vmem:[#allocation3 + $0x8] sm:$0x3] %v261_v5 }
  0x27   : > { %v1329_v6 = vld.sshfl [vmem:[#allocation1] sm:$0xff pattern:$0x75643120]  ;;  %v1331_v7 = vld.sshfl [vmem:[#allocation1 + $0x8] sm:$0xff pattern:$0x75643120] }
  0x28   : > { %291 = vst [vmem:[#allocation1] ss:$2 sm:$0xff] %v1326_v3 }
  0x2f   : > { %v1334_v8 = vld.sshfl [vmem:[#allocation1] sm:$0xff pattern:$0x75643120]  ;;  %v1336_v9 = vld.sshfl [vmem:[#allocation1 + $0x8] sm:$0xff pattern:$0x75643120] }
  0x30   : > { %313 = vst [vmem:[#allocation1 + $0x1] ss:$2 sm:$0xff] %v1326_v3 }
  0x37   : > { %v1339_v10 = vld.sshfl [vmem:[#allocation1] sm:$0xff pattern:$0x75643120]  ;;  %v1341_v11 = vld.sshfl [vmem:[#allocation1 + $0x8] sm:$0xff pattern:$0x75643120] }
  0x38   : > { %334 = vst [vmem:[#allocation1] ss:$2 sm:$0xff] %v1326_v3 }
  0x3f   : > { %v1344_v12 = vld.sshfl [vmem:[#allocation1] sm:$0xff pattern:$0x75643120]  ;;  %v337_v13 = vld.sshfl [vmem:[#allocation1 + $0x8] sm:$0xff pattern:$0x75643120] }
  0x40   : > { %356 = vst [vmem:[#allocation1 + $0x1] ss:$2 sm:$0xff] %v1326_v3  ;;  %341 = vrot.lane.b32.xlu1 %v337_v13, %s1256_s29 }
  0x47   : > { %v1348_v14 = vld.sshfl [vmem:[#allocation1] sm:$0xff pattern:$0x75643120]  ;;  %v359_v15 = vld.sshfl [vmem:[#allocation1 + $0x8] sm:$0xff pattern:$0x75643120] }
  0x48   : > { %377 = vst [vmem:[#allocation1] ss:$2 sm:$0xff] %v1326_v3  ;;  %363 = vrot.lane.b32.xlu2 %v359_v15, %s1257_s30 }
  0x4f   : > { %v380_v16 = vld.sshfl [vmem:[#allocation1 + $0x8] sm:$0xff pattern:$0x75643120]  ;;  %v1352_v17 = vld.sshfl [vmem:[#allocation1] sm:$0xff pattern:$0x75643120] }
  0x50   : > { %384 = vrot.lane.b32.xlu0 %v380_v16, %s1258_s5  ;;  %399 = vst [vmem:[#allocation1 + $0x1] ss:$2 sm:$0xff] %v1326_v3 }
  0x57   : > { %v1356_v18 = vld.sshfl [vmem:[#allocation1] sm:$0xff pattern:$0x75643120]  ;;  %v402_v19 = vld.sshfl [vmem:[#allocation1 + $0x8] sm:$0xff pattern:$0x75643120] }
  0x58   : > { %420 = vst [vmem:[#allocation1] ss:$2 sm:$0xff] %v1326_v3  ;;  %406 = vrot.lane.b32.xlu1 %v402_v19, %s1259_s6 }
  0x5f   : > { %v421_v20 = vld.sshfl [vmem:[#allocation1] sm:$0xff pattern:$0x75643120]  ;;  %v423_v21 = vld.sshfl [vmem:[#allocation1 + $0x8] sm:$0xff pattern:$0x75643120] }
  0x60   : > { %442 = vst [vmem:[#allocation1 + $0x1] ss:$2 sm:$0xff] %v1326_v3  ;;  %427 = vrot.lane.b32.xlu2 %v423_v21, %s1260_s7 }
  0x67   : > { %v445_v22 = vld.sshfl [vmem:[#allocation1 + $0x8] sm:$0xff pattern:$0x75643120]  ;;  %v443_v23 = vld.sshfl [vmem:[#allocation1] sm:$0xff pattern:$0x75643120] }
  0x68   : > { %449 = vrot.lane.b32.xlu0 %v445_v22, %s1261_s8  ;;  %463 = vst [vmem:[#allocation1] ss:$2 sm:$0xff] %v1326_v3  ;;  %425 = vrot.lane.b32.xlu2 %v421_v20, %s1260_s7  ;;  %s1280_s7 = smov 121  }
  0x6f   : > { %v1362_v24 = vld.sshfl [vmem:[#allocation1] sm:$0xff pattern:$0x75643120]  ;;  %v466_v25 = vld.sshfl [vmem:[#allocation1 + $0x8] sm:$0xff pattern:$0x75643120] }
  0x70   : > { %447 = vrot.lane.b32.xlu0 %v443_v23, %s1261_s8  ;;  %485 = vst [vmem:[#allocation1 + $0x1] ss:$2 sm:$0xff] %v1326_v3  ;;  %470 = vrot.lane.b32.xlu1 %v466_v25, %s1262_s9  ;;  %s1281_s8 = smov 126  }
  0x77   : > { %v1366_v26 = vld.sshfl [vmem:[#allocation1] sm:$0xff pattern:$0x75643120]  ;;  %v488_v27 = vld.sshfl [vmem:[#allocation1 + $0x8] sm:$0xff pattern:$0x75643120] }
  0x78   : > { %506 = vst [vmem:[#allocation1] ss:$2 sm:$0xff] %v1326_v3  ;;  %492 = vrot.lane.b32.xlu2 %v488_v27, %s1263_s10 }
  0x7f   : > { %v509_v28 = vld.sshfl [vmem:[#allocation1 + $0x8] sm:$0xff pattern:$0x75643120]  ;;  %v507_v29 = vld.sshfl [vmem:[#allocation1] sm:$0xff pattern:$0x75643120] }
  0x80   : > { %513 = vrot.lane.b32.xlu0 %v509_v28, %s1264_s11  ;;  %528 = vst [vmem:[#allocation1 + $0x1] ss:$2 sm:$0xff] %v1326_v3 }
  0x87   : > { %v531_v30 = vld.sshfl [vmem:[#allocation1 + $0x8] sm:$0xff pattern:$0x75643120]  ;;  %v529_v31 = vld.sshfl [vmem:[#allocation1] sm:$0xff pattern:$0x75643120] }
  0x88   : > { %511 = vrot.lane.b32.xlu0 %v507_v29, %s1264_s11  ;;  %535 = vrot.lane.b32.xlu1 %v531_v30, %s1265_s12  ;;  %549 = vst [vmem:[#allocation1] ss:$2 sm:$0xff] %v1326_v3 }
  0x8f   : > { %v550_v32 = vld.sshfl [vmem:[#allocation1] sm:$0xff pattern:$0x75643120]  ;;  %v552_v33 = vld.sshfl [vmem:[#allocation1 + $0x8] sm:$0xff pattern:$0x75643120] }
  0x90   : > { %571 = vst [vmem:[#allocation1 + $0x1] ss:$2 sm:$0xff] %v1326_v3  ;;  %533 = vrot.lane.b32.xlu1 %v529_v31, %s1265_s12  ;;  %556 = vrot.lane.b32.xlu2 %v552_v33, %s1266_s13 }
  0x97   : > { %v574_v34 = vld.sshfl [vmem:[#allocation1 + $0x8] sm:$0xff pattern:$0x75643120]  ;;  %v572_v35 = vld.sshfl [vmem:[#allocation1] sm:$0xff pattern:$0x75643120] }
  0x98   : > { %578 = vrot.lane.b32.xlu0 %v574_v34, %s1267_s14  ;;  %592 = vst [vmem:[#allocation1] ss:$2 sm:$0xff] %v1326_v3  ;;  %554 = vrot.lane.b32.xlu2 %v550_v32, %s1266_s13 }
  0x9f   : > { %v595_v36 = vld.sshfl [vmem:[#allocation1 + $0x8] sm:$0xff pattern:$0x75643120]  ;;  %v593_v37 = vld.sshfl [vmem:[#allocation1] sm:$0xff pattern:$0x75643120] }
  0xa0   : > { %576 = vrot.lane.b32.xlu0 %v572_v35, %s1267_s14  ;;  %599 = vrot.lane.b32.xlu1 %v595_v36, %s1268_s16  ;;  %614 = vst [vmem:[#allocation1 + $0x1] ss:$2 sm:$0xff] %v1326_v3 }
  0xa2   : > { %v1379_v46 = vpop.permute.xlu2 %363 }
  0xa3   : > { %v366_v47 = vrot.slane %v1379_v46, 4 }
  0xa5   : > { %v370_v49 = vsel %vm368_vm0, %v1379_v46, %v366_v47 }
  0xa6   : > { %374 = vst [vmem:[#allocation3 + $0x20] sm:$0xc] %v370_v49 }
  0xa7   : > { %v617_v38 = vld.sshfl [vmem:[#allocation1 + $0x8] sm:$0xff pattern:$0x75643120]  ;;  %v615_v39 = vld.sshfl [vmem:[#allocation1] sm:$0xff pattern:$0x75643120] }
  0xa8   : > { %597 = vrot.lane.b32.xlu1 %v593_v37, %s1268_s16  ;;  %621 = vrot.lane.b32.xlu2 %v617_v38, %s1269_s18  ;;  %635 = vst [vmem:[#allocation1] ss:$2 sm:$0xff] %v1326_v3 }
  0xaf   : > { %v638_v40 = vld.sshfl [vmem:[#allocation1 + $0x8] sm:$0xff pattern:$0x75643120]  ;;  %v636_v41 = vld.sshfl [vmem:[#allocation1] sm:$0xff pattern:$0x75643120] }
  0xb0   : > { %642 = vrot.lane.b32.xlu0 %v638_v40, %s1270_s19  ;;  %657 = vst [vmem:[#allocation1 + $0x1] ss:$2 sm:$0xff] %v1326_v3  ;;  %619 = vrot.lane.b32.xlu2 %v615_v39, %s1269_s18 }
  0xb2   : > { %v1394_v55 = vpop.permute.xlu1 %341 }
  0xb3   : > { %v344_v57 = vrot.slane %v1394_v55, 4 }
  0xb5   : > { %v348_v59 = vsel %vm346_vm3, %v1394_v55, %v344_v57 }
  0xb6   : > { %352 = vst [vmem:[#allocation3 + $0x20] sm:$0x3] %v348_v59 }
  0xb7   : > { %v660_v42 = vld.sshfl [vmem:[#allocation1 + $0x8] sm:$0xff pattern:$0x75643120]  ;;  %v658_v43 = vld.sshfl [vmem:[#allocation1] sm:$0xff pattern:$0x75643120] }
  0xb8   : > { %664 = vrot.lane.b32.xlu1 %v660_v42, %s1271_s20  ;;  %640 = vrot.lane.b32.xlu0 %v636_v41, %s1270_s19  ;;  %678 = vst [vmem:[#allocation1] ss:$2 sm:$0xff] %v1326_v3 }
  0xba   : > { %v428_v54 = vpop.permute.xlu2 %427 }
  0xbb   : > { %v430_v56 = vrot.slane %v428_v54, 4 }
  0xbd   : > { %v434_v58 = vsel %vm432_vm2, %v428_v54, %v430_v56 }
  0xbe   : > { %438 = vst [vmem:[#allocation3 + $0x38] sm:$0x3] %v434_v58 }
  0xbf   : > { %v679_v44 = vld.sshfl [vmem:[#allocation1] sm:$0xff pattern:$0x75643120]  ;;  %v681_v45 = vld.sshfl [vmem:[#allocation1 + $0x8] sm:$0xff pattern:$0x75643120] }
  0xc0   : > { %662 = vrot.lane.b32.xlu1 %v658_v43, %s1271_s20  ;;  %683 = vrot.lane.b32.xlu2 %v679_v44, %s1272_s21  ;;  %700 = vst [vmem:[#allocation1 + $0x1] ss:$2 sm:$0xff] %v1326_v3 }
  0xc2   : > { %v1382_v48 = vpop.permute.xlu0 %384  ;;  %v426_v62 = vpop.permute.xlu2 %425 }
  0xc3   : > { %v387_v50 = vrot.slane %v1382_v48, 4  ;;  %v429_v0 = vrot.slane %v426_v62, 4 }
  0xc5   : > { %v391_v51 = vsel %vm389_vm1, %v1382_v48, %v387_v50  ;;  %v431_v2 = vsel %vm280_vm4, %v429_v0, %v430_v56 }
  0xc6   : > { %395 = vst [vmem:[#allocation3 + $0x2c] sm:$0x3] %v391_v51  ;;  %v433_v5 = vsel %vm432_vm2, %v426_v62, %v431_v2 }
  0xc7   : > { %v701_v52 = vld.sshfl [vmem:[#allocation1] sm:$0xff pattern:$0x75643120]  ;;  %v703_v53 = vld.sshfl [vmem:[#allocation1 + $0x8] sm:$0xff pattern:$0x75643120] }
  0xc8   : > { %685 = vrot.lane.b32.xlu1 %v681_v45, %s1272_s21  ;;  %705 = vrot.lane.b32.xlu0 %v701_v52, %s1273_s22  ;;  %721 = vst [vmem:[#allocation1] ss:$2 sm:$0xff] %v1326_v3 }
  0xc9   : > { %707 = vrot.lane.b32.xlu2 %v703_v53, %s1273_s22  ;;  %437 = vst [vmem:[#allocation3 + $0x30] sm:$0x33] %v433_v5 }
  0xca   : > { %v1403_v63 = vpop.permute.xlu1 %406 }
  0xcb   : > { %v409_v1 = vrot.slane %v1403_v63, 4 }
  0xcd   : > { %v413_v4 = vsel %vm411_vm5, %v1403_v63, %v409_v1 }
  0xce   : > { %417 = vst [vmem:[#allocation3 + $0x2c] sm:$0xc] %v413_v4 }
  0xcf   : > { %v724_v60 = vld.sshfl [vmem:[#allocation1 + $0x8] sm:$0xff pattern:$0x75643120]  ;;  %v722_v61 = vld.sshfl [vmem:[#allocation1] sm:$0xff pattern:$0x75643120] }
  0xd0   : > { %726 = vrot.lane.b32.xlu1 %v722_v61, %s1274_s23  ;;  %743 = vst [vmem:[#allocation1 + $0x1] ss:$2 sm:$0xff] %v1326_v3 }
  0xd1   : > { %728 = vrot.lane.b32.xlu2 %v724_v60, %s1274_s23 }
  0xd2   : > { %v1413_v16 = vpop.permute.xlu2 %492 }
  0xd3   : > { %v495_v20 = vrot.slane %v1413_v16, 4 }
  0xd5   : > { %v499_v22 = vsel %vm497_vm6, %v1413_v16, %v495_v20 }
  0xd6   : > { %503 = vst [vmem:[#allocation3 + $0x44] sm:$0xc] %v499_v22 }
  0xd7   : > { %v746_v13 = vld.sshfl [vmem:[#allocation1 + $0x8] sm:$0xff pattern:$0x75643120]  ;;  %v744_v15 = vld.sshfl [vmem:[#allocation1] sm:$0xff pattern:$0x75643120] }
  0xd8   : > { %750 = vrot.lane.b32.xlu0 %v746_v13, %s1275_s24  ;;  %764 = vst [vmem:[#allocation1] ss:$2 sm:$0xff] %v1326_v3 }
  0xd9   : > { %748 = vrot.lane.b32.xlu2 %v744_v15, %s1275_s24 }
  0xda   : > { %v450_v19 = vpop.permute.xlu0 %449 }
  0xdb   : > { %v452_v21 = vrot.slane %v450_v19, 4 }
  0xdd   : > { %v456_v23 = vsel %vm454_vm7, %v450_v19, %v452_v21 }
  0xde   : > { %460 = vst [vmem:[#allocation3 + $0x38] sm:$0xc] %v456_v23 }
  0xdf   : > { %v767_v25 = vld.sshfl [vmem:[#allocation1 + $0x8] sm:$0xff pattern:$0x75643120]  ;;  %v765_v27 = vld.sshfl [vmem:[#allocation1] sm:$0xff pattern:$0x75643120] }
  0xe0   : > { %771 = vrot.lane.b32.xlu0 %v767_v25, %s1276_s25  ;;  %769 = vrot.lane.b32.xlu1 %v765_v27, %s1276_s25  ;;  %786 = vst [vmem:[#allocation1 + $0x1] ss:$2 sm:$0xff] %v1326_v3 }
  0xe2   : > { %v448_v28 = vpop.permute.xlu0 %447  ;;  %v1422_v29 = vpop.permute.xlu1 %470 }
  0xe3   : > { %v451_v30 = vrot.slane %v448_v28, 4  ;;  %v473_v31 = vrot.slane %v1422_v29, 4 }
  0xe5   : > { %v453_v32 = vsel %vm280_vm4, %v451_v30, %v452_v21  ;;  %v477_v33 = vsel %vm475_vm8, %v1422_v29, %v473_v31 }
  0xe6   : > { %v455_v34 = vsel %vm454_vm7, %v448_v28, %v453_v32  ;;  %481 = vst [vmem:[#allocation3 + $0x44] sm:$0x3] %v477_v33  ;;  %vm712_vm7 = vcmask 187392  }
  0xe7   : > { %v789_v35 = vld.sshfl [vmem:[#allocation1 + $0x8] sm:$0xff pattern:$0x75643120]  ;;  %v787_v36 = vld.sshfl [vmem:[#allocation1] sm:$0xff pattern:$0x75643120] }
  0xe8   : > { %793 = vrot.lane.b32.xlu0 %v789_v35, %s1277_s26  ;;  %791 = vrot.lane.b32.xlu2 %v787_v36, %s1277_s26  ;;  %807 = vst [vmem:[#allocation1] ss:$2 sm:$0xff] %v1326_v3 }
  0xe9   : > { %459 = vst [vmem:[#allocation3 + $0x30] sm:$0xcc] %v455_v34 }
  0xea   : > { %v557_v37 = vpop.permute.xlu2 %556 }
  0xeb   : > { %v559_v38 = vrot.slane %v557_v37, 4 }
  0xed   : > { %v563_v39 = vsel %vm561_vm9, %v557_v37, %v559_v38 }
  0xee   : > { %567 = vst [vmem:[#allocation3 + $0x5c] sm:$0x3] %v563_v39 }
  0xef   : > { %v810_v40 = vld.sshfl [vmem:[#allocation1 + $0x8] sm:$0xff pattern:$0x75643120]  ;;  %v808_v44 = vld.sshfl [vmem:[#allocation1] sm:$0xff pattern:$0x75643120] }
  0xf0   : > { %276 = vrot.lane.b32.xlu0 %v1331_v7, %s1278_s27  ;;  %490 = vrot.lane.b32.xlu2 %v1366_v26, %s1263_s10 }
  0xf1   : > { %814 = vrot.lane.b32.xlu1 %v810_v40, %s1279_s28 }
  0xf2   : > { %v514_v41 = vpop.permute.xlu0 %513  ;;  %v555_v3 = vpop.permute.xlu2 %554 }
  0xf3   : > { %v516_v42 = vrot.slane %v514_v41, 4  ;;  %v558_v43 = vrot.slane %v555_v3, 4 }
  0xf5   : > { %v520_v45 = vsel %vm518_vm10, %v514_v41, %v516_v42  ;;  %v560_v49 = vsel %vm280_vm4, %v558_v43, %v559_v38 }
  0xf6   : > { %524 = vst [vmem:[#allocation3 + $0x50] sm:$0x3] %v520_v45  ;;  %v562_v51 = vsel %vm561_vm9, %v555_v3, %v560_v49  ;;  %vm669_vm9 = vcmask 236544  }
  0xf7   : > { %566 = vst [vmem:[#allocation3 + $0x54] sm:$0x33] %v562_v51 }
  0xf8   : > { %320 = vrot.lane.b32.xlu2 %v1341_v11, %s1280_s7  ;;  %812 = vrot.lane.b32.xlu0 %v808_v44, %s1279_s28 }
  0xf9   : > { %468 = vrot.lane.b32.xlu1 %v1362_v24, %s1262_s9  ;;  %s1100_s9 = sshll.u32 %s1561_s17, 2 }
  0xfa   : > { %v512_v7 = vpop.permute.xlu0 %511  ;;  %v536_v26 = vpop.permute.xlu1 %535  ;;  %s250_s12 = scalar_lea.vmem %s1557_s4, %s1100_s9 }
  0xfb   : > { %v515_v52 = vrot.slane %v512_v7, 4  ;;  %v538_v53 = vrot.slane %v536_v26, 4 }
  0xfd   : > { %v517_v54 = vsel %vm280_vm4, %v515_v52, %v516_v42  ;;  %v542_v56 = vsel %vm540_vm11, %v536_v26, %v538_v53 }
  0xfe   : > { %v519_v58 = vsel %vm518_vm10, %v512_v7, %v517_v54  ;;  %546 = vst [vmem:[#allocation3 + $0x50] sm:$0xc] %v542_v56  ;;  %vm733_vm10 = vcmask 179200  }
  0xff   : > { %523 = vst [vmem:[#allocation3 + $0x48] sm:$0x33] %v519_v58 }
 0x100   : > { %382 = vrot.lane.b32.xlu2 %v1352_v17, %s1258_s5  ;;  %339 = vrot.lane.b32.xlu0 %v1344_v12, %s1256_s29 }
 0x101   : > { %298 = vrot.lane.b32.xlu1 %v1336_v9, %s1281_s8 }
 0x102   : > { %v534_v11 = vpop.permute.xlu1 %533  ;;  %v622_v24 = vpop.permute.xlu2 %621 }
 0x103   : > { %v537_v59 = vrot.slane %v534_v11, 4  ;;  %v624_v60 = vrot.slane %v622_v24, 4 }
 0x105   : > { %v539_v61 = vsel %vm280_vm4, %v537_v59, %v538_v53  ;;  %v628_v62 = vsel %vm626_vm12, %v622_v24, %v624_v60 }
 0x106   : > { %v541_v0 = vsel %vm540_vm11, %v534_v11, %v539_v61  ;;  %632 = vst [vmem:[#allocation3 + $0x68] sm:$0xc] %v628_v62  ;;  %vm690_vm11 = vcmask 228352  }
 0x107   : > { %545 = vst [vmem:[#allocation3 + $0x48] sm:$0xcc] %v541_v0 }
 0x108   : > { %404 = vrot.lane.b32.xlu0 %v1356_v18, %s1259_s6  ;;  %296 = vrot.lane.b32.xlu2 %v1334_v8, %s1281_s8 }
 0x109   : > { %361 = vrot.lane.b32.xlu1 %v1348_v14, %s1257_s30 }
 0x10a   : > { %v579_v9 = vpop.permute.xlu0 %578  ;;  %v620_v12 = vpop.permute.xlu2 %619 }
 0x10b   : > { %v581_v17 = vrot.slane %v579_v9, 4  ;;  %v623_v2 = vrot.slane %v620_v12, 4 }
 0x10d   : > { %v585_v4 = vsel %vm583_vm13, %v579_v9, %v581_v17  ;;  %v625_v5 = vsel %vm280_vm4, %v623_v2, %v624_v60  ;;  %v1282_v2 = vmov 0  }
 0x10e   : > { %589 = vst [vmem:[#allocation3 + $0x5c] sm:$0xc] %v585_v4  ;;  %v627_v13 = vsel %vm626_vm12, %v620_v12, %v625_v5  ;;  %1246 = vset.pattern.permute.xlu1 %v1282_v2  ;;  %1247 = vset.pattern.permute.xlu0 %v1282_v2  ;;  %vm755_vm12 = vcmask 171008   ;;  %v1199_v46 = vld [vmem:[#allocation3 + $0x4c] sm:$0xf] }
 0x10f   : > { %631 = vst [vmem:[#allocation3 + $0x60] sm:$0xcc] %v627_v13 }
 0x110   : > { %318 = vrot.lane.b32.xlu0 %v1339_v10, %s1280_s7  ;;  %827 = vst [vmem:[#allocation3 + $0xa4] sm:$0xc] %v1282_v2 }
 0x111   : > { %274 = vrot.lane.b32.xlu1 %v1329_v6, %s1278_s27  ;;  %826 = vst [vmem:[#allocation3 + $0x9c] sm:$0xcc] %v1282_v2 }
 0x112   : > { %v577_v8 = vpop.permute.xlu0 %576  ;;  %v600_v14 = vpop.permute.xlu1 %599 }
 0x113   : > { %v580_v18 = vrot.slane %v577_v8, 4  ;;  %v602_v15 = vrot.slane %v600_v14, 4 }
 0x115   : > { %v582_v19 = vsel %vm280_vm4, %v580_v18, %v581_v17  ;;  %v606_v21 = vsel %vm604_vm14, %v600_v14, %v602_v15 }
 0x116   : > { %v584_v22 = vsel %vm583_vm13, %v577_v8, %v582_v19  ;;  %610 = vst [vmem:[#allocation3 + $0x68] sm:$0x3] %v606_v21  ;;  %vm776_vm13 = vcmask 130048  }
 0x117   : > { %588 = vst [vmem:[#allocation3 + $0x54] sm:$0xcc] %v584_v22 }
 0x11a   : > { %v598_v23 = vpop.permute.xlu1 %597  ;;  %v684_v25 = vpop.permute.xlu2 %683 }
 0x11b   : > { %v601_v27 = vrot.slane %v598_v23, 4  ;;  %v687_v52 = vrot.slane %v684_v25, 4 }
 0x11d   : > { %v603_v10 = vsel %vm280_vm4, %v601_v27, %v602_v15 }
 0x11e   : > { %v605_v28 = vsel %vm604_vm14, %v598_v23, %v603_v10  ;;  %vm325_vm14 = vcmask 990208  }
 0x11f   : > { %609 = vst [vmem:[#allocation3 + $0x60] sm:$0x33] %v605_v28 }
 0x122   : > { %v643_v6 = vpop.permute.xlu0 %642 }
 0x123   : > { %v645_v30 = vrot.slane %v643_v6, 4  ;;  %v708_v32 = vpop.permute.xlu2 %707 }
 0x124   : > { %v710_v33 = vrot.slane %v708_v32, 4 }
 0x125   : > { %v649_v34 = vsel %vm647_vm15, %v643_v6, %v645_v30 }
 0x126   : > { %653 = vst [vmem:[#allocation3 + $0x74] sm:$0x3] %v649_v34  ;;  %v714_v35 = vsel %vm712_vm7, %v708_v32, %v710_v33  ;;  %v1202_v63 = vld [vmem:[#allocation3 + $0x64] sm:$0xf] }
 0x127   : > { %718 = vst [vmem:[#allocation3 + $0x80] sm:$0xc] %v714_v35 }
 0x12a   : > { %v665_v36 = vpop.permute.xlu1 %664  ;;  %v641_v37 = vpop.permute.xlu0 %640 }
 0x12b   : > { %v667_v38 = vrot.slane %v665_v36, 4  ;;  %v644_v39 = vrot.slane %v641_v37, 4  ;;  %v729_v40 = vpop.permute.xlu2 %728 }
 0x12c   : > { %v731_v41 = vrot.slane %v729_v40, 4 }
 0x12d   : > { %v671_v3 = vsel %vm669_vm9, %v665_v36, %v667_v38  ;;  %v646_v42 = vsel %vm280_vm4, %v644_v39, %v645_v30 }
 0x12e   : > { %675 = vst [vmem:[#allocation3 + $0x74] sm:$0xc] %v671_v3  ;;  %v648_v43 = vsel %vm647_vm15, %v641_v37, %v646_v42  ;;  %v735_v44 = vsel %vm733_vm10, %v729_v40, %v731_v41  ;;  %vm282_vm15 = vcmask 1039360  }
 0x12f   : > { %652 = vst [vmem:[#allocation3 + $0x6c] sm:$0x33] %v648_v43 }
 0x130   : > { %739 = vst [vmem:[#allocation3 + $0x8c] sm:$0x3] %v735_v44 }
 0x132   : > { %v663_v45 = vpop.permute.xlu1 %662 }
 0x133   : > { %v666_v49 = vrot.slane %v663_v45, 4  ;;  %v749_v26 = vpop.permute.xlu2 %748 }
 0x134   : > { %v752_v4 = vrot.slane %v749_v26, 4 }
 0x135   : > { %v668_v51 = vsel %vm280_vm4, %v666_v49, %v667_v38 }
 0x136   : > { %v670_v7 = vsel %vm669_vm9, %v663_v45, %v668_v51 }
 0x137   : > { %674 = vst [vmem:[#allocation3 + $0x6c] sm:$0xcc] %v670_v7 }
 0x13a   : > { %v686_v53 = vpop.permute.xlu1 %685  ;;  %v706_v54 = vpop.permute.xlu0 %705 }
 0x13b   : > { %v688_v56 = vrot.slane %v686_v53, 4  ;;  %v709_v58 = vrot.slane %v706_v54, 4 }
 0x13d   : > { %v689_v11 = vsel %vm280_vm4, %v687_v52, %v688_v56  ;;  %v692_v24 = vsel %vm690_vm11, %v686_v53, %v688_v56  ;;  %v711_v59 = vsel %vm280_vm4, %v709_v58, %v710_v33 }
 0x13e   : > { %v691_v60 = vsel %vm690_vm11, %v684_v25, %v689_v11  ;;  %696 = vst [vmem:[#allocation3 + $0x80] sm:$0x3] %v692_v24  ;;  %v713_v61 = vsel %vm712_vm7, %v706_v54, %v711_v59  ;;  %vm819_vm7 = vcmask 113664  }
 0x13f   : > { %695 = vst [vmem:[#allocation3 + $0x78] sm:$0x33] %v691_v60 }
 0x140   : > { %717 = vst [vmem:[#allocation3 + $0x78] sm:$0xcc] %v713_v61 }
 0x142   : > { %v792_v62 = vpop.permute.xlu2 %791  ;;  %v727_v0 = vpop.permute.xlu1 %726 }
 0x143   : > { %v730_v9 = vrot.slane %v727_v0, 4  ;;  %v795_v33 = vrot.slane %v792_v62, 4 }
 0x145   : > { %v732_v12 = vsel %vm280_vm4, %v730_v9, %v731_v41 }
 0x146   : > { %v734_v17 = vsel %vm733_vm10, %v727_v0, %v732_v12  ;;  %v1171_v0 = vld [vmem:[#allocation3 + $0x80] sm:$0xf] }
 0x147   : > { %738 = vst [vmem:[#allocation3 + $0x84] sm:$0x33] %v734_v17 }
 0x14a   : > { %v751_v5 = vpop.permute.xlu0 %750  ;;  %v491_v13 = vpop.permute.xlu2 %490 }
 0x14b   : > { %v753_v8 = vrot.slane %v751_v5, 4  ;;  %v494_v14 = vrot.slane %v491_v13, 4 }
 0x14d   : > { %v754_v18 = vsel %vm280_vm4, %v752_v4, %v753_v8  ;;  %v757_v15 = vsel %vm755_vm12, %v751_v5, %v753_v8  ;;  %v496_v19 = vsel %vm280_vm4, %v494_v14, %v495_v20  ;;  %v1159_v4 = vld [vmem:[#allocation3 + $0x68] sm:$0xf] }
 0x14e   : > { %v756_v21 = vsel %vm755_vm12, %v749_v26, %v754_v18  ;;  %761 = vst [vmem:[#allocation3 + $0x8c] sm:$0xc] %v757_v15  ;;  %v498_v22 = vsel %vm497_vm6, %v491_v13, %v496_v19  ;;  %vm798_vm6 = vcmask 121856   ;;  %v857_v13 = vld [vmem:[%s1556_s3] sm:$0xff] }
 0x14f   : > { %760 = vst [vmem:[#allocation3 + $0x84] sm:$0xcc] %v756_v21  ;;  %860 = vperm.xlu1 %1246, %v857_v13  }
 0x150   : > { %502 = vst [vmem:[#allocation3 + $0x3c] sm:$0xcc] %v498_v22 }
 0x152   : > { %v772_v23 = vpop.permute.xlu0 %771  ;;  %v770_v25 = vpop.permute.xlu1 %769 }
 0x153   : > { %v774_v27 = vrot.slane %v772_v23, 4  ;;  %v773_v10 = vrot.slane %v770_v25, 4  ;;  %v1488_v28 = vpop.permute.xlu2 %320 }
 0x154   : > { %v323_v6 = vrot.slane %v1488_v28, 4 }
 0x155   : > { %v778_v30 = vsel %vm776_vm13, %v772_v23, %v774_v27  ;;  %v775_v16 = vsel %vm280_vm4, %v773_v10, %v774_v27  ;;  %v1207_v60 = vld [vmem:[#allocation3 + $0x88] sm:$0xf0]  ;;  %v1201_v27 = vld [vmem:[#allocation3 + $0x58] sm:$0xf0] }
 0x156   : > { %782 = vst [vmem:[#allocation3 + $0x98] sm:$0x3] %v778_v30  ;;  %v777_v20 = vsel %vm776_vm13, %v770_v25, %v775_v16  ;;  %v327_v32 = vsel %vm325_vm14, %v1488_v28, %v323_v6  ;;  %v1172_v29 = vor.u32 %v1207_v60, %v1171_v0  ;;  %v1147_v25 = vld [vmem:[#allocation3 + $0x50] sm:$0xf]  ;;  %v1206_v10 = vld [vmem:[#allocation3 + $0x80] sm:$0xf0] }
 0x157   : > { %781 = vst [vmem:[#allocation3 + $0x90] sm:$0x33] %v777_v20  ;;  %v1165_v30 = vld [vmem:[#allocation3 + $0x84] sm:$0xf0]  ;;  %v1163_v20 = vld [vmem:[#allocation3 + $0x78] sm:$0xf] }
 0x158   : > { %331 = vst [vmem:[#allocation3 + $0x14] sm:$0xc] %v327_v32  ;;  %v1196_v28 = vld [vmem:[#allocation3 + $0x34] sm:$0xf] }
 0x15a   : > { %v794_v34 = vpop.permute.xlu0 %793 }
 0x15b   : > { %v796_v35 = vrot.slane %v794_v34, 4  ;;  %v383_v36 = vpop.permute.xlu2 %382 }
 0x15c   : > { %v386_v37 = vrot.slane %v383_v36, 4 }
 0x15d   : > { %v797_v38 = vsel %vm280_vm4, %v795_v33, %v796_v35  ;;  %v800_v39 = vsel %vm798_vm6, %v794_v34, %v796_v35  ;;  %v1148_v34 = vor.u32 %v1201_v27, %v1147_v25  ;;  %v1164_v35 = vor.u32 %v1206_v10, %v1163_v20 }
 0x15e   : > { %v799_v40 = vsel %vm798_vm6, %v792_v62, %v797_v38  ;;  %804 = vst [vmem:[#allocation3 + $0x98] sm:$0xc] %v800_v39  ;;  %v388_v41 = vsel %vm280_vm4, %v386_v37, %v387_v50  ;;  %v1135_v37 = vld [vmem:[#allocation3 + $0x38] sm:$0xf] }
 0x15f   : > { %803 = vst [vmem:[#allocation3 + $0x90] sm:$0xcc] %v799_v40  ;;  %v390_v3 = vsel %vm389_vm1, %v383_v36, %v388_v41  ;;  %vm303_vm1 = vcmask 1031168   ;;  %v1205_v36 = vld [vmem:[#allocation3 + $0x7c] sm:$0xf] }
 0x160   : > { %394 = vst [vmem:[#allocation3 + $0x24] sm:$0x33] %v390_v3  ;;  %v1168_v39 = vor.u32 %v1205_v36, %v1165_v30  ;;  %v1198_v40 = vld [vmem:[#allocation3 + $0x40] sm:$0xf0]  ;;  %v1203_v41 = vld [vmem:[#allocation3 + $0x68] sm:$0xf0] }
 0x162   : > { %v1501_v42 = vpop.permute.xlu0 %276 }
 0x163   : > { %v279_v43 = vrot.slane %v1501_v42, 4  ;;  %v815_v44 = vpop.permute.xlu1 %814  ;;  %v297_v59 = vpop.permute.xlu2 %296 }
 0x164   : > { %v817_v45 = vrot.slane %v815_v44, 4  ;;  %v300_v61 = vrot.slane %v297_v59, 4 }
 0x165   : > { %v284_v49 = vsel %vm282_vm15, %v1501_v42, %v279_v43  ;;  %v1183_v56 = vld [vmem:[#allocation3 + $0x98] sm:$0xf]  ;;  %v828_v42 = vld [vmem:[%s1555_s2] sm:$0xf] }
 0x166   : > { %288 = vst [vmem:[#allocation3 + $0x8] sm:$0xc] %v284_v49  ;;  %v821_v48 = vsel %vm819_vm7, %v815_v44, %v817_v45  ;;  %v1175_v5 = vld [vmem:[#allocation3 + $0x90] sm:$0xf]  ;;  %v1208_v19 = vld [vmem:[#allocation3 + $0x94] sm:$0xf] }
 0x167   : > { %825 = vst [vmem:[#allocation3 + $0xa4] sm:$0x3] %v821_v48  ;;  %v1153_v44 = vld [vmem:[#allocation3 + $0x6c] sm:$0xf0]  ;;  %v1151_v48 = vld [vmem:[#allocation3 + $0x60] sm:$0xf] }
 0x16a   : > { %v813_v50 = vpop.permute.xlu0 %812 }
 0x16b   : > { %v469_v51 = vpop.permute.xlu1 %468  ;;  %v816_v7 = vrot.slane %v813_v50, 4 }
 0x16c   : > { %v472_v26 = vrot.slane %v469_v51, 4 }
 0x16d   : > { %v818_v52 = vsel %vm280_vm4, %v816_v7, %v817_v45  ;;  %v1136_v7 = vor.u32 %v1198_v40, %v1135_v37 }
 0x16e   : > { %v474_v53 = vsel %vm280_vm4, %v472_v26, %v473_v31  ;;  %v820_v54 = vsel %vm819_vm7, %v813_v50, %v818_v52  ;;  %v1210_v58 = vld [vmem:[#allocation3 + $0xa0] sm:$0xf0]  ;;  %v1204_v31 = vld [vmem:[#allocation3 + $0x70] sm:$0xf0]  ;;  %v1123_v50 = vld [vmem:[#allocation3 + $0x20] sm:$0xf]  ;;  %v1152_v26 = vor.u32 %v1203_v41, %v1151_v48 }
 0x16f   : > { %v476_v11 = vsel %vm475_vm8, %v469_v51, %v474_v53  ;;  %824 = vst [vmem:[#allocation3 + $0x9c] sm:$0x33] %v820_v54  ;;  %v1184_v24 = vor.u32 %v1210_v58, %v1183_v56  ;;  %v1195_v52 = vld [vmem:[#allocation3 + $0x28] sm:$0xf0]  ;;  %v1139_v53 = vld [vmem:[#allocation3 + $0x48] sm:$0xf] }
 0x170   : > { %480 = vst [vmem:[#allocation3 + $0x3c] sm:$0x33] %v476_v11  ;;  %v1200_v54 = vld [vmem:[#allocation3 + $0x50] sm:$0xf0] }
 0x171   : > { %1006 = vmatpush.bf16.msra.mxu2 %v1184_v24  ;;  %v1124_v24 = vor.u32 %v1195_v52, %v1123_v50 }
 0x172   : > { %v340_v62 = vpop.permute.xlu0 %339 }
 0x173   : > { %v299_v9 = vpop.permute.xlu1 %298  ;;  %v343_v12 = vrot.slane %v340_v62, 4 }
 0x174   : > { %v301_v17 = vrot.slane %v299_v9, 4 }
 0x175   : > { %v345_v2 = vsel %vm280_vm4, %v343_v12, %v344_v57  ;;  %1007 = vmatpush.bf16.msra.mxu2 %v1172_v29  ;;  %v1160_v57 = vor.u32 %v1204_v31, %v1159_v4  ;;  %v1111_v31 = vld [vmem:[#allocation3 + $0x8] sm:$0xf] }
 0x176   : > { %v302_v8 = vsel %vm280_vm4, %v300_v61, %v301_v17  ;;  %v305_v14 = vsel %vm303_vm1, %v299_v9, %v301_v17  ;;  %v347_v18 = vsel %vm346_vm3, %v340_v62, %v345_v2  ;;  %v1209_v15 = vld [vmem:[#allocation3 + $0x98] sm:$0xf0]  ;;  %v1177_v21 = vld [vmem:[#allocation3 + $0x9c] sm:$0xf0]  ;;  %v1127_v2 = vld [vmem:[#allocation3 + $0x30] sm:$0xf] }
 0x177   : > { %v304_v55 = vsel %vm303_vm1, %v297_v59, %v302_v8  ;;  %309 = vst [vmem:[#allocation3 + $0x14] sm:$0x3] %v305_v14  ;;  %v1176_v22 = vor.u32 %v1209_v15, %v1175_v5  ;;  %v1180_v23 = vor.u32 %v1208_v19, %v1177_v21  ;;  %v1140_v59 = vor.u32 %v1200_v54, %v1139_v53  ;;  %v1197_v0 = vld [vmem:[#allocation3 + $0x38] sm:$0xf0]  ;;  %v1129_v12 = vld [vmem:[#allocation3 + $0x3c] sm:$0xf0] }
 0x178   : > { %308 = vst [vmem:[#allocation3 + $0xc] sm:$0x33] %v304_v55  ;;  %v1128_v13 = vor.u32 %v1197_v0, %v1127_v2 }
 0x179   : > { %351 = vst [vmem:[#allocation3 + $0x18] sm:$0x33] %v347_v18  ;;  %1008 = vmatpush.bf16.msra.mxu2 %v1160_v57  ;;  %980 = vmatpush.bf16.msra.mxu0 %v1176_v22 }
 0x17a   : > { %993 = vmatpush.bf16.msra.mxu1 %v1180_v23  ;;  %v405_v16 = vpop.permute.xlu0 %404 }
 0x17b   : > { %v362_v32 = vpop.permute.xlu1 %361  ;;  %v408_v33 = vrot.slane %v405_v16, 4 }
 0x17c   : > { %v365_v38 = vrot.slane %v362_v32, 4 }
 0x17d   : > { %v410_v3 = vsel %vm280_vm4, %v408_v33, %v409_v1  ;;  %1009 = vmatpush.bf16.msra.mxu2 %v1148_v34  ;;  %981 = vmatpush.bf16.msra.mxu0 %v1164_v35  ;;  %v1156_v1 = vor.u32 %v1202_v63, %v1153_v44 }
 0x17e   : > { %v367_v45 = vsel %vm280_vm4, %v365_v38, %v366_v47  ;;  %v412_v49 = vsel %vm411_vm5, %v405_v16, %v410_v3  ;;  %994 = vmatpush.bf16.msra.mxu1 %v1168_v39  ;;  %v1141_v47 = vld [vmem:[#allocation3 + $0x54] sm:$0xf0]  ;;  %v1192_v62 = vld [vmem:[#allocation3 + $0x10] sm:$0xf0] }
 0x17f   : > { %v369_v51 = vsel %vm368_vm0, %v362_v32, %v367_v45  ;;  %416 = vst [vmem:[#allocation3 + $0x24] sm:$0xcc] %v412_v49  ;;  %v1144_v61 = vor.u32 %v1199_v46, %v1141_v47  ;;  %v1112_v5 = vor.u32 %v1192_v62, %v1111_v31 }
 0x180   : > { %373 = vst [vmem:[#allocation3 + $0x18] sm:$0xcc] %v369_v51 }
 0x181   : > { %1010 = vmatpush.bf16.msra.mxu2 %v1136_v7  ;;  %982 = vmatpush.bf16.msra.mxu0 %v1152_v26 }
 0x182   : > { %995 = vmatpush.bf16.msra.mxu1 %v1156_v1  ;;  %v319_v56 = vpop.permute.xlu0 %318 }
 0x183   : > { %v275_v58 = vpop.permute.xlu1 %274  ;;  %v322_v11 = vrot.slane %v319_v56, 4 }
 0x184   : > { %v278_v60 = vrot.slane %v275_v58, 4 }
 0x185   : > { %v324_v9 = vsel %vm280_vm4, %v322_v11, %v323_v6  ;;  %1011 = vmatpush.bf16.msra.mxu2 %v1124_v24  ;;  %983 = vmatpush.bf16.msra.mxu0 %v1140_v59  ;;  %v1132_v6 = vor.u32 %v1196_v28, %v1129_v12 }
 0x186   : > { %v281_v29 = vsel %vm280_vm4, %v278_v60, %v279_v43  ;;  %v326_v17 = vsel %vm325_vm14, %v319_v56, %v324_v9  ;;  %996 = vmatpush.bf16.msra.mxu1 %v1144_v61  ;;  %v1194_v14 = vld [vmem:[#allocation3 + $0x20] sm:$0xf0]  ;;  %v1117_v18 = vld [vmem:[#allocation3 + $0x24] sm:$0xf0] }
 0x187   : > { %v283_v4 = vsel %vm282_vm15, %v275_v58, %v281_v29  ;;  %330 = vst [vmem:[#allocation3 + $0xc] sm:$0xcc] %v326_v17  ;;  %v1115_v8 = vld [vmem:[#allocation3 + $0x18] sm:$0xf]  ;;  %v1193_v43 = vld [vmem:[#allocation3 + $0x1c] sm:$0xf] }
 0x188   : > { %287 = vst [vmem:[#allocation3] sm:$0xcc] %v283_v4  ;;  %v1116_v15 = vor.u32 %v1194_v14, %v1115_v8  ;;  %v1120_v19 = vor.u32 %v1193_v43, %v1117_v18 }
 0x189   : > { %1012 = vmatpush.bf16.msra.mxu2 %v1112_v5  ;;  %984 = vmatpush.bf16.msra.mxu0 %v1128_v13 }
 0x18a   : > { %997 = vmatpush.bf16.msra.mxu1 %v1132_v6 }
 0x18c   : > { %1187 = vmatmul.msk.bf16.vlgmr.msra.gmra.mxu2 %vm432_vm2, %v828_v42 }
 0x18d   : > { %985 = vmatpush.bf16.msra.mxu0 %v1116_v15 }
 0x18e   : > { %998 = vmatpush.bf16.msra.mxu1 %v1120_v19  ;;  %v1191_v21 = vld [vmem:[#allocation3 + $0x8] sm:$0xf0]  ;;  %v1105_v55 = vld [vmem:[#allocation3 + $0xc] sm:$0xf0] }
 0x18f   : > { %v1103_v57 = vld [vmem:[#allocation3] sm:$0xf]  ;;  %v1190_v22 = vld [vmem:[#allocation3 + $0x4] sm:$0xf] }
 0x190   : > { %v1104_v23 = vor.u32 %v1191_v21, %v1103_v57  ;;  %v1108_v25 = vor.u32 %v1190_v22, %v1105_v55 }
 0x192   : > { %986 = vmatpush.bf16.msra.mxu0 %v1104_v23  ;;  %999 = vmatpush.bf16.msra.mxu1 %v1108_v25 }
 0x195   : > { %1185 = vmatmul.msk.bf16.vlgmr.msra.gmra.mxu0 %vm432_vm2, %v828_v42  ;;  %1186 = vmatmul.msk.bf16.vlgmr.msra.gmra.mxu1 %vm432_vm2, %v828_v42 }
 0x1c1   : > { %v861_v27 = vpop.permute.xlu1 %860 }
 0x20f   : > { %v1014_v10 = vpop.f32.mrf.mxu2 }
 0x210   : > { %v1015_v30 = vadd.f32 %v1014_v10, %v861_v27 }
 0x212   : > { %v1020_v16 = vmax.f32 %v1015_v30, 0.0  ;;  %v988_v20 = vpop.f32.mrf.mxu0  ;;  %v1001_v32 = vpop.f32.mrf.mxu1 }
 0x213   : > { %v989_v33 = vadd.f32 %v988_v20, %v861_v27  ;;  %v1002_v34 = vadd.f32 %v1001_v32, %v861_v27 }
 0x214   : > { %v1022_v35 = vpack.c.bf16 %v1020_v16, %v1020_v16 }
 0x215   : > { %v1018_v36 = vmax.f32 %v989_v33, 0.0  ;;  %v1019_v37 = vmax.f32 %v1002_v34, 0.0 }
 0x216   : > { %1024 = vst [vmem:[%s250_s12 + $0x8] sm:$0xf] %v1022_v35 }
 0x217   : > { %v1021_v38 = vpack.c.bf16 %v1019_v37, %v1018_v36  ;;  %v1016_v39 = vpop.f32.mrf.mxu2 }
 0x219   : > { %1023 = vst [vmem:[%s250_s12] sm:$0xff] %v1021_v38 }
 0x21a   : > { %v990_v40 = vpop.f32.mrf.mxu0  ;;  %v1003_v41 = vpop.f32.mrf.mxu1 }
 0x21b PF: > { %s14_s15 = sadd.s32 1, %s1254_s15  }
 0x21c   : > { %p11_p6 = scmp.ge.s32.totalorder %s14_s15, 4  }
 0x21e   :  { %13 = sbr.rel (!%p11_p6) target bundleno = 1 (0x1), region = 82 }

// kernel: regress_convnet_forward.5
= control target key start
LH: loop header
LB: loop body
LE: loop exit
PB: predicated region body
PF: predicated region fallthrough
CT: control target
= control target key end

     0   :  { %s1235_s1 = inlined_call_operand.vmem [shape: bf16[1024,128], index: 1, kind: input, shape index: {}]   ;;  %s1236_s0 = inlined_call_operand.vmem [shape: bf16[8,1024], index: 0, kind: input, shape index: {}]   ;;  %s1237_s2 = inlined_call_operand.vmem [shape: f32[1,128], index: 2, kind: input, shape index: {}]   ;;  %s1238_s3 = inlined_call_operand.vmem [shape: f32[8,128], index: 3, kind: output, shape index: {}]  }
   0x1   :  { %v947_v0 = vld [vmem:[%s1235_s1 + $0x38] sm:$0xff]  ;;  %v946_v4 = vld [vmem:[%s1235_s1 + $0x30] sm:$0xff]  ;;  %v945_v8 = vld [vmem:[%s1235_s1 + $0x28] sm:$0xff] }
   0x2   :  { %v955_v1 = vld [vmem:[%s1235_s1 + $0x78] sm:$0xff]  ;;  %564 = vmatpush.bf16.msra.mxu0 %v947_v0  ;;  %v954_v5 = vld [vmem:[%s1235_s1 + $0x70] sm:$0xff]  ;;  %v953_v9 = vld [vmem:[%s1235_s1 + $0x68] sm:$0xff] }
   0x3   :  { %v963_v2 = vld [vmem:[%s1235_s1 + $0xb8] sm:$0xff]  ;;  %577 = vmatpush.bf16.msra.mxu1 %v955_v1  ;;  %v962_v6 = vld [vmem:[%s1235_s1 + $0xb0] sm:$0xff]  ;;  %v961_v10 = vld [vmem:[%s1235_s1 + $0xa8] sm:$0xff] }
   0x4   :  { %v971_v3 = vld [vmem:[%s1235_s1 + $0xf8] sm:$0xff]  ;;  %590 = vmatpush.bf16.msra.mxu2 %v963_v2  ;;  %v970_v7 = vld [vmem:[%s1235_s1 + $0xf0] sm:$0xff]  ;;  %v969_v11 = vld [vmem:[%s1235_s1 + $0xe8] sm:$0xff] }
   0x5   :  { %603 = vmatpush.bf16.msra.mxu3 %v971_v3  ;;  %v944_v12 = vld [vmem:[%s1235_s1 + $0x20] sm:$0xff]  ;;  %v943_v16 = vld [vmem:[%s1235_s1 + $0x18] sm:$0xff]  ;;  %v942_v20 = vld [vmem:[%s1235_s1 + $0x10] sm:$0xff] }
   0x6   :  { %565 = vmatpush.bf16.msra.mxu0 %v946_v4  ;;  %v952_v13 = vld [vmem:[%s1235_s1 + $0x60] sm:$0xff]  ;;  %v951_v17 = vld [vmem:[%s1235_s1 + $0x58] sm:$0xff]  ;;  %v950_v21 = vld [vmem:[%s1235_s1 + $0x50] sm:$0xff] }
   0x7   :  { %578 = vmatpush.bf16.msra.mxu1 %v954_v5  ;;  %v960_v14 = vld [vmem:[%s1235_s1 + $0xa0] sm:$0xff]  ;;  %v959_v18 = vld [vmem:[%s1235_s1 + $0x98] sm:$0xff]  ;;  %v958_v22 = vld [vmem:[%s1235_s1 + $0x90] sm:$0xff] }
   0x8   :  { %591 = vmatpush.bf16.msra.mxu2 %v962_v6  ;;  %v968_v15 = vld [vmem:[%s1235_s1 + $0xe0] sm:$0xff]  ;;  %v967_v19 = vld [vmem:[%s1235_s1 + $0xd8] sm:$0xff]  ;;  %v966_v23 = vld [vmem:[%s1235_s1 + $0xd0] sm:$0xff] }
   0x9   :  { %604 = vmatpush.bf16.msra.mxu3 %v970_v7  ;;  %v941_v24 = vld [vmem:[%s1235_s1 + $0x8] sm:$0xff]  ;;  %v20_v29 = vld [vmem:[%s1236_s0] sm:$0xff]  ;;  %v979_v38 = vld [vmem:[%s1235_s1 + $0x138] sm:$0xff] }
   0xa   :  { %566 = vmatpush.bf16.msra.mxu0 %v945_v8  ;;  %v949_v25 = vld [vmem:[%s1235_s1 + $0x48] sm:$0xff]  ;;  %v940_v30 = vld [vmem:[%s1235_s1] sm:$0xff]  ;;  %v156_v36 = vunpack.c.l.b16 %v20_v29  ;;  %v157_v37 = vunpack.c.h.b16 %v20_v29  ;;  %v987_v39 = vld [vmem:[%s1235_s1 + $0x178] sm:$0xff] }
   0xb   :  { %579 = vmatpush.bf16.msra.mxu1 %v953_v9  ;;  %v957_v26 = vld [vmem:[%s1235_s1 + $0x88] sm:$0xff]  ;;  %v948_v31 = vld [vmem:[%s1235_s1 + $0x40] sm:$0xff]  ;;  %v995_v40 = vld [vmem:[%s1235_s1 + $0x1b8] sm:$0xff] }
   0xc   :  { %592 = vmatpush.bf16.msra.mxu2 %v961_v10  ;;  %v965_v27 = vld [vmem:[%s1235_s1 + $0xc8] sm:$0xff]  ;;  %v956_v34 = vld [vmem:[%s1235_s1 + $0x80] sm:$0xff]  ;;  %v1003_v41 = vld [vmem:[%s1235_s1 + $0x1f8] sm:$0xff]  ;;  %v164_v44 = vpack.c.b16 %v156_v36, %v156_v36  ;;  %v165_v45 = vpack.c.b16 %v157_v37, %v157_v37 }
   0xd   :  { %605 = vmatpush.bf16.msra.mxu3 %v969_v11  ;;  %v21_v28 = vld [vmem:[%s1236_s0 + $0x8] sm:$0xff]  ;;  %v964_v35 = vld [vmem:[%s1235_s1 + $0xc0] sm:$0xff]  ;;  %v978_v46 = vld [vmem:[%s1235_s1 + $0x130] sm:$0xff] }
   0xe   :  { %567 = vmatpush.bf16.msra.mxu0 %v944_v12  ;;  %v158_v32 = vunpack.c.l.b16 %v21_v28  ;;  %v159_v33 = vunpack.c.h.b16 %v21_v28  ;;  %v986_v47 = vld [vmem:[%s1235_s1 + $0x170] sm:$0xff]  ;;  %v977_v50 = vld [vmem:[%s1235_s1 + $0x128] sm:$0xff]  ;;  %v976_v54 = vld [vmem:[%s1235_s1 + $0x120] sm:$0xff] }
   0xf   :  { %580 = vmatpush.bf16.msra.mxu1 %v952_v13  ;;  %v994_v48 = vld [vmem:[%s1235_s1 + $0x1b0] sm:$0xff]  ;;  %v985_v51 = vld [vmem:[%s1235_s1 + $0x168] sm:$0xff]  ;;  %v984_v55 = vld [vmem:[%s1235_s1 + $0x160] sm:$0xff] }
  0x10   :  { %593 = vmatpush.bf16.msra.mxu2 %v960_v14  ;;  %v166_v42 = vpack.c.b16 %v158_v32, %v158_v32  ;;  %v167_v43 = vpack.c.b16 %v159_v33, %v159_v33  ;;  %v1002_v49 = vld [vmem:[%s1235_s1 + $0x1f0] sm:$0xff]  ;;  %v993_v52 = vld [vmem:[%s1235_s1 + $0x1a8] sm:$0xff]  ;;  %v992_v56 = vld [vmem:[%s1235_s1 + $0x1a0] sm:$0xff] }
  0x11   :  { %606 = vmatpush.bf16.msra.mxu3 %v968_v15  ;;  %v1001_v53 = vld [vmem:[%s1235_s1 + $0x1e8] sm:$0xff]  ;;  %v1000_v57 = vld [vmem:[%s1235_s1 + $0x1e0] sm:$0xff]  ;;  %v975_v58 = vld [vmem:[%s1235_s1 + $0x118] sm:$0xff] }
  0x12   :  { %568 = vmatpush.bf16.msra.mxu0 %v943_v16  ;;  %v983_v59 = vld [vmem:[%s1235_s1 + $0x158] sm:$0xff]  ;;  %v974_v62 = vld [vmem:[%s1235_s1 + $0x110] sm:$0xff]  ;;  %v973_v2 = vld [vmem:[%s1235_s1 + $0x108] sm:$0xff] }
  0x13   :  { %581 = vmatpush.bf16.msra.mxu1 %v951_v17  ;;  %v991_v60 = vld [vmem:[%s1235_s1 + $0x198] sm:$0xff]  ;;  %v982_v63 = vld [vmem:[%s1235_s1 + $0x150] sm:$0xff]  ;;  %v981_v3 = vld [vmem:[%s1235_s1 + $0x148] sm:$0xff] }
  0x14   :  { %594 = vmatpush.bf16.msra.mxu2 %v959_v18  ;;  %v999_v61 = vld [vmem:[%s1235_s1 + $0x1d8] sm:$0xff]  ;;  %v990_v0 = vld [vmem:[%s1235_s1 + $0x190] sm:$0xff]  ;;  %v989_v5 = vld [vmem:[%s1235_s1 + $0x188] sm:$0xff] }
  0x15   :  { %607 = vmatpush.bf16.msra.mxu3 %v967_v19  ;;  %v998_v1 = vld [vmem:[%s1235_s1 + $0x1d0] sm:$0xff]  ;;  %v997_v6 = vld [vmem:[%s1235_s1 + $0x1c8] sm:$0xff]  ;;  %v23_v7 = vld [vmem:[%s1236_s0 + $0x18] sm:$0xff] }
  0x16   :  { %569 = vmatpush.bf16.msra.mxu0 %v942_v20  ;;  %v22_v4 = vld [vmem:[%s1236_s0 + $0x10] sm:$0xff]  ;;  %v972_v10 = vld [vmem:[%s1235_s1 + $0x100] sm:$0xff]  ;;  %v162_v12 = vunpack.c.l.b16 %v23_v7  ;;  %v163_v13 = vunpack.c.h.b16 %v23_v7 }
  0x17   :  { %582 = vmatpush.bf16.msra.mxu1 %v950_v21  ;;  %v160_v8 = vunpack.c.l.b16 %v22_v4  ;;  %v161_v9 = vunpack.c.h.b16 %v22_v4  ;;  %v980_v11 = vld [vmem:[%s1235_s1 + $0x140] sm:$0xff] }
  0x18   :  { %595 = vmatpush.bf16.msra.mxu2 %v958_v22  ;;  %v988_v14 = vld [vmem:[%s1235_s1 + $0x180] sm:$0xff]  ;;  %v170_v18 = vpack.c.b16 %v162_v12, %v162_v12  ;;  %v171_v19 = vpack.c.b16 %v163_v13, %v163_v13 }
  0x19   :  { %608 = vmatpush.bf16.msra.mxu3 %v966_v23  ;;  %v996_v15 = vld [vmem:[%s1235_s1 + $0x1c0] sm:$0xff]  ;;  %v168_v16 = vpack.c.b16 %v160_v8, %v160_v8  ;;  %v169_v17 = vpack.c.b16 %v161_v9, %v161_v9 }
  0x1a   :  { %570 = vmatpush.bf16.msra.mxu0 %v941_v24 }
  0x1b   :  { %583 = vmatpush.bf16.msra.mxu1 %v949_v25 }
  0x1c   :  { %596 = vmatpush.bf16.msra.mxu2 %v957_v26 }
  0x1d   :  { %609 = vmatpush.bf16.msra.mxu3 %v965_v27 }
  0x1e   :  { %571 = vmatpush.bf16.msra.mxu0 %v940_v30 }
  0x1f   :  { %584 = vmatpush.bf16.msra.mxu1 %v948_v31 }
  0x20   :  { %597 = vmatpush.bf16.msra.mxu2 %v956_v34 }
  0x21   :  { %610 = vmatpush.bf16.msra.mxu3 %v964_v35  ;;  %572 = vmatmul.bf16.vlgmr.msra.gmra.mxu0 %v164_v44 }
  0x22   :  { %616 = vmatpush.bf16.msrb.mxu0 %v979_v38  ;;  %585 = vmatmul.bf16.vlgmr.msra.gmra.mxu1 %v165_v45  ;;  %v1004_v38 = vld [vmem:[%s1237_s2] ss:$0 sm:$0xff] }
  0x23   :  { %629 = vmatpush.bf16.msrb.mxu1 %v987_v39  ;;  %598 = vmatmul.bf16.vlgmr.msra.gmra.mxu2 %v166_v42 }
  0x24   :  { %642 = vmatpush.bf16.msrb.mxu2 %v995_v40  ;;  %611 = vmatmul.bf16.vlgmr.msra.gmra.mxu3 %v167_v43 }
  0x25   :  { %655 = vmatpush.bf16.msrb.mxu3 %v1003_v41 }
  0x26   :  { %617 = vmatpush.bf16.msrb.mxu0 %v978_v46 }
  0x27   :  { %630 = vmatpush.bf16.msrb.mxu1 %v986_v47 }
  0x28   :  { %643 = vmatpush.bf16.msrb.mxu2 %v994_v48 }
  0x29   :  { %656 = vmatpush.bf16.msrb.mxu3 %v1002_v49 }
  0x2a   :  { %618 = vmatpush.bf16.msrb.mxu0 %v977_v50 }
  0x2b   :  { %631 = vmatpush.bf16.msrb.mxu1 %v985_v51 }
  0x2c   :  { %644 = vmatpush.bf16.msrb.mxu2 %v993_v52 }
  0x2d   :  { %657 = vmatpush.bf16.msrb.mxu3 %v1001_v53 }
  0x2e   :  { %619 = vmatpush.bf16.msrb.mxu0 %v976_v54 }
  0x2f   :  { %632 = vmatpush.bf16.msrb.mxu1 %v984_v55 }
  0x30   :  { %645 = vmatpush.bf16.msrb.mxu2 %v992_v56 }
  0x31   :  { %658 = vmatpush.bf16.msrb.mxu3 %v1000_v57 }
  0x32   :  { %620 = vmatpush.bf16.msrb.mxu0 %v975_v58 }
  0x33   :  { %633 = vmatpush.bf16.msrb.mxu1 %v983_v59 }
  0x34   :  { %646 = vmatpush.bf16.msrb.mxu2 %v991_v60 }
  0x35   :  { %659 = vmatpush.bf16.msrb.mxu3 %v999_v61 }
  0x36   :  { %621 = vmatpush.bf16.msrb.mxu0 %v974_v62 }
  0x37   :  { %634 = vmatpush.bf16.msrb.mxu1 %v982_v63 }
  0x38   :  { %647 = vmatpush.bf16.msrb.mxu2 %v990_v0 }
  0x39   :  { %660 = vmatpush.bf16.msrb.mxu3 %v998_v1 }
  0x3a   :  { %622 = vmatpush.bf16.msrb.mxu0 %v973_v2 }
  0x3b   :  { %635 = vmatpush.bf16.msrb.mxu1 %v981_v3 }
  0x3c   :  { %648 = vmatpush.bf16.msrb.mxu2 %v989_v5 }
  0x3d   :  { %661 = vmatpush.bf16.msrb.mxu3 %v997_v6 }
  0x3e   :  { %623 = vmatpush.bf16.msrb.mxu0 %v972_v10 }
  0x3f   :  { %636 = vmatpush.bf16.msrb.mxu1 %v980_v11 }
  0x40   :  { %649 = vmatpush.bf16.msrb.mxu2 %v988_v14 }
  0x41   :  { %662 = vmatpush.bf16.msrb.mxu3 %v996_v15  ;;  %624 = vmatmul.bf16.vlgmr.msrb.gmra.mxu0 %v168_v16 }
  0x42   :  { %637 = vmatmul.bf16.vlgmr.msrb.gmra.mxu1 %v169_v17 }
  0x43   :  { %650 = vmatmul.bf16.vlgmr.msrb.gmra.mxu2 %v170_v18 }
  0x44   :  { %663 = vmatmul.bf16.vlgmr.msrb.gmra.mxu3 %v171_v19 }
  0x9e   :  { %v573_v20 = vpop.f32.mrf.mxu0 }
  0x9f   :  { %v586_v21 = vpop.f32.mrf.mxu1 }
  0xa0   :  { %v587_v28 = vadd.f32 %v586_v21, %v573_v20 }
  0xa6   :  { %v599_v22 = vpop.f32.mrf.mxu2  ;;  %v575_v24 = vpop.f32.mrf.mxu0 }
  0xa7   :  { %v612_v23 = vpop.f32.mrf.mxu3  ;;  %v588_v25 = vpop.f32.mrf.mxu1  ;;  %v600_v29 = vadd.f32 %v599_v22, %v587_v28 }
  0xa9   :  { %v613_v30 = vadd.f32 %v612_v23, %v600_v29 }
  0xae   :  { %v601_v26 = vpop.f32.mrf.mxu2 }
  0xaf   :  { %v614_v27 = vpop.f32.mrf.mxu3 }
  0xbe   :  { %v625_v31 = vpop.f32.mrf.mxu0 }
  0xbf   :  { %v638_v32 = vpop.f32.mrf.mxu1  ;;  %v626_v33 = vadd.f32 %v625_v31, %v613_v30 }
  0xc1   :  { %v639_v34 = vadd.f32 %v638_v32, %v626_v33 }
  0xc6   :  { %v651_v35 = vpop.f32.mrf.mxu2  ;;  %v627_v39 = vpop.f32.mrf.mxu0 }
  0xc7   :  { %v664_v36 = vpop.f32.mrf.mxu3  ;;  %v652_v37 = vadd.f32 %v651_v35, %v639_v34  ;;  %v640_v40 = vpop.f32.mrf.mxu1 }
  0xc9   :  { %v665_v41 = vadd.f32 %v664_v36, %v652_v37 }
  0xcb   :  { %v678_v42 = vadd.f32 %v1004_v38, %v665_v41 }
  0xcd   :  { %679 = vst [vmem:[%s1238_s3] sm:$0xff] %v678_v42 }
  0xce   :  { %v653_v43 = vpop.f32.mrf.mxu2 }
  0xcf   :  { %v666_v44 = vpop.f32.mrf.mxu3 }

// kernel: regress_convnet_forward.3
= control target key start
LH: loop header
LB: loop body
LE: loop exit
PB: predicated region body
PF: predicated region fallthrough
CT: control target
= control target key end

     0   :  { %s5295_s15 = smov 0   ;;  %s8215_s0 = inlined_call_operand.vmem [shape: bf16[1,9216], index: 0, kind: input, shape index: {}, may-alias: {0,1}]   ;;  %s8216_s1 = inlined_call_operand.vmem [shape: bf16[1,9216], index: 1, kind: input, shape index: {}, may-alias: {0,1}]   ;;  %s8217_s2 = inlined_call_operand.vmem [shape: bf16[8,32], index: 2, kind: input, shape index: {}]   ;;  %s8218_s3 = inlined_call_operand.vmem [shape: f32[8,1], index: 3, kind: input, shape index: {}]   ;;  %s8219_s4 = inlined_call_operand.vmem [shape: bf16[8,8192], index: 4, kind: output, shape index: {}]  }
   0x1 LB: > { %s4577_s16 = sadd.s32 4294967295, %s5259_s15   ;;  %p4583_p0 = scmp.ge.s32.totalorder %s5259_s15, 1  ;;  %s5259_s15 = sphi %s5295_s15, %s14_s15  }
   0x2   : > { %p186_p1 = scmp.lt.s32.totalorder %s5259_s15, 5 }
   0x4   : > { %p187_p2 = pnand %p4583_p0, %p186_p1 }
   0x6   : > { %190 = sbr.rel (%p187_p2) target bundleno = 1010 (0x3f2), region = 36 }
   0xb   : > { %s5303_s17 = sshll.u32 %s4577_s16, 4  ;;  %vm8223_vm0 = vcmask 1040384   ;;  %vm250_vm1 = vsmask.f32 256  ;;  %vm8222_vm2 = vcmask 1041409   ;;  %vm8220_vm3 = vcmask 1042434  }
   0xc   : > { %p224_p3 = scmp.lt.s32.totalorder %s5303_s17, 71  ;;  %s4808_s18 = sadd.s32 16, %s5303_s17  ;;  %vm5308_vm4 = vmand %vm8223_vm0, %vm250_vm1  ;;  %v8293_v0 = vmov 0  ;;  %vm253_vm5 = vsmask.f32 1280  ;;  %v8295_v1 = vmov 0 }
   0xd   : > { %v8294_v0 = vsel %vm5308_vm4, 4294967295, %v8293_v0  ;;  %vm257_vm6 = vsmask.f32 2304  ;;  %p234_p4 = scmp.lt.s32.totalorder %s4808_s18, 71  ;;  %vm5313_vm7 = vmand %vm8222_vm2, %vm253_vm5  ;;  %vm8221_vm9 = vcmask 1043459   ;;  %v8297_v2 = vmov 0 }
   0xe   : > { %v8296_v1 = vsel %vm5313_vm7, 4294967295, %v8295_v1  ;;  %vm255_vm8 = vmor %vm5313_vm7, %vm5308_vm4  ;;  %vm261_vm10 = vsmask.f32 3328  ;;  %s225_s19 = scalar_select %p224_p3, %s5303_s17, 71  ;;  %vm8224_vm13 = vcmask 1044484   ;;  %v8299_v3 = vmov 0 }
   0xf   : > { %vm5322_vm11 = vmand %vm8220_vm3, %vm257_vm6  ;;  %vm265_vm14 = vsmask.f32 4352  ;;  %s8864_s18 = smov (!%p234_p4, %s4808_s18), 71  ;;  %vm8227_vm5 = vcmask 1045509   ;;  %vm269_vm6 = vsmask.f32 5376 }
  0x10   : > { %v8298_v2 = vsel %vm5322_vm11, 4294967295, %v8297_v2  ;;  %vm259_vm12 = vmor %vm5322_vm11, %vm255_vm8  ;;  %s226_s22 = scalar_lea.vmem %s8215_s0, %s225_s19  ;;  %s236_s25 = scalar_lea.vmem %s8216_s1, %s8864_s18  ;;  %vm8225_vm2 = vcmask 1047559   ;;  %vm277_vm0 = vsmask.f32 7424  ;;  %v283_v8 = vld [vmem:[#allocation2 + $0x8] sm:$0xff]  ;;  %v287_v10 = vld [vmem:[#allocation2 + $0x10] sm:$0xff] }
  0x11   : > { %vm5330_vm15 = vmand %vm8221_vm9, %vm261_vm10  ;;  %vm8226_vm10 = vcmask 1046534   ;;  %vm273_vm9 = vsmask.f32 6400  ;;  %v248_v6 = vld [vmem:[%s226_s22 + $0x8] sm:$0xff]  ;;  %v286_v9 = vld [vmem:[%s236_s25] sm:$0xff]  ;;  %s5261_s26 = smov 127  }
  0x12   : > { %v8300_v3 = vsel %vm5330_vm15, 4294967295, %v8299_v3  ;;  %vm263_vm1 = vmor %vm5330_vm15, %vm259_vm12  ;;  %v280_v12 = vld [vmem:[#allocation2] sm:$0xff]  ;;  %v247_v13 = vld [vmem:[%s226_s22] sm:$0xff]  ;;  %s5262_s27 = smov 126   ;;  %s5263_s28 = smov 112  }
  0x13   : > { %8301 = vst [vmem:[#allocation4_spill] sm:$0xff] %v8300_v3  ;;  %vm5337_vm3 = vmand %vm8224_vm13, %vm265_vm14  ;;  %s5264_s29 = smov 111   ;;  %s5265_s30 = smov 96  }
  0x14   : > { %vm267_vm8 = vmor %vm5337_vm3, %vm263_vm1  ;;  %s5266_s5 = smov 110   ;;  %s5267_s6 = smov 95  }
  0x15   : > { %vm5350_vm12 = vmand %vm8227_vm5, %vm269_vm6  ;;  %s5268_s7 = smov 94   ;;  %vm8228_vm5 = vcmask 1039360   ;;  %p241_p5 = scmp.lt.s32.totalorder %s5303_s17, 63 }
  0x16   : > { %vm271_vm14 = vmor %vm5350_vm12, %vm267_vm8 }
  0x17   : > { %vm5357_vm13 = vmand %vm8226_vm10, %vm273_vm9  ;;  %vm452_vm9 = vsmask.f32 7938  ;;  %vm8241_vm10 = vcmask 1043456   ;;  %s8866_s17 = smov (!%p241_p5, %s5303_s17), 63 }
  0x18   : > { %vm275_vm1 = vmor %vm5357_vm13, %vm271_vm14  ;;  %vm8312_vm14 = vcmask 1044484   ;;  %s4588_s12 = sshll.u32 %s8866_s17, 2 }
  0x19   : > { %vm5364_vm6 = vmand %vm8225_vm2, %vm277_vm0  ;;  %s8111_s16 = scalar_lea.vmem %s8219_s4, %s4588_s12 }
  0x1a   : > { %vm279_vm8 = vmor %vm5364_vm6, %vm275_vm1 }
  0x1b   : > { %v5370_v14 = vsel %vm279_vm8, %v248_v6, %v283_v8  ;;  %v288_v15 = vsel %vm279_vm8, %v286_v9, %v287_v10  ;;  %v5373_v16 = vsel %vm279_vm8, %v247_v13, %v280_v12  ;;  %vm5475_vm0 = vmor %vm5337_vm3, %vm5308_vm4  ;;  %vm454_vm3 = vsmask.f32 7954 }
  0x1c   : > { %285 = vst [vmem:[#allocation2 + $0x8] sm:$0xff] %v5370_v14  ;;  %vm5558_vm1 = vmand %vm8312_vm14, %vm454_vm3  ;;  %vm8315_vm8 = vcmask 1040384  }
  0x1d   : > { %289 = vst [vmem:[#allocation2 + $0x10] sm:$0xff] %v288_v15  ;;  %vm5563_vm2 = vmand %vm8315_vm8, %vm452_vm9  ;;  %vm8238_vm9 = vcmask 1031168   ;;  %vm8235_vm8 = vcmask 916480  }
  0x1e   : > { %297 = vst [vmem:[#allocation1 + $0x20] ss:$4 sm:$0xff] %v5370_v14  ;;  %vm5580_vm3 = vmor %vm5558_vm1, %vm5563_vm2 }
  0x1f   : > { %282 = vst [vmem:[#allocation2] sm:$0xff] %v5373_v16  ;;  %vm5654_vm14 = vmor %vm5350_vm12, %vm5313_vm7  ;;  %vm8236_vm12 = vsmask.f32 7942 }
  0x20   : > { %294 = vst [vmem:[#allocation1] ss:$4 sm:$0xff] %v5373_v16 }
  0x24   : > { %v292_v20 = vld [vmem:[#allocation2 + $0x10] sm:$0x7] }
  0x25   : > { %v5378_v17 = vld [vmem:[#allocation1 + $0x20] sm:$0xff]  ;;  %v5380_v18 = vld [vmem:[#allocation1 + $0x28] sm:$0xff]  ;;  %v5382_v19 = vld [vmem:[#allocation1 + $0x30] sm:$0xff] }
  0x26   : > { %v5384_v21 = vld [vmem:[#allocation1 + $0x38] sm:$0xff] }
  0x27   : > { %358 = vst [vmem:[#allocation1 + $0x20] ss:$4 sm:$0xff] %v5370_v14  ;;  %v5387_v22 = vld [vmem:[#allocation1] sm:$0xff]  ;;  %v5389_v23 = vld [vmem:[#allocation1 + $0x8] sm:$0xff]  ;;  %v5391_v24 = vld [vmem:[#allocation1 + $0x10] sm:$0xff] }
  0x28   : > { %v5393_v25 = vld [vmem:[#allocation1 + $0x18] sm:$0xff] }
  0x29   : > { %307 = vst [vmem:[#allocation1] ss:$4 sm:$0xff] %v292_v20  ;;  %v353_v37 = vld [vmem:[#allocation2 + $0x10] sm:$0xf] }
  0x2a   : > { %v489_v63 = vld [vmem:[#allocation2 + $0x10] sm:$0xf] }
  0x2e   : > { %v363_v26 = vld [vmem:[#allocation1 + $0x20] sm:$0xff]  ;;  %v364_v27 = vld [vmem:[#allocation1 + $0x28] sm:$0xff]  ;;  %v365_v28 = vld [vmem:[#allocation1 + $0x30] sm:$0xff] }
  0x2f   : > { %v366_v29 = vld [vmem:[#allocation1 + $0x38] sm:$0xff]  ;;  %v379_v30 = vshll.u32 %v363_v26, 16  ;;  %v381_v31 = vshll.u32 %v364_v27, 16  ;;  %v383_v35 = vshll.u32 %v365_v28, 16 }
  0x30   : > { %v5395_v32 = vld [vmem:[#allocation1] sm:$0xff]  ;;  %v5397_v33 = vld [vmem:[#allocation1 + $0x8] sm:$0xff]  ;;  %495 = vst [vmem:[#allocation1 + $0x21] ss:$4 sm:$0xff] %v5370_v14  ;;  %v385_v36 = vshll.u32 %v366_v29, 16 }
  0x31   : > { %v4826_v34 = vpack.i.bf16 %v381_v31, %v379_v30  ;;  %355 = vst [vmem:[#allocation1] ss:$4 sm:$0xff] %v5373_v16 }
  0x32   : > { %v4831_v40 = vpack.i.bf16 %v385_v36, %v383_v35 }
  0x33   : > { %4827 = vrot.lane.b32.xlu1 %v4826_v34, %s5261_s26 }
  0x37   : > { %v504_v38 = vld [vmem:[#allocation1 + $0x20] sm:$0xff]  ;;  %v508_v39 = vld [vmem:[#allocation1 + $0x30] sm:$0xff]  ;;  %v510_v41 = vld [vmem:[#allocation1 + $0x38] sm:$0xff] }
  0x38   : > { %v359_v42 = vld [vmem:[#allocation1] sm:$0xff]  ;;  %v360_v43 = vld [vmem:[#allocation1 + $0x8] sm:$0xff]  ;;  %v361_v44 = vld [vmem:[#allocation1 + $0x10] sm:$0xff]  ;;  %526 = vrot.lane.b32.xlu0 %v504_v38, %s5262_s27  ;;  %530 = vrot.lane.b32.xlu2 %v508_v39, %s5262_s27 }
  0x39   : > { %v362_v45 = vld [vmem:[#allocation1 + $0x18] sm:$0xff]  ;;  %v506_v46 = vld [vmem:[#allocation1 + $0x28] sm:$0xff]  ;;  %v371_v47 = vshll.u32 %v359_v42, 16  ;;  %v373_v48 = vshll.u32 %v360_v43, 16  ;;  %v375_v6 = vshll.u32 %v361_v44, 16 }
  0x3a   : > { %368 = vst [vmem:[#allocation1] ss:$4 sm:$0xff] %v353_v37  ;;  %v377_v8 = vshll.u32 %v362_v45, 16  ;;  %v611_v43 = vld [vmem:[#allocation2 + $0x10] sm:$0xf] }
  0x3b   : > { %4832 = vrot.lane.b32.xlu1 %v4831_v40, %s5261_s26  ;;  %616 = vst [vmem:[#allocation1 + $0x20] ss:$4 sm:$0xff] %v5370_v14  ;;  %v4836_v60 = vpack.i.bf16 %v373_v48, %v371_v47 }
  0x3c   : > { %v4841_v28 = vpack.i.bf16 %v377_v8, %v375_v6 }
  0x40   : > { %532 = vrot.lane.b32.xlu0 %v510_v41, %s5262_s27 }
  0x41   : > { %v369_v49 = vld [vmem:[#allocation1] sm:$0xff]  ;;  %v370_v50 = vld [vmem:[#allocation1 + $0x8] sm:$0xff] }
  0x42   : > { %492 = vst [vmem:[#allocation1 + $0x1] ss:$4 sm:$0xff] %v5373_v16  ;;  %v387_v51 = vshll.u32 %v369_v49, 16  ;;  %v389_v52 = vshll.u32 %v370_v50, 16  ;;  %v621_v53 = vld [vmem:[#allocation1 + $0x20] sm:$0xff]  ;;  %v622_v54 = vld [vmem:[#allocation1 + $0x28] sm:$0xff] }
  0x43   : > { %528 = vrot.lane.b32.xlu1 %v506_v46, %s5262_s27  ;;  %v623_v55 = vld [vmem:[#allocation1 + $0x30] sm:$0xff]  ;;  %v624_v56 = vld [vmem:[#allocation1 + $0x38] sm:$0xff]  ;;  %v641_v57 = vshll.u32 %v621_v53, 16  ;;  %v644_v58 = vshll.u32 %v622_v54, 16 }
  0x44   : > { %v4846_v59 = vpack.i.bf16 %v389_v52, %v387_v51  ;;  %762 = vst [vmem:[#allocation1 + $0x22] ss:$4 sm:$0xff] %v5370_v14  ;;  %v647_v30 = vshll.u32 %v623_v55, 16  ;;  %v650_v31 = vshll.u32 %v624_v56, 16 }
  0x45   : > { %v643_v61 = vrot.slane %v641_v57, 7  ;;  %v646_v62 = vrot.slane %v644_v58, 7 }
  0x46   : > { %4847 = vrot.lane.b32.xlu2 %v4846_v59, %s5261_s26  ;;  %v649_v34 = vrot.slane %v647_v30, 7  ;;  %v652_v35 = vrot.slane %v650_v31, 7 }
  0x47   : > { %v4851_v15 = vpack.i.bf16 %v646_v62, %v643_v61  ;;  %v756_v61 = vld [vmem:[#allocation2 + $0x10] sm:$0xf] }
  0x48   : > { %4837 = vrot.lane.b32.xlu0 %v4836_v60, %s5261_s26  ;;  %v4856_v38 = vpack.i.bf16 %v652_v35, %v649_v34 }
  0x49   : > { %v496_v9 = vld [vmem:[#allocation1] sm:$0xff]  ;;  %v498_v10 = vld [vmem:[#allocation1 + $0x8] sm:$0xff]  ;;  %v500_v12 = vld [vmem:[#allocation1 + $0x10] sm:$0xff] }
  0x4a   : > { %v502_v13 = vld [vmem:[#allocation1 + $0x18] sm:$0xff] }
  0x4b   : > { %513 = vst [vmem:[#allocation1 + $0x1] ss:$4 sm:$0xff] %v489_v63  ;;  %522 = vrot.lane.b32.xlu1 %v500_v12, %s5262_s27  ;;  %v771_v20 = vld [vmem:[#allocation1 + $0x20] sm:$0xff]  ;;  %v775_v26 = vld [vmem:[#allocation1 + $0x30] sm:$0xff]  ;;  %v5413_v27 = vld [vmem:[#allocation1 + $0x38] sm:$0xff] }
  0x4c   : > { %v773_v29 = vld [vmem:[#allocation1 + $0x28] sm:$0xff] }
  0x4d   : > { %883 = vst [vmem:[#allocation1 + $0x20] ss:$4 sm:$0xff] %v5370_v14 }
  0x4e   : > { %4852 = vrot.lane.b32.xlu2 %v4851_v15, %s5263_s28 }
  0x50   : > { %4842 = vrot.lane.b32.xlu0 %v4841_v28, %s5261_s26 }
  0x52   : > { %v514_v36 = vld [vmem:[#allocation1] sm:$0xff]  ;;  %v516_v37 = vld [vmem:[#allocation1 + $0x8] sm:$0xff] }
  0x53   : > { %613 = vst [vmem:[#allocation1] ss:$4 sm:$0xff] %v5373_v16  ;;  %795 = vrot.lane.b32.xlu1 %v773_v29, %s5264_s29 }
  0x54   : > { %v888_v39 = vld [vmem:[#allocation1 + $0x20] sm:$0xff]  ;;  %v889_v40 = vld [vmem:[#allocation1 + $0x28] sm:$0xff]  ;;  %v890_v41 = vld [vmem:[#allocation1 + $0x30] sm:$0xff] }
  0x55   : > { %v891_v42 = vld [vmem:[#allocation1 + $0x38] sm:$0xff]  ;;  %v908_v62 = vshll.u32 %v888_v39, 16  ;;  %v911_v63 = vshll.u32 %v889_v40, 16  ;;  %v914_v15 = vshll.u32 %v890_v41, 16 }
  0x56   : > { %518 = vrot.lane.b32.xlu2 %v496_v9, %s5262_s27  ;;  %1029 = vst [vmem:[#allocation1 + $0x23] ss:$4 sm:$0xff] %v5370_v14 }
  0x57   : > { %v910_v31 = vrot.slane %v908_v62, 6  ;;  %v913_v34 = vrot.slane %v911_v63, 6  ;;  %v8310_v63 = vmov 0 }
  0x58   : > { %4857 = vrot.lane.b32.xlu0 %v4856_v38, %s5263_s28  ;;  %v8311_v63 = vsel %vm5475_vm0, 4294967295, %v8310_v63 }
  0x59   : > { %v4861_v39 = vpack.i.bf16 %v913_v34, %v910_v31 }
  0x5a   : > { %v5423_v44 = vld [vmem:[#allocation1] sm:$0xff]  ;;  %v5425_v45 = vld [vmem:[#allocation1 + $0x8] sm:$0xff]  ;;  %v619_v46 = vld [vmem:[#allocation1 + $0x10] sm:$0xff] }
  0x5b   : > { %v620_v47 = vld [vmem:[#allocation1 + $0x18] sm:$0xff]  ;;  %534 = vrot.lane.b32.xlu1 %v514_v36, %s5262_s27  ;;  %v635_v48 = vshll.u32 %v619_v46, 16  ;;  %v916_v36 = vrot.slane %v914_v15, 6 }
  0x5c   : > { %626 = vst [vmem:[#allocation1] ss:$4 sm:$0xff] %v611_v43  ;;  %v638_v49 = vshll.u32 %v620_v47, 16  ;;  %v878_v46 = vld [vmem:[#allocation2 + $0x10] sm:$0xf] }
  0x5d   : > { %v1040_v50 = vld [vmem:[#allocation1 + $0x28] sm:$0xff]  ;;  %v5430_v51 = vld [vmem:[#allocation1 + $0x38] sm:$0xff]  ;;  %v1042_v52 = vld [vmem:[#allocation1 + $0x30] sm:$0xff]  ;;  %v637_v56 = vrot.slane %v635_v48, 7 }
  0x5e   : > { %524 = vrot.lane.b32.xlu2 %v502_v13, %s5262_s27  ;;  %v5432_v53 = vld [vmem:[#allocation1 + $0x20] sm:$0xff]  ;;  %v640_v57 = vrot.slane %v638_v49, 7 }
  0x5f   : > { %1150 = vst [vmem:[#allocation1 + $0x20] ss:$4 sm:$0xff] %v5370_v14 }
  0x60   : > { %520 = vrot.lane.b32.xlu0 %v498_v10, %s5262_s27  ;;  %v4876_v58 = vpack.i.bf16 %v640_v57, %v637_v56 }
  0x63   : > { %v627_v54 = vld [vmem:[#allocation1] sm:$0xff]  ;;  %v628_v55 = vld [vmem:[#allocation1 + $0x8] sm:$0xff]  ;;  %1062 = vrot.lane.b32.xlu1 %v1040_v50, %s5265_s30 }
  0x64   : > { %759 = vst [vmem:[#allocation1 + $0x2] ss:$4 sm:$0xff] %v5373_v16  ;;  %v653_v59 = vshll.u32 %v627_v54, 16  ;;  %v656_v60 = vshll.u32 %v628_v55, 16 }
  0x66   : > { %797 = vrot.lane.b32.xlu2 %v775_v26, %s5264_s29  ;;  %v655_v10 = vrot.slane %v653_v59, 7  ;;  %v658_v12 = vrot.slane %v656_v60, 7  ;;  %v917_v26 = vshll.u32 %v891_v42, 16  ;;  %v1155_v28 = vld [vmem:[#allocation1 + $0x20] sm:$0xff]  ;;  %v1156_v29 = vld [vmem:[#allocation1 + $0x28] sm:$0xff]  ;;  %v5444_v30 = vld [vmem:[#allocation1 + $0x30] sm:$0xff] }
  0x67   : > { %v629_v42 = vshll.u32 %v5423_v44, 16  ;;  %v1175_v57 = vshll.u32 %v1155_v28, 16 }
  0x68   : > { %793 = vrot.lane.b32.xlu0 %v771_v20, %s5264_s29  ;;  %v5446_v20 = vld [vmem:[#allocation1 + $0x38] sm:$0xff]  ;;  %v4881_v35 = vpack.i.bf16 %v658_v12, %v655_v10  ;;  %v919_v38 = vrot.slane %v917_v26, 6 }
  0x69   : > { %1295 = vst [vmem:[#allocation1 + $0x20] ss:$4 sm:$0xff] %v5370_v14  ;;  %v631_v14 = vrot.slane %v629_v42, 7 }
  0x6a   : > { %v4866_v41 = vpack.i.bf16 %v919_v38, %v916_v36  ;;  %v5495_v36 = vld [vmem:[#allocation2 + $0xa] sm:$0xff] }
  0x6b   : > { %v763_v6 = vld [vmem:[#allocation1] sm:$0xff]  ;;  %v5439_v8 = vld [vmem:[#allocation1 + $0x8] sm:$0xff]  ;;  %v767_v9 = vld [vmem:[#allocation1 + $0x10] sm:$0xff]  ;;  %4877 = vrot.lane.b32.xlu1 %v4876_v58, %s5263_s28  ;;  %v1178_v58 = vshll.u32 %v1156_v29, 16 }
  0x6c   : > { %v5442_v13 = vld [vmem:[#allocation1 + $0x18] sm:$0xff] }
  0x6d   : > { %780 = vst [vmem:[#allocation1 + $0x2] ss:$4 sm:$0xff] %v756_v61  ;;  %v345_v61 = vld [vmem:[#allocation3 + $0x40] sm:$0x11]  ;;  %v1023_v38 = vld [vmem:[#allocation2 + $0x10] sm:$0xf] }
  0x6e   : > { %536 = vrot.lane.b32.xlu2 %v516_v37, %s5262_s27  ;;  %v632_v37 = vshll.u32 %v5425_v45, 16  ;;  %v348_v45 = vld [vmem:[#allocation3 + $0x48] sm:$0x1]  ;;  %v346_v26 = vsel %vm5475_vm0, %v5395_v32, %v345_v61 }
  0x6f   : > { %v349_v56 = vsel %vm5308_vm4, %v5397_v33, %v348_v45  ;;  %v1177_v33 = vrot.slane %v1175_v57, 5  ;;  %347 = vst [vmem:[#allocation3 + $0x40] sm:$0x11] %v346_v26  ;;  %vm8326_vm4 = vcmask 1045509  }
  0x70   : > { %799 = vrot.lane.b32.xlu0 %v5413_v27, %s5264_s29  ;;  %v634_v27 = vrot.slane %v632_v37, 7  ;;  %350 = vst [vmem:[#allocation3 + $0x48] sm:$0x1] %v349_v56  ;;  %v5486_v4 = vld [vmem:[#allocation1 + $0x20] sm:$0xff]  ;;  %v5488_v28 = vld [vmem:[#allocation1 + $0x38] sm:$0xff]  ;;  %v1306_v34 = vld [vmem:[#allocation1 + $0x28] sm:$0xff] }
  0x71   : > { %v336_v37 = vld [vmem:[#allocation3 + $0x28] sm:$0x11] }
  0x72   : > { %v4871_v47 = vpack.i.bf16 %v634_v27, %v631_v14  ;;  %v337_v27 = vsel %vm5475_vm0, %v5380_v18, %v336_v37 }
  0x73   : > { %4882 = vrot.lane.b32.xlu1 %v4881_v35, %s5263_s28  ;;  %v5493_v35 = vld [vmem:[#allocation1 + $0x30] sm:$0xff]  ;;  %338 = vst [vmem:[#allocation3 + $0x28] sm:$0x11] %v337_v27 }
  0x74   : > { %v5453_v40 = vld [vmem:[#allocation1 + $0x8] sm:$0xff]  ;;  %v781_v43 = vld [vmem:[#allocation1] sm:$0xff]  ;;  %1415 = vst [vmem:[#allocation1 + $0x20] ss:$4 sm:$0xff] %v5495_v36 }
  0x75   : > { %880 = vst [vmem:[#allocation1] ss:$4 sm:$0xff] %v5373_v16 }
  0x76   : > { %4862 = vrot.lane.b32.xlu2 %v4861_v39, %s5266_s5 }
  0x78   : > { %4867 = vrot.lane.b32.xlu0 %v4866_v41, %s5266_s5 }
  0x7b   : > { %789 = vrot.lane.b32.xlu1 %v767_v9, %s5264_s29  ;;  %v1180_v9 = vrot.slane %v1178_v58, 5  ;;  %v5519_v45 = vld [vmem:[#allocation1 + $0x28] sm:$0xff]  ;;  %v5521_v18 = vld [vmem:[#allocation1 + $0x30] sm:$0xff]  ;;  %v1181_v58 = vshll.u32 %v5444_v30, 16 }
  0x7c   : > { %v886_v48 = vld [vmem:[#allocation1 + $0x10] sm:$0xff]  ;;  %v887_v49 = vld [vmem:[#allocation1 + $0x18] sm:$0xff]  ;;  %v5461_v50 = vld [vmem:[#allocation1] sm:$0xff] }
  0x7d   : > { %v5463_v44 = vld [vmem:[#allocation1 + $0x8] sm:$0xff]  ;;  %v902_v54 = vshll.u32 %v886_v48, 16  ;;  %v905_v55 = vshll.u32 %v887_v49, 16  ;;  %v4886_v31 = vpack.i.bf16 %v1180_v9, %v1177_v33  ;;  %v5517_v49 = vld [vmem:[#allocation1 + $0x20] sm:$0xff] }
  0x7e   : > { %1064 = vrot.lane.b32.xlu2 %v1042_v52, %s5265_s30  ;;  %893 = vst [vmem:[#allocation1] ss:$4 sm:$0xff] %v878_v46 }
  0x7f   : > { %v904_v59 = vrot.slane %v902_v54, 6  ;;  %v907_v60 = vrot.slane %v905_v55, 6  ;;  %v896_v54 = vshll.u32 %v5461_v50, 16 }
  0x80   : > { %4872 = vrot.lane.b32.xlu0 %v4871_v47, %s5263_s28  ;;  %v342_v47 = vld [vmem:[#allocation3 + $0x38] sm:$0x11] }
  0x81   : > { %v4901_v10 = vpack.i.bf16 %v907_v60, %v904_v59  ;;  %v343_v48 = vsel %vm5475_vm0, %v5384_v21, %v342_v47  ;;  %v898_v57 = vrot.slane %v896_v54, 6  ;;  %v1184_v59 = vshll.u32 %v5446_v20, 16  ;;  %v321_v60 = vld [vmem:[#allocation3] sm:$0x11] }
  0x82   : > { %344 = vst [vmem:[#allocation3 + $0x38] sm:$0x11] %v343_v48  ;;  %v1183_v20 = vrot.slane %v1181_v58, 5 }
  0x83   : > { %801 = vrot.lane.b32.xlu1 %v781_v43, %s5264_s29  ;;  %v339_v43 = vld [vmem:[#allocation3 + $0x30] sm:$0x11] }
  0x84   : > { %v340_v46 = vsel %vm5475_vm0, %v5382_v19, %v339_v43  ;;  %v5524_v19 = vld [vmem:[#allocation1 + $0x38] sm:$0xff]  ;;  %v327_v43 = vld [vmem:[#allocation3 + $0x10] sm:$0x11] }
  0x85   : > { %v894_v62 = vld [vmem:[#allocation1] sm:$0xff]  ;;  %v895_v52 = vld [vmem:[#allocation1 + $0x8] sm:$0xff]  ;;  %341 = vst [vmem:[#allocation3 + $0x30] sm:$0x11] %v340_v46  ;;  %v328_v54 = vsel %vm5475_vm0, %v5391_v24, %v327_v43 }
  0x86   : > { %785 = vrot.lane.b32.xlu2 %v763_v6, %s5264_s29  ;;  %1026 = vst [vmem:[#allocation1 + $0x3] ss:$4 sm:$0xff] %v5373_v16  ;;  %v920_v12 = vshll.u32 %v894_v62, 16  ;;  %v923_v15 = vshll.u32 %v895_v52, 16  ;;  %v333_v6 = vld [vmem:[#allocation3 + $0x20] sm:$0x11] }
  0x87   : > { %v334_v29 = vsel %vm5475_vm0, %v5378_v17, %v333_v6  ;;  %1496 = vst [vmem:[#allocation1 + $0x21] ss:$4 sm:$0xff] %v5495_v36 }
  0x88   : > { %1060 = vrot.lane.b32.xlu0 %v5432_v53, %s5265_s30  ;;  %335 = vst [vmem:[#allocation3 + $0x20] sm:$0x11] %v334_v29  ;;  %v922_v32 = vrot.slane %v920_v12, 6  ;;  %v925_v53 = vrot.slane %v923_v15, 6  ;;  %v484_v15 = vld [vmem:[#allocation3 + $0x48] sm:$0x1] }
  0x89   : > { %v481_v29 = vld [vmem:[#allocation3 + $0x40] sm:$0x11]  ;;  %329 = vst [vmem:[#allocation3 + $0x10] sm:$0x11] %v328_v54  ;;  %v1290_v12 = vld [vmem:[#allocation2 + $0x10] sm:$0xf] }
  0x8a   : > { %v4906_v14 = vpack.i.bf16 %v925_v53, %v922_v32 }
  0x8b   : > { %4902 = vrot.lane.b32.xlu1 %v4901_v10, %s5266_s5 }
  0x8d   : > { %v5499_v39 = vld [vmem:[#allocation1] sm:$0xff]  ;;  %v5501_v41 = vld [vmem:[#allocation1 + $0x8] sm:$0xff]  ;;  %v1034_v42 = vld [vmem:[#allocation1 + $0x10] sm:$0xff] }
  0x8e   : > { %4887 = vrot.lane.b32.xlu2 %v4886_v31, %s5267_s6  ;;  %v5504_v17 = vld [vmem:[#allocation1 + $0x18] sm:$0xff] }
  0x8f   : > { %1047 = vst [vmem:[#allocation1 + $0x3] ss:$4 sm:$0xff] %v1023_v38 }
  0x90   : > { %787 = vrot.lane.b32.xlu0 %v5439_v8, %s5264_s29  ;;  %v899_v8 = vshll.u32 %v5463_v44, 16 }
  0x92   : > { %v5533_v21 = vpop.permute.xlu2 %530  ;;  %v901_v50 = vrot.slane %v899_v8, 6 }
  0x93   : > { %4907 = vrot.lane.b32.xlu1 %v4906_v14, %s5266_s5  ;;  %v330_v14 = vld [vmem:[#allocation3 + $0x18] sm:$0x11] }
  0x94   : > { %v4891_v44 = vpack.i.bf16 %v901_v50, %v898_v57  ;;  %v331_v8 = vsel %vm5475_vm0, %v5393_v25, %v330_v14 }
  0x95   : > { %332 = vst [vmem:[#allocation3 + $0x18] sm:$0x11] %v331_v8 }
  0x96   : > { %v5529_v55 = vld [vmem:[#allocation1 + $0x8] sm:$0xff]  ;;  %791 = vrot.lane.b32.xlu2 %v5442_v13, %s5264_s29  ;;  %v5535_v56 = vld [vmem:[#allocation1] sm:$0xff]  ;;  %v1145_v13 = vld [vmem:[#allocation2 + $0x10] sm:$0xf] }
  0x97   : > { %1147 = vst [vmem:[#allocation1] ss:$4 sm:$0xff] %v5373_v16 }
  0x98   : > { %1066 = vrot.lane.b32.xlu0 %v5430_v51, %s5265_s30  ;;  %v322_v51 = vsel %vm5475_vm0, %v5387_v22, %v321_v60  ;;  %v8316_v22 = vmov 0 }
  0x99   : > { %323 = vst [vmem:[#allocation3] sm:$0x11] %v322_v51  ;;  %v8317_v22 = vsel %vm5563_vm2, 4294967295, %v8316_v22 }
  0x9b   : > { %1328 = vrot.lane.b32.xlu1 %v1306_v34, %s5268_s7  ;;  %v324_v34 = vld [vmem:[#allocation3 + $0x8] sm:$0x11] }
  0x9c   : > { %v325_v37 = vsel %vm5475_vm0, %v5389_v23, %v324_v34 }
  0x9d   : > { %326 = vst [vmem:[#allocation3 + $0x8] sm:$0x11] %v325_v37 }
  0x9e   : > { %803 = vrot.lane.b32.xlu2 %v5453_v40, %s5264_s29  ;;  %v5545_v61 = vld [vmem:[#allocation1 + $0x10] sm:$0xff]  ;;  %v5547_v62 = vld [vmem:[#allocation1 + $0x18] sm:$0xff]  ;;  %v5552_v52 = vld [vmem:[#allocation1] sm:$0xff]  ;;  %v1186_v40 = vrot.slane %v1184_v59, 5 }
  0x9f   : > { %v5554_v33 = vld [vmem:[#allocation1 + $0x8] sm:$0xff]  ;;  %v469_v59 = vld [vmem:[#allocation3 + $0x20] sm:$0x11]  ;;  %v1163_v34 = vshll.u32 %v5552_v52, 16 }
  0xa0   : > { %v4848_v30 = vpop.permute.xlu2 %4847  ;;  %4892 = vrot.lane.b32.xlu0 %v4891_v44, %s5266_s5  ;;  %1160 = vst [vmem:[#allocation1] ss:$4 sm:$0xff] %v1145_v13  ;;  %v4896_v31 = vpack.i.bf16 %v1186_v40, %v1183_v20  ;;  %v1172_v20 = vshll.u32 %v5547_v62, 16 }
  0xa1   : > { %v4850_v9 = vunpack.i.h.bf16 %v4848_v30  ;;  %v4849_v10 = vunpack.i.l.bf16 %v4848_v30  ;;  %v1169_v30 = vshll.u32 %v5545_v61, 16  ;;  %v1505_v61 = vld [vmem:[#allocation1 + $0x20] sm:$0xff] }
  0xa3   : > { %v420_v26 = vrot.slane %v4850_v9, 4  ;;  %v5567_v6 = vrot.slane %v4849_v10, 4  ;;  %1056 = vrot.lane.b32.xlu1 %v1034_v42, %s5265_s30  ;;  %v5625_v62 = vrot.slane %v1169_v30, 5 }
  0xa5   : > { %v441_v32 = vsel %vm8228_vm5, %v4850_v9, %v420_v26  ;;  %v439_v53 = vsel %vm8241_vm10, %v5567_v6, %v420_v26  ;;  %v4828_v38 = vpop.permute.xlu1 %4827 }
  0xa6   : > { %v485_v27 = vsel %vm5563_vm2, %v441_v32, %v484_v15  ;;  %v440_v46 = vsel %vm8228_vm5, %v4849_v10, %v439_v53  ;;  %1052 = vrot.lane.b32.xlu2 %v5499_v39, %s5265_s30  ;;  %v4830_v47 = vunpack.i.h.bf16 %v4828_v38  ;;  %v4829_v23 = vunpack.i.l.bf16 %v4828_v38  ;;  %v472_v10 = vld [vmem:[#allocation3 + $0x28] sm:$0x11]  ;;  %v475_v15 = vld [vmem:[#allocation3 + $0x30] sm:$0x11] }
  0xa7   : > { %486 = vst [vmem:[#allocation3 + $0x48] sm:$0x1] %v485_v27  ;;  %v482_v48 = vsel %vm5580_vm3, %v440_v46, %v481_v29  ;;  %v5602_v44 = vld [vmem:[#allocation1] sm:$0xff]  ;;  %v5604_v58 = vld [vmem:[#allocation1 + $0x8] sm:$0xff]  ;;  %vm8325_vm2 = vsmask.f32 7958 }
  0xa8   : > { %483 = vst [vmem:[#allocation3 + $0x40] sm:$0x11] %v482_v48  ;;  %v416_v57 = vrot.slane %v4830_v47, 4  ;;  %v5597_v50 = vrot.slane %v4829_v23, 4  ;;  %v5599_v39 = vpop.permute.xlu2 %4852  ;;  %4897 = vrot.lane.b32.xlu0 %v4896_v31, %s5267_s6  ;;  %v478_v31 = vld [vmem:[#allocation3 + $0x38] sm:$0x11]  ;;  %vm5723_vm0 = vmand %vm8326_vm4, %vm8325_vm2 }
  0xa9   : > { %1292 = vst [vmem:[#allocation1] ss:$4 sm:$0xff] %v5373_v16  ;;  %vm8331_vm4 = vcmask 1039360  }
  0xaa   : > { %v431_v24 = vsel %vm8241_vm10, %v5597_v50, %v416_v57  ;;  %v5608_v13 = vpop.permute.xlu0 %526 }
  0xab   : > { %v432_v25 = vsel %vm8228_vm5, %v4829_v23, %v431_v24  ;;  %1068 = vrot.lane.b32.xlu1 %v5535_v56, %s5265_s30  ;;  %v544_v56 = vrot.slane %v5533_v21, 4  ;;  %v4854_v24 = vunpack.i.l.bf16 %v5599_v39 }
  0xac   : > { %v470_v60 = vsel %vm5580_vm3, %v432_v25, %v469_v59  ;;  %v597_v59 = vld [vmem:[#allocation3 + $0x30] sm:$0x22]  ;;  %v591_v25 = vld [vmem:[#allocation3 + $0x20] sm:$0x22] }
  0xad   : > { %471 = vst [vmem:[#allocation3 + $0x20] sm:$0x11] %v470_v60  ;;  %v4833_v51 = vpop.permute.xlu1 %4832 }
  0xae   : > { %1330 = vrot.lane.b32.xlu2 %v5493_v35, %s5268_s7  ;;  %v4835_v40 = vunpack.i.h.bf16 %v4833_v51  ;;  %v4834_v9 = vunpack.i.l.bf16 %v4833_v51  ;;  %v5627_v35 = vrot.slane %v1172_v20, 5  ;;  %v542_v51 = vrot.slane %v5608_v13, 4 }
  0xb0   : > { %v418_v16 = vrot.slane %v4835_v40, 4  ;;  %v417_v26 = vrot.slane %v4834_v9, 4  ;;  %v5621_v29 = vpop.permute.xlu2 %518  ;;  %1054 = vrot.lane.b32.xlu0 %v5501_v41, %s5265_s30  ;;  %v1166_v41 = vshll.u32 %v5554_v33, 16  ;;  %v5637_v43 = vld [vmem:[#allocation1 + $0x10] sm:$0xff]  ;;  %v5639_v14 = vld [vmem:[#allocation1 + $0x18] sm:$0xff]  ;;  %v5641_v27 = vld [vmem:[#allocation1] sm:$0xff] }
  0xb1   : > { %v8320_v33 = vmov 0 }
  0xb2   : > { %v433_v32 = vsel %vm8241_vm10, %v416_v57, %v417_v26  ;;  %v435_v53 = vsel %vm8241_vm10, %v417_v26, %v418_v16  ;;  %v437_v38 = vsel %vm8241_vm10, %v418_v16, %v5567_v6  ;;  %v5634_v37 = vpop.permute.xlu0 %532  ;;  %v5648_v6 = vld [vmem:[#allocation1 + $0x8] sm:$0xff]  ;;  %v8321_v33 = vsel %vm5654_vm14, 4294967295, %v8320_v33 }
  0xb3   : > { %v434_v46 = vsel %vm8228_vm5, %v4830_v47, %v433_v32  ;;  %v436_v52 = vsel %vm8228_vm5, %v4834_v9, %v435_v53  ;;  %v438_v23 = vsel %vm8228_vm5, %v4835_v40, %v437_v38  ;;  %v545_v48 = vrot.slane %v5634_v37, 4  ;;  %1527 = vrot.lane.b32.xlu1 %v1505_v61, %s5261_s26  ;;  %1313 = vst [vmem:[#allocation1] ss:$4 sm:$0xff] %v1290_v12  ;;  %v588_v32 = vld [vmem:[#allocation3 + $0x18] sm:$0x22] }
  0xb4   : > { %v4855_v47 = vunpack.i.h.bf16 %v5599_v39  ;;  %v473_v54 = vsel %vm5580_vm3, %v434_v46, %v472_v10  ;;  %v476_v8 = vsel %vm5580_vm3, %v436_v52, %v475_v15  ;;  %v479_v57 = vsel %vm5580_vm3, %v438_v23, %v478_v31  ;;  %v594_v10 = vld [vmem:[#allocation3 + $0x28] sm:$0x22] }
  0xb5   : > { %474 = vst [vmem:[#allocation3 + $0x28] sm:$0x11] %v473_v54  ;;  %v561_v5 = vsel %vm8241_vm10, %v544_v56, %v545_v48  ;;  %v529_v60 = vpop.permute.xlu1 %528  ;;  %v1187_v40 = vshll.u32 %v5602_v44, 16  ;;  %v4916_v12 = vpack.i.bf16 %v5627_v35, %v5625_v62  ;;  %v1165_v15 = vrot.slane %v1163_v34, 5  ;;  %v5695_v34 = vld [vmem:[#allocation2 + $0x2] sm:$0xff] }
  0xb6   : > { %477 = vst [vmem:[#allocation3 + $0x30] sm:$0x11] %v476_v8  ;;  %v562_v30 = vsel %vm8238_vm9, %v5533_v21, %v561_v5  ;;  %1058 = vrot.lane.b32.xlu2 %v5504_v17, %s5265_s30  ;;  %v543_v20 = vrot.slane %v529_v60, 4  ;;  %v1190_v16 = vshll.u32 %v5604_v58, 16  ;;  %v5682_v21 = vrot.slane %v4855_v47, 4 }
  0xb7   : > { %480 = vst [vmem:[#allocation3 + $0x38] sm:$0x11] %v479_v57  ;;  %v598_v9 = vsel %vm5654_vm14, %v562_v30, %v597_v59  ;;  %v1168_v61 = vrot.slane %v1166_v41, 5  ;;  %v5690_v31 = vrot.slane %v4854_v24, 4  ;;  %v1189_v38 = vrot.slane %v1187_v40, 5 }
  0xb8   : > { %599 = vst [vmem:[#allocation3 + $0x30] sm:$0x22] %v598_v9  ;;  %v557_v17 = vsel %vm8241_vm10, %v542_v51, %v543_v20  ;;  %v559_v44 = vsel %vm8241_vm10, %v543_v20, %v544_v56  ;;  %v525_v26 = vpop.permute.xlu2 %524  ;;  %1326 = vrot.lane.b32.xlu0 %v5486_v4, %s5268_s7  ;;  %v1192_v52 = vrot.slane %v1190_v16, 5  ;;  %vm8322_vm5 = vcmask 1041409   ;;  %v457_v40 = vld [vmem:[#allocation3] sm:$0x11] }
  0xb9   : > { %v558_v58 = vsel %vm8238_vm9, %v5608_v13, %v557_v17  ;;  %v560_v62 = vsel %vm8238_vm9, %v529_v60, %v559_v44  ;;  %v541_v35 = vrot.slane %v525_v26, 4  ;;  %vm5713_vm1 = vmand %vm8322_vm5, %vm8236_vm12  ;;  %v8323_v8 = vmov 0 }
  0xba   : > { %v592_v56 = vsel %vm5654_vm14, %v558_v58, %v591_v25  ;;  %v595_v4 = vsel %vm5654_vm14, %v560_v62, %v594_v10  ;;  %v5701_v53 = vpop.permute.xlu0 %4837  ;;  %v5707_v23 = vld [vmem:[#allocation1] sm:$0xff]  ;;  %v5709_v54 = vld [vmem:[#allocation1 + $0x8] sm:$0xff]  ;;  %v8324_v8 = vsel %vm5713_vm1, 4294967295, %v8323_v8  ;;  %v4911_v59 = vpack.i.bf16 %v1168_v61, %v1165_v15  ;;  %v5737_v10 = vld [vmem:[#allocation1 + $0x30] sm:$0xff] }
  0xbb   : > { %593 = vst [vmem:[#allocation3 + $0x20] sm:$0x22] %v592_v56  ;;  %v555_v41 = vsel %vm8241_vm10, %v541_v35, %v542_v51  ;;  %v4840_v13 = vunpack.i.h.bf16 %v5701_v53  ;;  %v4839_v46 = vunpack.i.l.bf16 %v5701_v53  ;;  %4917 = vrot.lane.b32.xlu1 %v4916_v12, %s5267_s6  ;;  %v698_v5 = vsel %vm8241_vm10, %v5690_v31, %v5682_v21  ;;  %v585_v15 = vld [vmem:[#allocation3 + $0x10] sm:$0x22]  ;;  %vm5747_vm2 = vmor %vm5723_vm0, %vm5713_vm1  ;;  %v1507_v58 = vld [vmem:[#allocation1 + $0x28] sm:$0xff] }
  0xbc   : > { %596 = vst [vmem:[#allocation3 + $0x28] sm:$0x22] %v595_v4  ;;  %v556_v57 = vsel %vm8238_vm9, %v525_v26, %v555_v41  ;;  %v4921_v16 = vpack.i.bf16 %v1192_v52, %v1189_v38  ;;  %v699_v17 = vsel %vm8235_vm8, %v4854_v24, %v698_v5  ;;  %v5758_v24 = vld [vmem:[#allocation1 + $0x38] sm:$0xff]  ;;  %vm8237_vm5 = vcmask 908288   ;;  %vm5791_vm0 = vmor %vm5357_vm13, %vm5322_vm11 }
  0xbd   : > { %v589_v60 = vsel %vm5654_vm14, %v556_v57, %v588_v32  ;;  %v412_v51 = vrot.slane %v4840_v13, 4  ;;  %v411_v30 = vrot.slane %v4839_v46, 4  ;;  %v5731_v20 = vpop.permute.xlu1 %522  ;;  %1412 = vst [vmem:[#allocation1] ss:$4 sm:$0xff] %v5695_v34  ;;  %v1410_v52 = vld [vmem:[#allocation2 + $0x12] sm:$0x7]  ;;  %vm8334_vm8 = vmmov %vm8331_vm4 }
  0xbe   : > { %590 = vst [vmem:[#allocation3 + $0x18] sm:$0x22] %v589_v60  ;;  %1070 = vrot.lane.b32.xlu2 %v5529_v55, %s5265_s30  ;;  %v540_v9 = vrot.slane %v5731_v20, 4  ;;  %vm8335_vm12 = vmmov %vm8331_vm4  ;;  %vm3599_vm13 = vcmask 1043457  }
  0xbf   : > { %v422_v12 = vsel %vm8241_vm10, %v411_v30, %v412_v51  ;;  %1615 = vst [vmem:[#allocation1 + $0x20] ss:$4 sm:$0xff] %v5495_v36  ;;  %v463_v30 = vld [vmem:[#allocation3 + $0x10] sm:$0x11] }
  0xc0   : > { %v424_v55 = vsel %vm8331_vm4, %v4839_v46, %v422_v12  ;;  %v553_v26 = vsel %vm8241_vm10, %v540_v9, %v541_v35  ;;  %v5755_v61 = vpop.permute.xlu2 %797  ;;  %4912 = vrot.lane.b32.xlu0 %v4911_v59, %s5267_s6  ;;  %v460_v59 = vld [vmem:[#allocation3 + $0x8] sm:$0x11] }
  0xc1   : > { %v458_v62 = vsel %vm5580_vm3, %v424_v55, %v457_v40  ;;  %v554_v56 = vsel %vm8238_vm9, %v5731_v20, %v553_v26  ;;  %v811_v57 = vrot.slane %v5755_v61, 4  ;;  %v466_v55 = vld [vmem:[#allocation3 + $0x18] sm:$0x11] }
  0xc2   : > { %v736_v4 = vld [vmem:[#allocation3 + $0x20] sm:$0x22]  ;;  %459 = vst [vmem:[#allocation3] sm:$0x11] %v458_v62  ;;  %v586_v35 = vsel %vm5654_vm14, %v554_v56, %v585_v15  ;;  %v4843_v32 = vpop.permute.xlu0 %4842 }
  0xc3   : > { %v737_v38 = vsel %vm5747_vm2, %v699_v17, %v736_v4  ;;  %587 = vst [vmem:[#allocation3 + $0x10] sm:$0x22] %v586_v35  ;;  %v4845_v41 = vunpack.i.h.bf16 %v4843_v32  ;;  %v4844_v46 = vunpack.i.l.bf16 %v4843_v32  ;;  %4922 = vrot.lane.b32.xlu1 %v4921_v16, %s5267_s6 }
  0xc4   : > { %738 = vst [vmem:[#allocation3 + $0x20] sm:$0x22] %v737_v38  ;;  %v5771_v5 = vld [vmem:[#allocation1] sm:$0xff]  ;;  %v5773_v25 = vld [vmem:[#allocation1 + $0x8] sm:$0xff]  ;;  %v5775_v60 = vld [vmem:[#allocation1 + $0x10] sm:$0xff] }
  0xc5   : > { %v414_v40 = vrot.slane %v4845_v41, 4  ;;  %v413_v12 = vrot.slane %v4844_v46, 4  ;;  %v5777_v15 = vpop.permute.xlu1 %795  ;;  %v5779_v17 = vld [vmem:[#allocation1 + $0x18] sm:$0xff] }
  0xc6   : > { %1529 = vrot.lane.b32.xlu2 %v1507_v58, %s5261_s26  ;;  %v810_v16 = vrot.slane %v5777_v15, 4  ;;  %1425 = vst [vmem:[#allocation1] ss:$4 sm:$0xff] %v1410_v52  ;;  %v861_v58 = vld [vmem:[#allocation3 + $0x28] sm:$0x44] }
  0xc7   : > { %v429_v26 = vsel %vm8241_vm10, %v414_v40, %v5597_v50  ;;  %v425_v62 = vsel %vm8241_vm10, %v412_v51, %v413_v12  ;;  %v427_v56 = vsel %vm8241_vm10, %v413_v12, %v414_v40  ;;  %v606_v52 = vld [vmem:[#allocation3 + $0x48] sm:$0x2] }
  0xc8   : > { %v430_v35 = vsel %vm8331_vm4, %v4845_v41, %v429_v26  ;;  %v426_v32 = vsel %vm8334_vm8, %v4840_v13, %v425_v62  ;;  %v428_v50 = vsel %vm8335_vm12, %v4844_v46, %v427_v56  ;;  %v826_v51 = vsel %vm8241_vm10, %v810_v16, %v811_v57  ;;  %v537_v7 = vpop.permute.xlu2 %536  ;;  %1332 = vrot.lane.b32.xlu0 %v5488_v28, %s5268_s7  ;;  %v5826_v26 = vld [vmem:[#allocation1 + $0x38] sm:$0xff] }
  0xc9   : > { %v467_v38 = vsel %vm5580_vm3, %v430_v35, %v466_v55  ;;  %v461_v53 = vsel %vm5580_vm3, %v426_v32, %v460_v59  ;;  %v464_v13 = vsel %vm5580_vm3, %v428_v50, %v463_v30  ;;  %v827_v41 = vsel %vm8237_vm5, %v5777_v15, %v826_v51  ;;  %v5824_v30 = vld [vmem:[#allocation1 + $0x30] sm:$0xff]  ;;  %v600_v35 = vld [vmem:[#allocation3 + $0x38] sm:$0x22] }
  0xca   : > { %468 = vst [vmem:[#allocation3 + $0x18] sm:$0x11] %v467_v38  ;;  %v862_v46 = vsel %vm5791_vm0, %v827_v41, %v861_v58  ;;  %v547_v40 = vrot.slane %v537_v7, 4  ;;  %v5817_v12 = vpop.permute.xlu0 %4857  ;;  %vm8336_vm12 = vsmask.f32 7942  ;;  %v8337_v50 = vmov 0 }
  0xcb   : > { %462 = vst [vmem:[#allocation3 + $0x8] sm:$0x11] %v461_v53  ;;  %v8239_v28 = vunpack.i.h.bf16 %v5817_v12  ;;  %v4859_v55 = vunpack.i.l.bf16 %v5817_v12  ;;  %1322 = vrot.lane.b32.xlu1 %v5637_v43, %s5268_s7  ;;  %v1620_v43 = vld [vmem:[#allocation1 + $0x20] sm:$0xff]  ;;  %vm5835_vm8 = vmand %vm3599_vm13, %vm8336_vm12  ;;  %vm3601_vm4 = vcmask 1047557   ;;  %vm8340_vm13 = vsmask.f32 7958 }
  0xcc   : > { %465 = vst [vmem:[#allocation3 + $0x10] sm:$0x11] %v464_v13  ;;  %v567_v59 = vsel %vm8238_vm9, %v537_v7, %v547_v40  ;;  %v8338_v50 = vsel %vm5835_vm8, 4294967295, %v8337_v50  ;;  %v1621_v7 = vld [vmem:[#allocation1 + $0x28] sm:$0xff]  ;;  %v603_v41 = vld [vmem:[#allocation3 + $0x40] sm:$0x22]  ;;  %vm3602_vm12 = vmand %vm3601_vm4, %vm8340_vm13 }
  0xcd   : > { %863 = vst [vmem:[#allocation3 + $0x28] sm:$0x44] %v862_v46  ;;  %v607_v62 = vsel %vm5313_vm7, %v567_v59, %v606_v52  ;;  %v5832_v56 = vrot.slane %v8239_v28, 4  ;;  %v685_v58 = vrot.slane %v4859_v55, 4  ;;  %v535_v32 = vpop.permute.xlu1 %534  ;;  %v5841_v38 = vld [vmem:[#allocation1] sm:$0xff]  ;;  %v5849_v46 = vld [vmem:[#allocation1 + $0x8] sm:$0xff]  ;;  %vm5865_vm4 = vmor %vm3602_vm12, %vm5835_vm8 }
  0xce   : > { %8339 = vst [vmem:[#allocation5_spill] sm:$0xff] %v8338_v50  ;;  %1318 = vrot.lane.b32.xlu2 %v5641_v27, %s5268_s7  ;;  %v546_v51 = vrot.slane %v535_v32, 4  ;;  %v739_v52 = vld [vmem:[#allocation3 + $0x28] sm:$0x22]  ;;  %v742_v27 = vld [vmem:[#allocation3 + $0x30] sm:$0x22] }
  0xcf   : > { %608 = vst [vmem:[#allocation3 + $0x48] sm:$0x2] %v607_v62  ;;  %v700_v53 = vsel %vm8241_vm10, %v5682_v21, %v685_v58  ;;  %v702_v13 = vsel %vm8241_vm10, %v685_v58, %v5832_v56  ;;  %vm8341_vm5 = vcmask 916480   ;;  %vm8358_vm8 = vcmask 1043456  }
  0xd0   : > { %1755 = vst [vmem:[#allocation1 + $0x22] ss:$4 sm:$0xff] %v5495_v36  ;;  %v701_v59 = vsel %vm8341_vm5, %v4855_v47, %v700_v53  ;;  %vm8342_vm9 = vmmov %vm8341_vm5  ;;  %v563_v21 = vsel %vm8241_vm10, %v545_v48, %v546_v51  ;;  %v565_v58 = vsel %vm8241_vm10, %v546_v51, %v547_v40  ;;  %v5859_v28 = vpop.permute.xlu2 %4862  ;;  %1320 = vrot.lane.b32.xlu0 %v5648_v6, %s5268_s7  ;;  %v8343_v36 = vmov 0 }
  0xd1   : > { %v703_v62 = vsel %vm8342_vm9, %v4859_v55, %v702_v13  ;;  %v8344_v36 = vsel %vm5865_vm4, 4294967295, %v8343_v36  ;;  %v740_v39 = vsel %vm5747_vm2, %v701_v59, %v739_v52  ;;  %vm8346_vm9 = vcmask 1031168   ;;  %1493 = vst [vmem:[#allocation1 + $0x1] ss:$4 sm:$0xff] %v5695_v34  ;;  %v579_v52 = vld [vmem:[#allocation3] sm:$0x22] }
  0xd2   : > { %8345 = vst [vmem:[#allocation6_spill] sm:$0xff] %v8344_v36  ;;  %v743_v47 = vsel %vm5747_vm2, %v703_v62, %v742_v27  ;;  %v564_v48 = vsel %vm8346_vm9, %v5634_v37, %v563_v21  ;;  %vm8347_vm5 = vmmov %vm8346_vm9  ;;  %v521_v51 = vpop.permute.xlu0 %520  ;;  %v1640_v53 = vshll.u32 %v1620_v43, 16  ;;  %v538_v13 = vrot.slane %v5621_v29, 4  ;;  %v582_v37 = vld [vmem:[#allocation3 + $0x8] sm:$0x22] }
  0xd3   : > { %v566_v40 = vsel %vm8347_vm5, %v535_v32, %v565_v58  ;;  %741 = vst [vmem:[#allocation3 + $0x28] sm:$0x22] %v740_v39  ;;  %v601_v6 = vsel %vm5654_vm14, %v564_v48, %v600_v35  ;;  %v539_v27 = vrot.slane %v521_v51, 4  ;;  %1334 = vrot.lane.b32.xlu1 %v5707_v23, %s5268_s7  ;;  %v1643_v32 = vshll.u32 %v1621_v7, 16  ;;  %vm8348_vm13 = vmmov %vm8347_vm5  ;;  %v1490_v39 = vld [vmem:[#allocation2 + $0x12] sm:$0xf] }
  0xd4   : > { %v604_v55 = vsel %vm5654_vm14, %v566_v40, %v603_v41  ;;  %744 = vst [vmem:[#allocation3 + $0x30] sm:$0x22] %v743_v47  ;;  %vm8349_vm12 = vmmov %vm8347_vm5  ;;  %v1642_v23 = vrot.slane %v1640_v53, 7  ;;  %v1646_v7 = vshll.u32 %v5824_v30, 16  ;;  %v1649_v58 = vshll.u32 %v5826_v26, 16 }
  0xd5   : > { %602 = vst [vmem:[#allocation3 + $0x38] sm:$0x22] %v601_v6  ;;  %v548_v59 = vsel %vm8241_vm10, %v538_v13, %v539_v27  ;;  %v551_v35 = vsel %vm8241_vm10, %v539_v27, %v540_v9  ;;  %v5888_v41 = vpop.permute.xlu1 %1062  ;;  %v8252_v40 = vunpack.i.h.bf16 %v5859_v28  ;;  %vm8240_vm9 = vcmask 785408   ;;  %vm5921_vm5 = vmor %vm5364_vm6, %vm5330_vm15 }
  0xd6   : > { %605 = vst [vmem:[#allocation3 + $0x40] sm:$0x22] %v604_v55  ;;  %v550_v43 = vsel %vm8348_vm13, %v5621_v29, %v548_v59  ;;  %v552_v62 = vsel %vm8349_vm12, %v521_v51, %v551_v35  ;;  %1324 = vrot.lane.b32.xlu2 %v5639_v14, %s5268_s7  ;;  %v8249_v9 = vrot.slane %v5888_v41, 4  ;;  %v1645_v14 = vrot.slane %v1643_v32, 7  ;;  %v1128_v51 = vld [vmem:[#allocation3 + $0x28] sm:$0x88] }
  0xd7   : > { %v580_v21 = vsel %vm5654_vm14, %v550_v43, %v579_v52  ;;  %v583_v20 = vsel %vm5654_vm14, %v552_v62, %v582_v37  ;;  %v4864_v55 = vunpack.i.l.bf16 %v5859_v28  ;;  %v1648_v11 = vrot.slane %v1646_v7, 7  ;;  %v858_v32 = vld [vmem:[#allocation3 + $0x20] sm:$0x44]  ;;  %vm8362_vm14 = vmmov %vm8358_vm8 }
  0xd8   : > { %581 = vst [vmem:[#allocation3] sm:$0x22] %v580_v21  ;;  %v5902_v29 = vpop.permute.xlu2 %1064  ;;  %1531 = vrot.lane.b32.xlu0 %v5737_v10, %s5261_s26  ;;  %v5906_v47 = vld [vmem:[#allocation1] sm:$0xff]  ;;  %v5908_v30 = vld [vmem:[#allocation1 + $0x8] sm:$0xff]  ;;  %v5910_v48 = vld [vmem:[#allocation1 + $0x10] sm:$0xff]  ;;  %v8350_v10 = vmov 0  ;;  %v4926_v59 = vpack.i.bf16 %v1645_v14, %v1642_v23 }
  0xd9   : > { %584 = vst [vmem:[#allocation3 + $0x8] sm:$0x22] %v583_v20  ;;  %v8248_v26 = vrot.slane %v5902_v29, 4  ;;  %v5914_v6 = vld [vmem:[#allocation1 + $0x18] sm:$0xff]  ;;  %v8351_v10 = vsel %vm5921_vm5, 4294967295, %v8350_v10  ;;  %v1651_v27 = vrot.slane %v1649_v58, 7 }
  0xda   : > { %8352 = vst [vmem:[#allocation7_spill] sm:$0xff] %v8351_v10  ;;  %v5925_v53 = vpop.permute.xlu0 %793  ;;  %v5939_v35 = vrot.slane %v8252_v40, 4  ;;  %vm986_vm6 = vsmask.f32 7946  ;;  %v5948_v7 = vrot.slane %v4864_v55, 4  ;;  %vm8353_vm13 = vcmask 908288  }
  0xdb   : > { %1514 = vst [vmem:[#allocation1 + $0x1] ss:$4 sm:$0xff] %v1490_v39  ;;  %v1093_v13 = vsel %vm8241_vm10, %v8249_v9, %v8248_v26  ;;  %v8250_v52 = vrot.slane %v5925_v53, 4  ;;  %1533 = vrot.lane.b32.xlu1 %v5758_v24, %s5261_s26  ;;  %vm988_vm12 = vsmask.f32 7962  ;;  %v4931_v58 = vpack.i.bf16 %v1651_v27, %v1648_v11  ;;  %v1766_v26 = vld [vmem:[#allocation1 + $0x28] sm:$0xff] }
  0xdc   : > { %v1094_v37 = vsel %vm8240_vm9, %v5888_v41, %v1093_v13  ;;  %v965_v11 = vsel %vm8358_vm8, %v5948_v7, %v5939_v35  ;;  %vm8359_vm4 = vcmask 1046534  }
  0xdd   : > { %v1129_v43 = vsel %vm5921_vm5, %v1094_v37, %v1128_v51  ;;  %v824_v24 = vsel %vm8241_vm10, %v8250_v52, %v810_v16  ;;  %v4878_v62 = vpop.permute.xlu1 %4877  ;;  %v8355_v51 = vmov 0  ;;  %vm5975_vm7 = vmand %vm8359_vm4, %vm988_vm12  ;;  %vm8371_vm4 = vcmask 908288  }
  0xde   : > { %1130 = vst [vmem:[#allocation3 + $0x28] sm:$0x88] %v1129_v43  ;;  %v825_v23 = vsel %vm8353_vm13, %v5925_v53, %v824_v24  ;;  %1336 = vrot.lane.b32.xlu2 %v5709_v54, %s5268_s7  ;;  %v4880_v21 = vunpack.i.h.bf16 %v4878_v62  ;;  %v4879_v20 = vunpack.i.l.bf16 %v4878_v62  ;;  %vm8354_vm13 = vcmask 1042434   ;;  %v730_v62 = vld [vmem:[#allocation3 + $0x10] sm:$0x22] }
  0xdf   : > { %v859_v15 = vsel %vm5791_vm0, %v825_v23, %v858_v32  ;;  %vm5963_vm9 = vmand %vm8354_vm13, %vm986_vm6  ;;  %vm8364_vm13 = vcmask 916480   ;;  %v733_v23 = vld [vmem:[#allocation3 + $0x18] sm:$0x22] }
  0xe0   : > { %860 = vst [vmem:[#allocation3 + $0x20] sm:$0x44] %v859_v15  ;;  %v682_v39 = vrot.slane %v4880_v21, 4  ;;  %v5956_v16 = vrot.slane %v4879_v20, 4  ;;  %v5958_v14 = vpop.permute.xlu2 %785  ;;  %4927 = vrot.lane.b32.xlu0 %v4926_v59, %s5262_s27  ;;  %v8356_v51 = vsel %vm5963_vm9, 4294967295, %v8355_v51  ;;  %vm8363_vm6 = vmmov %vm8358_vm8 }
  0xe1   : > { %8357 = vst [vmem:[#allocation8_spill] sm:$0xff] %v8356_v51  ;;  %vm8365_vm10 = vmmov %vm8364_vm13 }
  0xe2   : > { %v5967_v54 = vld [vmem:[#allocation1] sm:$0xff]  ;;  %v5969_v13 = vld [vmem:[#allocation1 + $0x8] sm:$0xff]  ;;  %v694_v37 = vsel %vm8362_vm14, %v5956_v16, %v682_v39  ;;  %v696_v32 = vsel %vm8363_vm6, %v682_v39, %v5690_v31  ;;  %v5983_v59 = vpop.permute.xlu0 %799  ;;  %v864_v39 = vld [vmem:[#allocation3 + $0x30] sm:$0x44]  ;;  %vm8366_vm14 = vcmask 900096  }
  0xe3   : > { %1612 = vst [vmem:[#allocation1] ss:$4 sm:$0xff] %v5695_v34  ;;  %v695_v43 = vsel %vm8364_vm13, %v4879_v20, %v694_v37  ;;  %v697_v24 = vsel %vm8365_vm10, %v4880_v21, %v696_v32  ;;  %v8251_v15 = vrot.slane %v5983_v59, 4  ;;  %4932 = vrot.lane.b32.xlu1 %v4931_v58, %s5262_s27  ;;  %v966_v52 = vsel %vm8366_vm14, %v4864_v55, %v965_v11  ;;  %vm5999_vm10 = vmor %vm5975_vm7, %vm5963_vm9 }
  0xe4   : > { %v731_v9 = vsel %vm5747_vm2, %v695_v43, %v730_v62  ;;  %v734_v31 = vsel %vm5747_vm2, %v697_v24, %v733_v23  ;;  %v8367_v21 = vmov 0  ;;  %vm8370_vm8 = vmmov %vm8363_vm6  ;;  %v751_v62 = vld [vmem:[#allocation3 + $0x48] sm:$0x2] }
  0xe5   : > { %v8368_v21 = vsel %vm5999_vm10, 4294967295, %v8367_v21  ;;  %732 = vst [vmem:[#allocation3 + $0x10] sm:$0x22] %v731_v9  ;;  %v828_v20 = vsel %vm8370_vm8, %v811_v57, %v8251_v15  ;;  %v4883_v58 = vpop.permute.xlu1 %4882  ;;  %v1610_v9 = vld [vmem:[#allocation2 + $0x12] sm:$0xf]  ;;  %vm8372_vm7 = vmmov %vm8364_vm13 }
  0xe6   : > { %8369 = vst [vmem:[#allocation9_spill] sm:$0xff] %v8368_v21  ;;  %v829_v55 = vsel %vm8371_vm4, %v5755_v61, %v828_v20  ;;  %1788 = vrot.lane.b32.xlu2 %v1766_v26, %s5263_s28  ;;  %v4885_v11 = vunpack.i.h.bf16 %v4883_v58  ;;  %v4884_v27 = vunpack.i.l.bf16 %v4883_v58  ;;  %vm8373_vm12 = vmmov %vm8363_vm6 }
  0xe7   : > { %735 = vst [vmem:[#allocation3 + $0x18] sm:$0x22] %v734_v31  ;;  %v1003_v37 = vld [vmem:[#allocation3 + $0x20] sm:$0x44]  ;;  %v865_v32 = vsel %vm5791_vm0, %v829_v55, %v864_v39  ;;  %vm8375_vm13 = vmmov %vm8372_vm7 }
  0xe8   : > { %v1004_v43 = vsel %vm5999_vm10, %v966_v52, %v1003_v37  ;;  %866 = vst [vmem:[#allocation3 + $0x30] sm:$0x44] %v865_v32  ;;  %v688_v24 = vrot.slane %v4885_v11, 4  ;;  %v687_v57 = vrot.slane %v4884_v27, 4  ;;  %v6015_v23 = vpop.permute.xlu2 %4887  ;;  %1519 = vrot.lane.b32.xlu0 %v5906_v47, %s5261_s26  ;;  %v745_v37 = vld [vmem:[#allocation3 + $0x38] sm:$0x22]  ;;  %v8374_v32 = vunpack.i.h.bf16 %v5817_v12  ;;  %vm8376_vm14 = vmmov %vm8372_vm7 }
  0xe9   : > { %1005 = vst [vmem:[#allocation3 + $0x20] sm:$0x44] %v1004_v43  ;;  %v748_v43 = vld [vmem:[#allocation3 + $0x40] sm:$0x22]  ;;  %vm8377_vm8 = vmmov %vm8363_vm6 }
  0xea   : > { %v1616_v61 = vld [vmem:[#allocation1] sm:$0xff]  ;;  %v1617_v26 = vld [vmem:[#allocation1 + $0x8] sm:$0xff]  ;;  %v1618_v31 = vld [vmem:[#allocation1 + $0x10] sm:$0xff]  ;;  %v708_v20 = vsel %vm8372_vm7, %v4885_v11, %v688_v24  ;;  %v704_v39 = vsel %vm8373_vm12, %v5832_v56, %v687_v57  ;;  %v706_v52 = vsel %vm8363_vm6, %v687_v57, %v688_v24  ;;  %v6023_v58 = vpop.permute.xlu0 %4867  ;;  %vm8380_vm7 = vcmask 900096  }
  0xeb   : > { %v1619_v55 = vld [vmem:[#allocation1 + $0x18] sm:$0xff]  ;;  %v705_v15 = vsel %vm8375_vm13, %v8374_v32, %v704_v39  ;;  %v707_v47 = vsel %vm8376_vm14, %v4884_v27, %v706_v52  ;;  %v752_v40 = vsel %vm5713_vm1, %v708_v20, %v751_v62  ;;  %1521 = vrot.lane.b32.xlu1 %v5908_v30, %s5261_s26  ;;  %v8253_v12 = vunpack.i.h.bf16 %v6023_v58  ;;  %v1764_v52 = vld [vmem:[#allocation1 + $0x20] sm:$0xff]  ;;  %vm8378_vm4 = vmmov %vm8363_vm6 }
  0xec   : > { %1625 = vst [vmem:[#allocation1] ss:$4 sm:$0xff] %v1610_v9  ;;  %v746_v56 = vsel %vm5747_vm2, %v705_v15, %v745_v37  ;;  %v749_v11 = vsel %vm5747_vm2, %v707_v47, %v748_v43  ;;  %v1628_v24 = vshll.u32 %v1616_v61, 16  ;;  %v4869_v27 = vunpack.i.l.bf16 %v6023_v58  ;;  %vm8381_vm12 = vmmov %vm8380_vm7 }
  0xed   : > { %753 = vst [vmem:[#allocation3 + $0x48] sm:$0x2] %v752_v40  ;;  %v6039_v57 = vpop.permute.xlu1 %789  ;;  %v1631_v62 = vshll.u32 %v1617_v26, 16  ;;  %v6043_v30 = vrot.slane %v8253_v12, 4  ;;  %v1634_v15 = vshll.u32 %v1618_v31, 16  ;;  %v1637_v9 = vshll.u32 %v1619_v55, 16  ;;  %vm8383_vm6 = vmmov %vm8378_vm4 }
  0xee   : > { %747 = vst [vmem:[#allocation3 + $0x38] sm:$0x22] %v746_v56  ;;  %1523 = vrot.lane.b32.xlu2 %v5910_v48, %s5261_s26  ;;  %v952_v40 = vrot.slane %v4869_v27, 4  ;;  %v6050_v26 = vrot.slane %v1628_v24, 7  ;;  %v1006_v48 = vld [vmem:[#allocation3 + $0x28] sm:$0x44]  ;;  %v8379_v47 = vunpack.i.h.bf16 %v5859_v28  ;;  %vm8385_vm13 = vmmov %vm8378_vm4 }
  0xef   : > { %750 = vst [vmem:[#allocation3 + $0x40] sm:$0x22] %v749_v11  ;;  %v1009_v61 = vld [vmem:[#allocation3 + $0x30] sm:$0x44]  ;;  %v1633_v55 = vrot.slane %v1631_v62, 7  ;;  %v6060_v24 = vrot.slane %v1634_v15, 7 }
  0xf0   : > { %v792_v39 = vpop.permute.xlu2 %791  ;;  %1525 = vrot.lane.b32.xlu0 %v5914_v6, %s5261_s26  ;;  %v967_v37 = vsel %vm8377_vm8, %v5939_v35, %v952_v40  ;;  %v969_v32 = vsel %vm8378_vm4, %v952_v40, %v6043_v30  ;;  %v852_v11 = vld [vmem:[#allocation3 + $0x10] sm:$0x44]  ;;  %v855_v6 = vld [vmem:[#allocation3 + $0x18] sm:$0x44]  ;;  %v6062_v20 = vrot.slane %v1637_v9, 7  ;;  %v8382_v62 = vrot.slane %v6039_v57, 4 }
  0xf1   : > { %v808_v31 = vrot.slane %v792_v39, 4  ;;  %v968_v43 = vsel %vm8380_vm7, %v8379_v47, %v967_v37  ;;  %v970_v56 = vsel %vm8381_vm12, %v4869_v27, %v969_v32  ;;  %v8384_v37 = vrot.slane %v5925_v53, 4  ;;  %vm8388_vm7 = vmmov %vm8383_vm6 }
  0xf2   : > { %v4873_v12 = vpop.permute.xlu0 %4872  ;;  %v1007_v35 = vsel %vm5999_vm10, %v968_v43, %v1006_v48  ;;  %v1010_v40 = vsel %vm5999_vm10, %v970_v56, %v1009_v61  ;;  %vm8386_vm14 = vcmask 908288   ;;  %vm1253_vm4 = vsmask.f32 7950  ;;  %vm8389_vm12 = vmmov %vm8383_vm6 }
  0xf3   : > { %v820_v28 = vsel %vm8383_vm6, %v8382_v62, %v808_v31  ;;  %v822_v27 = vsel %vm8385_vm13, %v808_v31, %v8384_v37  ;;  %1786 = vrot.lane.b32.xlu1 %v1764_v52, %s5263_s28  ;;  %1008 = vst [vmem:[#allocation3 + $0x28] sm:$0x44] %v1007_v35  ;;  %vm8387_vm8 = vmmov %vm8386_vm14  ;;  %v4875_v32 = vunpack.i.h.bf16 %v4873_v12  ;;  %v4874_v48 = vunpack.i.l.bf16 %v4873_v12  ;;  %v1626_v43 = vld [vmem:[#allocation1] sm:$0xff]  ;;  %v1627_v31 = vld [vmem:[#allocation1 + $0x8] sm:$0xff] }
  0xf4   : > { %v821_v15 = vsel %vm8386_vm14, %v6039_v57, %v820_v28  ;;  %v823_v9 = vsel %vm8387_vm8, %v792_v39, %v822_v27  ;;  %1011 = vst [vmem:[#allocation3 + $0x30] sm:$0x44] %v1010_v40  ;;  %v867_v39 = vld [vmem:[#allocation3 + $0x38] sm:$0x44]  ;;  %v4936_v12 = vpack.i.bf16 %v1633_v55, %v6050_v26  ;;  %v8390_v62 = vrot.slane %v5983_v59, 4 }
  0xf5   : > { %v853_v61 = vsel %vm5791_vm0, %v821_v15, %v852_v11  ;;  %v856_v47 = vsel %vm5791_vm0, %v823_v9, %v855_v6  ;;  %v802_v53 = vpop.permute.xlu1 %801  ;;  %v680_v52 = vrot.slane %v4875_v32, 4  ;;  %v679_v56 = vrot.slane %v4874_v48, 4  ;;  %v873_v37 = vld [vmem:[#allocation3 + $0x48] sm:$0x4]  ;;  %1752 = vst [vmem:[#allocation1 + $0x2] ss:$4 sm:$0xff] %v5695_v34 }
  0xf6   : > { %854 = vst [vmem:[#allocation3 + $0x10] sm:$0x44] %v853_v61  ;;  %1535 = vrot.lane.b32.xlu2 %v5967_v54, %s5261_s26  ;;  %v813_v35 = vrot.slane %v802_v53, 4  ;;  %v4941_v11 = vpack.i.bf16 %v6062_v20, %v6060_v24  ;;  %v1652_v27 = vshll.u32 %v1626_v43, 16  ;;  %v727_v26 = vld [vmem:[#allocation3 + $0x8] sm:$0x22] }
  0xf7   : > { %857 = vst [vmem:[#allocation3 + $0x18] sm:$0x44] %v856_v47  ;;  %v692_v6 = vsel %vm8388_vm7, %v680_v52, %v5956_v16  ;;  %v689_v40 = vsel %vm8389_vm12, %v679_v56, %v680_v52  ;;  %vm8391_vm13 = vcmask 916480   ;;  %v724_v16 = vld [vmem:[#allocation3] sm:$0x22]  ;;  %vm8393_vm7 = vmmov %vm8383_vm6 }
  0xf8   : > { %v830_v28 = vsel %vm8383_vm6, %v8390_v62, %v813_v35  ;;  %v804_v54 = vpop.permute.xlu2 %803  ;;  %1537 = vrot.lane.b32.xlu0 %v5969_v13, %s5261_s26  ;;  %v693_v20 = vsel %vm8391_vm13, %v4875_v32, %v692_v6  ;;  %vm8392_vm14 = vmmov %vm8391_vm13  ;;  %v870_v47 = vld [vmem:[#allocation3 + $0x40] sm:$0x44]  ;;  %v1655_v32 = vshll.u32 %v1627_v31, 16  ;;  %v8258_v6 = vunpack.i.l.bf16 %v6015_v23  ;;  %v1125_v31 = vld [vmem:[#allocation3 + $0x20] sm:$0x88] }
  0xf9   : > { %v691_v55 = vsel %vm8392_vm14, %v4874_v48, %v689_v40  ;;  %v831_v24 = vsel %vm8387_vm8, %v5983_v59, %v830_v28  ;;  %v814_v15 = vrot.slane %v804_v54, 4  ;;  %v728_v9 = vsel %vm5747_vm2, %v693_v20, %v727_v26  ;;  %vm8394_vm12 = vmmov %vm8387_vm8  ;;  %v1749_v20 = vld [vmem:[#allocation2 + $0x12] sm:$0xf] }
  0xfa   : > { %v725_v61 = vsel %vm5747_vm2, %v691_v55, %v724_v16  ;;  %v868_v13 = vsel %vm5791_vm0, %v831_v24, %v867_v39  ;;  %v6106_v43 = vpop.permute.xlu0 %1060  ;;  %v8256_v48 = vunpack.i.h.bf16 %v6015_v23  ;;  %729 = vst [vmem:[#allocation3 + $0x8] sm:$0x22] %v728_v9  ;;  %vm8395_vm6 = vmmov %vm8387_vm8  ;;  %vm1255_vm13 = vsmask.f32 7966  ;;  %v1770_v16 = vld [vmem:[#allocation1 + $0x38] sm:$0xff] }
  0xfb   : > { %v832_v52 = vsel %vm8393_vm7, %v813_v35, %v814_v15  ;;  %v834_v59 = vsel %vm8394_vm12, %v804_v54, %v814_v15  ;;  %v8257_v56 = vrot.slane %v6106_v43, 4  ;;  %4937 = vrot.lane.b32.xlu1 %v4936_v12, %s5262_s27  ;;  %726 = vst [vmem:[#allocation3] sm:$0x22] %v725_v61  ;;  %v8396_v62 = vrot.slane %v5888_v41, 4  ;;  %vm8397_vm14 = vmmov %vm8393_vm7  ;;  %v1768_v54 = vld [vmem:[#allocation1 + $0x30] sm:$0xff] }
  0xfc   : > { %v833_v39 = vsel %vm8395_vm6, %v802_v53, %v832_v52  ;;  %v874_v40 = vsel %vm5322_vm11, %v834_v59, %v873_v37  ;;  %869 = vst [vmem:[#allocation3 + $0x38] sm:$0x44] %v868_v13  ;;  %v1654_v26 = vrot.slane %v1652_v27, 7  ;;  %vm8398_vm8 = vcmask 785408   ;;  %v6127_v15 = vld [vmem:[#allocation2 + $0xa] sm:$0xff]  ;;  %v1756_v9 = vld [vmem:[#allocation1] sm:$0xff] }
  0xfd   : > { %v871_v35 = vsel %vm5791_vm0, %v833_v39, %v870_v47  ;;  %v1091_v12 = vsel %vm8397_vm14, %v8257_v56, %v8396_v62  ;;  %v4903_v28 = vpop.permute.xlu1 %4902  ;;  %v1657_v24 = vrot.slane %v1655_v32, 7  ;;  %v6131_v41 = vrot.slane %v8256_v48, 4  ;;  %875 = vst [vmem:[#allocation3 + $0x48] sm:$0x4] %v874_v40  ;;  %v6135_v61 = vld [vmem:[#allocation1 + $0x8] sm:$0xff]  ;;  %v6137_v13 = vld [vmem:[#allocation1 + $0x10] sm:$0xff] }
  0xfe   : > { %872 = vst [vmem:[#allocation3 + $0x40] sm:$0x44] %v871_v35  ;;  %v1092_v53 = vsel %vm8398_vm8, %v6106_v43, %v1091_v12  ;;  %4942 = vrot.lane.b32.xlu2 %v4941_v11, %s5262_s27  ;;  %v4905_v37 = vunpack.i.h.bf16 %v4903_v28  ;;  %v4904_v55 = vunpack.i.l.bf16 %v4903_v28  ;;  %v6141_v11 = vrot.slane %v8258_v6, 4  ;;  %v6148_v59 = vld [vmem:[#allocation1 + $0x18] sm:$0xff]  ;;  %v997_v40 = vld [vmem:[#allocation3 + $0x10] sm:$0x44] }
  0xff   : > { %v1126_v27 = vsel %vm5921_vm5, %v1092_v53, %v1125_v31  ;;  %vm8399_vm7 = vcmask 1043459   ;;  %v8400_v39 = vmov 0  ;;  %1874 = vst [vmem:[#allocation1 + $0x20] ss:$4 sm:$0xff] %v6127_v15  ;;  %vm8403_vm6 = vcmask 1047559  }
 0x100   : > { %1127 = vst [vmem:[#allocation3 + $0x20] sm:$0x88] %v1126_v27  ;;  %v949_v47 = vrot.slane %v4905_v37, 4  ;;  %v6143_v32 = vrot.slane %v4904_v55, 4  ;;  %v6145_v52 = vpop.permute.xlu2 %1052  ;;  %1790 = vrot.lane.b32.xlu0 %v1768_v54, %s5263_s28  ;;  %vm6152_vm12 = vmand %vm8399_vm7, %vm1253_vm4  ;;  %vm8406_vm8 = vcmask 1043456   ;;  %v4946_v28 = vpack.i.bf16 %v1657_v24, %v1654_v26 }
 0x101   : > { %v8401_v39 = vsel %vm6152_vm12, 4294967295, %v8400_v39  ;;  %vm6159_vm14 = vmand %vm8403_vm6, %vm1255_vm13  ;;  %1773 = vst [vmem:[#allocation1 + $0x2] ss:$4 sm:$0xff] %v1749_v20  ;;  %v805_v54 = vrot.slane %v5958_v14, 4  ;;  %vm8408_vm4 = vcmask 900096   ;;  %vm8263_vm13 = vcmask 777216  }
 0x102   : > { %8402 = vst [vmem:[#allocation10_spill] sm:$0xff] %v8401_v39  ;;  %v961_v35 = vsel %vm8406_vm8, %v6143_v32, %v949_v47  ;;  %vm8407_vm11 = vmmov %vm8406_vm8  ;;  %v788_v12 = vpop.permute.xlu0 %787  ;;  %v1000_v48 = vld [vmem:[#allocation3 + $0x18] sm:$0x44]  ;;  %v846_v20 = vld [vmem:[#allocation3] sm:$0x44] }
 0x103   : > { %v963_v62 = vsel %vm8407_vm11, %v949_v47, %v5948_v7  ;;  %v962_v53 = vsel %vm8408_vm4, %v4904_v55, %v961_v35  ;;  %vm8409_vm7 = vmmov %vm8408_vm4  ;;  %v806_v56 = vrot.slane %v788_v12, 4  ;;  %1792 = vrot.lane.b32.xlu1 %v1770_v16, %s5263_s28  ;;  %v849_v24 = vld [vmem:[#allocation3 + $0x8] sm:$0x44]  ;;  %v8415_v16 = vrot.slane %v6039_v57, 4 }
 0x104   : > { %v964_v27 = vsel %vm8409_vm7, %v4905_v37, %v963_v62  ;;  %vm8410_vm6 = vmmov %vm8406_vm8  ;;  %v998_v7 = vsel %vm5999_vm10, %v962_v53, %v997_v40  ;;  %v8411_v37 = vmov 0  ;;  %vm8417_vm7 = vcmask 908288  }
 0x105   : > { %v1232_v6 = vsel %vm8410_vm6, %v6141_v11, %v6131_v41  ;;  %v1001_v26 = vsel %vm5999_vm10, %v964_v27, %v1000_v48  ;;  %vm6182_vm11 = vmor %vm6159_vm14, %vm6152_vm12  ;;  %999 = vst [vmem:[#allocation3 + $0x10] sm:$0x44] %v998_v7  ;;  %v4908_v40 = vpop.permute.xlu1 %4907  ;;  %v8419_v53 = vunpack.i.l.bf16 %v6015_v23  ;;  %v1018_v7 = vld [vmem:[#allocation3 + $0x48] sm:$0x4]  ;;  %vm8420_vm14 = vcmask 900096  }
 0x106   : > { %v8412_v37 = vsel %vm6182_vm11, 4294967295, %v8411_v37  ;;  %vm8414_vm8 = vmmov %vm8410_vm6  ;;  %1002 = vst [vmem:[#allocation3 + $0x18] sm:$0x44] %v1001_v26  ;;  %4947 = vrot.lane.b32.xlu2 %v4946_v28, %s5262_s27  ;;  %v4910_v31 = vunpack.i.h.bf16 %v4908_v40  ;;  %v4909_v62 = vunpack.i.l.bf16 %v4908_v40 }
 0x107   : > { %8413 = vst [vmem:[#allocation11_spill] sm:$0xff] %v8412_v37  ;;  %v815_v55 = vsel %vm8414_vm8, %v805_v54, %v806_v56  ;;  %vm8416_vm4 = vmmov %vm8410_vm6  ;;  %v1233_v27 = vsel %vm8263_vm13, %v8419_v53, %v1232_v6  ;;  %v1270_v54 = vld [vmem:[#allocation3 + $0x20] sm:$0x88]  ;;  %v1882_v6 = vld [vmem:[#allocation1 + $0x38] sm:$0xff] }
 0x108   : > { %v818_v47 = vsel %vm8416_vm4, %v806_v56, %v8415_v16  ;;  %v817_v48 = vsel %vm8417_vm7, %v5958_v14, %v815_v55  ;;  %vm8418_vm6 = vmmov %vm8417_vm7  ;;  %v1271_v14 = vsel %vm6182_vm11, %v1233_v27, %v1270_v54  ;;  %v954_v28 = vrot.slane %v4909_v62, 4  ;;  %v6203_v26 = vpop.permute.xlu2 %1330  ;;  %1778 = vrot.lane.b32.xlu0 %v1756_v9, %s5263_s28  ;;  %v1881_v55 = vld [vmem:[#allocation1 + $0x30] sm:$0xff]  ;;  %v1015_v16 = vld [vmem:[#allocation3 + $0x40] sm:$0x44] }
 0x109   : > { %v819_v35 = vsel %vm8418_vm6, %v788_v12, %v818_v47  ;;  %v847_v57 = vsel %vm5791_vm0, %v817_v48, %v846_v20  ;;  %v955_v12 = vrot.slane %v4910_v31, 4  ;;  %1272 = vst [vmem:[#allocation3 + $0x20] sm:$0x88] %v1271_v14  ;;  %v1905_v47 = vshll.u32 %v1881_v55, 16  ;;  %vm8421_vm8 = vmmov %vm8416_vm4  ;;  %v1131_v53 = vld [vmem:[#allocation3 + $0x30] sm:$0x88] }
 0x10a   : > { %v850_v56 = vsel %vm5791_vm0, %v819_v35, %v849_v24  ;;  %848 = vst [vmem:[#allocation3] sm:$0x44] %v847_v57  ;;  %v1908_v20 = vshll.u32 %v1882_v6, 16  ;;  %v971_v40 = vsel %vm8421_vm8, %v6043_v30, %v954_v28  ;;  %v8259_v35 = vrot.slane %v6203_v26, 4  ;;  %v6211_v27 = vpop.permute.xlu0 %1066  ;;  %v1774_v9 = vld [vmem:[#allocation1] sm:$0xff]  ;;  %v6213_v54 = vld [vmem:[#allocation1 + $0x8] sm:$0xff]  ;;  %vm8423_vm7 = vmmov %vm8420_vm14 }
 0x10b   : > { %851 = vst [vmem:[#allocation3 + $0x8] sm:$0x44] %v850_v56  ;;  %v975_v24 = vsel %vm8420_vm14, %v4910_v31, %v955_v12  ;;  %v973_v48 = vsel %vm8416_vm4, %v954_v28, %v955_v12  ;;  %v1012_v57 = vld [vmem:[#allocation3 + $0x38] sm:$0x44]  ;;  %v8422_v14 = vunpack.i.h.bf16 %v6023_v58  ;;  %vm8424_vm6 = vmmov %vm8423_vm7  ;;  %v8261_v12 = vrot.slane %v6211_v27, 4  ;;  %1780 = vrot.lane.b32.xlu1 %v6135_v61, %s5263_s28 }
 0x10c   : > { %v974_v31 = vsel %vm8424_vm6, %v4909_v62, %v973_v48  ;;  %v1019_v30 = vsel %vm5963_vm9, %v975_v24, %v1018_v7  ;;  %1871 = vst [vmem:[#allocation1] ss:$4 sm:$0xff] %v5695_v34  ;;  %v1907_v55 = vrot.slane %v1905_v47, 6  ;;  %v1910_v6 = vrot.slane %v1908_v20, 6  ;;  %v1879_v62 = vld [vmem:[#allocation1 + $0x20] sm:$0xff]  ;;  %vm8426_vm14 = vmmov %vm8416_vm4 }
 0x10d   : > { %v972_v56 = vsel %vm8423_vm7, %v8422_v14, %v971_v40  ;;  %v1016_v58 = vsel %vm5999_vm10, %v974_v31, %v1015_v16  ;;  %1020 = vst [vmem:[#allocation3 + $0x48] sm:$0x4] %v1019_v30  ;;  %v1880_v40 = vld [vmem:[#allocation1 + $0x28] sm:$0xff]  ;;  %v8425_v7 = vrot.slane %v5902_v29, 4  ;;  %v6234_v24 = vpop.permute.xlu1 %1328  ;;  %vm8427_vm8 = vcmask 785408   ;;  %vm8428_vm7 = vmmov %vm8426_vm14 }
 0x10e   : > { %v1013_v28 = vsel %vm5999_vm10, %v972_v56, %v1012_v57  ;;  %1017 = vst [vmem:[#allocation3 + $0x40] sm:$0x44] %v1016_v58  ;;  %1782 = vrot.lane.b32.xlu2 %v6137_v13, %s5263_s28  ;;  %vm8262_vm4 = vcmask 769024   ;;  %v8260_v16 = vrot.slane %v6234_v24, 4  ;;  %v1393_v20 = vld [vmem:[#allocation3 + $0x74] sm:$0x11]  ;;  %v4956_v57 = vpack.i.bf16 %v1910_v6, %v1907_v55  ;;  %vm8435_vm13 = vmmov %vm8428_vm7 }
 0x10f   : > { %1014 = vst [vmem:[#allocation3 + $0x38] sm:$0x44] %v1013_v28  ;;  %v1095_v61 = vsel %vm8426_vm14, %v8425_v7, %v8261_v12  ;;  %v1122_v56 = vld [vmem:[#allocation3 + $0x18] sm:$0x88]  ;;  %vm8429_vm6 = vnez %v8311_v63  ;;  %v1899_v6 = vshll.u32 %v1879_v62, 16  ;;  %v1902_v7 = vshll.u32 %v1880_v40, 16  ;;  %vm8431_vm14 = vmmov %vm8428_vm7 }
 0x110   : > { %v1096_v48 = vsel %vm8427_vm8, %v5902_v29, %v1095_v61  ;;  %2014 = vst [vmem:[#allocation1 + $0x23] ss:$4 sm:$0xff] %v6127_v15  ;;  %v1359_v29 = vsel %vm8428_vm7, %v8260_v16, %v8259_v35  ;;  %v1059_v14 = vpop.permute.xlu2 %1058  ;;  %1784 = vrot.lane.b32.xlu0 %v6148_v59, %s5263_s28  ;;  %v1869_v31 = vld [vmem:[#allocation2 + $0x12] sm:$0xf]  ;;  %v2363_v37 = vld [vmem:[#allocation3 + $0xb0] sm:$0x11] }
 0x111   : > { %v1132_v47 = vsel %vm5921_vm5, %v1096_v48, %v1131_v53  ;;  %v1360_v13 = vsel %vm8262_vm4, %v6234_v24, %v1359_v29  ;;  %v1075_v53 = vrot.slane %v1059_v14, 4  ;;  %v8430_v48 = vrot.slane %v6106_v43, 4 }
 0x112   : > { %1133 = vst [vmem:[#allocation3 + $0x30] sm:$0x88] %v1132_v47  ;;  %v1394_v30 = vsel %vm8429_vm6, %v1360_v13, %v1393_v20  ;;  %v4893_v28 = vpop.permute.xlu0 %4892 }
 0x113   : > { %v1875_v58 = vld [vmem:[#allocation1] sm:$0xff]  ;;  %v1876_v55 = vld [vmem:[#allocation1 + $0x8] sm:$0xff]  ;;  %v6255_v61 = vld [vmem:[#allocation1 + $0x10] sm:$0xff]  ;;  %1395 = vst [vmem:[#allocation3 + $0x74] sm:$0x11] %v1394_v30  ;;  %v1089_v59 = vsel %vm8431_vm14, %v1075_v53, %v8430_v48  ;;  %v4895_v47 = vunpack.i.h.bf16 %v4893_v28  ;;  %v4894_v29 = vunpack.i.l.bf16 %v4893_v28  ;;  %4957 = vrot.lane.b32.xlu1 %v4956_v57, %s5264_s29  ;;  %v1438_v48 = vshll.u32 %v5519_v45, 16 }
 0x114   : > { %v1887_v35 = vshll.u32 %v1875_v58, 16  ;;  %v1878_v16 = vld [vmem:[#allocation1 + $0x18] sm:$0xff]  ;;  %v1090_v20 = vsel %vm8427_vm8, %v1059_v14, %v1089_v59  ;;  %v1890_v13 = vshll.u32 %v1876_v55, 16  ;;  %vm8432_vm14 = vmmov %vm8428_vm7  ;;  %v1119_v58 = vld [vmem:[#allocation3 + $0x10] sm:$0x88]  ;;  %v1904_v55 = vrot.slane %v1902_v7, 6 }
 0x115   : > { %1884 = vst [vmem:[#allocation1] ss:$4 sm:$0xff] %v1869_v31  ;;  %v1123_v62 = vsel %vm5921_vm5, %v1090_v20, %v1122_v56  ;;  %v947_v40 = vrot.slane %v4895_v47, 4  ;;  %v946_v12 = vrot.slane %v4894_v29, 4  ;;  %v6264_v30 = vpop.permute.xlu1 %1056  ;;  %v1901_v56 = vrot.slane %v1899_v6, 6 }
 0x116   : > { %v1889_v43 = vrot.slane %v1887_v35, 6  ;;  %1124 = vst [vmem:[#allocation3 + $0x18] sm:$0x88] %v1123_v62  ;;  %1794 = vrot.lane.b32.xlu2 %v1774_v9, %s5263_s28  ;;  %v1074_v57 = vrot.slane %v6264_v30, 4  ;;  %v1892_v28 = vrot.slane %v1890_v13, 6  ;;  %vm8433_vm8 = vcmask 900096  }
 0x117   : > { %v956_v14 = vsel %vm8428_vm7, %v946_v12, %v947_v40  ;;  %v959_v31 = vsel %vm8432_vm14, %v947_v40, %v6143_v32  ;;  %vm8434_vm4 = vmmov %vm8433_vm8  ;;  %v991_v20 = vld [vmem:[#allocation3] sm:$0x44]  ;;  %v994_v45 = vld [vmem:[#allocation3 + $0x8] sm:$0x44]  ;;  %vm8436_vm7 = vcmask 785408  }
 0x118   : > { %v958_v59 = vsel %vm8433_vm8, %v4894_v29, %v956_v14  ;;  %v960_v35 = vsel %vm8434_vm4, %v4895_v47, %v959_v31  ;;  %v1087_v9 = vsel %vm8435_vm13, %v1074_v57, %v1075_v53  ;;  %v1071_v62 = vpop.permute.xlu2 %1070  ;;  %1796 = vrot.lane.b32.xlu0 %v6213_v54, %s5263_s28  ;;  %v4961_v12 = vpack.i.bf16 %v1892_v28, %v1889_v43  ;;  %v1140_v47 = vld [vmem:[#allocation3 + $0x48] sm:$0x8]  ;;  %vm8437_vm13 = vmmov %vm8436_vm7 }
 0x119   : > { %v992_v32 = vsel %vm5999_vm10, %v958_v59, %v991_v20  ;;  %v995_v6 = vsel %vm5999_vm10, %v960_v35, %v994_v45  ;;  %v1088_v7 = vsel %vm8436_vm7, %v6264_v30, %v1087_v9  ;;  %v1081_v29 = vrot.slane %v1071_v62, 4  ;;  %v2025_v35 = vld [vmem:[#allocation1 + $0x28] sm:$0xff]  ;;  %v1134_v9 = vld [vmem:[#allocation3 + $0x38] sm:$0x88]  ;;  %vm8438_vm4 = vmmov %vm8432_vm14 }
 0x11a   : > { %v1473_v13 = vld [vmem:[#allocation3 + $0x74] sm:$0x11]  ;;  %993 = vst [vmem:[#allocation3] sm:$0x44] %v992_v32  ;;  %v1120_v53 = vsel %vm5921_vm5, %v1088_v7, %v1119_v58  ;;  %v6287_v40 = vpop.permute.xlu0 %4897  ;;  %v1893_v54 = vshll.u32 %v6255_v61, 16  ;;  %v1896_v43 = vshll.u32 %v1878_v16, 16  ;;  %v4951_v20 = vpack.i.bf16 %v1904_v55, %v1901_v56  ;;  %vm8439_vm14 = vmmov %vm8438_vm4 }
 0x11b   : > { %v1474_v28 = vsel %vm5580_vm3, %v1438_v48, %v1473_v13  ;;  %996 = vst [vmem:[#allocation3 + $0x8] sm:$0x44] %v995_v6  ;;  %v1101_v14 = vsel %vm8437_vm13, %v1071_v62, %v1081_v29  ;;  %v4900_v31 = vunpack.i.h.bf16 %v6287_v40  ;;  %v4899_v59 = vunpack.i.l.bf16 %v6287_v40  ;;  %4962 = vrot.lane.b32.xlu1 %v4961_v12, %s5264_s29  ;;  %v1137_v55 = vld [vmem:[#allocation3 + $0x40] sm:$0x88]  ;;  %vm8444_vm13 = vmmov %vm8438_vm4 }
 0x11c   : > { %1475 = vst [vmem:[#allocation3 + $0x74] sm:$0x11] %v1474_v28  ;;  %v1141_v58 = vsel %vm5330_vm15, %v1101_v14, %v1140_v47  ;;  %v1885_v61 = vld [vmem:[#allocation1] sm:$0xff]  ;;  %v1886_v16 = vld [vmem:[#allocation1 + $0x8] sm:$0xff]  ;;  %v1895_v32 = vrot.slane %v1893_v54, 6  ;;  %v1898_v6 = vrot.slane %v1896_v43, 6  ;;  %v8440_v13 = vunpack.i.h.bf16 %v6015_v23 }
 0x11d   : > { %1121 = vst [vmem:[#allocation3 + $0x10] sm:$0x88] %v1120_v53  ;;  %v6300_v48 = vrot.slane %v4900_v31, 4  ;;  %v1219_v45 = vrot.slane %v4899_v59, 4  ;;  %v1069_v62 = vpop.permute.xlu1 %1068  ;;  %v1911_v47 = vshll.u32 %v1885_v61, 16  ;;  %vm8441_vm8 = vcmask 777216  }
 0x11e   : > { %1142 = vst [vmem:[#allocation3 + $0x48] sm:$0x8] %v1141_v58  ;;  %2047 = vrot.lane.b32.xlu2 %v2025_v35, %s5266_s5  ;;  %v1080_v12 = vrot.slane %v1069_v62, 4  ;;  %vm8442_vm7 = vmmov %vm8441_vm8  ;;  %v1273_v14 = vld [vmem:[#allocation3 + $0x28] sm:$0x88]  ;;  %v8443_v54 = vrot.slane %v6211_v27, 4 }
 0x11f   : > { %v1234_v7 = vsel %vm8438_vm4, %v6131_v41, %v1219_v45  ;;  %v1236_v56 = vsel %vm8439_vm14, %v1219_v45, %v6300_v48  ;;  %2011 = vst [vmem:[#allocation1 + $0x3] ss:$4 sm:$0xff] %v5695_v34  ;;  %v1276_v35 = vld [vmem:[#allocation3 + $0x30] sm:$0x88]  ;;  %v2023_v45 = vld [vmem:[#allocation1 + $0x20] sm:$0xff]  ;;  %vm8445_vm14 = vcmask 785408  }
 0x120   : > { %v1235_v53 = vsel %vm8441_vm8, %v8440_v13, %v1234_v7  ;;  %v1237_v28 = vsel %vm8442_vm7, %v4899_v59, %v1236_v56  ;;  %v1097_v43 = vsel %vm8444_vm13, %v8443_v54, %v1080_v12  ;;  %v1099_v41 = vsel %vm8438_vm4, %v1080_v12, %v1081_v29  ;;  %v6316_v58 = vpop.permute.xlu2 %1529  ;;  %4952 = vrot.lane.b32.xlu0 %v4951_v20, %s5264_s29  ;;  %vm8446_vm8 = vmmov %vm8445_vm14 }
 0x121   : > { %v1274_v23 = vsel %vm6182_vm11, %v1235_v53, %v1273_v14  ;;  %v1277_v61 = vsel %vm6182_vm11, %v1237_v28, %v1276_v35  ;;  %v1098_v59 = vsel %vm8445_vm14, %v6211_v27, %v1097_v43  ;;  %v1100_v7 = vsel %vm8446_vm8, %v1069_v62, %v1099_v41  ;;  %v1113_v14 = vld [vmem:[#allocation3] sm:$0x88]  ;;  %v1116_v62 = vld [vmem:[#allocation3 + $0x8] sm:$0x88]  ;;  %vm8447_vm7 = vmmov %vm8438_vm4 }
 0x122   : > { %1275 = vst [vmem:[#allocation3 + $0x28] sm:$0x88] %v1274_v23  ;;  %v1135_v29 = vsel %vm5921_vm5, %v1098_v59, %v1134_v9  ;;  %v1138_v12 = vsel %vm5921_vm5, %v1100_v7, %v1137_v55  ;;  %v1055_v20 = vpop.permute.xlu0 %1054  ;;  %v4966_v56 = vpack.i.bf16 %v1898_v6, %v1895_v32  ;;  %v1914_v13 = vshll.u32 %v1886_v16, 16  ;;  %vm8448_vm13 = vmmov %vm8438_vm4  ;;  %v2008_v16 = vld [vmem:[#allocation2 + $0x12] sm:$0xf] }
 0x123   : > { %v1072_v53 = vrot.slane %v6145_v52, 4  ;;  %1278 = vst [vmem:[#allocation3 + $0x30] sm:$0x88] %v1277_v61  ;;  %v1073_v28 = vrot.slane %v1055_v20, 4  ;;  %2045 = vrot.lane.b32.xlu1 %v2023_v45, %s5266_s5  ;;  %v8267_v27 = vrot.slane %v6316_v58, 4  ;;  %v1913_v6 = vrot.slane %v1911_v47, 6  ;;  %vm8449_vm4 = vmmov %vm8446_vm8 }
 0x124   : > { %1136 = vst [vmem:[#allocation3 + $0x38] sm:$0x88] %v1135_v29  ;;  %vm8450_vm14 = vmmov %vm8449_vm4  ;;  %v1590_v43 = vld [vmem:[#allocation3 + $0x6c] sm:$0x22]  ;;  %v1916_v23 = vrot.slane %v1914_v13, 6 }
 0x125   : > { %1139 = vst [vmem:[#allocation3 + $0x40] sm:$0x88] %v1138_v12  ;;  %v1082_v9 = vsel %vm8447_vm7, %v1072_v53, %v1073_v28  ;;  %v1085_v55 = vsel %vm8448_vm13, %v1073_v28, %v1074_v57  ;;  %v6337_v32 = vpop.permute.xlu1 %1527  ;;  %vm8451_vm8 = vmmov %vm8447_vm7  ;;  %vm8452_vm7 = vcmask 1039360   ;;  %vm8453_vm13 = vnez %v8321_v33  ;;  %v6360_v13 = vld [vmem:[#allocation1 + $0x30] sm:$0xff]  ;;  %v2029_v28 = vld [vmem:[#allocation1 + $0x38] sm:$0xff] }
 0x126   : > { %v1084_v35 = vsel %vm8449_vm4, %v6145_v52, %v1082_v9  ;;  %v1086_v54 = vsel %vm8450_vm14, %v1055_v20, %v1085_v55  ;;  %4967 = vrot.lane.b32.xlu2 %v4966_v56, %s5264_s29  ;;  %v8266_v41 = vrot.slane %v6337_v32, 4  ;;  %v2015_v45 = vld [vmem:[#allocation1] sm:$0xff]  ;;  %v2017_v61 = vld [vmem:[#allocation1 + $0x8] sm:$0xff]  ;;  %v2019_v47 = vld [vmem:[#allocation1 + $0x10] sm:$0xff]  ;;  %v4971_v56 = vpack.i.bf16 %v1916_v23, %v1913_v6  ;;  %2133 = vst [vmem:[#allocation1 + $0x20] ss:$4 sm:$0xff] %v6127_v15 }
 0x127   : > { %v1114_v30 = vsel %vm5921_vm5, %v1084_v35, %v1113_v14  ;;  %v1117_v57 = vsel %vm5921_vm5, %v1086_v54, %v1116_v62  ;;  %v2021_v59 = vld [vmem:[#allocation1 + $0x18] sm:$0xff]  ;;  %v1390_v14 = vld [vmem:[#allocation3 + $0x6c] sm:$0x11]  ;;  %v8454_v62 = vrot.slane %v6234_v24, 4  ;;  %vm8455_vm4 = vmmov %vm8451_vm8  ;;  %vm8456_vm14 = vcmask 769024  }
 0x128   : > { %1115 = vst [vmem:[#allocation3] sm:$0x88] %v1114_v30  ;;  %v1557_v52 = vsel %vm8451_vm8, %v8266_v41, %v8267_v27  ;;  %v6353_v7 = vpop.permute.xlu2 %1318  ;;  %2037 = vrot.lane.b32.xlu0 %v2015_v45, %s5266_s5  ;;  %vm8457_vm8 = vmmov %vm8455_vm4 }
 0x129   : > { %1118 = vst [vmem:[#allocation3 + $0x8] sm:$0x88] %v1117_v57  ;;  %v1558_v29 = vsel %vm8452_vm7, %v6337_v32, %v1557_v52  ;;  %vm8458_vm7 = vmmov %vm8455_vm4 }
 0x12a   : > { %v1591_v12 = vsel %vm8453_vm13, %v1558_v29, %v1590_v43  ;;  %2032 = vst [vmem:[#allocation1 + $0x3] ss:$4 sm:$0xff] %v2008_v16  ;;  %v1327_v20 = vpop.permute.xlu0 %1326  ;;  %vm8461_vm15 = vmmov %vm8458_vm7 }
 0x12b   : > { %1592 = vst [vmem:[#allocation3 + $0x6c] sm:$0x22] %v1591_v12  ;;  %v1342_v53 = vrot.slane %v1327_v20, 4  ;;  %2039 = vrot.lane.b32.xlu1 %v2017_v61, %s5266_s5  ;;  %v1436_v61 = vshll.u32 %v5517_v49, 16  ;;  %v1387_v12 = vld [vmem:[#allocation3 + $0x64] sm:$0x11] }
 0x12d   : > { %v1357_v9 = vsel %vm8455_vm4, %v1342_v53, %v8454_v62  ;;  %v4918_v55 = vpop.permute.xlu1 %4917  ;;  %vm8459_vm4 = vcmask 777216   ;;  %v1267_v62 = vld [vmem:[#allocation3 + $0x18] sm:$0x88] }
 0x12e   : > { %v1358_v35 = vsel %vm8456_vm14, %v1327_v20, %v1357_v9  ;;  %4972 = vrot.lane.b32.xlu2 %v4971_v56, %s5264_s29  ;;  %v4920_v16 = vunpack.i.h.bf16 %v4918_v55  ;;  %v4919_v6 = vunpack.i.l.bf16 %v4918_v55  ;;  %vm8460_vm14 = vmmov %vm8459_vm4 }
 0x12f   : > { %v1391_v54 = vsel %vm8429_vm6, %v1358_v35, %v1390_v14  ;;  %v1264_v14 = vld [vmem:[#allocation3 + $0x10] sm:$0x88] }
 0x130   : > { %1392 = vst [vmem:[#allocation3 + $0x6c] sm:$0x11] %v1391_v54  ;;  %v1216_v43 = vrot.slane %v4920_v16, 4  ;;  %v1215_v45 = vrot.slane %v4919_v6, 4  ;;  %v6371_v23 = vpop.permute.xlu2 %1324  ;;  %2043 = vrot.lane.b32.xlu0 %v2021_v59, %s5266_s5  ;;  %v6398_v54 = vld [vmem:[#allocation1 + $0x38] sm:$0xff] }
 0x131   : > { %v6374_v24 = vld [vmem:[#allocation1] sm:$0xff]  ;;  %v6376_v30 = vld [vmem:[#allocation1 + $0x8] sm:$0xff]  ;;  %v8268_v57 = vrot.slane %v6371_v23, 4 }
 0x132   : > { %2130 = vst [vmem:[#allocation1] ss:$4 sm:$0xff] %v5695_v34  ;;  %v1228_v52 = vsel %vm8457_vm8, %v1215_v45, %v1216_v43  ;;  %v1230_v29 = vsel %vm8458_vm7, %v1216_v43, %v6141_v11  ;;  %v4913_v20 = vpop.permute.xlu0 %4912  ;;  %vm8462_vm8 = vcmask 769024   ;;  %v1261_v27 = vld [vmem:[#allocation3 + $0x8] sm:$0x88] }
 0x133   : > { %v1229_v56 = vsel %vm8459_vm4, %v4919_v6, %v1228_v52  ;;  %v1231_v59 = vsel %vm8460_vm14, %v4920_v16, %v1230_v29  ;;  %v1355_v9 = vsel %vm8461_vm15, %v8268_v57, %v1342_v53  ;;  %v4915_v55 = vunpack.i.h.bf16 %v4913_v20  ;;  %2051 = vrot.lane.b32.xlu1 %v2029_v28, %s5266_s5  ;;  %v6396_v16 = vld [vmem:[#allocation1 + $0x30] sm:$0xff]  ;;  %vm8463_vm15 = vmmov %vm8458_vm7 }
 0x134   : > { %v1265_v49 = vsel %vm6182_vm11, %v1229_v56, %v1264_v14  ;;  %v1268_v11 = vsel %vm6182_vm11, %v1231_v59, %v1267_v62  ;;  %v1356_v35 = vsel %vm8462_vm8, %v6371_v23, %v1355_v9  ;;  %v4914_v6 = vunpack.i.l.bf16 %v4913_v20  ;;  %v1285_v14 = vld [vmem:[#allocation3 + $0x48] sm:$0x8]  ;;  %vm8464_vm14 = vmmov %vm8459_vm4 }
 0x135   : > { %1266 = vst [vmem:[#allocation3 + $0x10] sm:$0x88] %v1265_v49  ;;  %v1434_v53 = vshll.u32 %v5779_v17, 16  ;;  %v1388_v28 = vsel %vm8429_vm6, %v1356_v35, %v1387_v12  ;;  %v1214_v43 = vrot.slane %v4915_v55, 4  ;;  %v4923_v52 = vpop.permute.xlu1 %4922  ;;  %v1405_v49 = vld [vmem:[#allocation3 + $0x94] sm:$0x1]  ;;  %vm8465_vm8 = vmmov %vm8459_vm4 }
 0x136   : > { %1269 = vst [vmem:[#allocation3 + $0x18] sm:$0x88] %v1268_v11  ;;  %v1213_v29 = vrot.slane %v4914_v6, 4  ;;  %2041 = vrot.lane.b32.xlu2 %v2019_v47, %s5266_s5  ;;  %v4925_v56 = vunpack.i.h.bf16 %v4923_v52  ;;  %v4924_v59 = vunpack.i.l.bf16 %v4923_v52  ;;  %v2164_v41 = vshll.u32 %v6396_v16, 16  ;;  %v1258_v52 = vld [vmem:[#allocation3] sm:$0x88] }
 0x137   : > { %v1470_v62 = vld [vmem:[#allocation3 + $0x6c] sm:$0x11]  ;;  %1389 = vst [vmem:[#allocation3 + $0x64] sm:$0x11] %v1388_v28  ;;  %v1226_v9 = vsel %vm8463_vm15, %v1214_v43, %v1215_v45  ;;  %vm8466_vm15 = vmmov %vm8458_vm7  ;;  %v1381_v16 = vld [vmem:[#allocation3 + $0x54] sm:$0x11] }
 0x138   : > { %v1471_v11 = vsel %vm5580_vm3, %v1436_v61, %v1470_v62  ;;  %v1223_v35 = vsel %vm8458_vm7, %v1213_v29, %v1214_v43  ;;  %v1227_v47 = vsel %vm8459_vm4, %v4915_v55, %v1226_v9  ;;  %v1222_v57 = vrot.slane %v4925_v56, 4  ;;  %v6412_v20 = vpop.permute.xlu2 %1336  ;;  %2049 = vrot.lane.b32.xlu0 %v6360_v13, %s5266_s5 }
 0x139   : > { %1472 = vst [vmem:[#allocation3 + $0x6c] sm:$0x11] %v1471_v11  ;;  %v1225_v45 = vsel %vm8464_vm14, %v4914_v6, %v1223_v35  ;;  %v1262_v28 = vsel %vm6182_vm11, %v1227_v47, %v1261_v27  ;;  %v1221_v12 = vrot.slane %v4924_v59, 4  ;;  %v1347_v61 = vrot.slane %v6412_v20, 4  ;;  %v2134_v43 = vld [vmem:[#allocation1] sm:$0xff]  ;;  %v2135_v29 = vld [vmem:[#allocation1 + $0x8] sm:$0xff]  ;;  %vm8468_vm14 = vmmov %vm8465_vm8 }
 0x13a   : > { %v1259_v55 = vsel %vm6182_vm11, %v1225_v45, %v1258_v52  ;;  %1263 = vst [vmem:[#allocation3 + $0x8] sm:$0x88] %v1262_v28  ;;  %v1242_v62 = vsel %vm8465_vm8, %v4925_v56, %v1222_v57  ;;  %v6423_v9 = vpop.permute.xlu0 %1332  ;;  %v2146_v13 = vshll.u32 %v2134_v43, 16  ;;  %v2149_v11 = vshll.u32 %v2135_v29, 16  ;;  %v1279_v6 = vld [vmem:[#allocation3 + $0x38] sm:$0x88] }
 0x13b   : > { %1260 = vst [vmem:[#allocation3] sm:$0x88] %v1259_v55  ;;  %v1238_v27 = vsel %vm8466_vm15, %v6300_v48, %v1221_v12  ;;  %v1240_v35 = vsel %vm8458_vm7, %v1221_v12, %v1222_v57  ;;  %v1286_v47 = vsel %vm6152_vm12, %v1242_v62, %v1285_v14  ;;  %vm8467_vm4 = vcmask 769024   ;;  %v1396_v56 = vld [vmem:[#allocation3 + $0x7c] sm:$0x11] }
 0x13c   : > { %v1367_v52 = vsel %vm8467_vm4, %v6412_v20, %v1347_v61  ;;  %v1239_v45 = vsel %vm8468_vm14, %v4900_v31, %v1238_v27  ;;  %v1241_v28 = vsel %vm8465_vm8, %v4924_v59, %v1240_v35  ;;  %v1282_v43 = vld [vmem:[#allocation3 + $0x40] sm:$0x88]  ;;  %1287 = vst [vmem:[#allocation3 + $0x48] sm:$0x8] %v1286_v47  ;;  %vm8469_vm15 = vnez %v8294_v0  ;;  %v2128_v62 = vld [vmem:[#allocation2 + $0x12] sm:$0xf]  ;;  %vm8472_vm14 = vmmov %vm8458_vm7 }
 0x13d   : > { %v1406_v48 = vsel %vm8469_vm15, %v1367_v52, %v1405_v49  ;;  %v1345_v57 = vrot.slane %v6423_v9, 4  ;;  %v2138_v14 = vld [vmem:[#allocation1 + $0x20] sm:$0xff]  ;;  %v1280_v12 = vsel %vm6182_vm11, %v1239_v45, %v1279_v6  ;;  %v1283_v29 = vsel %vm6182_vm11, %v1241_v28, %v1282_v43  ;;  %v1323_v31 = vpop.permute.xlu1 %1322  ;;  %v2136_v59 = vld [vmem:[#allocation1 + $0x10] sm:$0xff]  ;;  %v2137_v27 = vld [vmem:[#allocation1 + $0x18] sm:$0xff] }
 0x13e   : > { %1407 = vst [vmem:[#allocation3 + $0x94] sm:$0x1] %v1406_v48  ;;  %v2148_v40 = vrot.slane %v2146_v13, 5  ;;  %v2151_v55 = vrot.slane %v2149_v11, 5  ;;  %v1467_v35 = vld [vmem:[#allocation3 + $0x64] sm:$0x11]  ;;  %2053 = vrot.lane.b32.xlu2 %v6374_v24, %s5266_s5  ;;  %vm8473_vm8 = vmmov %vm8467_vm4 }
 0x13f   : > { %1281 = vst [vmem:[#allocation3 + $0x38] sm:$0x88] %v1280_v12  ;;  %v8470_v49 = vrot.slane %v6203_v26, 4  ;;  %v1340_v6 = vrot.slane %v1323_v31, 4  ;;  %v2152_v52 = vshll.u32 %v2136_v59, 16  ;;  %v1468_v13 = vsel %vm5580_vm3, %v1434_v53, %v1467_v35  ;;  %v2139_v48 = vld [vmem:[#allocation1 + $0x28] sm:$0xff]  ;;  %vm8479_vm15 = vmmov %vm8473_vm8 }
 0x140   : > { %1284 = vst [vmem:[#allocation3 + $0x40] sm:$0x88] %v1283_v29  ;;  %v4981_v45 = vpack.i.bf16 %v2151_v55, %v2148_v40  ;;  %v1384_v28 = vld [vmem:[#allocation3 + $0x5c] sm:$0x11]  ;;  %v2155_v43 = vshll.u32 %v2137_v27, 16  ;;  %v8471_v24 = vrot.slane %v6371_v23, 4  ;;  %v6463_v17 = vpop.permute.xlu2 %1788  ;;  %2055 = vrot.lane.b32.xlu0 %v6376_v30, %s5266_s5 }
 0x141   : > { %v1361_v47 = vsel %vm8458_vm7, %v8470_v49, %v1345_v57  ;;  %1469 = vst [vmem:[#allocation3 + $0x64] sm:$0x11] %v1468_v13  ;;  %v2154_v53 = vrot.slane %v2152_v52, 5  ;;  %v2158_v55 = vshll.u32 %v2138_v14, 16  ;;  %v1338_v27 = vrot.slane %v6353_v7, 4 }
 0x142   : > { %v1362_v11 = vsel %vm8467_vm4, %v6203_v26, %v1361_v47  ;;  %v1353_v59 = vsel %vm8472_vm14, %v1340_v6, %v8471_v24  ;;  %v2166_v26 = vrot.slane %v2164_v41, 5  ;;  %4982 = vrot.lane.b32.xlu1 %v4981_v45, %s5265_s30  ;;  %v2157_v23 = vrot.slane %v2155_v43, 5  ;;  %v1378_v30 = vld [vmem:[#allocation3 + $0x4c] sm:$0x11]  ;;  %v1321_v49 = vpop.permute.xlu0 %1320  ;;  %2143 = vst [vmem:[#allocation1] ss:$4 sm:$0xff] %v2128_v62  ;;  %vm8477_vm4 = vmmov %vm8472_vm14 }
 0x143   : > { %v1397_v12 = vsel %vm8429_vm6, %v1362_v11, %v1396_v56  ;;  %v1354_v29 = vsel %vm8473_vm8, %v1323_v31, %v1353_v59  ;;  %v8474_v56 = vshll.u32 %v6398_v54, 16  ;;  %v2161_v41 = vshll.u32 %v2139_v48, 16  ;;  %2272 = vst [vmem:[#allocation1 + $0x20] ss:$4 sm:$0xff] %v6127_v15  ;;  %vm8478_vm14 = vmmov %vm8477_vm4 }
 0x144   : > { %1398 = vst [vmem:[#allocation3 + $0x7c] sm:$0x11] %v1397_v12  ;;  %v1385_v35 = vsel %vm8429_vm6, %v1354_v29, %v1384_v28  ;;  %v1339_v47 = vrot.slane %v1321_v49, 4  ;;  %v4991_v52 = vpack.i.bf16 %v2157_v23, %v2154_v53  ;;  %v2160_v13 = vrot.slane %v2158_v55, 5 }
 0x145   : > { %v2169_v40 = vrot.slane %v8474_v56, 5  ;;  %1386 = vst [vmem:[#allocation3 + $0x5c] sm:$0x11] %v1385_v35  ;;  %v1485_v31 = vld [vmem:[#allocation3 + $0x94] sm:$0x1]  ;;  %v1440_v54 = vshll.u32 %v5521_v18, 16  ;;  %vm8476_vm7 = vnez %v8317_v22  ;;  %v1335_v48 = vpop.permute.xlu1 %1334 }
 0x146   : > { %v2163_v11 = vrot.slane %v2161_v41, 5  ;;  %v8475_v14 = vshll.u32 %v5849_v46, 16  ;;  %v1348_v28 = vsel %vm8477_vm4, %v1338_v27, %v1339_v47  ;;  %v1351_v62 = vsel %vm8478_vm14, %v1339_v47, %v1340_v6  ;;  %4992 = vrot.lane.b32.xlu2 %v4991_v52, %s5265_s30  ;;  %v1402_v56 = vld [vmem:[#allocation3 + $0x8c] sm:$0x11]  ;;  %vm8481_vm14 = vmmov %vm8473_vm8 }
 0x147   : > { %v4986_v43 = vpack.i.bf16 %v2169_v40, %v2166_v26  ;;  %v1350_v12 = vsel %vm8473_vm8, %v6353_v7, %v1348_v28  ;;  %v1352_v18 = vsel %vm8479_vm15, %v1321_v49, %v1351_v62  ;;  %v1346_v24 = vrot.slane %v1335_v48, 4  ;;  %v1399_v26 = vld [vmem:[#allocation3 + $0x84] sm:$0x11]  ;;  %vm8480_vm15 = vmmov %vm8477_vm4 }
 0x148   : > { %v1486_v45 = vsel %vm8476_vm7, %v8475_v14, %v1485_v31  ;;  %v4976_v59 = vpack.i.bf16 %v2163_v11, %v2160_v13  ;;  %v1432_v46 = vshll.u32 %v5775_v60, 16  ;;  %v1379_v53 = vsel %vm8429_vm6, %v1350_v12, %v1378_v30  ;;  %v6499_v23 = vpop.permute.xlu2 %1523  ;;  %v1593_v30 = vld [vmem:[#allocation3 + $0x74] sm:$0x22] }
 0x149   : > { %1487 = vst [vmem:[#allocation3 + $0x94] sm:$0x1] %v1486_v45  ;;  %v1382_v6 = vsel %vm8429_vm6, %v1352_v18, %v1381_v16  ;;  %v1363_v7 = vsel %vm8477_vm4, %v1345_v57, %v1346_v24  ;;  %v1365_v40 = vsel %vm8480_vm15, %v1346_v24, %v1347_v61  ;;  %v2144_v55 = vld [vmem:[#allocation1] sm:$0xff]  ;;  %v2145_v27 = vld [vmem:[#allocation1 + $0x8] sm:$0xff]  ;;  %v1428_v52 = vshll.u32 %v5771_v5, 16 }
 0x14a   : > { %1380 = vst [vmem:[#allocation3 + $0x4c] sm:$0x11] %v1379_v53  ;;  %4977 = vrot.lane.b32.xlu0 %v4976_v59, %s5265_s30  ;;  %4987 = vrot.lane.b32.xlu1 %v4986_v43, %s5265_s30  ;;  %v1364_v35 = vsel %vm8481_vm14, %v6423_v9, %v1363_v7  ;;  %v1366_v57 = vsel %vm8473_vm8, %v1335_v48, %v1365_v40  ;;  %v1532_v49 = vpop.permute.xlu0 %1531  ;;  %v2170_v41 = vshll.u32 %v2144_v55, 16  ;;  %v2173_v16 = vshll.u32 %v2145_v27, 16  ;;  %v6516_v31 = vld [vmem:[#allocation1 + $0x20] sm:$0xff]  ;;  %v6520_v45 = vld [vmem:[#allocation1 + $0x28] sm:$0xff]  ;;  %vm8484_vm14 = vmmov %vm8477_vm4 }
 0x14b   : > { %v1476_v29 = vld [vmem:[#allocation3 + $0x7c] sm:$0x11]  ;;  %1383 = vst [vmem:[#allocation3 + $0x54] sm:$0x11] %v1382_v6  ;;  %v1400_v61 = vsel %vm8429_vm6, %v1364_v35, %v1399_v26  ;;  %v1403_v9 = vsel %vm8429_vm6, %v1366_v57, %v1402_v56  ;;  %v1545_v13 = vrot.slane %v1532_v49, 4  ;;  %v6522_v28 = vld [vmem:[#allocation1 + $0x30] sm:$0xff] }
 0x14c   : > { %v1477_v60 = vsel %vm5580_vm3, %v1440_v54, %v1476_v29  ;;  %v1464_v20 = vld [vmem:[#allocation3 + $0x5c] sm:$0x11]  ;;  %2269 = vst [vmem:[#allocation1] ss:$4 sm:$0xff] %v5695_v34  ;;  %v2172_v11 = vrot.slane %v2170_v41, 5  ;;  %v2175_v14 = vrot.slane %v2173_v16, 5 }
 0x14d   : > { %1478 = vst [vmem:[#allocation3 + $0x7c] sm:$0x11] %v1477_v60  ;;  %v1465_v47 = vsel %vm5580_vm3, %v1432_v46, %v1464_v20  ;;  %v6518_v54 = vld [vmem:[#allocation1 + $0x38] sm:$0xff]  ;;  %v1430_v62 = vshll.u32 %v5773_v25, 16  ;;  %v8482_v5 = vrot.slane %v6316_v58, 4  ;;  %v1534_v48 = vpop.permute.xlu1 %1533  ;;  %vm8483_vm15 = vcmask 1039360  }
 0x14e   : > { %1466 = vst [vmem:[#allocation3 + $0x5c] sm:$0x11] %v1465_v47  ;;  %v4996_v18 = vpack.i.bf16 %v2175_v14, %v2172_v11  ;;  %v1546_v24 = vrot.slane %v1534_v48, 4  ;;  %v1596_v53 = vld [vmem:[#allocation3 + $0x7c] sm:$0x22]  ;;  %v1442_v7 = vshll.u32 %v5524_v19, 16  ;;  %vm8485_vm8 = vmmov %vm8483_vm15 }
 0x14f   : > { %1401 = vst [vmem:[#allocation3 + $0x84] sm:$0x11] %v1400_v61  ;;  %v1559_v43 = vsel %vm8477_vm4, %v8482_v5, %v1545_v13  ;;  %v1599_v40 = vld [vmem:[#allocation3 + $0x84] sm:$0x22]  ;;  %v1444_v55 = vshll.u32 %v5841_v38, 16  ;;  %vm8497_vm7 = vcmask 1039360  }
 0x150   : > { %1404 = vst [vmem:[#allocation3 + $0x8c] sm:$0x11] %v1403_v9  ;;  %v1560_v12 = vsel %vm8483_vm15, %v6316_v58, %v1559_v43  ;;  %4997 = vrot.lane.b32.xlu2 %v4996_v18, %s5265_s30  ;;  %v1561_v26 = vsel %vm8484_vm14, %v1545_v13, %v1546_v24  ;;  %v6537_v29 = vpop.permute.xlu2 %1535  ;;  %v2267_v58 = vld [vmem:[#allocation2 + $0x12] sm:$0xf]  ;;  %vm8486_vm15 = vmmov %vm8485_vm8 }
 0x151   : > { %v1458_v59 = vld [vmem:[#allocation3 + $0x4c] sm:$0x11]  ;;  %v1594_v46 = vsel %vm8453_vm13, %v1560_v12, %v1593_v30  ;;  %2391 = vst [vmem:[#allocation1 + $0x20] ss:$4 sm:$0xff] %v6127_v15  ;;  %v1562_v15 = vsel %vm8485_vm8, %v1532_v49, %v1561_v26  ;;  %v8271_v60 = vrot.slane %v6537_v29, 4  ;;  %vm8487_vm14 = vmmov %vm8477_vm4  ;;  %vm8488_vm8 = vcmask 1031168  }
 0x152   : > { %v1459_v25 = vsel %vm5580_vm3, %v1428_v52, %v1458_v59  ;;  %v1461_v6 = vld [vmem:[#allocation3 + $0x54] sm:$0x11]  ;;  %1595 = vst [vmem:[#allocation3 + $0x74] sm:$0x22] %v1594_v46  ;;  %v1597_v35 = vsel %vm8453_vm13, %v1562_v15, %v1596_v53  ;;  %v4928_v20 = vpop.permute.xlu0 %4927 }
 0x153   : > { %1460 = vst [vmem:[#allocation3 + $0x4c] sm:$0x11] %v1459_v25  ;;  %v1462_v56 = vsel %vm5580_vm3, %v1430_v62, %v1461_v6  ;;  %v2275_v27 = vld [vmem:[#allocation1 + $0x8] sm:$0xff]  ;;  %v2273_v57 = vld [vmem:[#allocation1] sm:$0xff]  ;;  %v2277_v61 = vld [vmem:[#allocation1 + $0x10] sm:$0xff]  ;;  %v1563_v19 = vsel %vm8477_vm4, %v1546_v24, %v8271_v60  ;;  %v4930_v30 = vunpack.i.h.bf16 %v4928_v20  ;;  %v4929_v49 = vunpack.i.l.bf16 %v4928_v20 }
 0x154   : > { %1463 = vst [vmem:[#allocation3 + $0x54] sm:$0x11] %v1462_v56  ;;  %2297 = vrot.lane.b32.xlu1 %v2275_v27, %s5267_s6  ;;  %2295 = vrot.lane.b32.xlu0 %v2273_v57, %s5267_s6  ;;  %v2279_v41 = vld [vmem:[#allocation1 + $0x18] sm:$0xff]  ;;  %v1564_v16 = vsel %vm8486_vm15, %v1534_v48, %v1563_v19  ;;  %v1729_v25 = vld [vmem:[#allocation3 + $0x6c] sm:$0x22]  ;;  %vm8489_vm15 = vmmov %vm8477_vm4  ;;  %v1541_v19 = vrot.slane %v6499_v23, 4 }
 0x155   : > { %1598 = vst [vmem:[#allocation3 + $0x7c] sm:$0x22] %v1597_v35  ;;  %v1600_v9 = vsel %vm8453_vm13, %v1564_v16, %v1599_v40  ;;  %v1683_v13 = vrot.slane %v4930_v30, 4  ;;  %v6557_v11 = vrot.slane %v4929_v49, 4  ;;  %v6559_v14 = vpop.permute.xlu1 %4932  ;;  %v6561_v62 = vld [vmem:[#allocation2 + $0xc] sm:$0xff]  ;;  %v8498_v60 = vrot.slane %v6337_v32, 4 }
 0x156   : > { %v1479_v38 = vld [vmem:[#allocation3 + $0x84] sm:$0x11]  ;;  %2290 = vst [vmem:[#allocation1] ss:$4 sm:$0xff] %v2267_v58  ;;  %v4935_v43 = vunpack.i.h.bf16 %v6559_v14  ;;  %v4934_v48 = vunpack.i.l.bf16 %v6559_v14 }
 0x157   : > { %v1480_v47 = vsel %vm5580_vm3, %v1442_v7, %v1479_v38  ;;  %v1482_v52 = vld [vmem:[#allocation3 + $0x8c] sm:$0x11]  ;;  %v1696_v59 = vsel %vm8487_vm14, %v6557_v11, %v1683_v13  ;;  %1601 = vst [vmem:[#allocation3 + $0x84] sm:$0x22] %v1600_v9  ;;  %vm8490_vm14 = vmmov %vm8488_vm8  ;;  %v1581_v9 = vld [vmem:[#allocation3 + $0x54] sm:$0x22] }
 0x158   : > { %1481 = vst [vmem:[#allocation3 + $0x84] sm:$0x11] %v1480_v47  ;;  %v1483_v5 = vsel %vm5580_vm3, %v1444_v55, %v1482_v52  ;;  %v6567_v12 = vld [vmem:[#allocation1 + $0x20] sm:$0xff]  ;;  %v6569_v18 = vld [vmem:[#allocation1 + $0x28] sm:$0xff]  ;;  %v6571_v24 = vld [vmem:[#allocation1 + $0x30] sm:$0xff]  ;;  %v1697_v53 = vsel %vm8488_vm8, %v4929_v49, %v1696_v59  ;;  %2299 = vrot.lane.b32.xlu2 %v2277_v61, %s5267_s6  ;;  %v6581_v6 = vrot.slane %v4935_v43, 4  ;;  %v6583_v58 = vpop.permute.xlu2 %4942 }
 0x159   : > { %1484 = vst [vmem:[#allocation3 + $0x8c] sm:$0x11] %v1483_v5  ;;  %v6575_v46 = vld [vmem:[#allocation1 + $0x38] sm:$0xff]  ;;  %v1684_v26 = vrot.slane %v4934_v48, 4  ;;  %v1730_v56 = vsel %vm5747_vm2, %v1697_v53, %v1729_v25  ;;  %v8270_v47 = vunpack.i.h.bf16 %v6583_v58  ;;  %v1578_v52 = vld [vmem:[#allocation3 + $0x4c] sm:$0x22] }
 0x15a   : > { %2521 = vst [vmem:[#allocation1 + $0x21] ss:$4 sm:$0xff] %v6561_v62  ;;  %v1520_v55 = vpop.permute.xlu0 %1519  ;;  %v1732_v57 = vld [vmem:[#allocation3 + $0x74] sm:$0x22] }
 0x15b   : > { %1731 = vst [vmem:[#allocation3 + $0x6c] sm:$0x22] %v1730_v56  ;;  %v1698_v15 = vsel %vm8477_vm4, %v1683_v13, %v1684_v26  ;;  %v1700_v40 = vsel %vm8489_vm15, %v1684_v26, %v6581_v6  ;;  %vm8491_vm15 = vmmov %vm8477_vm4  ;;  %v1849_v13 = vld [vmem:[#allocation3 + $0x6c] sm:$0x44] }
 0x15c   : > { %v1735_v7 = vld [vmem:[#allocation3 + $0x7c] sm:$0x22]  ;;  %2303 = vrot.lane.b32.xlu1 %v6516_v31, %s5267_s6  ;;  %v1699_v27 = vsel %vm8490_vm14, %v4930_v30, %v1698_v15  ;;  %v1701_v35 = vsel %vm8488_vm8, %v4934_v48, %v1700_v40  ;;  %2301 = vrot.lane.b32.xlu0 %v2279_v41, %s5267_s6  ;;  %v8272_v31 = vunpack.i.l.bf16 %v6583_v58  ;;  %v1539_v41 = vrot.slane %v1520_v55, 4 }
 0x15d   : > { %v6596_v20 = vld [vmem:[#allocation1] sm:$0xff]  ;;  %v6598_v61 = vld [vmem:[#allocation1 + $0x8] sm:$0xff]  ;;  %v1733_v49 = vsel %vm5747_vm2, %v1699_v27, %v1732_v57  ;;  %v1736_v38 = vsel %vm5747_vm2, %v1701_v35, %v1735_v7  ;;  %v1522_v30 = vpop.permute.xlu1 %1521  ;;  %vm8492_vm14 = vcmask 1039360   ;;  %v2386_v40 = vld [vmem:[#allocation2 + $0x12] sm:$0xf] }
 0x15e   : > { %2388 = vst [vmem:[#allocation1] ss:$4 sm:$0xff] %v5695_v34  ;;  %v1540_v16 = vrot.slane %v1522_v30, 4  ;;  %v6623_v26 = vrot.slane %v8272_v31, 4  ;;  %vm8493_vm8 = vmmov %vm8492_vm14  ;;  %v1738_v57 = vld [vmem:[#allocation3 + $0x84] sm:$0x22] }
 0x15f   : > { %1734 = vst [vmem:[#allocation3 + $0x74] sm:$0x22] %v1733_v49  ;;  %v1584_v49 = vld [vmem:[#allocation3 + $0x5c] sm:$0x22] }
 0x160   : > { %1737 = vst [vmem:[#allocation3 + $0x7c] sm:$0x22] %v1736_v38  ;;  %2305 = vrot.lane.b32.xlu2 %v6520_v45, %s5267_s6  ;;  %v1549_v5 = vsel %vm8477_vm4, %v1539_v41, %v1540_v16  ;;  %v1551_v34 = vsel %vm8491_vm15, %v1540_v16, %v1541_v19  ;;  %v6613_v48 = vpop.permute.xlu2 %4947  ;;  %vm8494_vm15 = vmmov %vm8477_vm4 }
 0x161   : > { %v6615_v59 = vld [vmem:[#allocation1 + $0x20] sm:$0xff]  ;;  %v6617_v53 = vld [vmem:[#allocation1 + $0x28] sm:$0xff]  ;;  %v6619_v25 = vld [vmem:[#allocation1 + $0x30] sm:$0xff]  ;;  %v1550_v56 = vsel %vm8492_vm14, %v1520_v55, %v1549_v5  ;;  %v1552_v45 = vsel %vm8493_vm8, %v1522_v30, %v1551_v34  ;;  %v8269_v7 = vunpack.i.l.bf16 %v6613_v48  ;;  %v1681_v55 = vrot.slane %v8270_v47, 4 }
 0x162   : > { %v6628_v15 = vld [vmem:[#allocation1 + $0x38] sm:$0xff]  ;;  %v1579_v27 = vsel %vm8453_vm13, %v1550_v56, %v1578_v52  ;;  %v1582_v35 = vsel %vm8453_vm13, %v1552_v45, %v1581_v9  ;;  %v1526_v38 = vpop.permute.xlu0 %1525  ;;  %v1587_v45 = vld [vmem:[#allocation3 + $0x64] sm:$0x22]  ;;  %vm8495_vm14 = vmmov %vm8477_vm4  ;;  %vm8496_vm8 = vcmask 1031168  }
 0x163   : > { %2581 = vst [vmem:[#allocation1 + $0x20] ss:$4 sm:$0xff] %v6561_v62  ;;  %v6641_v30 = vrot.slane %v8269_v7, 4  ;;  %v1542_v41 = vrot.slane %v1526_v38, 4  ;;  %v1692_v56 = vsel %vm8477_vm4, %v6623_v26, %v1681_v55 }
 0x164   : > { %2309 = vrot.lane.b32.xlu1 %v6518_v54, %s5267_s6  ;;  %1580 = vst [vmem:[#allocation3 + $0x4c] sm:$0x22] %v1579_v27  ;;  %2307 = vrot.lane.b32.xlu0 %v6522_v28, %s5267_s6 }
 0x165   : > { %v2392_v16 = vld [vmem:[#allocation1] sm:$0xff]  ;;  %1583 = vst [vmem:[#allocation3 + $0x54] sm:$0x22] %v1582_v35  ;;  %v2393_v52 = vld [vmem:[#allocation1 + $0x8] sm:$0xff]  ;;  %v2394_v5 = vld [vmem:[#allocation1 + $0x10] sm:$0xff]  ;;  %v1702_v54 = vsel %vm8494_vm15, %v6581_v6, %v6641_v30  ;;  %v1553_v27 = vsel %vm8495_vm14, %v1541_v19, %v1542_v41  ;;  %v6652_v28 = vpop.permute.xlu1 %1786  ;;  %v4950_v35 = vunpack.i.h.bf16 %v6613_v48  ;;  %v1555_v6 = vsel %vm8477_vm4, %v1542_v41, %v8498_v60 }
 0x166   : > { %v2395_v34 = vld [vmem:[#allocation1 + $0x18] sm:$0xff]  ;;  %v2404_v7 = vshll.u32 %v2392_v16, 16  ;;  %v1703_v47 = vsel %vm8496_vm8, %v4935_v43, %v1702_v54  ;;  %v1554_v9 = vsel %vm8497_vm7, %v6499_v23, %v1553_v27  ;;  %vm8499_vm15 = vmmov %vm8497_vm7  ;;  %v2406_v31 = vshll.u32 %v2393_v52, 16  ;;  %v6680_v52 = vld [vmem:[#allocation2 + $0x4] sm:$0xff] }
 0x167   : > { %2401 = vst [vmem:[#allocation1] ss:$4 sm:$0xff] %v2386_v40  ;;  %v1739_v19 = vsel %vm5747_vm2, %v1703_v47, %v1738_v57  ;;  %v1556_v16 = vsel %vm8499_vm15, %v1526_v38, %v1555_v6  ;;  %v1585_v40 = vsel %vm8453_vm13, %v1554_v9, %v1584_v49  ;;  %v8273_v32 = vrot.slane %v6652_v28, 4  ;;  %vm8500_vm7 = vmmov %vm8477_vm4 }
 0x168   : > { %1740 = vst [vmem:[#allocation3 + $0x84] sm:$0x22] %v1739_v19  ;;  %v1588_v14 = vsel %vm8453_vm13, %v1556_v16, %v1587_v45  ;;  %2311 = vrot.lane.b32.xlu2 %v6596_v20, %s5267_s6  ;;  %v6673_v23 = vpop.permute.xlu2 %1782  ;;  %v2408_v60 = vshll.u32 %v2394_v5, 16  ;;  %v2410_v43 = vshll.u32 %v2395_v34, 16  ;;  %v5001_v47 = vpack.i.bf16 %v2406_v31, %v2404_v7  ;;  %vm8502_vm14 = vmmov %vm8477_vm4 }
 0x169   : > { %1586 = vst [vmem:[#allocation3 + $0x5c] sm:$0x22] %v1585_v40  ;;  %v2418_v57 = vshll.u32 %v6575_v46, 16  ;;  %v1694_v20 = vsel %vm8500_vm7, %v1681_v55, %v6557_v11  ;;  %v8501_v9 = vrot.slane %v6463_v17, 4  ;;  %v2412_v46 = vshll.u32 %v6567_v12, 16  ;;  %vm8506_vm15 = vmmov %vm8500_vm7 }
 0x16a   : > { %v6676_v49 = vld [vmem:[#allocation1 + $0x20] sm:$0xff]  ;;  %v6678_v38 = vld [vmem:[#allocation1 + $0x28] sm:$0xff]  ;;  %v2588_v41 = vld [vmem:[#allocation1 + $0x30] sm:$0xff]  ;;  %1589 = vst [vmem:[#allocation3 + $0x64] sm:$0x22] %v1588_v14  ;;  %v1538_v31 = vpop.permute.xlu0 %1537  ;;  %v2414_v34 = vshll.u32 %v6569_v18, 16  ;;  %v8503_v54 = vunpack.i.l.bf16 %v6583_v58  ;;  %v5006_v19 = vpack.i.bf16 %v2410_v43, %v2408_v60 }
 0x16b   : > { %v1816_v5 = vsel %vm8502_vm14, %v8273_v32, %v8501_v9  ;;  %v2589_v7 = vld [vmem:[#allocation1 + $0x38] sm:$0xff]  ;;  %v1687_v27 = vrot.slane %v4950_v35, 4  ;;  %vm8504_vm4 = vcmask 916480   ;;  %v1605_v55 = vld [vmem:[#allocation3 + $0x94] sm:$0x2]  ;;  %v1548_v6 = vrot.slane %v1538_v31, 4 }
 0x16c   : > { %v1693_v45 = vsel %vm8496_vm8, %v8503_v54, %v1692_v56  ;;  %5002 = vrot.lane.b32.xlu1 %v5001_v47, %s5268_s7  ;;  %v1817_v11 = vsel %vm8504_vm4, %v6652_v28, %v1816_v5  ;;  %2313 = vrot.lane.b32.xlu0 %v6598_v61, %s5267_s6  ;;  %2721 = vst [vmem:[#allocation1 + $0x22] ss:$4 sm:$0xff] %v6561_v62  ;;  %v1602_v18 = vld [vmem:[#allocation3 + $0x8c] sm:$0x22]  ;;  %v2612_v40 = vshll.u32 %v2588_v41, 16  ;;  %v2615_v14 = vshll.u32 %v2589_v7, 16 }
 0x16d   : > { %v1850_v12 = vsel %vm5791_vm0, %v1817_v11, %v1849_v13  ;;  %v8505_v47 = vrot.slane %v6537_v29, 4  ;;  %vm8507_vm7 = vcmask 1039360   ;;  %v4938_v5 = vpop.permute.xlu1 %4937  ;;  %vm8509_vm8 = vnez %v8296_v1 }
 0x16e   : > { %v2402_v16 = vld [vmem:[#allocation1] sm:$0xff]  ;;  %v2403_v56 = vld [vmem:[#allocation1 + $0x8] sm:$0xff]  ;;  %1851 = vst [vmem:[#allocation3 + $0x6c] sm:$0x44] %v1850_v12  ;;  %v1567_v61 = vsel %vm8507_vm7, %v1538_v31, %v1548_v6  ;;  %vm8508_vm14 = vmmov %vm8507_vm7  ;;  %v4940_v60 = vunpack.i.h.bf16 %v4938_v5  ;;  %v4939_v43 = vunpack.i.l.bf16 %v4938_v5  ;;  %v8510_v7 = vshll.u32 %v6571_v24, 16 }
 0x16f   : > { %v1565_v9 = vsel %vm8506_vm15, %v8505_v47, %v1548_v6  ;;  %v2420_v54 = vshll.u32 %v2402_v16, 16  ;;  %v2422_v32 = vshll.u32 %v2403_v56, 16  ;;  %v1606_v13 = vsel %vm8509_vm8, %v1567_v61, %v1605_v55  ;;  %2518 = vst [vmem:[#allocation1 + $0x1] ss:$4 sm:$0xff] %v6680_v52  ;;  %v1852_v5 = vld [vmem:[#allocation3 + $0x74] sm:$0x44] }
 0x170   : > { %v1566_v50 = vsel %vm8508_vm14, %v6537_v29, %v1565_v9  ;;  %1607 = vst [vmem:[#allocation3 + $0x94] sm:$0x2] %v1606_v13  ;;  %v5016_v31 = vpack.i.bf16 %v2418_v57, %v8510_v7  ;;  %v5011_v11 = vpack.i.bf16 %v2414_v34, %v2412_v46  ;;  %v8511_v6 = vunpack.i.h.bf16 %v6583_v58  ;;  %v1723_v16 = vld [vmem:[#allocation3 + $0x5c] sm:$0x22]  ;;  %5007 = vrot.lane.b32.xlu2 %v5006_v19, %s5268_s7  ;;  %v6720_v47 = vpop.permute.xlu2 %1794 }
 0x171   : > { %v1603_v41 = vsel %vm8453_vm13, %v1566_v50, %v1602_v18  ;;  %vm8512_vm4 = vcmask 1031168   ;;  %v1679_v55 = vrot.slane %v4940_v60, 4  ;;  %v1678_v56 = vrot.slane %v4939_v43, 4  ;;  %v1726_v57 = vld [vmem:[#allocation3 + $0x64] sm:$0x22] }
 0x172   : > { %v1695_v12 = vsel %vm8512_vm4, %v8511_v6, %v1694_v20  ;;  %vm8513_vm15 = vmmov %vm8512_vm4  ;;  %1604 = vst [vmem:[#allocation3 + $0x8c] sm:$0x22] %v1603_v41  ;;  %vm8514_vm7 = vcmask 1043456   ;;  %v1724_v24 = vsel %vm5747_vm2, %v1693_v45, %v1723_v16  ;;  %v5021_v58 = vpack.i.bf16 %v2422_v32, %v2420_v54  ;;  %v1717_v20 = vld [vmem:[#allocation3 + $0x4c] sm:$0x22]  ;;  %v1791_v19 = vpop.permute.xlu0 %1790 }
 0x173   : > { %v1706_v29 = vsel %vm8513_vm15, %v4950_v35, %v1687_v27  ;;  %v1704_v50 = vsel %vm8514_vm7, %v6641_v30, %v1687_v27  ;;  %v2614_v46 = vrot.slane %v2612_v40, 7  ;;  %1725 = vst [vmem:[#allocation3 + $0x5c] sm:$0x22] %v1724_v24  ;;  %v1727_v35 = vsel %vm5747_vm2, %v1695_v12, %v1726_v57  ;;  %vm8515_vm14 = vmmov %vm8514_vm7  ;;  %v1720_v45 = vld [vmem:[#allocation3 + $0x54] sm:$0x22] }
 0x174   : > { %v1688_v34 = vsel %vm8515_vm14, %v1678_v56, %v1679_v55  ;;  %vm8516_vm4 = vmmov %vm8514_vm7  ;;  %v2617_v9 = vrot.slane %v2615_v14, 7  ;;  %1728 = vst [vmem:[#allocation3 + $0x64] sm:$0x22] %v1727_v35  ;;  %5017 = vrot.lane.b32.xlu1 %v5016_v31, %s5268_s7  ;;  %5012 = vrot.lane.b32.xlu0 %v5011_v11, %s5268_s7  ;;  %v1804_v27 = vrot.slane %v1791_v19, 4  ;;  %v2606_v40 = vshll.u32 %v6676_v49, 16 }
 0x175   : > { %v1690_v18 = vsel %vm8516_vm4, %v1679_v55, %v6623_v26  ;;  %v1689_v30 = vsel %vm8513_vm15, %v4939_v43, %v1688_v34  ;;  %vm8517_vm7 = vmmov %vm8513_vm15  ;;  %v1806_v14 = vrot.slane %v6720_v47, 4  ;;  %v2515_v54 = vld [vmem:[#allocation2 + $0x14] sm:$0x7]  ;;  %v2609_v13 = vshll.u32 %v6678_v38, 16  ;;  %v1858_v12 = vld [vmem:[#allocation3 + $0x84] sm:$0x44]  ;;  %v1793_v16 = vpop.permute.xlu1 %1792 }
 0x176   : > { %v1691_v32 = vsel %vm8517_vm7, %v4940_v60, %v1690_v18  ;;  %v1718_v61 = vsel %vm5747_vm2, %v1689_v30, %v1717_v20  ;;  %v8518_v60 = vunpack.i.l.bf16 %v6613_v48  ;;  %vm8519_vm14 = vmmov %vm8517_vm7  ;;  %v8520_v41 = vrot.slane %v6463_v17, 4  ;;  %v6748_v7 = vld [vmem:[#allocation1] sm:$0xff]  ;;  %v6750_v31 = vld [vmem:[#allocation1 + $0x8] sm:$0xff] }
 0x177   : > { %v1721_v26 = vsel %vm5747_vm2, %v1691_v32, %v1720_v45  ;;  %1719 = vst [vmem:[#allocation3 + $0x4c] sm:$0x22] %v1718_v61  ;;  %v6752_v11 = vld [vmem:[#allocation1 + $0x10] sm:$0xff]  ;;  %v1855_v6 = vld [vmem:[#allocation3 + $0x7c] sm:$0x44]  ;;  %vm8521_vm15 = vcmask 916480   ;;  %v5031_v35 = vpack.i.bf16 %v2617_v9, %v2614_v46  ;;  %vm8522_vm7 = vmmov %vm8516_vm4 }
 0x178   : > { %v1705_v43 = vsel %vm8519_vm14, %v8518_v60, %v1704_v50  ;;  %v1818_v49 = vsel %vm8516_vm4, %v8520_v41, %v1804_v27  ;;  %v1744_v55 = vld [vmem:[#allocation3 + $0x94] sm:$0x2]  ;;  %1722 = vst [vmem:[#allocation3 + $0x54] sm:$0x22] %v1721_v26  ;;  %v6756_v38 = vld [vmem:[#allocation1 + $0x18] sm:$0xff]  ;;  %v1805_v56 = vrot.slane %v1793_v16, 4  ;;  %5022 = vrot.lane.b32.xlu2 %v5021_v58, %s5268_s7  ;;  %vm8523_vm14 = vmmov %vm8516_vm4 }
 0x179   : > { %v1819_v48 = vsel %vm8521_vm15, %v6463_v17, %v1818_v49  ;;  %v1741_v50 = vld [vmem:[#allocation3 + $0x8c] sm:$0x22]  ;;  %v1745_v24 = vsel %vm5713_vm1, %v1706_v29, %v1744_v55  ;;  %2531 = vst [vmem:[#allocation1 + $0x1] ss:$4 sm:$0xff] %v2515_v54  ;;  %v2608_v20 = vrot.slane %v2606_v40, 7  ;;  %v6769_v29 = vpop.permute.xlu2 %2047  ;;  %v2611_v32 = vrot.slane %v2609_v13, 7  ;;  %vm8524_vm4 = vmmov %vm8521_vm15 }
 0x17a   : > { %v1853_v57 = vsel %vm5791_vm0, %v1819_v48, %v1852_v5  ;;  %v1742_v34 = vsel %vm5747_vm2, %v1705_v43, %v1741_v50  ;;  %1746 = vst [vmem:[#allocation3 + $0x94] sm:$0x2] %v1745_v24  ;;  %v2732_v18 = vld [vmem:[#allocation1 + $0x28] sm:$0xff]  ;;  %v1820_v17 = vsel %vm8522_vm7, %v1804_v27, %v1805_v56  ;;  %v1822_v30 = vsel %vm8523_vm14, %v1805_v56, %v1806_v14  ;;  %vm8525_vm15 = vmmov %vm8524_vm4  ;;  %v1779_v27 = vpop.permute.xlu0 %1778  ;;  %v1840_v43 = vld [vmem:[#allocation3 + $0x54] sm:$0x44] }
 0x17b   : > { %1743 = vst [vmem:[#allocation3 + $0x8c] sm:$0x22] %v1742_v34  ;;  %v1821_v46 = vsel %vm8524_vm4, %v1791_v19, %v1820_v17  ;;  %v1823_v9 = vsel %vm8525_vm15, %v1793_v16, %v1822_v30  ;;  %v1800_v40 = vrot.slane %v6673_v23, 4  ;;  %v5026_v61 = vpack.i.bf16 %v2611_v32, %v2608_v20  ;;  %v1837_v60 = vld [vmem:[#allocation3 + $0x4c] sm:$0x44]  ;;  %vm8526_vm14 = vmmov %vm8522_vm7 }
 0x17c   : > { %1854 = vst [vmem:[#allocation3 + $0x74] sm:$0x44] %v1853_v57  ;;  %v1856_v45 = vsel %vm5791_vm0, %v1821_v46, %v1855_v6  ;;  %v1859_v58 = vsel %vm5791_vm0, %v1823_v9, %v1858_v12  ;;  %2754 = vrot.lane.b32.xlu1 %v2732_v18, %s5262_s27  ;;  %5032 = vrot.lane.b32.xlu0 %v5031_v35, %s5261_s26  ;;  %v1798_v54 = vrot.slane %v1779_v27, 4  ;;  %vm8527_vm15 = vmmov %vm8524_vm4  ;;  %v1843_v35 = vld [vmem:[#allocation3 + $0x5c] sm:$0x44]  ;;  %v8528_v17 = vrot.slane %v6652_v28, 4 }
 0x17d   : > { %1857 = vst [vmem:[#allocation3 + $0x7c] sm:$0x44] %v1856_v45  ;;  %v1781_v19 = vpop.permute.xlu1 %1780  ;;  %v1846_v34 = vld [vmem:[#allocation3 + $0x64] sm:$0x44]  ;;  %v2734_v32 = vld [vmem:[#allocation1 + $0x30] sm:$0xff]  ;;  %vm8535_vm1 = vcmask 916480  }
 0x17e   : > { %1860 = vst [vmem:[#allocation3 + $0x84] sm:$0x44] %v1859_v58  ;;  %v1799_v13 = vrot.slane %v1781_v19, 4 }
 0x180   : > { %v6780_v26 = vld [vmem:[#allocation1] sm:$0xff]  ;;  %v6782_v5 = vld [vmem:[#allocation1 + $0x8] sm:$0xff]  ;;  %5027 = vrot.lane.b32.xlu2 %v5026_v61, %s5261_s26  ;;  %v1808_v41 = vsel %vm8522_vm7, %v1798_v54, %v1799_v13  ;;  %v1810_v49 = vsel %vm8526_vm14, %v1799_v13, %v1800_v40  ;;  %vm8529_vm14 = vmmov %vm8522_vm7 }
 0x181   : > { %2578 = vst [vmem:[#allocation1] ss:$4 sm:$0xff] %v6680_v52  ;;  %v6788_v6 = vpop.permute.xlu2 %4967  ;;  %v1809_v12 = vsel %vm8524_vm4, %v1779_v27, %v1808_v41  ;;  %v1811_v16 = vsel %vm8527_vm15, %v1781_v19, %v1810_v49  ;;  %vm8530_vm15 = vmmov %vm8524_vm4  ;;  %v2576_v41 = vld [vmem:[#allocation2 + $0x14] sm:$0xf] }
 0x182   : > { %v8276_v55 = vunpack.i.h.bf16 %v6788_v6  ;;  %v1838_v48 = vsel %vm5791_vm0, %v1809_v12, %v1837_v60  ;;  %v1841_v56 = vsel %vm5791_vm0, %v1811_v16, %v1840_v43  ;;  %v4969_v50 = vunpack.i.l.bf16 %v6788_v6  ;;  %v1785_v24 = vpop.permute.xlu0 %1784 }
 0x183   : > { %1839 = vst [vmem:[#allocation3 + $0x4c] sm:$0x44] %v1838_v48  ;;  %v1801_v57 = vrot.slane %v1785_v24, 4 }
 0x184   : > { %1842 = vst [vmem:[#allocation3 + $0x54] sm:$0x44] %v1841_v56  ;;  %v6800_v20 = vrot.slane %v8276_v55, 4  ;;  %v6806_v58 = vrot.slane %v4969_v50, 4 }
 0x185   : > { %v1812_v18 = vsel %vm8522_vm7, %v1800_v40, %v1801_v57  ;;  %v1814_v30 = vsel %vm8529_vm14, %v1801_v57, %v8528_v17  ;;  %v4958_v46 = vpop.permute.xlu1 %4957  ;;  %v6819_v17 = vld [vmem:[#allocation1 + $0x38] sm:$0xff]  ;;  %vm8531_vm14 = vmmov %vm8522_vm7 }
 0x186   : > { %v1813_v61 = vsel %vm8524_vm4, %v6673_v23, %v1812_v18  ;;  %v1815_v19 = vsel %vm8530_vm15, %v1785_v24, %v1814_v30  ;;  %v4960_v54 = vunpack.i.h.bf16 %v4958_v46  ;;  %v4959_v23 = vunpack.i.l.bf16 %v4958_v46 }
 0x187   : > { %v1844_v28 = vsel %vm5791_vm0, %v1813_v61, %v1843_v35  ;;  %v1847_v12 = vsel %vm5791_vm0, %v1815_v19, %v1846_v34  ;;  %v1951_v35 = vsel %vm8522_vm7, %v6806_v58, %v6800_v20  ;;  %vm8532_vm4 = vcmask 908288  }
 0x188   : > { %v2584_v9 = vld [vmem:[#allocation1 + $0x10] sm:$0xff]  ;;  %v2585_v45 = vld [vmem:[#allocation1 + $0x18] sm:$0xff]  ;;  %v2582_v27 = vld [vmem:[#allocation1] sm:$0xff]  ;;  %1845 = vst [vmem:[#allocation3 + $0x5c] sm:$0x44] %v1844_v28  ;;  %2756 = vrot.lane.b32.xlu2 %v2734_v32, %s5262_s27  ;;  %v1944_v16 = vrot.slane %v4960_v54, 4 }
 0x189   : > { %v2600_v13 = vshll.u32 %v2584_v9, 16  ;;  %v2603_v60 = vshll.u32 %v2585_v45, 16  ;;  %v2583_v40 = vld [vmem:[#allocation1 + $0x8] sm:$0xff]  ;;  %v2594_v43 = vshll.u32 %v2582_v27, 16  ;;  %v6816_v48 = vpop.permute.xlu2 %4972  ;;  %1848 = vst [vmem:[#allocation3 + $0x64] sm:$0x44] %v1847_v12  ;;  %vm8533_vm15 = vmmov %vm8532_vm4 }
 0x18a   : > { %v2597_v49 = vshll.u32 %v2583_v40, 16  ;;  %v4975_v18 = vunpack.i.h.bf16 %v6816_v48  ;;  %2591 = vst [vmem:[#allocation1] ss:$4 sm:$0xff] %v2576_v41  ;;  %v6824_v34 = vrot.slane %v4959_v23, 4  ;;  %v4974_v32 = vunpack.i.l.bf16 %v6816_v48  ;;  %v1797_v46 = vpop.permute.xlu0 %1796  ;;  %v2730_v27 = vld [vmem:[#allocation1 + $0x20] sm:$0xff] }
 0x18b   : > { %v2602_v56 = vrot.slane %v2600_v13, 7  ;;  %v2605_v24 = vrot.slane %v2603_v60, 7  ;;  %v2596_v57 = vrot.slane %v2594_v43, 7  ;;  %v1807_v61 = vrot.slane %v1797_v46, 4  ;;  %v1861_v40 = vld [vmem:[#allocation3 + $0x8c] sm:$0x44] }
 0x18c   : > { %v2599_v30 = vrot.slane %v2597_v49, 7  ;;  %v6829_v45 = vrot.slane %v4975_v18, 4  ;;  %v1959_v13 = vsel %vm8531_vm14, %v6824_v34, %v1944_v16  ;;  %v1945_v60 = vrot.slane %v4974_v32, 4  ;;  %2840 = vst [vmem:[#allocation1 + $0x20] ss:$4 sm:$0xff] %v6561_v62  ;;  %vm8534_vm14 = vmmov %vm8522_vm7 }
 0x18d   : > { %v5041_v9 = vpack.i.bf16 %v2605_v24, %v2602_v56  ;;  %v1952_v43 = vsel %vm8532_vm4, %v4969_v50, %v1951_v35  ;;  %v1994_v28 = vld [vmem:[#allocation3 + $0x7c] sm:$0x44]  ;;  %v1960_v41 = vsel %vm8533_vm15, %v4959_v23, %v1959_v13  ;;  %v1997_v49 = vld [vmem:[#allocation3 + $0x84] sm:$0x44]  ;;  %v1824_v12 = vsel %vm8522_vm7, %v1806_v14, %v1807_v61  ;;  %v4963_v56 = vpop.permute.xlu1 %4962  ;;  %vm8536_vm4 = vmmov %vm8535_vm1 }
 0x18e   : > { %v5036_v19 = vpack.i.bf16 %v2599_v30, %v2596_v57  ;;  %v1995_v24 = vsel %vm5999_vm10, %v1960_v41, %v1994_v28  ;;  %v1961_v57 = vsel %vm8534_vm14, %v1944_v16, %v1945_v60  ;;  %v1864_v30 = vld [vmem:[#allocation3 + $0x94] sm:$0x4]  ;;  %v1825_v50 = vsel %vm8535_vm1, %v6720_v47, %v1824_v12  ;;  %vm8538_vm14 = vmmov %vm8533_vm15 }
 0x18f   : > { %5042 = vrot.lane.b32.xlu1 %v5041_v9, %s5261_s26  ;;  %v1826_v35 = vsel %vm8536_vm4, %v1797_v46, %v1807_v61  ;;  %v1982_v23 = vld [vmem:[#allocation3 + $0x5c] sm:$0x44]  ;;  %1996 = vst [vmem:[#allocation3 + $0x7c] sm:$0x44] %v1995_v24  ;;  %v1962_v9 = vsel %vm8533_vm15, %v4960_v54, %v1961_v57  ;;  %v1963_v14 = vsel %vm8522_vm7, %v1945_v60, %v6829_v45  ;;  %v4965_v47 = vunpack.i.h.bf16 %v4963_v56  ;;  %vm8539_vm4 = vmmov %vm8522_vm7 }
 0x190   : > { %5037 = vrot.lane.b32.xlu0 %v5036_v19, %s5261_s26  ;;  %v1862_v19 = vsel %vm5791_vm0, %v1825_v50, %v1861_v40  ;;  %v1983_v13 = vsel %vm5999_vm10, %v1952_v43, %v1982_v23  ;;  %v1998_v16 = vsel %vm5999_vm10, %v1962_v9, %v1997_v49  ;;  %v4964_v28 = vunpack.i.l.bf16 %v4963_v56  ;;  %vm8540_vm15 = vmmov %vm8539_vm4 }
 0x191   : > { %1863 = vst [vmem:[#allocation3 + $0x8c] sm:$0x44] %v1862_v19  ;;  %v6856_v46 = vpop.permute.xlu2 %2041  ;;  %v2592_v61 = vld [vmem:[#allocation1] sm:$0xff]  ;;  %v2593_v54 = vld [vmem:[#allocation1 + $0x8] sm:$0xff]  ;;  %vm8537_vm1 = vnez %v8298_v2  ;;  %v1938_v40 = vrot.slane %v4965_v47, 4  ;;  %v1964_v57 = vsel %vm8538_vm14, %v4974_v32, %v1963_v14  ;;  %vm8541_vm7 = vmmov %vm8538_vm14  ;;  %v8545_v48 = vunpack.i.h.bf16 %v6788_v6 }
 0x192   : > { %1984 = vst [vmem:[#allocation3 + $0x5c] sm:$0x44] %v1983_v13  ;;  %v1865_v60 = vsel %vm8537_vm1, %v1826_v35, %v1864_v30  ;;  %v2618_v41 = vshll.u32 %v2592_v61, 16  ;;  %v2621_v12 = vshll.u32 %v2593_v54, 16  ;;  %v1937_v43 = vrot.slane %v4964_v28, 4  ;;  %v4953_v24 = vpop.permute.xlu0 %4952  ;;  %vm8542_vm1 = vmmov %vm8541_vm7 }
 0x193   : > { %2718 = vst [vmem:[#allocation1 + $0x2] ss:$4 sm:$0xff] %v6680_v52  ;;  %v4955_v56 = vunpack.i.h.bf16 %v4953_v24  ;;  %v4954_v50 = vunpack.i.l.bf16 %v4953_v24  ;;  %v1949_v30 = vsel %vm8540_vm15, %v1938_v40, %v6806_v58  ;;  %v1976_v35 = vld [vmem:[#allocation3 + $0x4c] sm:$0x44]  ;;  %v1979_v54 = vld [vmem:[#allocation3 + $0x54] sm:$0x44]  ;;  %vm8543_vm14 = vmmov %vm8539_vm4 }
 0x194   : > { %1999 = vst [vmem:[#allocation3 + $0x84] sm:$0x44] %v1998_v16  ;;  %v2620_v23 = vrot.slane %v2618_v41, 7  ;;  %v2623_v9 = vrot.slane %v2621_v12, 7  ;;  %v1947_v19 = vsel %vm8539_vm4, %v1937_v43, %v1938_v40  ;;  %v1950_v61 = vsel %vm8542_vm1, %v4965_v47, %v1949_v30  ;;  %v2715_v14 = vld [vmem:[#allocation2 + $0x14] sm:$0xf]  ;;  %vm8544_vm15 = vmmov %vm8539_vm4 }
 0x195   : > { %1866 = vst [vmem:[#allocation3 + $0x94] sm:$0x4] %v1865_v60  ;;  %v1948_v13 = vsel %vm8541_vm7, %v4964_v28, %v1947_v19  ;;  %v1942_v49 = vrot.slane %v4955_v56, 4  ;;  %v1941_v55 = vrot.slane %v4954_v50, 4  ;;  %v6868_v32 = vpop.permute.xlu1 %2045  ;;  %v1980_v58 = vsel %vm5999_vm10, %v1950_v61, %v1979_v54  ;;  %v1988_v43 = vld [vmem:[#allocation3 + $0x6c] sm:$0x44]  ;;  %vm8546_vm7 = vmmov %vm8542_vm1 }
 0x196   : > { %v5046_v16 = vpack.i.bf16 %v2623_v9, %v2620_v23  ;;  %v1977_v60 = vsel %vm5999_vm10, %v1948_v13, %v1976_v35  ;;  %v2061_v41 = vrot.slane %v6868_v32, 4  ;;  %v1965_v47 = vsel %vm8542_vm1, %v4975_v18, %v6829_v45  ;;  %1981 = vst [vmem:[#allocation3 + $0x54] sm:$0x44] %v1980_v58  ;;  %v1985_v23 = vld [vmem:[#allocation3 + $0x64] sm:$0x44] }
 0x197   : > { %1978 = vst [vmem:[#allocation3 + $0x4c] sm:$0x44] %v1977_v60  ;;  %v1953_v12 = vsel %vm8543_vm14, %v6800_v20, %v1941_v55  ;;  %v1957_v40 = vsel %vm8544_vm15, %v1942_v49, %v6824_v34  ;;  %v2108_v20 = vld [vmem:[#allocation3 + $0x6c] sm:$0x88]  ;;  %vm8547_vm14 = vmmov %vm8542_vm1  ;;  %v8548_v30 = vrot.slane %v6769_v29, 4  ;;  %vm8549_vm15 = vcmask 900096  }
 0x198   : > { %2752 = vrot.lane.b32.xlu0 %v2730_v27, %s5262_s27  ;;  %v2000_v28 = vld [vmem:[#allocation3 + $0x8c] sm:$0x44]  ;;  %v1955_v27 = vsel %vm8539_vm4, %v1941_v55, %v1942_v49  ;;  %5047 = vrot.lane.b32.xlu1 %v5046_v16, %s5261_s26  ;;  %v1954_v18 = vsel %vm8546_vm7, %v8545_v48, %v1953_v12  ;;  %v1958_v49 = vsel %vm8547_vm14, %v4955_v56, %v1957_v40  ;;  %v1991_v13 = vld [vmem:[#allocation3 + $0x74] sm:$0x44]  ;;  %v2099_v12 = vld [vmem:[#allocation3 + $0x54] sm:$0x88] }
 0x199   : > { %v2001_v24 = vsel %vm5999_vm10, %v1964_v57, %v2000_v28  ;;  %v1956_v45 = vsel %vm8542_vm1, %v4954_v50, %v1955_v27  ;;  %v6892_v9 = vpop.permute.xlu2 %2053  ;;  %v1986_v57 = vsel %vm5999_vm10, %v1954_v18, %v1985_v23  ;;  %v2075_v50 = vsel %vm8539_vm4, %v2061_v41, %v8548_v30  ;;  %v2096_v28 = vld [vmem:[#allocation3 + $0x4c] sm:$0x88]  ;;  %vm8550_vm7 = vmmov %vm8539_vm4 }
 0x19a   : > { %v2722_v55 = vld [vmem:[#allocation1] sm:$0xff]  ;;  %v2724_v19 = vld [vmem:[#allocation1 + $0x8] sm:$0xff]  ;;  %v2726_v34 = vld [vmem:[#allocation1 + $0x10] sm:$0xff]  ;;  %2002 = vst [vmem:[#allocation3 + $0x8c] sm:$0x44] %v2001_v24  ;;  %v1989_v6 = vsel %vm5999_vm10, %v1956_v45, %v1988_v43  ;;  %v2076_v56 = vsel %vm8549_vm15, %v6868_v32, %v2075_v50  ;;  %v2038_v61 = vpop.permute.xlu0 %2037  ;;  %v1992_v16 = vsel %vm5999_vm10, %v1958_v49, %v1991_v13  ;;  %v2059_v40 = vrot.slane %v6856_v46, 4 }
 0x19b   : > { %v2728_v35 = vld [vmem:[#allocation1 + $0x18] sm:$0xff]  ;;  %2744 = vrot.lane.b32.xlu2 %v2722_v55, %s5262_s27  ;;  %1987 = vst [vmem:[#allocation3 + $0x64] sm:$0x44] %v1986_v57  ;;  %v2109_v58 = vsel %vm5921_vm5, %v2076_v56, %v2108_v20  ;;  %v2845_v24 = vld [vmem:[#allocation1 + $0x20] sm:$0xff]  ;;  %v2846_v48 = vld [vmem:[#allocation1 + $0x28] sm:$0xff] }
 0x19c   : > { %2739 = vst [vmem:[#allocation1 + $0x2] ss:$4 sm:$0xff] %v2715_v14  ;;  %v2003_v54 = vld [vmem:[#allocation3 + $0x94] sm:$0x4]  ;;  %v2057_v14 = vrot.slane %v2038_v61, 4  ;;  %vm8551_vm1 = vmmov %vm8539_vm4 }
 0x19d   : > { %v2004_v60 = vsel %vm5963_vm9, %v1965_v47, %v2003_v54  ;;  %1990 = vst [vmem:[#allocation3 + $0x6c] sm:$0x44] %v1989_v6  ;;  %v2040_v27 = vpop.permute.xlu1 %2039  ;;  %v6915_v18 = vld [vmem:[#allocation1 + $0x30] sm:$0xff]  ;;  %v6917_v47 = vld [vmem:[#allocation1 + $0x38] sm:$0xff]  ;;  %vm8552_vm14 = vmmov %vm8549_vm15 }
 0x19e   : > { %2005 = vst [vmem:[#allocation3 + $0x94] sm:$0x4] %v2004_v60  ;;  %v2058_v43 = vrot.slane %v2040_v27, 4  ;;  %vm8553_vm4 = vmmov %vm8552_vm14  ;;  %v2105_v54 = vld [vmem:[#allocation3 + $0x64] sm:$0x88] }
 0x19f   : > { %1993 = vst [vmem:[#allocation3 + $0x74] sm:$0x44] %v1992_v16  ;;  %v2865_v16 = vshll.u32 %v2845_v24, 16  ;;  %vm8554_vm15 = vmmov %vm8551_vm1 }
 0x1a0   : > { %2746 = vrot.lane.b32.xlu0 %v2724_v19, %s5262_s27  ;;  %2110 = vst [vmem:[#allocation3 + $0x6c] sm:$0x88] %v2109_v58  ;;  %2748 = vrot.lane.b32.xlu1 %v2726_v34, %s5262_s27  ;;  %v2067_v45 = vsel %vm8550_vm7, %v2057_v14, %v2058_v43  ;;  %v2069_v23 = vsel %vm8551_vm1, %v2058_v43, %v2059_v40  ;;  %vm8555_vm7 = vmmov %vm8551_vm1 }
 0x1a1   : > { %v6922_v20 = vpop.permute.xlu2 %4992  ;;  %2980 = vst [vmem:[#allocation1 + $0x23] ss:$4 sm:$0xff] %v6561_v62  ;;  %v2068_v55 = vsel %vm8552_vm14, %v2038_v61, %v2067_v45  ;;  %v2070_v19 = vsel %vm8553_vm4, %v2040_v27, %v2069_v23  ;;  %v2102_v62 = vld [vmem:[#allocation3 + $0x5c] sm:$0x88]  ;;  %v2065_v61 = vrot.slane %v6892_v9, 4  ;;  %vm8556_vm1 = vmmov %vm8553_vm4 }
 0x1a2   : > { %v4995_v49 = vunpack.i.h.bf16 %v6922_v20  ;;  %v2097_v34 = vsel %vm5921_vm5, %v2068_v55, %v2096_v28  ;;  %v2100_v30 = vsel %vm5921_vm5, %v2070_v19, %v2099_v12  ;;  %v4994_v50 = vunpack.i.l.bf16 %v6922_v20  ;;  %v2044_v13 = vpop.permute.xlu0 %2043  ;;  %vm8557_vm14 = vmmov %vm8556_vm1 }
 0x1a3   : > { %v2742_v57 = vld [vmem:[#allocation1 + $0x8] sm:$0xff]  ;;  %v2740_v6 = vld [vmem:[#allocation1] sm:$0xff]  ;;  %2750 = vrot.lane.b32.xlu2 %v2728_v35, %s5262_s27  ;;  %v2060_v56 = vrot.slane %v2044_v13, 4  ;;  %2098 = vst [vmem:[#allocation3 + $0x4c] sm:$0x88] %v2097_v34  ;;  %v2868_v28 = vshll.u32 %v2846_v48, 16  ;;  %vm8558_vm4 = vmmov %vm8555_vm7 }
 0x1a4   : > { %2837 = vst [vmem:[#allocation1] ss:$4 sm:$0xff] %v6680_v52  ;;  %v6938_v35 = vrot.slane %v4995_v49, 4  ;;  %v6946_v27 = vrot.slane %v4994_v50, 4  ;;  %v2835_v48 = vld [vmem:[#allocation2 + $0x14] sm:$0xf] }
 0x1a5   : > { %2101 = vst [vmem:[#allocation3 + $0x54] sm:$0x88] %v2100_v30  ;;  %v2071_v60 = vsel %vm8554_vm15, %v2059_v40, %v2060_v56  ;;  %v2073_v58 = vsel %vm8555_vm7, %v2060_v56, %v2061_v41  ;;  %v2052_v12 = vpop.permute.xlu1 %2051  ;;  %v2117_v41 = vld [vmem:[#allocation3 + $0x84] sm:$0x88]  ;;  %vm8559_vm15 = vmmov %vm8556_vm1  ;;  %v2867_v34 = vrot.slane %v2865_v16, 6 }
 0x1a6   : > { %v2072_v14 = vsel %vm8556_vm1, %v6856_v46, %v2071_v60  ;;  %v2074_v43 = vsel %vm8557_vm14, %v2044_v13, %v2073_v58  ;;  %v2064_v24 = vrot.slane %v2052_v12, 4  ;;  %vm8560_vm7 = vmmov %vm8558_vm4  ;;  %vm8561_vm1 = vcmask 785408  }
 0x1a7   : > { %v2103_v40 = vsel %vm5921_vm5, %v2072_v14, %v2102_v62  ;;  %v2106_v32 = vsel %vm5921_vm5, %v2074_v43, %v2105_v54  ;;  %v2210_v55 = vsel %vm8560_vm7, %v6946_v27, %v6938_v35  ;;  %vm8563_vm14 = vmmov %vm8558_vm4 }
 0x1a8   : > { %2758 = vrot.lane.b32.xlu0 %v6819_v17, %s5262_s27  ;;  %2760 = vrot.lane.b32.xlu1 %v2740_v6, %s5262_s27  ;;  %2104 = vst [vmem:[#allocation3 + $0x5c] sm:$0x88] %v2103_v40  ;;  %v2081_v17 = vsel %vm8558_vm4, %v2064_v24, %v2065_v61  ;;  %v2870_v6 = vrot.slane %v2868_v28, 6  ;;  %v2211_v16 = vsel %vm8561_vm1, %v4994_v50, %v2210_v55  ;;  %vm8564_vm7 = vmmov %vm8559_vm15 }
 0x1a9   : > { %2107 = vst [vmem:[#allocation3 + $0x64] sm:$0x88] %v2106_v32  ;;  %v2082_v46 = vsel %vm8559_vm15, %v2052_v12, %v2081_v17  ;;  %v2874_v12 = vshll.u32 %v6917_v47, 16  ;;  %v2111_v32 = vld [vmem:[#allocation3 + $0x74] sm:$0x88]  ;;  %vm8565_vm1 = vmmov %vm8558_vm4 }
 0x1aa   : > { %v2118_v30 = vsel %vm5921_vm5, %v2082_v46, %v2117_v41  ;;  %v2050_v13 = vpop.permute.xlu0 %2049  ;;  %v5051_v17 = vpack.i.bf16 %v2870_v6, %v2867_v34  ;;  %v2114_v46 = vld [vmem:[#allocation3 + $0x7c] sm:$0x88]  ;;  %v6978_v55 = vpop.permute.xlu2 %4997  ;;  %vm8570_vm9 = vmmov %vm8565_vm1 }
 0x1ab   : > { %v2843_v45 = vld [vmem:[#allocation1 + $0x10] sm:$0xff]  ;;  %v2844_v23 = vld [vmem:[#allocation1 + $0x18] sm:$0xff]  ;;  %2762 = vrot.lane.b32.xlu2 %v2742_v57, %s5262_s27  ;;  %v2841_v19 = vld [vmem:[#allocation1] sm:$0xff]  ;;  %2119 = vst [vmem:[#allocation3 + $0x84] sm:$0x88] %v2118_v30  ;;  %v2871_v57 = vshll.u32 %v6915_v18, 16 }
 0x1ac   : > { %v2859_v62 = vshll.u32 %v2843_v45, 16  ;;  %v2862_v56 = vshll.u32 %v2844_v23, 16  ;;  %v2842_v54 = vld [vmem:[#allocation1 + $0x8] sm:$0xff]  ;;  %v2853_v60 = vshll.u32 %v2841_v19, 16  ;;  %v2063_v14 = vrot.slane %v2050_v13, 4 }
 0x1ad   : > { %v2856_v58 = vshll.u32 %v2842_v54, 16  ;;  %2850 = vst [vmem:[#allocation1] ss:$4 sm:$0xff] %v2835_v48  ;;  %v8562_v45 = vrot.slane %v6769_v29, 4  ;;  %v2876_v6 = vrot.slane %v2874_v12, 6 }
 0x1ae   : > { %v2861_v43 = vrot.slane %v2859_v62, 6  ;;  %v2864_v40 = vrot.slane %v2862_v56, 6  ;;  %v2855_v28 = vrot.slane %v2853_v60, 6  ;;  %v2079_v48 = vsel %vm8558_vm4, %v2063_v14, %v2064_v24  ;;  %vm8567_vm4 = vmmov %vm8564_vm7 }
 0x1af   : > { %v2858_v41 = vrot.slane %v2856_v58, 6  ;;  %v2077_v23 = vsel %vm8563_vm14, %v8562_v45, %v2063_v14  ;;  %v2241_v18 = vld [vmem:[#allocation3 + $0x5c] sm:$0x88]  ;;  %v2080_v30 = vsel %vm8564_vm7, %v2050_v13, %v2079_v48  ;;  %v2873_v24 = vrot.slane %v2871_v57, 6  ;;  %vm8566_vm14 = vmmov %vm8564_vm7 }
 0x1b0   : > { %v5066_v19 = vpack.i.bf16 %v2864_v40, %v2861_v43  ;;  %v2078_v47 = vsel %vm8559_vm15, %v6769_v29, %v2077_v23  ;;  %v2242_v50 = vsel %vm6182_vm11, %v2211_v16, %v2241_v18  ;;  %v2115_v56 = vsel %vm5921_vm5, %v2080_v30, %v2114_v46  ;;  %v2123_v16 = vld [vmem:[#allocation3 + $0x94] sm:$0x8]  ;;  %vm8569_vm7 = vmmov %vm8565_vm1 }
 0x1b1   : > { %v5056_v62 = vpack.i.bf16 %v2858_v41, %v2855_v28  ;;  %v2112_v34 = vsel %vm5921_vm5, %v2078_v47, %v2111_v32  ;;  %2243 = vst [vmem:[#allocation3 + $0x5c] sm:$0x88] %v2242_v50  ;;  %v5000_v60 = vunpack.i.h.bf16 %v6978_v55  ;;  %v4999_v28 = vunpack.i.l.bf16 %v6978_v55  ;;  %v2120_v41 = vld [vmem:[#allocation3 + $0x8c] sm:$0x88]  ;;  %v2238_v47 = vld [vmem:[#allocation3 + $0x54] sm:$0x88] }
 0x1b2   : > { %5067 = vrot.lane.b32.xlu1 %v5066_v19, %s5263_s28  ;;  %2113 = vst [vmem:[#allocation3 + $0x74] sm:$0x88] %v2112_v34  ;;  %v2056_v29 = vpop.permute.xlu0 %2055  ;;  %v5061_v32 = vpack.i.bf16 %v2876_v6, %v2873_v24  ;;  %vm8568_vm15 = vnez %v8300_v3  ;;  %v2235_v6 = vld [vmem:[#allocation3 + $0x4c] sm:$0x88] }
 0x1b3   : > { %5057 = vrot.lane.b32.xlu0 %v5056_v62, %s5263_s28  ;;  %5052 = vrot.lane.b32.xlu2 %v5051_v17, %s5263_s28  ;;  %2116 = vst [vmem:[#allocation3 + $0x7c] sm:$0x88] %v2115_v56  ;;  %v2066_v14 = vrot.slane %v2056_v29, 4  ;;  %v2205_v18 = vrot.slane %v5000_v60, 4  ;;  %v2204_v24 = vrot.slane %v4999_v28, 4 }
 0x1b4   : > { %v2851_v13 = vld [vmem:[#allocation1] sm:$0xff]  ;;  %v2852_v54 = vld [vmem:[#allocation1 + $0x8] sm:$0xff]  ;;  %v4983_v58 = vpop.permute.xlu1 %4982 }
 0x1b5   : > { %v2877_v43 = vshll.u32 %v2851_v13, 16  ;;  %v2880_v40 = vshll.u32 %v2852_v54, 16  ;;  %2977 = vst [vmem:[#allocation1 + $0x3] ss:$4 sm:$0xff] %v6680_v52  ;;  %v4985_v57 = vunpack.i.h.bf16 %v4983_v58  ;;  %v4984_v12 = vunpack.i.l.bf16 %v4983_v58  ;;  %v7013_v54 = vpop.permute.xlu2 %2299  ;;  %v2974_v58 = vld [vmem:[#allocation2 + $0x14] sm:$0xf] }
 0x1b6   : > { %v2083_v17 = vsel %vm8565_vm1, %v2065_v61, %v2066_v14  ;;  %v2085_v46 = vsel %vm8566_vm14, %v2056_v29, %v2066_v14  ;;  %vm8571_vm1 = vcmask 785408  }
 0x1b7   : > { %v2879_v45 = vrot.slane %v2877_v43, 6  ;;  %v2882_v23 = vrot.slane %v2880_v40, 6  ;;  %v2197_v48 = vrot.slane %v4985_v57, 4  ;;  %v2196_v19 = vrot.slane %v4984_v12, 4  ;;  %vm8572_vm14 = vmmov %vm8571_vm1 }
 0x1b8   : > { %v2084_v30 = vsel %vm8567_vm4, %v6892_v9, %v2083_v17  ;;  %v2124_v62 = vsel %vm8568_vm15, %v2085_v46, %v2123_v16  ;;  %v7006_v9 = vld [vmem:[#allocation1 + $0x28] sm:$0xff]  ;;  %v7018_v17 = vld [vmem:[#allocation1 + $0x30] sm:$0xff]  ;;  %v7020_v46 = vld [vmem:[#allocation1 + $0x38] sm:$0xff] }
 0x1b9   : > { %v5071_v50 = vpack.i.bf16 %v2882_v23, %v2879_v45  ;;  %v2206_v55 = vsel %vm8569_vm7, %v2196_v19, %v2197_v48  ;;  %v2208_v61 = vsel %vm8570_vm9, %v2197_v48, %v6946_v27  ;;  %v2121_v34 = vsel %vm5921_vm5, %v2084_v30, %v2120_v41  ;;  %2125 = vst [vmem:[#allocation3 + $0x94] sm:$0x8] %v2124_v62  ;;  %vm8573_vm9 = vmmov %vm8569_vm7 }
 0x1ba   : > { %v2207_v56 = vsel %vm8571_vm1, %v4984_v12, %v2206_v55  ;;  %v2209_v29 = vsel %vm8572_vm14, %v4985_v57, %v2208_v61  ;;  %2122 = vst [vmem:[#allocation3 + $0x8c] sm:$0x88] %v2121_v34  ;;  %v2222_v43 = vsel %vm8573_vm9, %v2204_v24, %v2205_v18  ;;  %vm8576_vm4 = vmmov %vm8571_vm1  ;;  %v7025_v61 = vld [vmem:[#allocation1 + $0x20] sm:$0xff]  ;;  %v7027_v34 = vld [vmem:[#allocation2 + $0xc] sm:$0xff] }
 0x1bb   : > { %5072 = vrot.lane.b32.xlu1 %v5071_v50, %s5263_s28  ;;  %5062 = vrot.lane.b32.xlu0 %v5061_v32, %s5263_s28  ;;  %v2236_v27 = vsel %vm6182_vm11, %v2207_v56, %v2235_v6  ;;  %v2239_v13 = vsel %vm6182_vm11, %v2209_v29, %v2238_v47  ;;  %8574 = vst [vmem:[#allocation12_spill] sm:$0xff] %v7018_v17  ;;  %vm8577_vm7 = vmmov %vm8571_vm1  ;;  %v2256_v56 = vld [vmem:[#allocation3 + $0x84] sm:$0x88] }
 0x1bc   : > { %v4978_v14 = vpop.permute.xlu0 %4977  ;;  %v2985_v40 = vld [vmem:[#allocation1 + $0x10] sm:$0xff]  ;;  %v7016_v57 = vld [vmem:[#allocation1 + $0x18] sm:$0xff]  ;;  %v2981_v12 = vld [vmem:[#allocation1] sm:$0xff]  ;;  %2237 = vst [vmem:[#allocation3 + $0x4c] sm:$0x88] %v2236_v27  ;;  %v4988_v16 = vpop.permute.xlu1 %4987  ;;  %v2224_v19 = vsel %vm8576_vm4, %v5000_v60, %v2205_v18  ;;  %v2223_v62 = vsel %vm8577_vm7, %v4999_v28, %v2222_v43 }
 0x1bd   : > { %v4980_v41 = vunpack.i.h.bf16 %v4978_v14  ;;  %v4979_v32 = vunpack.i.l.bf16 %v4978_v14  ;;  %8575 = vst [vmem:[#allocation13_spill] sm:$0xff] %v7020_v46  ;;  %3003 = vrot.lane.b32.xlu2 %v2981_v12, %s5264_s29  ;;  %v2983_v45 = vld [vmem:[#allocation1 + $0x8] sm:$0xff]  ;;  %v4990_v23 = vunpack.i.h.bf16 %v4988_v16  ;;  %v4989_v48 = vunpack.i.l.bf16 %v4988_v16  ;;  %vm8578_vm1 = vmmov %vm8573_vm9 }
 0x1be   : > { %2240 = vst [vmem:[#allocation3 + $0x54] sm:$0x88] %v2239_v13  ;;  %vm8579_vm14 = vmmov %vm8578_vm1 }
 0x1bf   : > { %2998 = vst [vmem:[#allocation1 + $0x3] ss:$4 sm:$0xff] %v2974_v58  ;;  %v2201_v47 = vrot.slane %v4980_v41, 4  ;;  %v2200_v30 = vrot.slane %v4979_v32, 4  ;;  %v2203_v50 = vrot.slane %v4990_v23, 4  ;;  %v2202_v55 = vrot.slane %v4989_v48, 4  ;;  %vm8580_vm9 = vmmov %vm8578_vm1 }
 0x1c0   : > { %v2262_v6 = vld [vmem:[#allocation3 + $0x94] sm:$0x8]  ;;  %3099 = vst [vmem:[#allocation1 + $0x20] ss:$4 sm:$0xff] %v7027_v34  ;;  %vm8581_vm4 = vmmov %vm8578_vm1 }
 0x1c1   : > { %v2212_v29 = vsel %vm8578_vm1, %v6938_v35, %v2200_v30  ;;  %v2214_v27 = vsel %vm8579_vm14, %v2200_v30, %v2201_v47  ;;  %v2259_v60 = vld [vmem:[#allocation3 + $0x8c] sm:$0x88]  ;;  %v2263_v18 = vsel %vm6152_vm12, %v2224_v19, %v2262_v6  ;;  %v2218_v28 = vsel %vm8580_vm9, %v2202_v55, %v2203_v50  ;;  %v2253_v35 = vld [vmem:[#allocation3 + $0x7c] sm:$0x88]  ;;  %vm8582_vm1 = vmmov %vm8577_vm7 }
 0x1c2   : > { %v2220_v13 = vsel %vm8581_vm4, %v2203_v50, %v2204_v24  ;;  %v2213_v58 = vsel %vm8577_vm7, %v4995_v49, %v2212_v29  ;;  %v2260_v14 = vsel %vm6182_vm11, %v2223_v62, %v2259_v60  ;;  %2264 = vst [vmem:[#allocation3 + $0x94] sm:$0x8] %v2263_v18  ;;  %v2219_v43 = vsel %vm8582_vm1, %v4989_v48, %v2218_v28  ;;  %vm8583_vm14 = vmmov %vm8582_vm1  ;;  %v2244_v19 = vld [vmem:[#allocation3 + $0x64] sm:$0x88]  ;;  %v7060_v62 = vpop.permute.xlu2 %2305  ;;  %v2250_v50 = vld [vmem:[#allocation3 + $0x74] sm:$0x88] }
 0x1c3   : > { %v2221_v12 = vsel %vm8583_vm14, %v4990_v23, %v2220_v13  ;;  %vm8584_vm15 = vmmov %vm8582_vm1  ;;  %3007 = vrot.lane.b32.xlu1 %v2985_v40, %s5264_s29  ;;  %3005 = vrot.lane.b32.xlu0 %v2983_v45, %s5264_s29  ;;  %2261 = vst [vmem:[#allocation3 + $0x8c] sm:$0x88] %v2260_v14  ;;  %v2254_v20 = vsel %vm6182_vm11, %v2219_v43, %v2253_v35  ;;  %v8278_v48 = vrot.slane %v7013_v54, 4  ;;  %v2357_v60 = vld [vmem:[#allocation3 + $0xa0] sm:$0x11]  ;;  %vm8591_vm7 = vcmask 777216  }
 0x1c4   : > { %v2215_v16 = vsel %vm8584_vm15, %v4979_v32, %v2214_v27  ;;  %v2257_v49 = vsel %vm6182_vm11, %v2221_v12, %v2256_v56  ;;  %vm8585_vm9 = vmmov %vm8581_vm4  ;;  %2255 = vst [vmem:[#allocation3 + $0x7c] sm:$0x88] %v2254_v20  ;;  %v2245_v40 = vsel %vm6182_vm11, %v2213_v58, %v2244_v19  ;;  %v2247_v32 = vld [vmem:[#allocation3 + $0x6c] sm:$0x88]  ;;  %v3094_v14 = vld [vmem:[#allocation2 + $0x14] sm:$0xf] }
 0x1c5   : > { %v2216_v24 = vsel %vm8585_vm9, %v2201_v47, %v2202_v55  ;;  %vm8586_vm4 = vmmov %vm8582_vm1  ;;  %2258 = vst [vmem:[#allocation3 + $0x84] sm:$0x88] %v2257_v49  ;;  %v2248_v47 = vsel %vm6182_vm11, %v2215_v16, %v2247_v32 }
 0x1c6   : > { %v2217_v23 = vsel %vm8586_vm4, %v4980_v41, %v2216_v24  ;;  %v7056_v45 = vld [vmem:[#allocation1] sm:$0xff]  ;;  %v7058_v30 = vld [vmem:[#allocation1 + $0x8] sm:$0xff]  ;;  %v2298_v55 = vpop.permute.xlu1 %2297  ;;  %2246 = vst [vmem:[#allocation3 + $0x64] sm:$0x88] %v2245_v40  ;;  %vm8590_vm15 = vmmov %vm8585_vm9  ;;  %v2296_v40 = vpop.permute.xlu0 %2295 }
 0x1c7   : > { %8587 = vst [vmem:[#allocation14_spill] sm:$0xff] %v7056_v45  ;;  %v2251_v41 = vsel %vm6182_vm11, %v2217_v23, %v2250_v50  ;;  %v2316_v6 = vrot.slane %v2298_v55, 4  ;;  %v7067_v56 = vld [vmem:[#allocation1 + $0x20] sm:$0xff]  ;;  %v7069_v29 = vld [vmem:[#allocation1 + $0x28] sm:$0xff]  ;;  %v7071_v27 = vld [vmem:[#allocation1 + $0x30] sm:$0xff] }
 0x1c8   : > { %8588 = vst [vmem:[#allocation15_spill] sm:$0xff] %v7058_v30  ;;  %v7073_v18 = vld [vmem:[#allocation1 + $0x38] sm:$0xff]  ;;  %vm8593_vm1 = vmmov %vm8585_vm9 }
 0x1c9   : > { %3096 = vst [vmem:[#allocation1] ss:$4 sm:$0xff] %v6680_v52  ;;  %v2327_v28 = vsel %vm8590_vm15, %v2316_v6, %v8278_v48  ;;  %v2354_v50 = vld [vmem:[#allocation3 + $0x98] sm:$0x11]  ;;  %vm8594_vm14 = vmmov %vm8591_vm7 }
 0x1ca   : > { %2249 = vst [vmem:[#allocation3 + $0x6c] sm:$0x88] %v2248_v47  ;;  %v2328_v13 = vsel %vm8591_vm7, %v2298_v55, %v2327_v28  ;;  %v7084_v23 = vpop.permute.xlu2 %2311  ;;  %vm8598_vm9 = vmmov %vm8593_vm1 }
 0x1cb   : > { %8589 = vst [vmem:[#allocation16_spill] sm:$0xff] %v7073_v18  ;;  %3009 = vrot.lane.b32.xlu0 %v7016_v57, %s5264_s29  ;;  %v2358_v58 = vsel %vm8429_vm6, %v2328_v13, %v2357_v60  ;;  %vm8599_vm4 = vmmov %vm8591_vm7  ;;  %v8603_v10 = vrot.slane %v7084_v23, 4 }
 0x1cc   : > { %2252 = vst [vmem:[#allocation3 + $0x74] sm:$0x88] %v2251_v41  ;;  %v2315_v41 = vrot.slane %v2296_v40, 4  ;;  %vm8601_vm15 = vmmov %vm8593_vm1  ;;  %v4785_v63 = vld [vmem:[#allocation3 + $0x80] sm:$0xf0] }
 0x1cd   : > { %3238 = vst [vmem:[#allocation1 + $0x20] ss:$4 sm:$0xff] %v7027_v34  ;;  %vm8602_vm7 = vmmov %vm8593_vm1 }
 0x1ce   : > { %2359 = vst [vmem:[#allocation3 + $0xa0] sm:$0x11] %v2358_v58 }
 0x1d0   : > { %v3102_v35 = vld [vmem:[#allocation1 + $0x10] sm:$0xff]  ;;  %v3103_v43 = vld [vmem:[#allocation1 + $0x18] sm:$0xff]  ;;  %v3100_v12 = vld [vmem:[#allocation1] sm:$0xff] }
 0x1d1   : > { %v3118_v16 = vshll.u32 %v3102_v35, 16  ;;  %v3121_v20 = vshll.u32 %v3103_v43, 16  ;;  %v3101_v49 = vld [vmem:[#allocation1 + $0x8] sm:$0xff]  ;;  %v3112_v24 = vshll.u32 %v3100_v12, 16 }
 0x1d2   : > { %v3115_v19 = vshll.u32 %v3101_v49, 16  ;;  %3109 = vst [vmem:[#allocation1] ss:$4 sm:$0xff] %v3094_v14  ;;  %v2325_v14 = vsel %vm8593_vm1, %v2315_v41, %v2316_v6  ;;  %v8281_v6 = vrot.slane %v7060_v62, 4 }
 0x1d3   : > { %v3120_v32 = vrot.slane %v3118_v16, 5  ;;  %v3123_v47 = vrot.slane %v3121_v20, 5  ;;  %v3114_v57 = vrot.slane %v3112_v24, 5  ;;  %3011 = vrot.lane.b32.xlu0 %v7025_v61, %s5264_s29  ;;  %v2326_v12 = vsel %vm8594_vm14, %v2296_v40, %v2325_v14  ;;  %v2304_v24 = vpop.permute.xlu1 %2303  ;;  %v7109_v61 = vpop.permute.xlu2 %5007  ;;  %vm8604_vm14 = vmmov %vm8599_vm4 }
 0x1d4   : > { %v3117_v55 = vrot.slane %v3115_v19, 5  ;;  %v7086_v60 = vld [vmem:[#allocation1 + $0x20] sm:$0xff]  ;;  %v7088_v28 = vld [vmem:[#allocation1 + $0x28] sm:$0xff]  ;;  %v7090_v13 = vld [vmem:[#allocation1 + $0x30] sm:$0xff]  ;;  %v2355_v16 = vsel %vm8429_vm6, %v2326_v12, %v2354_v50  ;;  %v8288_v39 = vunpack.i.h.bf16 %v7109_v61  ;;  %v5009_v3 = vunpack.i.l.bf16 %v7109_v61 }
 0x1d5   : > { %v5081_v58 = vpack.i.bf16 %v3123_v47, %v3120_v32  ;;  %v7092_v35 = vld [vmem:[#allocation1 + $0x38] sm:$0xff]  ;;  %2356 = vst [vmem:[#allocation3 + $0x98] sm:$0x11] %v2355_v16  ;;  %v2319_v47 = vrot.slane %v2304_v24, 4 }
 0x1d6   : > { %8592 = vst [vmem:[#allocation17_spill] sm:$0xff] %v7092_v35  ;;  %v5076_v43 = vpack.i.bf16 %v3117_v55, %v3114_v57  ;;  %v2366_v50 = vld [vmem:[#allocation3 + $0xb8] sm:$0x11] }
 0x1d7   : > { %3357 = vst [vmem:[#allocation1 + $0x20] ss:$4 sm:$0xff] %v7027_v34  ;;  %5082 = vrot.lane.b32.xlu1 %v5081_v58, %s5266_s5  ;;  %v2333_v41 = vsel %vm8598_vm9, %v2319_v47, %v8281_v6  ;;  %v3233_v55 = vld [vmem:[#allocation2 + $0x14] sm:$0xf]  ;;  %vm8605_vm9 = vmmov %vm8599_vm4 }
 0x1d8   : > { %5077 = vrot.lane.b32.xlu2 %v5076_v43, %s5266_s5  ;;  %v2334_v58 = vsel %vm8599_vm4, %v2304_v24, %v2333_v41  ;;  %v2302_v24 = vpop.permute.xlu0 %2301 }
 0x1d9   : > { %v7103_v20 = vld [vmem:[#allocation1] sm:$0xff]  ;;  %v7105_v49 = vld [vmem:[#allocation1 + $0x8] sm:$0xff]  ;;  %v2367_v16 = vsel %vm8429_vm6, %v2334_v58, %v2366_v50  ;;  %v2318_v6 = vrot.slane %v2302_v24, 4  ;;  %v7136_v58 = vrot.slane %v8288_v39, 4 }
 0x1da   : > { %8595 = vst [vmem:[#allocation18_spill] sm:$0xff] %v7103_v20 }
 0x1db   : > { %8596 = vst [vmem:[#allocation19_spill] sm:$0xff] %v7105_v49  ;;  %v2310_v41 = vpop.permute.xlu1 %2309  ;;  %v7132_v50 = vpop.permute.xlu2 %5022 }
 0x1dc   : > { %3235 = vst [vmem:[#allocation1] ss:$4 sm:$0xff] %v6680_v52  ;;  %v2322_v36 = vrot.slane %v2310_v41, 4 }
 0x1dd   : > { %2368 = vst [vmem:[#allocation3 + $0xb8] sm:$0x11] %v2367_v16  ;;  %v2360_v16 = vld [vmem:[#allocation3 + $0xa8] sm:$0x11] }
 0x1de   : > { %v7111_v19 = vld [vmem:[#allocation1 + $0x20] sm:$0xff]  ;;  %v7113_v40 = vld [vmem:[#allocation1 + $0x28] sm:$0xff]  ;;  %v7115_v32 = vld [vmem:[#allocation1 + $0x30] sm:$0xff] }
 0x1df   : > { %v7117_v57 = vld [vmem:[#allocation1 + $0x38] sm:$0xff] }
 0x1e0   : > { %8597 = vst [vmem:[#allocation20_spill] sm:$0xff] %v7117_v57  ;;  %v2339_v57 = vsel %vm8593_vm1, %v2322_v36, %v8603_v10 }
 0x1e1   : > { %3487 = vst [vmem:[#allocation1 + $0x21] ss:$4 sm:$0xff] %v7027_v34  ;;  %v2340_v51 = vsel %vm8599_vm4, %v2310_v41, %v2339_v57 }
 0x1e3   : > { %v3239_v14 = vld [vmem:[#allocation1] sm:$0xff]  ;;  %v3241_v43 = vld [vmem:[#allocation1 + $0x8] sm:$0xff]  ;;  %v3243_v12 = vld [vmem:[#allocation1 + $0x10] sm:$0xff] }
 0x1e4   : > { %3261 = vrot.lane.b32.xlu2 %v3239_v14, %s5265_s30  ;;  %v3245_v48 = vld [vmem:[#allocation1 + $0x18] sm:$0xff]  ;;  %3263 = vrot.lane.b32.xlu0 %v3241_v43, %s5265_s30  ;;  %v2446_v14 = vrot.slane %v5009_v3, 4  ;;  %v8600_v43 = vrot.slane %v7013_v54, 4 }
 0x1e5   : > { %3256 = vst [vmem:[#allocation1] ss:$4 sm:$0xff] %v3233_v55  ;;  %3267 = vrot.lane.b32.xlu1 %v3245_v48, %s5265_s30  ;;  %v2331_v55 = vsel %vm8602_vm7, %v2318_v6, %v2319_v47  ;;  %v2375_v48 = vld [vmem:[#allocation3 + $0xd0] sm:$0x11]  ;;  %v5003_v47 = vpop.permute.xlu1 %5002  ;;  %vm8609_vm7 = vcmask 769024  }
 0x1e6   : > { %v2329_v34 = vsel %vm8601_vm15, %v8600_v43, %v2318_v6  ;;  %v2332_v39 = vsel %vm8605_vm9, %v2302_v24, %v2331_v55  ;;  %vm8608_vm15 = vmmov %vm8593_vm1  ;;  %v5005_v57 = vunpack.i.h.bf16 %v5003_v47  ;;  %v7164_v24 = vpop.permute.xlu2 %5027 }
 0x1e7   : > { %v2330_v45 = vsel %vm8604_vm14, %v7013_v54, %v2329_v34  ;;  %v2364_v43 = vsel %vm8429_vm6, %v2332_v39, %v2363_v37  ;;  %v2458_v10 = vsel %vm8608_vm15, %v2446_v14, %v7136_v58  ;;  %v2376_v54 = vsel %vm8429_vm6, %v2340_v51, %v2375_v48  ;;  %v2369_v51 = vld [vmem:[#allocation3 + $0xc0] sm:$0x11]  ;;  %vm8611_vm14 = vmmov %vm8593_vm1 }
 0x1e8   : > { %v2361_v20 = vsel %vm8429_vm6, %v2330_v45, %v2360_v16  ;;  %2365 = vst [vmem:[#allocation3 + $0xb0] sm:$0x11] %v2364_v43  ;;  %v2308_v45 = vpop.permute.xlu0 %2307  ;;  %v2459_v39 = vsel %vm8609_vm7, %v5009_v3, %v2458_v10  ;;  %v5004_v34 = vunpack.i.l.bf16 %v5003_v47  ;;  %v2372_v16 = vld [vmem:[#allocation3 + $0xc8] sm:$0x11]  ;;  %v5029_v48 = vunpack.i.l.bf16 %v7164_v24  ;;  %vm8612_vm9 = vmmov %vm8599_vm4 }
 0x1e9   : > { %2362 = vst [vmem:[#allocation3 + $0xa8] sm:$0x11] %v2361_v20  ;;  %v2321_v37 = vrot.slane %v2308_v45, 4  ;;  %v8610_v43 = vrot.slane %v7060_v62, 4  ;;  %v8613_v35 = vunpack.i.h.bf16 %v7164_v24  ;;  %vm8614_vm15 = vmmov %vm8593_vm1 }
 0x1ea   : > { %2377 = vst [vmem:[#allocation3 + $0xd0] sm:$0x11] %v2376_v54  ;;  %v2445_v54 = vrot.slane %v5005_v57, 4  ;;  %v2444_v47 = vrot.slane %v5004_v34, 4  ;;  %vm8615_vm7 = vmmov %vm8593_vm1 }
 0x1eb   : > { %v2335_v3 = vsel %vm8593_vm1, %v8610_v43, %v2321_v37  ;;  %v2337_v10 = vsel %vm8611_vm14, %v2321_v37, %v2322_v36  ;;  %v7182_v46 = vrot.slane %v8613_v35, 4  ;;  %vm8616_vm1 = vcmask 769024  }
 0x1ec   : > { %v7153_v18 = vld [vmem:[#allocation1] sm:$0xff]  ;;  %v7155_v6 = vld [vmem:[#allocation1 + $0x8] sm:$0xff]  ;;  %3265 = vrot.lane.b32.xlu0 %v3243_v12, %s5265_s30  ;;  %v2556_v12 = vld [vmem:[#allocation3 + $0xb8] sm:$0x22]  ;;  %v2336_v20 = vsel %vm8612_vm9, %v7060_v62, %v2335_v3  ;;  %v2338_v41 = vsel %vm8599_vm4, %v2308_v45, %v2337_v10  ;;  %v2454_v62 = vsel %vm8614_vm15, %v2444_v47, %v2445_v54  ;;  %v2456_v45 = vsel %vm8615_vm7, %v2445_v54, %v2446_v14 }
 0x1ed   : > { %8606 = vst [vmem:[#allocation21_spill] sm:$0xff] %v7153_v18  ;;  %v2483_v18 = vld [vmem:[#allocation3 + $0x98] sm:$0x11]  ;;  %v2557_v55 = vsel %vm8453_vm13, %v6615_v59, %v2556_v12  ;;  %v2370_v36 = vsel %vm8429_vm6, %v2336_v20, %v2369_v51  ;;  %v2373_v37 = vsel %vm8429_vm6, %v2338_v41, %v2372_v16  ;;  %v2486_v3 = vld [vmem:[#allocation3 + $0xa0] sm:$0x11]  ;;  %v2455_v12 = vsel %vm8616_vm1, %v5004_v34, %v2454_v62  ;;  %vm8617_vm14 = vmmov %vm8616_vm1 }
 0x1ee   : > { %8607 = vst [vmem:[#allocation22_spill] sm:$0xff] %v7155_v6  ;;  %v3352_v6 = vld [vmem:[#allocation2 + $0x14] sm:$0xf]  ;;  %v2457_v20 = vsel %vm8617_vm14, %v5005_v57, %v2456_v45  ;;  %v7194_v51 = vrot.slane %v5029_v48, 4  ;;  %v8618_v14 = vunpack.i.h.bf16 %v7132_v50  ;;  %vm8619_vm9 = vmmov %vm8615_vm7  ;;  %v8620_v62 = vunpack.i.l.bf16 %v7132_v50 }
 0x1ef   : > { %3354 = vst [vmem:[#allocation1] ss:$4 sm:$0xff] %v6680_v52  ;;  %vm8621_vm4 = vcmask 1039360   ;;  %vm8623_vm15 = vmmov %vm8615_vm7  ;;  %vm8624_vm7 = vcmask 777216   ;;  %vm8626_vm14 = vnez %v8294_v0 }
 0x1f0   : > { %v2489_v43 = vld [vmem:[#allocation3 + $0xa8] sm:$0x11]  ;;  %2558 = vst [vmem:[#allocation3 + $0xb8] sm:$0x22] %v2557_v55  ;;  %v2453_v54 = vrot.slane %v8618_v14, 4  ;;  %v2484_v55 = vsel %vm5580_vm3, %v2455_v12, %v2483_v18  ;;  %v2662_v57 = vsel %vm8619_vm9, %v7194_v51, %v7182_v46  ;;  %v2452_v45 = vrot.slane %v8620_v62, 4  ;;  %v7207_v12 = vpop.permute.xlu2 %2756  ;;  %vm8625_vm1 = vmmov %vm8624_vm7 }
 0x1f1   : > { %v2490_v35 = vsel %vm5580_vm3, %v2459_v39, %v2489_v43  ;;  %2371 = vst [vmem:[#allocation3 + $0xc0] sm:$0x11] %v2370_v36  ;;  %v2487_v39 = vsel %vm5580_vm3, %v2457_v20, %v2486_v3  ;;  %v2314_v43 = vpop.permute.xlu0 %2313  ;;  %v5018_v36 = vpop.permute.xlu1 %5017  ;;  %v2663_v3 = vsel %vm8621_vm4, %v5029_v48, %v2662_v57  ;;  %v8622_v14 = vrot.slane %v7084_v23, 4  ;;  %v2504_v48 = vld [vmem:[#allocation3 + $0xd0] sm:$0x11]  ;;  %vm8627_vm4 = vmmov %vm8619_vm9 }
 0x1f2   : > { %2491 = vst [vmem:[#allocation3 + $0xa8] sm:$0x11] %v2490_v35  ;;  %v2324_v35 = vrot.slane %v2314_v43, 4  ;;  %v5020_v18 = vunpack.i.h.bf16 %v5018_v36 }
 0x1f3   : > { %2374 = vst [vmem:[#allocation3 + $0xc8] sm:$0x11] %v2373_v37 }
 0x1f4   : > { %2485 = vst [vmem:[#allocation3 + $0x98] sm:$0x11] %v2484_v55  ;;  %v2341_v62 = vsel %vm8623_vm15, %v8622_v14, %v2324_v35  ;;  %v2343_v37 = vsel %vm8624_vm7, %v2314_v43, %v2324_v35  ;;  %v2451_v21 = vrot.slane %v5020_v18, 4  ;;  %v3127_v55 = vshll.u32 %v7069_v29, 16 }
 0x1f5   : > { %2488 = vst [vmem:[#allocation3 + $0xa0] sm:$0x11] %v2487_v39  ;;  %vm8628_vm15 = vcmask 769024  }
 0x1f6   : > { %v3358_v10 = vld [vmem:[#allocation1] sm:$0xff]  ;;  %v3359_v49 = vld [vmem:[#allocation1 + $0x8] sm:$0xff]  ;;  %v3360_v59 = vld [vmem:[#allocation1 + $0x10] sm:$0xff] }
 0x1f7   : > { %v3361_v41 = vld [vmem:[#allocation1 + $0x18] sm:$0xff]  ;;  %v3374_v16 = vshll.u32 %v3360_v59, 16  ;;  %v3370_v47 = vshll.u32 %v3358_v10, 16  ;;  %v3372_v34 = vshll.u32 %v3359_v49, 16  ;;  %v2381_v59 = vld [vmem:[#allocation3 + $0xe0] sm:$0x1]  ;;  %v5019_v10 = vunpack.i.l.bf16 %v5018_v36  ;;  %vm8629_vm7 = vmmov %vm8628_vm15 }
 0x1f8   : > { %v3376_v30 = vshll.u32 %v3361_v41, 16  ;;  %3367 = vst [vmem:[#allocation1] ss:$4 sm:$0xff] %v3352_v6  ;;  %v2378_v41 = vld [vmem:[#allocation3 + $0xd8] sm:$0x11]  ;;  %v3124_v49 = vshll.u32 %v7067_v56, 16  ;;  %v2382_v56 = vsel %vm8626_vm14, %v2343_v37, %v2381_v59  ;;  %v7243_v37 = vpop.permute.xlu2 %2744 }
 0x1f9   : > { %v5086_v20 = vpack.i.bf16 %v3372_v34, %v3370_v47  ;;  %v2450_v17 = vrot.slane %v5019_v10, 4  ;;  %v2695_v36 = vld [vmem:[#allocation3 + $0xb8] sm:$0x22]  ;;  %2383 = vst [vmem:[#allocation3 + $0xe0] sm:$0x1] %v2382_v56  ;;  %v2468_v34 = vsel %vm8627_vm4, %v2451_v21, %v2452_v45  ;;  %v3129_v59 = vrot.slane %v3127_v55, 5 }
 0x1fa   : > { %v5091_v6 = vpack.i.bf16 %v3376_v30, %v3374_v16  ;;  %v2342_v30 = vsel %vm8625_vm1, %v7084_v23, %v2341_v62  ;;  %v3126_v16 = vrot.slane %v3124_v49, 5  ;;  %v2696_v47 = vsel %vm5747_vm2, %v2663_v3, %v2695_v36  ;;  %v2501_v3 = vld [vmem:[#allocation3 + $0xc8] sm:$0x11]  ;;  %v7238_v49 = vpop.permute.xlu1 %2754  ;;  %vm8630_vm1 = vmmov %vm8627_vm4 }
 0x1fb   : > { %5087 = vrot.lane.b32.xlu0 %v5086_v20, %s5267_s6  ;;  %v2379_v39 = vsel %vm8429_vm6, %v2342_v30, %v2378_v41  ;;  %v2466_v57 = vsel %vm8619_vm9, %v2450_v17, %v2451_v21  ;;  %2697 = vst [vmem:[#allocation3 + $0xb8] sm:$0x22] %v2696_v47  ;;  %v2469_v43 = vsel %vm8629_vm7, %v5020_v18, %v2468_v34  ;;  %v2770_v20 = vrot.slane %v7207_v12, 4  ;;  %v5013_v41 = vpop.permute.xlu0 %5012  ;;  %vm8632_vm9 = vmmov %vm8629_vm7  ;;  %v2492_v34 = vld [vmem:[#allocation3 + $0xb0] sm:$0x11] }
 0x1fc   : > { %5092 = vrot.lane.b32.xlu2 %v5091_v6, %s5267_s6  ;;  %v2467_v23 = vsel %vm8628_vm15, %v5019_v10, %v2466_v57  ;;  %2380 = vst [vmem:[#allocation3 + $0xd8] sm:$0x11] %v2379_v39  ;;  %v2505_v6 = vsel %vm5580_vm3, %v2469_v43, %v2504_v48  ;;  %v5096_v21 = vpack.i.bf16 %v3129_v59, %v3126_v16  ;;  %v5015_v14 = vunpack.i.h.bf16 %v5013_v41  ;;  %vm8634_vm4 = vmmov %vm8629_vm7 }
 0x1fd   : > { %v2470_v18 = vsel %vm8630_vm1, %v2452_v45, %v2453_v54  ;;  %v2502_v10 = vsel %vm5580_vm3, %v2467_v23, %v2501_v3  ;;  %2506 = vst [vmem:[#allocation3 + $0xd0] sm:$0x11] %v2505_v6  ;;  %v5014_v62 = vunpack.i.l.bf16 %v5013_v41  ;;  %v8631_v36 = vunpack.i.h.bf16 %v7132_v50  ;;  %vm8635_vm15 = vmmov %vm8630_vm1  ;;  %v2495_v23 = vld [vmem:[#allocation3 + $0xb8] sm:$0x11]  ;;  %v2818_v41 = vld [vmem:[#allocation3 + $0xc0] sm:$0x44] }
 0x1fe   : > { %2503 = vst [vmem:[#allocation3 + $0xc8] sm:$0x11] %v2502_v10  ;;  %v2769_v30 = vrot.slane %v7238_v49, 4  ;;  %v2449_v56 = vrot.slane %v5015_v14, 4  ;;  %v8633_v16 = vunpack.i.l.bf16 %v7132_v50  ;;  %vm8636_vm7 = vnez %v8317_v22  ;;  %vm8638_vm14 = vmmov %vm8630_vm1 }
 0x1ff   : > { %v7230_v35 = vld [vmem:[#allocation1] sm:$0xff]  ;;  %v7232_v29 = vld [vmem:[#allocation1 + $0x8] sm:$0xff]  ;;  %v2448_v48 = vrot.slane %v5014_v62, 4  ;;  %v8639_v59 = vunpack.i.h.bf16 %v7109_v61  ;;  %vm8640_vm12 = vmmov %vm8634_vm4 }
 0x200   : > { %3484 = vst [vmem:[#allocation1 + $0x1] ss:$4 sm:$0xff] %v6680_v52  ;;  %v2472_v52 = vsel %vm8632_vm9, %v8631_v36, %v2453_v54  ;;  %v2471_v45 = vsel %vm8634_vm4, %v8633_v16, %v2470_v18  ;;  %v2510_v55 = vld [vmem:[#allocation3 + $0xe0] sm:$0x1]  ;;  %v2784_v47 = vsel %vm8635_vm15, %v2769_v30, %v2770_v20  ;;  %vm8637_vm9 = vmmov %vm8630_vm1  ;;  %v2464_v50 = vsel %vm8638_vm14, %v2449_v56, %v2450_v17 }
 0x201   : > { %v2511_v54 = vsel %vm8636_vm7, %v2472_v52, %v2510_v55  ;;  %v2460_v39 = vsel %vm8630_vm1, %v7136_v58, %v2448_v48  ;;  %v2462_v57 = vsel %vm8637_vm9, %v2448_v48, %v2449_v56  ;;  %vm8641_vm15 = vmmov %vm8634_vm4  ;;  %vm8642_vm7 = vcmask 1031168   ;;  %v2498_v52 = vld [vmem:[#allocation3 + $0xc0] sm:$0x11] }
 0x202   : > { %2512 = vst [vmem:[#allocation3 + $0xe0] sm:$0x1] %v2511_v54  ;;  %v2461_v6 = vsel %vm8634_vm4, %v8639_v59, %v2460_v39  ;;  %v2463_v3 = vsel %vm8640_vm12, %v5014_v62, %v2462_v57  ;;  %v2785_v58 = vsel %vm8642_vm7, %v7238_v49, %v2784_v47  ;;  %v2559_v62 = vld [vmem:[#allocation3 + $0xc0] sm:$0x22]  ;;  %v7283_v48 = vpop.permute.xlu1 %5042  ;;  %v2550_v54 = vld [vmem:[#allocation3 + $0xa8] sm:$0x22]  ;;  %v7290_v57 = vpop.permute.xlu2 %2750  ;;  %vm8643_vm12 = vmmov %vm8630_vm1 }
 0x203   : > { %5097 = vrot.lane.b32.xlu0 %v5096_v21, %s5266_s5  ;;  %v2507_v43 = vld [vmem:[#allocation3 + $0xd8] sm:$0x11]  ;;  %v2465_v21 = vsel %vm8641_vm15, %v5015_v14, %v2464_v50  ;;  %v2493_v36 = vsel %vm5580_vm3, %v2461_v6, %v2492_v34  ;;  %v2496_v61 = vsel %vm5580_vm3, %v2463_v3, %v2495_v23  ;;  %v7281_v56 = vpop.permute.xlu0 %5032  ;;  %v2819_v16 = vsel %vm5791_vm0, %v2785_v58, %v2818_v41  ;;  %v2553_v34 = vld [vmem:[#allocation3 + $0xb0] sm:$0x22]  ;;  %v3496_v41 = vld [vmem:[#allocation1 + $0x20] sm:$0xff] }
 0x204   : > { %v2508_v17 = vsel %vm5580_vm3, %v2471_v45, %v2507_v43  ;;  %v2499_v14 = vsel %vm5580_vm3, %v2465_v21, %v2498_v52  ;;  %2494 = vst [vmem:[#allocation3 + $0xb0] sm:$0x11] %v2493_v36  ;;  %v2562_v45 = vld [vmem:[#allocation3 + $0xc8] sm:$0x22]  ;;  %v5035_v55 = vunpack.i.h.bf16 %v7281_v56  ;;  %v5034_v47 = vunpack.i.l.bf16 %v7281_v56  ;;  %vm8644_vm14 = vmmov %vm8630_vm1  ;;  %v2565_v52 = vld [vmem:[#allocation3 + $0xd0] sm:$0x22] }
 0x205   : > { %2509 = vst [vmem:[#allocation3 + $0xd8] sm:$0x11] %v2508_v17  ;;  %v5045_v39 = vunpack.i.h.bf16 %v7283_v48  ;;  %v2560_v50 = vsel %vm8453_vm13, %v6617_v53, %v2559_v62  ;;  %v5044_v23 = vunpack.i.l.bf16 %v7283_v48  ;;  %v2563_v43 = vsel %vm8453_vm13, %v6619_v25, %v2562_v45  ;;  %vm8645_vm7 = vmmov %vm8630_vm1  ;;  %v2547_v17 = vld [vmem:[#allocation3 + $0xa0] sm:$0x22] }
 0x206   : > { %2497 = vst [vmem:[#allocation3 + $0xb8] sm:$0x11] %v2496_v61  ;;  %v7301_v59 = vrot.slane %v5035_v55, 4  ;;  %v2650_v6 = vrot.slane %v5034_v47, 4  ;;  %v2551_v53 = vsel %vm8453_vm13, %v6752_v11, %v2550_v54  ;;  %v2554_v25 = vsel %vm8453_vm13, %v6756_v38, %v2553_v34  ;;  %v2544_v11 = vld [vmem:[#allocation3 + $0x98] sm:$0x22] }
 0x207   : > { %v3488_v18 = vld [vmem:[#allocation1] sm:$0xff]  ;;  %v3490_v10 = vld [vmem:[#allocation1 + $0x8] sm:$0xff]  ;;  %2500 = vst [vmem:[#allocation3 + $0xc0] sm:$0x11] %v2499_v14  ;;  %v2647_v3 = vrot.slane %v5045_v39, 4  ;;  %v3492_v21 = vld [vmem:[#allocation1 + $0x10] sm:$0xff]  ;;  %v2548_v36 = vsel %vm8453_vm13, %v6750_v31, %v2547_v17  ;;  %v2566_v48 = vsel %vm8453_vm13, %v6628_v15, %v2565_v52  ;;  %v8646_v54 = vunpack.i.h.bf16 %v7164_v24 }
 0x208   : > { %3510 = vrot.lane.b32.xlu1 %v3488_v18, %s5268_s7  ;;  %3512 = vrot.lane.b32.xlu2 %v3490_v10, %s5268_s7  ;;  %2820 = vst [vmem:[#allocation3 + $0xc0] sm:$0x44] %v2819_v16  ;;  %v2646_v58 = vrot.slane %v5044_v23, 4  ;;  %v2664_v18 = vsel %vm8643_vm12, %v7182_v46, %v2650_v6  ;;  %v2666_v10 = vsel %vm8644_vm14, %v2650_v6, %v7301_v59  ;;  %v2571_v45 = vld [vmem:[#allocation3 + $0xe0] sm:$0x2]  ;;  %vm8647_vm9 = vcmask 1039360   ;;  %vm8651_vm14 = vmmov %vm8630_vm1 }
 0x209   : > { %2561 = vst [vmem:[#allocation3 + $0xc0] sm:$0x22] %v2560_v50  ;;  %v2545_v46 = vsel %vm8453_vm13, %v6748_v7, %v2544_v11  ;;  %v2665_v31 = vsel %vm8647_vm9, %v8646_v54, %v2664_v18  ;;  %vm8648_vm4 = vmmov %vm8647_vm9  ;;  %v2572_v34 = vsel %vm8509_vm8, %v6782_v5, %v2571_v45  ;;  %v3380_v24 = vshll.u32 %v7113_v40, 16  ;;  %v2812_v45 = vld [vmem:[#allocation3 + $0xb0] sm:$0x44] }
 0x20a   : > { %2564 = vst [vmem:[#allocation3 + $0xc8] sm:$0x22] %v2563_v43  ;;  %v2658_v38 = vsel %vm8630_vm1, %v2646_v58, %v2647_v3  ;;  %v7332_v7 = vpop.permute.xlu2 %2762  ;;  %v2667_v50 = vsel %vm8648_vm4, %v5034_v47, %v2666_v10  ;;  %v5048_v43 = vpop.permute.xlu1 %5047  ;;  %vm8649_vm15 = vmmov %vm8648_vm4 }
 0x20b   : > { %3271 = vrot.lane.b32.xlu0 %v7088_v28, %s5265_s30  ;;  %2552 = vst [vmem:[#allocation3 + $0xa8] sm:$0x22] %v2551_v53  ;;  %v2660_v28 = vsel %vm8645_vm7, %v2647_v3, %v7194_v51  ;;  %v5038_v61 = vpop.permute.xlu0 %5037  ;;  %v2568_v51 = vld [vmem:[#allocation3 + $0xd8] sm:$0x22]  ;;  %v2773_v15 = vrot.slane %v7332_v7, 4  ;;  %v5049_v53 = vunpack.i.l.bf16 %v5048_v43  ;;  %v2659_v47 = vsel %vm8649_vm15, %v5044_v23, %v2658_v38  ;;  %vm8650_vm12 = vmmov %vm8648_vm4 }
 0x20c   : > { %2555 = vst [vmem:[#allocation3 + $0xb0] sm:$0x22] %v2554_v25  ;;  %v5040_v14 = vunpack.i.h.bf16 %v5038_v61  ;;  %v5039_v62 = vunpack.i.l.bf16 %v5038_v61  ;;  %v2569_v16 = vsel %vm8453_vm13, %v6780_v26, %v2568_v51  ;;  %v5050_v26 = vunpack.i.h.bf16 %v5048_v43  ;;  %vm8652_vm7 = vmmov %vm8630_vm1 }
 0x20d   : > { %2546 = vst [vmem:[#allocation3 + $0x98] sm:$0x22] %v2545_v46  ;;  %v2661_v25 = vsel %vm8650_vm12, %v5045_v39, %v2660_v28  ;;  %v2767_v39 = vrot.slane %v7290_v57, 4  ;;  %vm8653_vm1 = vmmov %vm8648_vm4  ;;  %v2652_v28 = vrot.slane %v5049_v53, 4  ;;  %vm8655_vm4 = vcmask 1031168  }
 0x20e   : > { %2549 = vst [vmem:[#allocation3 + $0xa0] sm:$0x22] %v2548_v36  ;;  %v2645_v6 = vrot.slane %v5040_v14, 4  ;;  %v2644_v3 = vrot.slane %v5039_v62, 4  ;;  %vm8654_vm9 = vmmov %vm8653_vm1  ;;  %v3382_v36 = vshll.u32 %v7115_v32, 16 }
 0x20f   : > { %2567 = vst [vmem:[#allocation3 + $0xd0] sm:$0x22] %v2566_v48  ;;  %vm8656_vm15 = vmmov %vm8652_vm7 }
 0x210   : > { %3514 = vrot.lane.b32.xlu1 %v3492_v21, %s5268_s7  ;;  %3518 = vrot.lane.b32.xlu2 %v3496_v41, %s5268_s7  ;;  %v3378_v21 = vshll.u32 %v7111_v19, 16  ;;  %v2698_v41 = vld [vmem:[#allocation3 + $0xc0] sm:$0x22]  ;;  %2570 = vst [vmem:[#allocation3 + $0xd8] sm:$0x22] %v2569_v16  ;;  %v2654_v10 = vsel %vm8651_vm14, %v2644_v3, %v2645_v6  ;;  %v2656_v11 = vsel %vm8652_vm7, %v2645_v6, %v2646_v58  ;;  %v2653_v19 = vrot.slane %v5050_v26, 4  ;;  %vm8657_vm12 = vmmov %vm8652_vm7 }
 0x211   : > { %v2701_v5 = vld [vmem:[#allocation3 + $0xc8] sm:$0x22]  ;;  %v2699_v18 = vsel %vm5747_vm2, %v2665_v31, %v2698_v41  ;;  %2573 = vst [vmem:[#allocation3 + $0xe0] sm:$0x2] %v2572_v34  ;;  %v2657_v46 = vsel %vm8654_vm9, %v5040_v14, %v2656_v11  ;;  %v2792_v58 = vsel %vm8655_vm4, %v7332_v7, %v2773_v15  ;;  %v2668_v51 = vsel %vm8656_vm15, %v7301_v59, %v2652_v28  ;;  %vm8658_vm14 = vmmov %vm8653_vm1  ;;  %v2809_v11 = vld [vmem:[#allocation3 + $0xa8] sm:$0x44] }
 0x212   : > { %2700 = vst [vmem:[#allocation3 + $0xc0] sm:$0x22] %v2699_v18  ;;  %v2702_v40 = vsel %vm5747_vm2, %v2667_v50, %v2701_v5  ;;  %v2689_v23 = vld [vmem:[#allocation3 + $0xa8] sm:$0x22]  ;;  %v2670_v14 = vsel %vm8657_vm12, %v2652_v28, %v2653_v19  ;;  %vm8659_vm7 = vmmov %vm8653_vm1  ;;  %v5101_v54 = vpack.i.bf16 %v3380_v24, %v3378_v21  ;;  %v2672_v50 = vsel %vm8653_vm1, %v5050_v26, %v2653_v19  ;;  %v2749_v43 = vpop.permute.xlu1 %2748  ;;  %v7382_v6 = vpop.permute.xlu2 %5052  ;;  %v3494_v5 = vld [vmem:[#allocation1 + $0x18] sm:$0xff] }
 0x213   : > { %3273 = vrot.lane.b32.xlu0 %v7090_v13, %s5265_s30  ;;  %v2655_v13 = vsel %vm8653_vm1, %v5039_v62, %v2654_v10  ;;  %2703 = vst [vmem:[#allocation3 + $0xc8] sm:$0x22] %v2702_v40  ;;  %v2692_v17 = vld [vmem:[#allocation3 + $0xb0] sm:$0x22]  ;;  %v2690_v38 = vsel %vm5747_vm2, %v2659_v47, %v2689_v23  ;;  %v2830_v62 = vld [vmem:[#allocation3 + $0xe0] sm:$0x4]  ;;  %v2753_v48 = vpop.permute.xlu0 %2752  ;;  %v2671_v16 = vsel %vm8659_vm7, %v5049_v53, %v2670_v14  ;;  %v5055_v21 = vunpack.i.h.bf16 %v7382_v6  ;;  %vm8661_vm4 = vmmov %vm8657_vm12 }
 0x214   : > { %2691 = vst [vmem:[#allocation3 + $0xa8] sm:$0x22] %v2690_v38  ;;  %v2693_v61 = vsel %vm5747_vm2, %v2661_v25, %v2692_v17  ;;  %v2683_v52 = vld [vmem:[#allocation3 + $0x98] sm:$0x22]  ;;  %v2768_v34 = vrot.slane %v2753_v48, 4  ;;  %vm8660_vm9 = vnez %v8298_v2  ;;  %v5054_v24 = vunpack.i.l.bf16 %v7382_v6  ;;  %vm8662_vm15 = vmmov %vm8661_vm4 }
 0x215   : > { %2694 = vst [vmem:[#allocation3 + $0xb0] sm:$0x22] %v2693_v61  ;;  %v2686_v32 = vld [vmem:[#allocation3 + $0xa0] sm:$0x22]  ;;  %v2815_v53 = vld [vmem:[#allocation3 + $0xb8] sm:$0x44]  ;;  %vm8663_vm12 = vnez %v8324_v8 }
 0x216   : > { %v2687_v59 = vsel %vm5747_vm2, %v2657_v46, %v2686_v32  ;;  %v2704_v31 = vld [vmem:[#allocation3 + $0xd0] sm:$0x22]  ;;  %v2780_v47 = vsel %vm8661_vm4, %v2767_v39, %v2768_v34  ;;  %v2782_v25 = vsel %vm8662_vm15, %v2768_v34, %v2769_v30  ;;  %v2766_v2 = vrot.slane %v2749_v43, 4  ;;  %v3481_v28 = vld [vmem:[#allocation2 + $0x14] sm:$0xf] }
 0x217   : > { %2688 = vst [vmem:[#allocation3 + $0xa0] sm:$0x22] %v2687_v59  ;;  %v2707_v3 = vld [vmem:[#allocation3 + $0xd8] sm:$0x22]  ;;  %v7410_v40 = vrot.slane %v5055_v21, 4  ;;  %v3386_v6 = vshll.u32 %v7230_v35, 16 }
 0x218   : > { %3269 = vrot.lane.b32.xlu1 %v7086_v60, %s5265_s30  ;;  %3013 = vrot.lane.b32.xlu2 %v7006_v9, %s5264_s29  ;;  %v2684_v60 = vsel %vm5747_vm2, %v2655_v13, %v2683_v52  ;;  %v2669_v9 = vsel %vm8658_vm14, %v5035_v55, %v2668_v51  ;;  %v2831_v55 = vsel %vm8660_vm9, %v2792_v58, %v2830_v62  ;;  %v2710_v41 = vld [vmem:[#allocation3 + $0xe0] sm:$0x2]  ;;  %vm8664_vm14 = vcmask 1031168   ;;  %v3502_v17 = vld [vmem:[#allocation1 + $0x38] sm:$0xff]  ;;  %v2806_v58 = vld [vmem:[#allocation3 + $0xa0] sm:$0x44] }
 0x219   : > { %2685 = vst [vmem:[#allocation3 + $0x98] sm:$0x22] %v2684_v60  ;;  %v2705_v56 = vsel %vm5747_vm2, %v2669_v9, %v2704_v31  ;;  %v2708_v26 = vsel %vm5747_vm2, %v2671_v16, %v2707_v3  ;;  %v2711_v18 = vsel %vm8663_vm12, %v2672_v50, %v2710_v41  ;;  %v2781_v10 = vsel %vm8664_vm14, %v7290_v57, %v2780_v47  ;;  %vm8665_vm7 = vmmov %vm8664_vm14  ;;  %v2803_v46 = vld [vmem:[#allocation3 + $0x98] sm:$0x44]  ;;  %v3498_v60 = vld [vmem:[#allocation1 + $0x28] sm:$0xff] }
 0x21a   : > { %2706 = vst [vmem:[#allocation3 + $0xd0] sm:$0x22] %v2705_v56  ;;  %v2783_v44 = vsel %vm8665_vm7, %v2753_v48, %v2782_v25  ;;  %v2813_v19 = vsel %vm5791_vm0, %v2781_v10, %v2812_v45  ;;  %vm8666_vm2 = vmmov %vm8661_vm4  ;;  %v7412_v57 = vrot.slane %v5054_v24, 4  ;;  %v2827_v32 = vld [vmem:[#allocation3 + $0xd8] sm:$0x44]  ;;  %v8675_v50 = vld [vmem:[#allocation12_spill] sm:$0xff] }
 0x21b   : > { %3402 = vrot.lane.b32.xlu0 %v3382_v36, %s5267_s6  ;;  %2709 = vst [vmem:[#allocation3 + $0xd8] sm:$0x22] %v2708_v26  ;;  %v2816_v49 = vsel %vm5791_vm0, %v2783_v44, %v2815_v53  ;;  %v2778_v30 = vsel %vm8666_vm2, %v2766_v2, %v2767_v39  ;;  %vm8667_vm1 = vmmov %vm8665_vm7  ;;  %v2747_v13 = vpop.permute.xlu0 %2746  ;;  %v2764_v39 = vrot.slane %v7243_v37, 4  ;;  %v2761_v36 = vpop.permute.xlu1 %2760  ;;  %v2821_v3 = vld [vmem:[#allocation3 + $0xc8] sm:$0x44] }
 0x21c   : > { %2712 = vst [vmem:[#allocation3 + $0xe0] sm:$0x2] %v2711_v18  ;;  %v2779_v8 = vsel %vm8667_vm1, %v2749_v43, %v2778_v30  ;;  %v2765_v38 = vrot.slane %v2747_v13, 4  ;;  %vm8668_vm9 = vmmov %vm8666_vm2  ;;  %v2772_v14 = vrot.slane %v2761_v36, 4  ;;  %v3500_v18 = vld [vmem:[#allocation1 + $0x30] sm:$0xff] }
 0x21d   : > { %2832 = vst [vmem:[#allocation3 + $0xe0] sm:$0x4] %v2831_v55  ;;  %v2810_v23 = vsel %vm5791_vm0, %v2779_v8, %v2809_v11  ;;  %v2921_v61 = vsel %vm8668_vm9, %v7412_v57, %v7410_v40  ;;  %vm8669_vm4 = vmmov %vm8666_vm2 }
 0x21e   : > { %2814 = vst [vmem:[#allocation3 + $0xb0] sm:$0x44] %v2813_v19  ;;  %v2774_v52 = vsel %vm8669_vm4, %v2764_v39, %v2765_v38  ;;  %vm8670_vm15 = vmmov %vm8666_vm2 }
 0x21f   : > { %2817 = vst [vmem:[#allocation3 + $0xb8] sm:$0x44] %v2816_v49  ;;  %v2776_v51 = vsel %vm8670_vm15, %v2765_v38, %v2766_v2  ;;  %vm8671_vm12 = vmmov %vm8667_vm1 }
 0x220   : > { %5102 = vrot.lane.b32.xlu1 %v5101_v54, %s5267_s6  ;;  %3516 = vrot.lane.b32.xlu2 %v3494_v5, %s5268_s7  ;;  %2811 = vst [vmem:[#allocation3 + $0xa8] sm:$0x44] %v2810_v23  ;;  %v2775_v62 = vsel %vm8671_vm12, %v7243_v37, %v2774_v52  ;;  %vm8672_vm14 = vmmov %vm8667_vm1  ;;  %v3130_v37 = vshll.u32 %v7071_v27, 16  ;;  %v2824_v27 = vld [vmem:[#allocation3 + $0xd0] sm:$0x44] }
 0x221   : > { %3505 = vst [vmem:[#allocation1 + $0x1] ss:$4 sm:$0xff] %v3481_v28  ;;  %v2777_v48 = vsel %vm8672_vm14, %v2747_v13, %v2776_v51  ;;  %v2804_v9 = vsel %vm5791_vm0, %v2775_v62, %v2803_v46  ;;  %vm8673_vm7 = vmmov %vm8666_vm2  ;;  %vm8674_vm2 = vcmask 916480  }
 0x222   : > { %v2807_v16 = vsel %vm5791_vm0, %v2777_v48, %v2806_v58  ;;  %v2790_v45 = vsel %vm8673_vm7, %v2772_v14, %v2773_v15  ;;  %v2922_v54 = vsel %vm8674_vm2, %v5054_v24, %v2921_v61  ;;  %2805 = vst [vmem:[#allocation3 + $0x98] sm:$0x44] %v2804_v9  ;;  %v3132_v53 = vrot.slane %v3130_v37, 5  ;;  %vm8677_vm9 = vmmov %vm8669_vm4  ;;  %v8689_v37 = vld [vmem:[#allocation13_spill] sm:$0xff] }
 0x223   : > { %3524 = vrot.lane.b32.xlu0 %v3502_v17, %s5268_s7  ;;  %v2791_v59 = vsel %vm8667_vm1, %v2761_v36, %v2790_v45  ;;  %2808 = vst [vmem:[#allocation3 + $0xa0] sm:$0x44] %v2807_v16  ;;  %v2759_v7 = vpop.permute.xlu0 %2758  ;;  %vm8678_vm15 = vmmov %vm8667_vm1  ;;  %v8684_v36 = vld [vmem:[#allocation19_spill] sm:$0xff]  ;;  %v7475_v16 = vpop.permute.xlu2 %3003 }
 0x224   : > { %v2828_v31 = vsel %vm5791_vm0, %v2791_v59, %v2827_v32  ;;  %v2771_v56 = vrot.slane %v2759_v7, 4  ;;  %v5068_v26 = vpop.permute.xlu1 %5067  ;;  %vm8679_vm12 = vmmov %vm8667_vm1  ;;  %v3139_v61 = vshll.u32 %v8684_v36, 16  ;;  %v2969_v59 = vld [vmem:[#allocation3 + $0xe0] sm:$0x4] }
 0x225   : > { %2829 = vst [vmem:[#allocation3 + $0xd8] sm:$0x44] %v2828_v31  ;;  %v5070_v2 = vunpack.i.h.bf16 %v5068_v26  ;;  %v5069_v5 = vunpack.i.l.bf16 %v5068_v26  ;;  %vm8680_vm14 = vmmov %vm8669_vm4  ;;  %v2951_v23 = vld [vmem:[#allocation3 + $0xb0] sm:$0x44]  ;;  %v8690_v31 = vld [vmem:[#allocation17_spill] sm:$0xff] }
 0x226   : > { %v2954_v34 = vld [vmem:[#allocation3 + $0xb8] sm:$0x44]  ;;  %v2786_v24 = vsel %vm8677_vm9, %v2770_v20, %v2771_v56  ;;  %v2788_v41 = vsel %vm8669_vm4, %v2771_v56, %v2772_v14  ;;  %vm8681_vm7 = vmmov %vm8669_vm4 }
 0x227   : > { %v2955_v43 = vsel %vm5999_vm10, %v2922_v54, %v2954_v34  ;;  %v2787_v47 = vsel %vm8678_vm15, %v7207_v12, %v2786_v24  ;;  %v2789_v25 = vsel %vm8679_vm12, %v2759_v7, %v2788_v41  ;;  %v2906_v20 = vrot.slane %v5070_v2, 4  ;;  %v2948_v19 = vld [vmem:[#allocation3 + $0xa8] sm:$0x44]  ;;  %vm8682_vm1 = vmmov %vm8674_vm2  ;;  %v8692_v24 = vld [vmem:[#allocation18_spill] sm:$0xff] }
 0x228   : > { %3520 = vrot.lane.b32.xlu1 %v3498_v60, %s5268_s7  ;;  %3015 = vrot.lane.b32.xlu2 %v8675_v50, %s5264_s29  ;;  %2956 = vst [vmem:[#allocation3 + $0xb8] sm:$0x44] %v2955_v43  ;;  %v3506_v55 = vld [vmem:[#allocation1] sm:$0xff]  ;;  %v2822_v10 = vsel %vm5791_vm0, %v2787_v47, %v2821_v3  ;;  %v2825_v44 = vsel %vm5791_vm0, %v2789_v25, %v2824_v27  ;;  %v2905_v11 = vrot.slane %v5069_v5, 4  ;;  %vm8685_vm0 = vmmov %vm8669_vm4  ;;  %v3141_v7 = vrot.slane %v3139_v61, 5  ;;  %v8691_v3 = vld [vmem:[#allocation16_spill] sm:$0xff] }
 0x229   : > { %2823 = vst [vmem:[#allocation3 + $0xc8] sm:$0x44] %v2822_v10  ;;  %v2919_v49 = vsel %vm8681_vm7, %v2906_v20, %v7412_v57  ;;  %v8683_v57 = vld [vmem:[#allocation15_spill] sm:$0xff]  ;;  %vm8686_vm9 = vmmov %vm8685_vm0  ;;  %v2942_v60 = vld [vmem:[#allocation3 + $0x98] sm:$0x44]  ;;  %v3133_v56 = vshll.u32 %v8691_v3, 16 }
 0x22a   : > { %2826 = vst [vmem:[#allocation3 + $0xd0] sm:$0x44] %v2825_v44  ;;  %v2917_v12 = vsel %vm8680_vm14, %v2905_v11, %v2906_v20  ;;  %v2920_v4 = vsel %vm8682_vm1, %v5070_v2, %v2919_v49  ;;  %vm8687_vm4 = vmmov %vm8682_vm1  ;;  %v2945_v9 = vld [vmem:[#allocation3 + $0xa0] sm:$0x44]  ;;  %v3136_v41 = vshll.u32 %v8692_v24, 16  ;;  %v8696_v2 = vld [vmem:[#allocation8_spill] sm:$0xff] }
 0x22b   : > { %3526 = vrot.lane.b32.xlu0 %v3506_v55, %s5268_s7  ;;  %v5058_v30 = vpop.permute.xlu0 %5057  ;;  %v2918_v8 = vsel %vm8674_vm2, %v5069_v5, %v2917_v12  ;;  %v2952_v17 = vsel %vm5999_vm10, %v2920_v4, %v2951_v23  ;;  %vm8688_vm15 = vmmov %vm8682_vm1  ;;  %vm8697_vm2 = vnez %v8696_v2  ;;  %v3135_v20 = vrot.slane %v3133_v56, 5  ;;  %v3068_v56 = vld [vmem:[#allocation3 + $0xa8] sm:$0x88] }
 0x22c   : > { %v5060_v13 = vunpack.i.h.bf16 %v5058_v30  ;;  %v5059_v28 = vunpack.i.l.bf16 %v5058_v30  ;;  %v2949_v39 = vsel %vm5999_vm10, %v2918_v8, %v2948_v19  ;;  %2953 = vst [vmem:[#allocation3 + $0xb0] sm:$0x44] %v2952_v17  ;;  %v2966_v55 = vld [vmem:[#allocation3 + $0xd8] sm:$0x44]  ;;  %vm8693_vm12 = vmmov %vm8682_vm1  ;;  %v3138_v19 = vrot.slane %v3136_v41, 5  ;;  %v3508_v24 = vld [vmem:[#allocation1 + $0x8] sm:$0xff] }
 0x22d   : > { %2950 = vst [vmem:[#allocation3 + $0xa8] sm:$0x44] %v2949_v39  ;;  %v5073_v58 = vpop.permute.xlu1 %5072  ;;  %vm8694_vm14 = vmmov %vm8685_vm0 }
 0x22e   : > { %v2904_v38 = vrot.slane %v5060_v13, 4  ;;  %v2903_v46 = vrot.slane %v5059_v28, 4  ;;  %v5075_v14 = vunpack.i.h.bf16 %v5073_v58  ;;  %v5074_v62 = vunpack.i.l.bf16 %v5073_v58  ;;  %vm8695_vm7 = vmmov %vm8682_vm1 }
 0x22f   : > { %vm8698_vm1 = vmmov %vm8685_vm0 }
 0x230   : > { %3522 = vrot.lane.b32.xlu1 %v3500_v18, %s5268_s7  ;;  %3154 = vrot.lane.b32.xlu2 %v3132_v53, %s5266_s5  ;;  %v2913_v52 = vsel %vm8685_vm0, %v2903_v46, %v2904_v38  ;;  %v2915_v51 = vsel %vm8686_vm9, %v2904_v38, %v2905_v11  ;;  %v2912_v50 = vrot.slane %v5075_v14, 4  ;;  %v2911_v34 = vrot.slane %v5074_v62, 4  ;;  %vm8699_vm9 = vmmov %vm8685_vm0  ;;  %v2960_v39 = vld [vmem:[#allocation3 + $0xc8] sm:$0x44]  ;;  %v8703_v46 = vld [vmem:[#allocation21_spill] sm:$0xff] }
 0x231   : > { %v2914_v48 = vsel %vm8687_vm4, %v5059_v28, %v2913_v52  ;;  %v2916_v32 = vsel %vm8688_vm15, %v5060_v13, %v2915_v51  ;;  %v2963_v8 = vld [vmem:[#allocation3 + $0xd0] sm:$0x44]  ;;  %vm8700_vm15 = vmmov %vm8687_vm4  ;;  %v2957_v28 = vld [vmem:[#allocation3 + $0xc0] sm:$0x44]  ;;  %v3023_v52 = vrot.slane %v7475_v16, 4 }
 0x232   : > { %v2943_v45 = vsel %vm5999_vm10, %v2914_v48, %v2942_v60  ;;  %v2946_v54 = vsel %vm5999_vm10, %v2916_v32, %v2945_v9  ;;  %v2931_v26 = vsel %vm8693_vm12, %v5075_v14, %v2912_v50  ;;  %v2929_v47 = vsel %vm8694_vm14, %v2911_v34, %v2912_v50  ;;  %vm8701_vm12 = vmmov %vm8687_vm4  ;;  %v5078_v51 = vpop.permute.xlu2 %5077  ;;  %v3062_v32 = vld [vmem:[#allocation3 + $0x98] sm:$0x88]  ;;  %v3065_v60 = vld [vmem:[#allocation3 + $0xa0] sm:$0x88] }
 0x233   : > { %3021 = vrot.lane.b32.xlu0 %v8683_v57, %s5264_s29  ;;  %2944 = vst [vmem:[#allocation3 + $0x98] sm:$0x44] %v2943_v45  ;;  %v5063_v43 = vpop.permute.xlu0 %5062  ;;  %v2930_v25 = vsel %vm8695_vm7, %v5074_v62, %v2929_v47  ;;  %v2970_v5 = vsel %vm8697_vm2, %v2931_v26, %v2969_v59  ;;  %v8704_v57 = vld [vmem:[#allocation20_spill] sm:$0xff]  ;;  %v5080_v62 = vunpack.i.h.bf16 %v5078_v51  ;;  %v5079_v48 = vunpack.i.l.bf16 %v5078_v51  ;;  %vm8705_vm14 = vmmov %vm8685_vm0 }
 0x234   : > { %2947 = vst [vmem:[#allocation3 + $0xa0] sm:$0x44] %v2946_v54  ;;  %v5065_v27 = vunpack.i.h.bf16 %v5063_v43  ;;  %v5064_v53 = vunpack.i.l.bf16 %v5063_v43  ;;  %v2967_v10 = vsel %vm5999_vm10, %v2930_v25, %v2966_v55  ;;  %v3384_v58 = vshll.u32 %v8704_v57, 16  ;;  %vm8706_vm7 = vmmov %vm8685_vm0 }
 0x235   : > { %2971 = vst [vmem:[#allocation3 + $0xe0] sm:$0x4] %v2970_v5  ;;  %v3008_v4 = vpop.permute.xlu1 %3007  ;;  %v5106_v45 = vpack.i.bf16 %v3138_v19, %v3135_v20 }
 0x236   : > { %v2910_v18 = vrot.slane %v5065_v27, 4  ;;  %v2909_v44 = vrot.slane %v5064_v53, 4  ;;  %2968 = vst [vmem:[#allocation3 + $0xd8] sm:$0x44] %v2967_v10  ;;  %v3025_v38 = vrot.slane %v3008_v4, 4  ;;  %v5111_v54 = vpack.i.bf16 %v3386_v6, %v3384_v58 }
 0x238   : > { %3017 = vrot.lane.b32.xlu1 %v8689_v37, %s5264_s29  ;;  %3275 = vrot.lane.b32.xlu2 %v8690_v31, %s5265_s30  ;;  %v2927_v11 = vsel %vm8698_vm1, %v2910_v18, %v2911_v34  ;;  %v2923_v12 = vsel %vm8685_vm0, %v7410_v40, %v2909_v44  ;;  %v2925_v49 = vsel %vm8699_vm9, %v2909_v44, %v2910_v18  ;;  %v8702_v40 = vld [vmem:[#allocation14_spill] sm:$0xff]  ;;  %v3163_v34 = vrot.slane %v5080_v62, 4  ;;  %vm8710_vm1 = vmmov %vm8685_vm0 }
 0x239   : > { %v2928_v30 = vsel %vm8687_vm4, %v5065_v27, %v2927_v11  ;;  %v2924_v23 = vsel %vm8700_vm15, %v5055_v21, %v2923_v12  ;;  %v2926_v13 = vsel %vm8701_vm12, %v5064_v53, %v2925_v49  ;;  %vm8712_vm4 = vcmask 900096   ;;  %v8714_v44 = vld [vmem:[#allocation22_spill] sm:$0xff]  ;;  %vm8715_vm15 = vmmov %vm8685_vm0 }
 0x23a   : > { %v2964_v17 = vsel %vm5999_vm10, %v2928_v30, %v2963_v8  ;;  %v2958_v21 = vsel %vm5999_vm10, %v2924_v23, %v2957_v28  ;;  %v2961_v36 = vsel %vm5999_vm10, %v2926_v13, %v2960_v39  ;;  %vm8707_vm10 = vcmask 908288   ;;  %vm8716_vm12 = vmmov %vm8685_vm0 }
 0x23b   : > { %3160 = vrot.lane.b32.xlu0 %v3141_v7, %s5266_s5  ;;  %2965 = vst [vmem:[#allocation3 + $0xd0] sm:$0x44] %v2964_v17  ;;  %v3006_v61 = vpop.permute.xlu0 %3005  ;;  %vm8708_vm2 = vmmov %vm8707_vm10  ;;  %v3162_v7 = vrot.slane %v5079_v48, 4  ;;  %v3388_v28 = vshll.u32 %v7232_v29, 16 }
 0x23c   : > { %2959 = vst [vmem:[#allocation3 + $0xc0] sm:$0x44] %v2958_v21  ;;  %v3024_v14 = vrot.slane %v3006_v61, 4  ;;  %vm8711_vm9 = vmmov %vm8708_vm2 }
 0x23d   : > { %2962 = vst [vmem:[#allocation3 + $0xc8] sm:$0x44] %v2961_v36  ;;  %v3320_v36 = vld [vmem:[#allocation3 + $0xe4] sm:$0x11] }
 0x23e   : > { %v3033_v35 = vsel %vm8705_vm14, %v3023_v52, %v3024_v14  ;;  %v3035_v9 = vsel %vm8706_vm7, %v3024_v14, %v3025_v38  ;;  %v3262_v25 = vpop.permute.xlu2 %3261  ;;  %vm8717_vm14 = vmmov %vm8712_vm4 }
 0x23f   : > { %v3034_v15 = vsel %vm8707_vm10, %v7475_v16, %v3033_v35  ;;  %v3036_v59 = vsel %vm8708_vm2, %v3006_v61, %v3035_v9  ;;  %v3172_v16 = vsel %vm8710_vm1, %v3162_v7, %v3163_v34  ;;  %vm8718_vm7 = vmmov %vm8685_vm0  ;;  %v3281_v6 = vrot.slane %v3262_v25, 4 }
 0x240   : > { %3019 = vrot.lane.b32.xlu1 %v8702_v40, %s5264_s29  ;;  %3277 = vrot.lane.b32.xlu2 %v8703_v46, %s5265_s30  ;;  %v3063_v31 = vsel %vm5921_vm5, %v3034_v15, %v3062_v32  ;;  %v3066_v50 = vsel %vm5921_vm5, %v3036_v59, %v3065_v60  ;;  %v3173_v53 = vsel %vm8712_vm4, %v5079_v48, %v3172_v16  ;;  %vm8719_vm10 = vmmov %vm8708_vm2  ;;  %v3323_v15 = vld [vmem:[#allocation3 + $0xec] sm:$0x11]  ;;  %v3326_v59 = vld [vmem:[#allocation3 + $0xf4] sm:$0x11] }
 0x241   : > { %3064 = vst [vmem:[#allocation3 + $0x98] sm:$0x88] %v3063_v31  ;;  %vm8720_vm2 = vmmov %vm8712_vm4 }
 0x242   : > { %3067 = vst [vmem:[#allocation3 + $0xa0] sm:$0x88] %v3066_v50  ;;  %vm8721_vm1 = vmmov %vm8685_vm0 }
 0x243   : > { %v3010_v43 = vpop.permute.xlu0 %3009  ;;  %vm8724_vm4 = vmmov %vm8721_vm1 }
 0x244   : > { %v3026_v3 = vrot.slane %v3010_v43, 4 }
 0x246   : > { %v3037_v55 = vsel %vm8685_vm0, %v3025_v38, %v3026_v3  ;;  %vm8722_vm0 = vcmask 785408  }
 0x247   : > { %v3038_v27 = vsel %vm8711_vm9, %v3008_v4, %v3037_v55  ;;  %v3071_v4 = vld [vmem:[#allocation3 + $0xb0] sm:$0x88]  ;;  %vm8723_vm9 = vmmov %vm8721_vm1 }
 0x248   : > { %5107 = vrot.lane.b32.xlu1 %v5106_v45, %s5266_s5  ;;  %5112 = vrot.lane.b32.xlu2 %v5111_v54, %s5267_s6  ;;  %v3201_v41 = vld [vmem:[#allocation3 + $0x98] sm:$0x88]  ;;  %v3069_v47 = vsel %vm5921_vm5, %v3038_v27, %v3068_v56 }
 0x249   : > { %v7532_v26 = vpop.permute.xlu1 %5082  ;;  %v3202_v5 = vsel %vm6182_vm11, %v3173_v53, %v3201_v41  ;;  %3070 = vst [vmem:[#allocation3 + $0xa8] sm:$0x88] %v3069_v47  ;;  %v3204_v12 = vld [vmem:[#allocation3 + $0xa0] sm:$0x88] }
 0x24a   : > { %v5085_v18 = vunpack.i.h.bf16 %v7532_v26  ;;  %v5084_v10 = vunpack.i.l.bf16 %v7532_v26  ;;  %3203 = vst [vmem:[#allocation3 + $0x98] sm:$0x88] %v3202_v5 }
 0x24b   : > { %v7547_v19 = vpop.permute.xlu0 %3011 }
 0x24c   : > { %v7545_v20 = vrot.slane %v5085_v18, 4  ;;  %v3164_v11 = vrot.slane %v5084_v10, 4  ;;  %v3027_v49 = vrot.slane %v7547_v19, 4 }
 0x24e   : > { %v3174_v30 = vsel %vm8715_vm15, %v3163_v34, %v3164_v11  ;;  %v3176_v8 = vsel %vm8716_vm12, %v3164_v11, %v7545_v20  ;;  %v3039_v13 = vsel %vm8718_vm7, %v3026_v3, %v3027_v49  ;;  %vm8725_vm15 = vmmov %vm8722_vm0  ;;  %vm8728_vm7 = vcmask 777216  }
 0x24f   : > { %v3175_v23 = vsel %vm8717_vm14, %v5080_v62, %v3174_v30  ;;  %v3040_v17 = vsel %vm8719_vm10, %v3010_v43, %v3039_v13  ;;  %v3177_v38 = vsel %vm8720_vm2, %v5084_v10, %v3176_v8  ;;  %vm8726_vm12 = vmmov %vm8722_vm0  ;;  %v3074_v8 = vld [vmem:[#allocation3 + $0xb8] sm:$0x88] }
 0x250   : > { %3279 = vrot.lane.b32.xlu1 %v8714_v44, %s5265_s30  ;;  %3528 = vrot.lane.b32.xlu2 %v3508_v24, %s5268_s7  ;;  %v3205_v39 = vsel %vm6182_vm11, %v3175_v23, %v3204_v12  ;;  %v3207_v40 = vld [vmem:[#allocation3 + $0xa8] sm:$0x88]  ;;  %v3072_v46 = vsel %vm5921_vm5, %v3040_v17, %v3071_v4  ;;  %vm8727_vm14 = vmmov %vm8721_vm1 }
 0x251   : > { %3206 = vst [vmem:[#allocation3 + $0xa0] sm:$0x88] %v3205_v39  ;;  %v3208_v57 = vsel %vm6182_vm11, %v3177_v38, %v3207_v40  ;;  %vm8729_vm10 = vmmov %vm8721_vm1 }
 0x252   : > { %3073 = vst [vmem:[#allocation3 + $0xb0] sm:$0x88] %v3072_v46  ;;  %vm8730_vm2 = vmmov %vm8721_vm1 }
 0x253   : > { %3209 = vst [vmem:[#allocation3 + $0xa8] sm:$0x88] %v3208_v57 }
 0x256   : > { %v7567_v29 = vpop.permute.xlu2 %5092  ;;  %v3264_v58 = vpop.permute.xlu0 %3263 }
 0x257   : > { %v3282_v21 = vrot.slane %v3264_v58, 4  ;;  %v7573_v14 = vpop.permute.xlu1 %3267  ;;  %v5095_v35 = vunpack.i.h.bf16 %v7567_v29  ;;  %v5094_v9 = vunpack.i.l.bf16 %v7567_v29 }
 0x258   : > { %3408 = vrot.lane.b32.xlu1 %v3388_v28, %s5267_s6  ;;  %v3284_v32 = vrot.slane %v7573_v14, 4 }
 0x259   : > { %v3291_v61 = vsel %vm8721_vm1, %v3281_v6, %v3282_v21  ;;  %v7592_v43 = vrot.slane %v5095_v35, 4  ;;  %v3412_v3 = vrot.slane %v5094_v9, 4  ;;  %vm8731_vm1 = vmmov %vm8728_vm7 }
 0x25a   : > { %v3292_v52 = vsel %vm8722_vm0, %v3262_v25, %v3291_v61  ;;  %vm8732_vm0 = vmmov %vm8731_vm1 }
 0x25b   : > { %v3321_v51 = vsel %vm8429_vm6, %v3292_v52, %v3320_v36  ;;  %v3424_v56 = vsel %vm8727_vm14, %v3412_v3, %v7592_v43  ;;  %vm8737_vm14 = vcmask 900096  }
 0x25c   : > { %3322 = vst [vmem:[#allocation3 + $0xe4] sm:$0x11] %v3321_v51  ;;  %v3425_v24 = vsel %vm8728_vm7, %v5094_v9, %v3424_v56  ;;  %v3569_v9 = vld [vmem:[#allocation3 + $0xe4] sm:$0x22]  ;;  %vm8738_vm7 = vmmov %vm8730_vm2 }
 0x25e   : > { %v3266_v48 = vpop.permute.xlu0 %3265 }
 0x25f   : > { %v3283_v60 = vrot.slane %v3266_v48, 4 }
 0x261   : > { %v3293_v45 = vsel %vm8723_vm9, %v3282_v21, %v3283_v60  ;;  %v3295_v54 = vsel %vm8724_vm4, %v3283_v60, %v3284_v32  ;;  %vm8733_vm9 = vmmov %vm8730_vm2  ;;  %vm8734_vm4 = vcmask 908288  }
 0x262   : > { %v7575_v62 = vpop.permute.xlu2 %3512  ;;  %v3294_v31 = vsel %vm8725_vm15, %v3264_v58, %v3293_v45  ;;  %v3296_v50 = vsel %vm8726_vm12, %v3266_v48, %v3295_v54  ;;  %vm8735_vm15 = vmmov %vm8730_vm2  ;;  %v3578_v45 = vld [vmem:[#allocation3 + $0xfc] sm:$0x22]  ;;  %v3210_v54 = vld [vmem:[#allocation3 + $0xb0] sm:$0x88] }
 0x263   : > { %v3324_v34 = vsel %vm8429_vm6, %v3294_v31, %v3323_v15  ;;  %v3327_v7 = vsel %vm8429_vm6, %v3296_v50, %v3326_v59  ;;  %v3449_v13 = vld [vmem:[#allocation3 + $0xe4] sm:$0x11]  ;;  %v3531_v58 = vrot.slane %v7575_v62, 4  ;;  %vm8736_vm12 = vmmov %vm8730_vm2 }
 0x264   : > { %3325 = vst [vmem:[#allocation3 + $0xec] sm:$0x11] %v3324_v34 }
 0x265   : > { %3328 = vst [vmem:[#allocation3 + $0xf4] sm:$0x11] %v3327_v7 }
 0x26a   : > { %v7594_v16 = vpop.permute.xlu2 %3518 }
 0x26b   : > { %v3452_v44 = vld [vmem:[#allocation3 + $0xec] sm:$0x11]  ;;  %v3534_v6 = vrot.slane %v7594_v16, 4 }
 0x26c   : > { %v3455_v41 = vld [vmem:[#allocation3 + $0xf4] sm:$0x11] }
 0x26d   : > { %v5088_v55 = vpop.permute.xlu0 %5087  ;;  %v3456_v47 = vsel %vm5580_vm3, %v3425_v24, %v3455_v41 }
 0x26e   : > { %v5090_v27 = vunpack.i.h.bf16 %v5088_v55  ;;  %v5089_v53 = vunpack.i.l.bf16 %v5088_v55  ;;  %3457 = vst [vmem:[#allocation3 + $0xf4] sm:$0x11] %v3456_v47  ;;  %v3572_v47 = vld [vmem:[#allocation3 + $0xec] sm:$0x22] }
 0x270   : > { %v3411_v25 = vrot.slane %v5090_v27, 4  ;;  %v3410_v5 = vrot.slane %v5089_v53, 4 }
 0x272   : > { %v7601_v10 = vpop.permute.xlu2 %3013  ;;  %v3420_v12 = vsel %vm8729_vm10, %v3410_v5, %v3411_v25  ;;  %v3422_v30 = vsel %vm8730_vm2, %v3411_v25, %v3412_v3  ;;  %vm8739_vm10 = vmmov %vm8730_vm2  ;;  %v3575_v25 = vld [vmem:[#allocation3 + $0xf4] sm:$0x22] }
 0x273   : > { %v3028_v11 = vrot.slane %v7601_v10, 4  ;;  %v3421_v4 = vsel %vm8731_vm1, %v5089_v53, %v3420_v12  ;;  %v3423_v23 = vsel %vm8732_vm0, %v5090_v27, %v3422_v30  ;;  %vm8740_vm2 = vmmov %vm8737_vm14  ;;  %vm8741_vm1 = vcmask 769024  }
 0x274   : > { %v3450_v39 = vsel %vm5580_vm3, %v3421_v4, %v3449_v13  ;;  %v3453_v17 = vsel %vm5580_vm3, %v3423_v23, %v3452_v44  ;;  %vm8742_vm0 = vmmov %vm8741_vm1  ;;  %v3077_v4 = vld [vmem:[#allocation3 + $0xc0] sm:$0x88] }
 0x275   : > { %v3041_v28 = vsel %vm8733_vm9, %v3027_v49, %v3028_v11  ;;  %3451 = vst [vmem:[#allocation3 + $0xe4] sm:$0x11] %v3450_v39  ;;  %v7617_v40 = vpop.permute.xlu0 %5097  ;;  %vm8743_vm9 = vmmov %vm8738_vm7 }
 0x276   : > { %v3042_v38 = vsel %vm8734_vm4, %v7547_v19, %v3041_v28  ;;  %3454 = vst [vmem:[#allocation3 + $0xec] sm:$0x11] %v3453_v17  ;;  %v5100_v57 = vunpack.i.h.bf16 %v7617_v40  ;;  %v5099_v49 = vunpack.i.l.bf16 %v7617_v40  ;;  %vm8744_vm4 = vmmov %vm8738_vm7 }
 0x277   : > { %v3075_v46 = vsel %vm5921_vm5, %v3042_v38, %v3074_v8 }
 0x278   : > { %3076 = vst [vmem:[#allocation3 + $0xb8] sm:$0x88] %v3075_v46  ;;  %v7627_v21 = vrot.slane %v5100_v57, 4  ;;  %v3166_v19 = vrot.slane %v5099_v49, 4  ;;  %v8749_v46 = vld [vmem:[#allocation6_spill] sm:$0xff] }
 0x27a   : > { %v3511_v36 = vpop.permute.xlu1 %3510  ;;  %v3517_v61 = vpop.permute.xlu2 %3516  ;;  %v3178_v48 = vsel %vm8735_vm15, %v7545_v20, %v3166_v19  ;;  %v3180_v60 = vsel %vm8736_vm12, %v3166_v19, %v7627_v21  ;;  %vm8745_vm15 = vmmov %vm8744_vm4 }
 0x27b   : > { %v3530_v52 = vrot.slane %v3511_v36, 4  ;;  %v3533_v51 = vrot.slane %v3517_v61, 4  ;;  %v3179_v15 = vsel %vm8737_vm14, %v5085_v18, %v3178_v48  ;;  %v3181_v50 = vsel %vm8740_vm2, %v5099_v49, %v3180_v60  ;;  %vm8746_vm12 = vmmov %vm8742_vm0 }
 0x27c   : > { %v3211_v20 = vsel %vm6182_vm11, %v3179_v15, %v3210_v54  ;;  %vm8747_vm14 = vmmov %vm8742_vm0  ;;  %v3332_v54 = vld [vmem:[#allocation3 + $0x104] sm:$0x11] }
 0x27d   : > { %v3540_v59 = vsel %vm8738_vm7, %v3530_v52, %v3531_v58  ;;  %v3546_v31 = vsel %vm8739_vm10, %v3533_v51, %v3534_v6  ;;  %3212 = vst [vmem:[#allocation3 + $0xb0] sm:$0x88] %v3211_v20  ;;  %v3272_v3 = vpop.permute.xlu0 %3271  ;;  %vm8748_vm7 = vcmask 908288   ;;  %vm8750_vm10 = vnez %v8749_v46  ;;  %vm8751_vm2 = vmmov %vm8744_vm4  ;;  %v3335_v52 = vld [vmem:[#allocation3 + $0x10c] sm:$0x11] }
 0x27e   : > { %v3541_v34 = vsel %vm8741_vm1, %v3511_v36, %v3540_v59  ;;  %v3547_v7 = vsel %vm8742_vm0, %v3517_v61, %v3546_v31  ;;  %v3286_v17 = vrot.slane %v3272_v3, 4  ;;  %vm8752_vm1 = vcmask 785408   ;;  %vm8753_vm0 = vmmov %vm8751_vm2 }
 0x27f   : > { %v3570_v26 = vsel %vm8453_vm13, %v3541_v34, %v3569_v9  ;;  %v3579_v18 = vsel %vm8453_vm13, %v3547_v7, %v3578_v45  ;;  %v3213_v56 = vld [vmem:[#allocation3 + $0xb8] sm:$0x88]  ;;  %v3329_v45 = vld [vmem:[#allocation3 + $0xfc] sm:$0x11] }
 0x280   : > { %3571 = vst [vmem:[#allocation3 + $0xe4] sm:$0x22] %v3570_v26  ;;  %v3214_v55 = vsel %vm6182_vm11, %v3181_v50, %v3213_v56  ;;  %v4667_v26 = vld [vmem:[#allocation3 + $0x98] sm:$0xf]  ;;  %v4778_v56 = vld [vmem:[#allocation3 + $0x48] sm:$0xf0] }
 0x281   : > { %3580 = vst [vmem:[#allocation3 + $0xfc] sm:$0x22] %v3579_v18 }
 0x282   : > { %v3515_v27 = vpop.permute.xlu1 %3514  ;;  %v7651_v53 = vpop.permute.xlu2 %3015  ;;  %3215 = vst [vmem:[#allocation3 + $0xb8] sm:$0x88] %v3214_v55 }
 0x283   : > { %v3532_v24 = vrot.slane %v3515_v27, 4  ;;  %v3029_v41 = vrot.slane %v7651_v53, 4 }
 0x285   : > { %v3542_v5 = vsel %vm8743_vm9, %v3531_v58, %v3532_v24  ;;  %v3544_v44 = vsel %vm8744_vm4, %v3532_v24, %v3533_v51  ;;  %v3043_v12 = vsel %vm8745_vm15, %v3028_v11, %v3029_v41  ;;  %v7664_v13 = vpop.permute.xlu0 %3273  ;;  %vm8754_vm9 = vmmov %vm8753_vm0 }
 0x286   : > { %v3543_v30 = vsel %vm8746_vm12, %v7575_v62, %v3542_v5  ;;  %v3545_v8 = vsel %vm8747_vm14, %v3515_v27, %v3544_v44  ;;  %v3044_v23 = vsel %vm8748_vm7, %v7601_v10, %v3043_v12  ;;  %v3287_v38 = vrot.slane %v7664_v13, 4  ;;  %vm8755_vm4 = vmmov %vm8752_vm1  ;;  %v4788_v27 = vld [vmem:[#allocation3 + $0x9c] sm:$0xf] }
 0x287   : > { %v3604_v28 = vld [vmem:[#allocation3 + $0xe4] sm:$0xee]  ;;  %v3573_v39 = vsel %vm8453_vm13, %v3543_v30, %v3572_v47  ;;  %v3576_v62 = vsel %vm8453_vm13, %v3545_v8, %v3575_v25  ;;  %v3078_v58 = vsel %vm5921_vm5, %v3044_v23, %v3077_v4  ;;  %vm8756_vm15 = vmmov %vm8753_vm0  ;;  %vm8758_vm14 = vcmask 900096  }
 0x288   : > { %v3605_v11 = vsel %vm8750_vm10, 0, %v3604_v28  ;;  %v3613_v49 = vld [vmem:[#allocation3 + $0xfc] sm:$0xee]  ;;  %3574 = vst [vmem:[#allocation3 + $0xec] sm:$0x22] %v3573_v39  ;;  %v3301_v19 = vsel %vm8751_vm2, %v3286_v17, %v3287_v38  ;;  %vm8757_vm12 = vmmov %vm8752_vm1 }
 0x289   : > { %3606 = vst [vmem:[#allocation3 + $0xe4] sm:$0xee] %v3605_v11  ;;  %v3614_v10 = vsel %vm8750_vm10, 0, %v3613_v49  ;;  %v3302_v51 = vsel %vm8752_vm1, %v3272_v3, %v3301_v19  ;;  %v4591_v39 = vld [vmem:[#allocation3] sm:$0xf]  ;;  %vm8759_vm7 = vmmov %vm8753_vm0 }
 0x28a   : > { %3615 = vst [vmem:[#allocation3 + $0xfc] sm:$0xee] %v3614_v10  ;;  %v3270_v36 = vpop.permute.xlu1 %3269  ;;  %v7680_v61 = vpop.permute.xlu2 %3154  ;;  %v3336_v9 = vsel %vm8429_vm6, %v3302_v51, %v3335_v52  ;;  %v4769_v10 = vld [vmem:[#allocation3 + $0x4] sm:$0xf]  ;;  %v4675_v19 = vld [vmem:[#allocation3 + $0xa0] sm:$0xf]  ;;  %vm8760_vm2 = vmmov %vm8752_vm1 }
 0x28b   : > { %3577 = vst [vmem:[#allocation3 + $0xf4] sm:$0x22] %v3576_v62  ;;  %v3285_v48 = vrot.slane %v3270_v36, 4  ;;  %v3168_v60 = vrot.slane %v7680_v61, 4  ;;  %v4592_v62 = vor.u32 %v4778_v56, %v4591_v39  ;;  %vm3873_vm1 = vcmask 261120  }
 0x28c   : > { %3079 = vst [vmem:[#allocation3 + $0xc0] sm:$0x88] %v3078_v58  ;;  %v4601_v56 = vld [vmem:[#allocation3 + $0x54] sm:$0xf0] }
 0x28d   : > { %v3297_v15 = vsel %vm8753_vm0, %v3284_v32, %v3285_v48  ;;  %v3299_v59 = vsel %vm8754_vm9, %v3285_v48, %v3286_v17  ;;  %3337 = vst [vmem:[#allocation3 + $0x10c] sm:$0x11] %v3336_v9  ;;  %v3182_v50 = vsel %vm8756_vm15, %v7627_v21, %v3168_v60  ;;  %v7697_v34 = vpop.permute.xlu0 %3402  ;;  %v3338_v17 = vld [vmem:[#allocation3 + $0x114] sm:$0x11]  ;;  %vm8761_vm9 = vmmov %vm8753_vm0  ;;  %vm8763_vm15 = vcmask 777216  }
 0x28e   : > { %v3298_v31 = vsel %vm8755_vm4, %v7573_v14, %v3297_v15  ;;  %v3300_v20 = vsel %vm8757_vm12, %v3270_v36, %v3299_v59  ;;  %v3183_v21 = vsel %vm8758_vm14, %v5100_v57, %v3182_v50  ;;  %v3416_v12 = vrot.slane %v7697_v34, 4  ;;  %v4593_v57 = vld [vmem:[#allocation3 + $0x4c] sm:$0xf0]  ;;  %v4789_v15 = vld [vmem:[#allocation3 + $0xa4] sm:$0xf]  ;;  %vm8762_vm4 = vmmov %vm8753_vm0 }
 0x28f   : > { %v3607_v7 = vld [vmem:[#allocation3 + $0xec] sm:$0xee]  ;;  %v3330_v3 = vsel %vm8429_vm6, %v3298_v31, %v3329_v45  ;;  %v3333_v32 = vsel %vm8429_vm6, %v3300_v20, %v3332_v54  ;;  %v4596_v36 = vor.u32 %v4769_v10, %v4593_v57  ;;  %v7733_v59 = vld [vmem:[%s8217_s2] sm:$0xf]  ;;  %vm8764_vm12 = vmmov %vm8763_vm15 }
 0x290   : > { %v3608_v14 = vsel %vm8750_vm10, 0, %v3607_v7  ;;  %3331 = vst [vmem:[#allocation3 + $0xfc] sm:$0x11] %v3330_v3  ;;  %v4797_v18 = vld [vmem:[#allocation3 + $0xe0] sm:$0xf0]  ;;  %vm8765_vm14 = vmmov %vm8764_vm12 }
 0x291   : > { %3609 = vst [vmem:[#allocation3 + $0xec] sm:$0xee] %v3608_v14  ;;  %v4668_v55 = vor.u32 %v4797_v18, %v4667_v26  ;;  %v4669_v24 = vld [vmem:[#allocation3 + $0xe4] sm:$0xf0]  ;;  %v4779_v18 = vld [vmem:[#allocation3 + $0x50] sm:$0xf0] }
 0x292   : > { %v3610_v47 = vld [vmem:[#allocation3 + $0xf4] sm:$0xee]  ;;  %v5103_v25 = vpop.permute.xlu1 %5102  ;;  %v7708_v5 = vpop.permute.xlu2 %3275  ;;  %3334 = vst [vmem:[#allocation3 + $0x104] sm:$0x11] %v3333_v32  ;;  %v4672_v44 = vor.u32 %v4788_v27, %v4669_v24  ;;  %v4599_v24 = vld [vmem:[#allocation3 + $0x8] sm:$0xf] }
 0x293   : > { %v3611_v30 = vsel %vm8750_vm10, 0, %v3610_v47  ;;  %v3216_v8 = vld [vmem:[#allocation3 + $0xc0] sm:$0x88]  ;;  %v5105_v4 = vunpack.i.h.bf16 %v5103_v25  ;;  %v5104_v23 = vunpack.i.l.bf16 %v5103_v25  ;;  %v3288_v40 = vrot.slane %v7708_v5, 4  ;;  %3883 = vmatpush.bf16.msra.mxu0 %v4668_v55  ;;  %v4770_v47 = vld [vmem:[#allocation3 + $0xc] sm:$0xf] }
 0x294   : > { %3612 = vst [vmem:[#allocation3 + $0xf4] sm:$0xee] %v3611_v30  ;;  %v3217_v28 = vsel %vm6182_vm11, %v3183_v21, %v3216_v8  ;;  %3896 = vmatpush.bf16.msra.mxu1 %v4672_v44  ;;  %v3464_v51 = vld [vmem:[#allocation3 + $0x10c] sm:$0x11]  ;;  %v3581_v21 = vld [vmem:[#allocation3 + $0x104] sm:$0x22] }
 0x295   : > { %3218 = vst [vmem:[#allocation3 + $0xc0] sm:$0x88] %v3217_v28  ;;  %v3415_v11 = vrot.slane %v5105_v4, 4  ;;  %v3414_v49 = vrot.slane %v5104_v23, 4  ;;  %v3303_v58 = vsel %vm8759_vm7, %v3287_v38, %v3288_v40  ;;  %v7723_v48 = vpop.permute.xlu0 %3524  ;;  %v4683_v25 = vld [vmem:[#allocation3 + $0xa8] sm:$0xf]  ;;  %vm8766_vm7 = vmmov %vm8753_vm0 }
 0x296   : > { %v3304_v52 = vsel %vm8760_vm2, %v7664_v13, %v3303_v58  ;;  %vm8767_vm2 = vmmov %vm8753_vm0 }
 0x297   : > { %v3458_v9 = vld [vmem:[#allocation3 + $0xfc] sm:$0x11]  ;;  %v3426_v45 = vsel %vm8753_vm0, %v7592_v43, %v3414_v49  ;;  %v3428_v54 = vsel %vm8761_vm9, %v3414_v49, %v3415_v11  ;;  %3884 = vmatpush.bf16.msra.mxu0 %v4592_v62  ;;  %v3339_v38 = vsel %vm8429_vm6, %v3304_v52, %v3338_v17  ;;  %v3430_v13 = vsel %vm8762_vm4, %v3415_v11, %v3416_v12  ;;  %v4790_v49 = vld [vmem:[#allocation3 + $0xac] sm:$0xf]  ;;  %vm8770_vm4 = vmmov %vm8767_vm2 }
 0x298   : > { %v3427_v43 = vsel %vm8763_vm15, %v5095_v35, %v3426_v45  ;;  %v3429_v31 = vsel %vm8764_vm12, %v5104_v23, %v3428_v54  ;;  %v4798_v50 = vld [vmem:[#allocation3 + $0xe8] sm:$0xf0]  ;;  %v4677_v20 = vld [vmem:[#allocation3 + $0xec] sm:$0xf0]  ;;  %3897 = vmatpush.bf16.msra.mxu1 %v4596_v36  ;;  %3340 = vst [vmem:[#allocation3 + $0x114] sm:$0x11] %v3339_v38  ;;  %v3431_v7 = vsel %vm8765_vm14, %v5105_v4, %v3430_v13  ;;  %vm8772_vm12 = vmmov %vm8767_vm2 }
 0x299   : > { %v3459_v3 = vsel %vm5580_vm3, %v3427_v43, %v3458_v9  ;;  %v3461_v32 = vld [vmem:[#allocation3 + $0x104] sm:$0x11]  ;;  %v4676_v26 = vor.u32 %v4798_v50, %v4675_v19  ;;  %v4680_v14 = vor.u32 %v4789_v15, %v4677_v20  ;;  %v3465_v29 = vsel %vm5580_vm3, %v3431_v7, %v3464_v51  ;;  %v3341_v4 = vld [vmem:[#allocation3 + $0x11c] sm:$0x11]  ;;  %v4607_v19 = vld [vmem:[#allocation3 + $0x10] sm:$0xf] }
 0x29a   : > { %3460 = vst [vmem:[#allocation3 + $0xfc] sm:$0x11] %v3459_v3  ;;  %v3462_v35 = vsel %vm5580_vm3, %v3429_v31, %v3461_v32  ;;  %v7749_v55 = vpop.permute.xlu1 %3520  ;;  %v7751_v27 = vpop.permute.xlu2 %3277  ;;  %4741 = vmatmul.msk.bf16.vlgmr.msra.gmra.mxu0 %vm3873_vm1, %v7733_v59  ;;  %v4600_v17 = vor.u32 %v4779_v18, %v4599_v24  ;;  %v4604_v11 = vor.u32 %v4770_v47, %v4601_v56  ;;  %vm8768_vm0 = vcmask 769024   ;;  %v4780_v36 = vld [vmem:[#allocation3 + $0x58] sm:$0xf0]  ;;  %vm8773_vm14 = vmmov %vm8767_vm2 }
 0x29b   : > { %3463 = vst [vmem:[#allocation3 + $0x104] sm:$0x11] %v3462_v35  ;;  %v3535_v44 = vrot.slane %v7749_v55, 4  ;;  %3909 = vmatpush.bf16.msra.mxu2 %v4676_v26  ;;  %3922 = vmatpush.bf16.msra.mxu3 %v4680_v14  ;;  %v3289_v30 = vrot.slane %v7751_v27, 4  ;;  %v4799_v8 = vld [vmem:[#allocation3 + $0xf0] sm:$0xf0]  ;;  %v4608_v43 = vor.u32 %v4780_v36, %v4607_v19  ;;  %vm8771_vm15 = vmmov %vm8768_vm0 }
 0x29c   : > { %v4684_v23 = vor.u32 %v4799_v8, %v4683_v25  ;;  %v4685_v57 = vld [vmem:[#allocation3 + $0xf4] sm:$0xf0]  ;;  %4742 = vmatmul.msk.bf16.vlgmr.msra.gmra.mxu1 %vm3873_vm1, %v7733_v59  ;;  %3466 = vst [vmem:[#allocation3 + $0x10c] sm:$0x11] %v3465_v29  ;;  %vm8769_vm9 = vcmask 785408   ;;  %v3537_v45 = vrot.slane %v7723_v48, 4 }
 0x29d   : > { %v3548_v28 = vsel %vm8766_vm7, %v3534_v6, %v3535_v44  ;;  %v3305_v39 = vsel %vm8767_vm2, %v3288_v40, %v3289_v30  ;;  %v4688_v58 = vor.u32 %v4790_v49, %v4685_v57  ;;  %v4609_v6 = vld [vmem:[#allocation3 + $0x5c] sm:$0xf0]  ;;  %v7771_v52 = vpop.permute.xlu0 %3526  ;;  %v4691_v9 = vld [vmem:[#allocation3 + $0xb0] sm:$0xf]  ;;  %v4771_v54 = vld [vmem:[#allocation3 + $0x14] sm:$0xf] }
 0x29e   : > { %v3549_v62 = vsel %vm8768_vm0, %v7594_v16, %v3548_v28  ;;  %v3306_v10 = vsel %vm8769_vm9, %v7708_v5, %v3305_v39  ;;  %3935 = vmatpush.bf16.msrb.mxu0 %v4684_v23  ;;  %v4791_v16 = vld [vmem:[#allocation3 + $0xb4] sm:$0xf]  ;;  %v3538_v5 = vrot.slane %v7771_v52, 4  ;;  %v3590_v15 = vld [vmem:[#allocation3 + $0x11c] sm:$0x22]  ;;  %v4612_v31 = vor.u32 %v4771_v54, %v4609_v6  ;;  %vm8774_vm7 = vmmov %vm8768_vm0 }
 0x29f   : > { %v3582_v51 = vsel %vm8453_vm13, %v3549_v62, %v3581_v21  ;;  %v3342_v40 = vsel %vm8429_vm6, %v3306_v10, %v3341_v4  ;;  %3910 = vmatpush.bf16.msra.mxu2 %v4600_v17  ;;  %3923 = vmatpush.bf16.msra.mxu3 %v4604_v11  ;;  %v4781_v29 = vld [vmem:[#allocation3 + $0x60] sm:$0xf0]  ;;  %v4617_v35 = vld [vmem:[#allocation3 + $0x64] sm:$0xf0]  ;;  %v3584_v24 = vld [vmem:[#allocation3 + $0x10c] sm:$0x22] }
 0x2a0   : > { %3583 = vst [vmem:[#allocation3 + $0x104] sm:$0x22] %v3582_v51  ;;  %3948 = vmatpush.bf16.msrb.mxu1 %v4688_v58  ;;  %v3554_v50 = vsel %vm8770_vm4, %v3537_v45, %v3538_v5  ;;  %v4615_v8 = vld [vmem:[#allocation3 + $0x18] sm:$0xf]  ;;  %v4772_v4 = vld [vmem:[#allocation3 + $0x1c] sm:$0xf]  ;;  %vm8775_vm2 = vmmov %vm8768_vm0 }
 0x2a1   : > { %3343 = vst [vmem:[#allocation3 + $0x11c] sm:$0x11] %v3342_v40  ;;  %v4800_v38 = vld [vmem:[#allocation3 + $0xf8] sm:$0xf0]  ;;  %v4693_v13 = vld [vmem:[#allocation3 + $0xfc] sm:$0xf0]  ;;  %v3555_v26 = vsel %vm8771_vm15, %v7723_v48, %v3554_v50  ;;  %v4616_v28 = vor.u32 %v4781_v29, %v4615_v8  ;;  %v4620_v39 = vor.u32 %v4772_v4, %v4617_v35  ;;  %vm8776_vm0 = vmmov %vm8770_vm4 }
 0x2a2   : > { %v3523_v20 = vpop.permute.xlu1 %3522  ;;  %4743 = vmatmul.msk.bf16.vlgmr.msra.gmra.mxu2 %vm3873_vm1, %v7733_v59  ;;  %4744 = vmatmul.msk.bf16.vlgmr.msra.gmra.mxu3 %vm3873_vm1, %v7733_v59  ;;  %v4692_v7 = vor.u32 %v4800_v38, %v4691_v9  ;;  %v4696_v3 = vor.u32 %v4791_v16, %v4693_v13  ;;  %v7786_v32 = vpop.permute.xlu2 %5112  ;;  %v3591_v21 = vsel %vm8453_vm13, %v3555_v26, %v3590_v15  ;;  %v3467_v17 = vld [vmem:[#allocation3 + $0x114] sm:$0x11]  ;;  %v3587_v11 = vld [vmem:[#allocation3 + $0x114] sm:$0x22]  ;;  %vm8777_vm9 = vmmov %vm8776_vm0  ;;  %vm8778_vm4 = vcmask 777216  }
 0x2a3   : > { %v3536_v14 = vrot.slane %v3523_v20, 4  ;;  %3936 = vmatpush.bf16.msrb.mxu0 %v4608_v43  ;;  %v5115_v18 = vunpack.i.h.bf16 %v7786_v32  ;;  %v5114_v56 = vunpack.i.l.bf16 %v7786_v32  ;;  %3592 = vst [vmem:[#allocation3 + $0x11c] sm:$0x22] %v3591_v21  ;;  %vm8779_vm15 = vmmov %vm8778_vm4  ;;  %v3675_v54 = vld [vmem:[%s8218_s3] sm:$0xff]  ;;  %v3080_v15 = vld [vmem:[#allocation3 + $0xc8] sm:$0x88] }
 0x2a4   : > { %3961 = vmatpush.bf16.msrb.mxu2 %v4692_v7  ;;  %3974 = vmatpush.bf16.msrb.mxu3 %v4696_v3  ;;  %v8781_v3 = vld [vmem:[#allocation4_spill] sm:$0xff] }
 0x2a5   : > { %v3550_v47 = vsel %vm8772_vm12, %v3535_v44, %v3536_v14  ;;  %3949 = vmatpush.bf16.msrb.mxu1 %v4612_v31  ;;  %v7797_v48 = vrot.slane %v5115_v18, 4  ;;  %v3417_v25 = vrot.slane %v5114_v56, 4  ;;  %v3552_v23 = vsel %vm8773_vm14, %v3536_v14, %v3537_v45  ;;  %v7803_v44 = vpop.permute.xlu0 %3021 }
 0x2a6   : > { %v3551_v57 = vsel %vm8774_vm7, %v7749_v55, %v3550_v47  ;;  %v3553_v49 = vsel %vm8775_vm2, %v3523_v20, %v3552_v23  ;;  %v3089_v55 = vld [vmem:[#allocation3 + $0xe0] sm:$0x8]  ;;  %v3032_v9 = vrot.slane %v7803_v44, 4  ;;  %vm8780_vm12 = vcmask 908288   ;;  %vm8783_vm7 = vmmov %vm8776_vm0  ;;  %v4699_v47 = vld [vmem:[#allocation3 + $0xb8] sm:$0xf] }
 0x2a7   : > { %v3616_v62 = vld [vmem:[#allocation3 + $0x104] sm:$0xee]  ;;  %v3585_v10 = vsel %vm8453_vm13, %v3551_v57, %v3584_v24  ;;  %v3434_v58 = vsel %vm8776_vm0, %v3417_v25, %v7797_v48  ;;  %v3432_v19 = vsel %vm8777_vm9, %v3416_v12, %v3417_v25  ;;  %v3588_v45 = vsel %vm8453_vm13, %v3553_v49, %v3587_v11  ;;  %vm8784_vm2 = vmmov %vm8776_vm0  ;;  %v4623_v11 = vld [vmem:[#allocation3 + $0x20] sm:$0xf] }
 0x2a8   : > { %v3617_v36 = vsel %vm8750_vm10, 0, %v3616_v62  ;;  %3586 = vst [vmem:[#allocation3 + $0x10c] sm:$0x22] %v3585_v10  ;;  %v3470_v6 = vld [vmem:[#allocation3 + $0x11c] sm:$0x11]  ;;  %v3435_v51 = vsel %vm8778_vm4, %v5114_v56, %v3434_v58  ;;  %3962 = vmatpush.bf16.msrb.mxu2 %v4616_v28  ;;  %3975 = vmatpush.bf16.msrb.mxu3 %v4620_v39  ;;  %v3433_v40 = vsel %vm8779_vm15, %v7697_v34, %v3432_v19  ;;  %v5269_v31 = vmov 0   ;;  %vm8786_vm9 = vmmov %vm8780_vm12 }
 0x2a9   : > { %3618 = vst [vmem:[#allocation3 + $0x104] sm:$0xee] %v3617_v36  ;;  %v3471_v16 = vsel %vm5580_vm3, %v3435_v51, %v3470_v6  ;;  %v3468_v12 = vsel %vm5580_vm3, %v3433_v40, %v3467_v17  ;;  %v3596_v34 = vld [vmem:[#allocation3 + $0x12c] sm:$0x2]  ;;  %v3051_v43 = vsel %vm8780_vm12, %v7803_v44, %v3032_v9  ;;  %5116 = vset.pattern.permute.xlu2 %v5269_v31  ;;  %v3593_v56 = vld [vmem:[#allocation3 + $0x124] sm:$0x22]  ;;  %vm8790_vm15 = vmmov %vm8784_vm2 }
 0x2aa   : > { %3472 = vst [vmem:[#allocation3 + $0x11c] sm:$0x11] %v3471_v16  ;;  %v7827_v38 = vpop.permute.xlu1 %3017  ;;  %4745 = vmatmul.msk.bf16.vlgmr.msrb.gmra.mxu0 %vm3873_vm1, %v7733_v59  ;;  %v3529_v13 = vpop.permute.xlu2 %3528  ;;  %v3625_v20 = vld [vmem:[#allocation3 + $0x11c] sm:$0xee]  ;;  %vm8782_vm14 = vnez %v8781_v3  ;;  %3678 = vperm.xlu2 %5116, %v3675_v54   ;;  %vm8785_vm0 = vcmask 769024   ;;  %vm8791_vm12 = vmmov %vm8786_vm9 }
 0x2ab   : > { %3469 = vst [vmem:[#allocation3 + $0x114] sm:$0x11] %v3468_v12  ;;  %v3030_v50 = vrot.slane %v7827_v38, 4  ;;  %v3539_v7 = vrot.slane %v3529_v13, 4  ;;  %v3090_v26 = vsel %vm8782_vm14, %v3051_v43, %v3089_v55  ;;  %5252 = vset.pattern.permute.xlu0 %v5269_v31  ;;  %v3626_v14 = vsel %vm8750_vm10, 0, %v3625_v20  ;;  %vm8787_vm4 = vmmov %vm8785_vm0  ;;  %v8793_v31 = vld [vmem:[#allocation10_spill] sm:$0xff] }
 0x2ac   : > { %3589 = vst [vmem:[#allocation3 + $0x114] sm:$0x22] %v3588_v45  ;;  %4746 = vmatmul.msk.bf16.vlgmr.msrb.gmra.mxu1 %vm3873_vm1, %v7733_v59  ;;  %v4792_v28 = vld [vmem:[#allocation3 + $0xbc] sm:$0xf]  ;;  %v4782_v49 = vld [vmem:[#allocation3 + $0x68] sm:$0xf0]  ;;  %vm8792_vm14 = vmmov %vm8786_vm9 }
 0x2ad   : > { %v3045_v29 = vsel %vm8783_vm7, %v3029_v41, %v3030_v50  ;;  %3627 = vst [vmem:[#allocation3 + $0x11c] sm:$0xee] %v3626_v14  ;;  %v3556_v35 = vsel %vm8784_vm2, %v3538_v5, %v3539_v7  ;;  %v3558_v21 = vsel %vm8785_vm0, %v3529_v13, %v3539_v7  ;;  %v7855_v4 = vpop.permute.xlu0 %3160  ;;  %v4625_v58 = vld [vmem:[#allocation3 + $0x6c] sm:$0xf0]  ;;  %v3086_v6 = vld [vmem:[#allocation3 + $0xd8] sm:$0x88]  ;;  %v4624_v40 = vor.u32 %v4782_v49, %v4623_v11 }
 0x2ae   : > { %v3046_v24 = vsel %vm8786_vm9, %v7651_v53, %v3045_v29  ;;  %v3557_v25 = vsel %vm8787_vm4, %v7771_v52, %v3556_v35  ;;  %v3597_v8 = vsel %vm8509_vm8, %v3558_v21, %v3596_v34  ;;  %3091 = vst [vmem:[#allocation3 + $0xe0] sm:$0x8] %v3090_v26  ;;  %v3171_v53 = vrot.slane %v7855_v4, 4  ;;  %v3083_v36 = vld [vmem:[#allocation3 + $0xd0] sm:$0x88]  ;;  %vm8789_vm8 = vmmov %vm8784_vm2  ;;  %v8795_v7 = vld [vmem:[#allocation5_spill] sm:$0xff] }
 0x2af   : > { %v3619_v41 = vld [vmem:[#allocation3 + $0x10c] sm:$0xee]  ;;  %v3081_v23 = vsel %vm5921_vm5, %v3046_v24, %v3080_v15  ;;  %v3594_v5 = vsel %vm8453_vm13, %v3557_v25, %v3593_v56  ;;  %3598 = vst [vmem:[#allocation3 + $0x12c] sm:$0x2] %v3597_v8  ;;  %vm8788_vm13 = vcmask 900096   ;;  %vm8794_vm7 = vnez %v8793_v31 }
 0x2b0   : > { %v3620_v57 = vsel %vm8750_vm10, 0, %v3619_v41  ;;  %3082 = vst [vmem:[#allocation3 + $0xc8] sm:$0x88] %v3081_v23  ;;  %v4801_v52 = vld [vmem:[#allocation3 + $0x100] sm:$0xf0]  ;;  %v3190_v19 = vsel %vm8788_vm13, %v7855_v4, %v3171_v53  ;;  %vm8796_vm2 = vnez %v8795_v7  ;;  %vm8800_vm9 = vmmov %vm8788_vm13 }
 0x2b1   : > { %3621 = vst [vmem:[#allocation3 + $0x10c] sm:$0xee] %v3620_v57  ;;  %v4700_v1 = vor.u32 %v4801_v52, %v4699_v47  ;;  %v4701_v39 = vld [vmem:[#allocation3 + $0x104] sm:$0xf0]  ;;  %v4773_v16 = vld [vmem:[#allocation3 + $0x24] sm:$0xf]  ;;  %vm8801_vm4 = vmmov %vm8800_vm9 }
 0x2b2   : > { %v3020_v17 = vpop.permute.xlu1 %3019  ;;  %4747 = vmatmul.msk.bf16.vlgmr.msrb.gmra.mxu2 %vm3873_vm1, %v7733_v59  ;;  %4748 = vmatmul.msk.bf16.vlgmr.msrb.gmra.mxu3 %vm3873_vm1, %v7733_v59  ;;  %v4704_v33 = vor.u32 %v4792_v28, %v4701_v39  ;;  %3595 = vst [vmem:[#allocation3 + $0x124] sm:$0x22] %v3594_v5  ;;  %v4628_v15 = vor.u32 %v4773_v16, %v4625_v58  ;;  %v4707_v13 = vld [vmem:[#allocation3 + $0xc0] sm:$0xf]  ;;  %v4783_v35 = vld [vmem:[#allocation3 + $0x70] sm:$0xf0]  ;;  %vm8802_vm13 = vmmov %vm8801_vm4 }
 0x2b3   : > { %v3622_v62 = vld [vmem:[#allocation3 + $0x114] sm:$0xee]  ;;  %v3031_v10 = vrot.slane %v3020_v17, 4  ;;  %3987 = vmatpush.bf16.msra.mxu0 %v4700_v1  ;;  %v4631_v8 = vld [vmem:[#allocation3 + $0x28] sm:$0xf] }
 0x2b4   : > { %v3623_v55 = vsel %vm8750_vm10, 0, %v3622_v62  ;;  %4000 = vmatpush.bf16.msra.mxu1 %v4704_v33  ;;  %v4633_v47 = vld [vmem:[#allocation3 + $0x74] sm:$0xf0]  ;;  %v4774_v41 = vld [vmem:[#allocation3 + $0x2c] sm:$0xf]  ;;  %v4632_v57 = vor.u32 %v4783_v35, %v4631_v8 }
 0x2b5   : > { %3624 = vst [vmem:[#allocation3 + $0x114] sm:$0xee] %v3623_v55  ;;  %v3047_v51 = vsel %vm8789_vm8, %v3030_v50, %v3031_v10  ;;  %v3049_v12 = vsel %vm8790_vm15, %v3031_v10, %v3032_v9  ;;  %v3228_v45 = vld [vmem:[#allocation3 + $0xe0] sm:$0x8]  ;;  %v4793_v9 = vld [vmem:[#allocation3 + $0xc4] sm:$0xf]  ;;  %v4636_v46 = vor.u32 %v4774_v41, %v4633_v47 }
 0x2b6   : > { %v3048_v54 = vsel %vm8791_vm12, %v7827_v38, %v3047_v51  ;;  %v3631_v34 = vld [vmem:[#allocation3 + $0x12c] sm:$0xe]  ;;  %v3050_v43 = vsel %vm8792_vm14, %v3020_v17, %v3049_v12  ;;  %v3229_v20 = vsel %vm8794_vm7, %v3190_v19, %v3228_v45  ;;  %v3347_v4 = vld [vmem:[#allocation3 + $0x12c] sm:$0x1]  ;;  %v3344_v19 = vld [vmem:[#allocation3 + $0x124] sm:$0x11]  ;;  %vm8806_vm14 = vnez %v8294_v0 }
 0x2b7   : > { %v3084_v50 = vsel %vm5921_vm5, %v3048_v54, %v3083_v36  ;;  %3988 = vmatpush.bf16.msra.mxu0 %v4624_v40  ;;  %v3632_v44 = vsel %vm8796_vm2, 0, %v3631_v34  ;;  %v3087_v3 = vsel %vm5921_vm5, %v3050_v43, %v3086_v6  ;;  %3230 = vst [vmem:[#allocation3 + $0xe0] sm:$0x8] %v3229_v20  ;;  %vm8797_vm5 = vmmov %vm8789_vm8  ;;  %v3219_v11 = vld [vmem:[#allocation3 + $0xc8] sm:$0x88]  ;;  %vm8804_vm15 = vcmask 785408  }
 0x2b8   : > { %3085 = vst [vmem:[#allocation3 + $0xd0] sm:$0x88] %v3084_v50  ;;  %4001 = vmatpush.bf16.msra.mxu1 %v4628_v15  ;;  %v4802_v38 = vld [vmem:[#allocation3 + $0x108] sm:$0xf0]  ;;  %v4709_v26 = vld [vmem:[#allocation3 + $0x10c] sm:$0xf0]  ;;  %vm8799_vm0 = vmmov %vm8797_vm5  ;;  %vm8810_vm2 = vnez %v8317_v22 }
 0x2b9   : > { %v3628_v14 = vld [vmem:[#allocation3 + $0x124] sm:$0xee]  ;;  %3633 = vst [vmem:[#allocation3 + $0x12c] sm:$0xe] %v3632_v44  ;;  %v4708_v56 = vor.u32 %v4802_v38, %v4707_v13  ;;  %v4712_v29 = vor.u32 %v4793_v9, %v4709_v26  ;;  %vm8803_vm8 = vmmov %vm8799_vm0  ;;  %v4804_v12 = vld [vmem:[#allocation3 + $0x118] sm:$0xf0] }
 0x2ba   : > { %v5108_v21 = vpop.permute.xlu1 %5107  ;;  %v3629_v24 = vsel %vm8750_vm10, 0, %v3628_v14  ;;  %3088 = vst [vmem:[#allocation3 + $0xd8] sm:$0x88] %v3087_v3  ;;  %4749 = vmatmul.msk.bf16.vlgmr.msra.gmra.mxu0 %vm3873_vm1, %v7733_v59  ;;  %vm8798_vm10 = vmmov %vm8797_vm5  ;;  %v4725_v45 = vld [vmem:[#allocation3 + $0x11c] sm:$0xf0] }
 0x2bb   : > { %v5110_v37 = vunpack.i.h.bf16 %v5108_v21  ;;  %v5109_v25 = vunpack.i.l.bf16 %v5108_v21  ;;  %3630 = vst [vmem:[#allocation3 + $0x124] sm:$0xee] %v3629_v24  ;;  %4013 = vmatpush.bf16.msra.mxu2 %v4708_v56  ;;  %4026 = vmatpush.bf16.msra.mxu3 %v4712_v29  ;;  %vm8805_vm12 = vmmov %vm8804_vm15  ;;  %v4784_v20 = vld [vmem:[#allocation3 + $0x78] sm:$0xf0]  ;;  %v4641_v0 = vld [vmem:[#allocation3 + $0x7c] sm:$0xf0] }
 0x2bc   : > { %4750 = vmatmul.msk.bf16.vlgmr.msra.gmra.mxu1 %vm3873_vm1, %v7733_v59  ;;  %v4803_v40 = vld [vmem:[#allocation3 + $0x110] sm:$0xf0]  ;;  %v4717_v16 = vld [vmem:[#allocation3 + $0x114] sm:$0xf0]  ;;  %v4649_v44 = vld [vmem:[#allocation3 + $0x84] sm:$0xf0] }
 0x2bd   : > { %v3170_v23 = vrot.slane %v5110_v37, 4  ;;  %v3169_v5 = vrot.slane %v5109_v25, 4  ;;  %v4639_v38 = vld [vmem:[#allocation3 + $0x30] sm:$0xf]  ;;  %v4775_v26 = vld [vmem:[#allocation3 + $0x34] sm:$0xf] }
 0x2be   : > { %v4640_v29 = vor.u32 %v4784_v20, %v4639_v38  ;;  %v4644_v35 = vor.u32 %v4775_v26, %v4641_v0  ;;  %v4647_v21 = vld [vmem:[#allocation3 + $0x38] sm:$0xf]  ;;  %v4776_v24 = vld [vmem:[#allocation3 + $0x3c] sm:$0xf]  ;;  %v4739_v22 = vld [vmem:[#allocation3 + $0xe0] sm:$0xf] }
 0x2bf   : > { %v3222_v52 = vld [vmem:[#allocation3 + $0xd0] sm:$0x88]  ;;  %v3184_v1 = vsel %vm8797_vm5, %v3168_v60, %v3169_v5  ;;  %v3186_v28 = vsel %vm8798_vm10, %v3169_v5, %v3170_v23  ;;  %4014 = vmatpush.bf16.msra.mxu2 %v4632_v57  ;;  %4027 = vmatpush.bf16.msra.mxu3 %v4636_v46  ;;  %v3188_v39 = vsel %vm8799_vm0, %v3170_v23, %v3171_v53  ;;  %vm8813_vm5 = vcmask 908288  }
 0x2c0   : > { %v3185_v17 = vsel %vm8800_vm9, %v7680_v61, %v3184_v1  ;;  %v3187_v33 = vsel %vm8801_vm4, %v5109_v25, %v3186_v28  ;;  %v3189_v49 = vsel %vm8802_vm13, %v5110_v37, %v3188_v39  ;;  %v4652_v25 = vor.u32 %v4776_v24, %v4649_v44  ;;  %v4786_v1 = vld [vmem:[#allocation3 + $0x88] sm:$0xf0]  ;;  %v4657_v28 = vld [vmem:[#allocation3 + $0x8c] sm:$0xf0]  ;;  %v4663_v39 = vld [vmem:[#allocation3 + $0x48] sm:$0xf] }
 0x2c1   : > { %v3220_v62 = vsel %vm6182_vm11, %v3185_v17, %v3219_v11  ;;  %v3223_v60 = vsel %vm6182_vm11, %v3187_v33, %v3222_v52  ;;  %v3225_v10 = vld [vmem:[#allocation3 + $0xd8] sm:$0x88]  ;;  %v4787_v52 = vld [vmem:[#allocation3 + $0x90] sm:$0xf0]  ;;  %v4655_v33 = vld [vmem:[#allocation3 + $0x40] sm:$0xf] }
 0x2c2   : > { %3221 = vst [vmem:[#allocation3 + $0xc8] sm:$0x88] %v3220_v62  ;;  %v3280_v58 = vpop.permute.xlu1 %3279  ;;  %4751 = vmatmul.msk.bf16.vlgmr.msra.gmra.mxu2 %vm3873_vm1, %v7733_v59  ;;  %4752 = vmatmul.msk.bf16.vlgmr.msra.gmra.mxu3 %vm3873_vm1, %v7733_v59  ;;  %v3226_v61 = vsel %vm6182_vm11, %v3189_v49, %v3225_v10  ;;  %vm8807_vm11 = vmmov %vm8799_vm0  ;;  %v4664_v17 = vor.u32 %v4787_v52, %v4663_v39  ;;  %v4777_v11 = vld [vmem:[#allocation3 + $0x44] sm:$0xf] }
 0x2c3   : > { %3224 = vst [vmem:[#allocation3 + $0xd0] sm:$0x88] %v3223_v60  ;;  %v3290_v53 = vrot.slane %v3280_v58, 4  ;;  %v4656_v49 = vor.u32 %v4786_v1, %v4655_v33  ;;  %v4660_v62 = vor.u32 %v4777_v11, %v4657_v28 }
 0x2c4   : > { %3227 = vst [vmem:[#allocation3 + $0xd8] sm:$0x88] %v3226_v61 }
 0x2c5   : > { %v3307_v55 = vsel %vm8803_vm8, %v3289_v30, %v3290_v53  ;;  %v3309_v36 = vsel %vm8804_vm15, %v3280_v58, %v3290_v53  ;;  %vm8819_vm8 = vmmov %vm8813_vm5 }
 0x2c6   : > { %v3308_v6 = vsel %vm8805_vm12, %v7751_v27, %v3307_v55  ;;  %v3348_v51 = vsel %vm8806_vm14, %v3309_v36, %v3347_v4  ;;  %vm8820_vm15 = vmmov %vm8813_vm5 }
 0x2c7   : > { %v3345_v2 = vsel %vm8429_vm6, %v3308_v6, %v3344_v19  ;;  %3349 = vst [vmem:[#allocation3 + $0x12c] sm:$0x1] %v3348_v51  ;;  %vm8808_vm6 = vcmask 777216   ;;  %vm8822_vm14 = vmmov %vm8813_vm5 }
 0x2c8   : > { %3346 = vst [vmem:[#allocation3 + $0x124] sm:$0x11] %v3345_v2  ;;  %vm8809_vm7 = vmmov %vm8808_vm6 }
 0x2c9   : > { %v4715_v54 = vld [vmem:[#allocation3 + $0xc8] sm:$0xf]  ;;  %v4794_v15 = vld [vmem:[#allocation3 + $0xcc] sm:$0xf] }
 0x2ca   : > { %v3409_v30 = vpop.permute.xlu1 %3408  ;;  %v4716_v34 = vor.u32 %v4803_v40, %v4715_v54  ;;  %v4720_v13 = vor.u32 %v4794_v15, %v4717_v16  ;;  %v4723_v43 = vld [vmem:[#allocation3 + $0xd0] sm:$0xf]  ;;  %v4795_v31 = vld [vmem:[#allocation3 + $0xd4] sm:$0xf] }
 0x2cb   : > { %v3419_v27 = vrot.slane %v3409_v30, 4  ;;  %v4724_v50 = vor.u32 %v4804_v12, %v4723_v43  ;;  %v4728_v7 = vor.u32 %v4795_v31, %v4725_v45  ;;  %v4731_v42 = vld [vmem:[#allocation3 + $0xd8] sm:$0xf]  ;;  %v4796_v32 = vld [vmem:[#allocation3 + $0xdc] sm:$0xf] }
 0x2cc   : > { %4039 = vmatpush.bf16.msrb.mxu0 %v4716_v34  ;;  %4052 = vmatpush.bf16.msrb.mxu1 %v4720_v13 }
 0x2cd   : > { %v3436_v9 = vsel %vm8807_vm11, %v7797_v48, %v3419_v27  ;;  %v3438_v3 = vsel %vm8808_vm6, %v3409_v30, %v3419_v27  ;;  %4065 = vmatpush.bf16.msrb.mxu2 %v4724_v50  ;;  %4078 = vmatpush.bf16.msrb.mxu3 %v4728_v7  ;;  %v4648_v48 = vor.u32 %v4785_v63, %v4647_v21 }
 0x2ce   : > { %v3476_v14 = vld [vmem:[#allocation3 + $0x12c] sm:$0x1]  ;;  %v3437_v56 = vsel %vm8809_vm7, %v5115_v18, %v3436_v9 }
 0x2cf   : > { %v3473_v47 = vld [vmem:[#allocation3 + $0x124] sm:$0x11]  ;;  %v3477_v37 = vsel %vm8810_vm2, %v3438_v3, %v3476_v14  ;;  %vm8826_vm2 = vmmov %vm8813_vm5 }
 0x2d0   : > { %v3474_v8 = vsel %vm5580_vm3, %v3437_v56, %v3473_v47  ;;  %3478 = vst [vmem:[#allocation3 + $0x12c] sm:$0x1] %v3477_v37  ;;  %4040 = vmatpush.bf16.msrb.mxu0 %v4640_v29  ;;  %4053 = vmatpush.bf16.msrb.mxu1 %v4644_v35  ;;  %vm8811_vm3 = vcmask 1039360  }
 0x2d1   : > { %3475 = vst [vmem:[#allocation3 + $0x124] sm:$0x11] %v3474_v8  ;;  %4066 = vmatpush.bf16.msrb.mxu2 %v4648_v48  ;;  %4079 = vmatpush.bf16.msrb.mxu3 %v4652_v25  ;;  %vm8814_vm10 = vmmov %vm8811_vm3 }
 0x2d2   : > { %vm8815_vm0 = vmmov %vm8811_vm3 }
 0x2d3   : > { %4753 = vmatmul.msk.bf16.vlgmr.msrb.gmra.mxu0 %vm3873_vm1, %v7733_v59  ;;  %4754 = vmatmul.msk.bf16.vlgmr.msrb.gmra.mxu1 %vm3873_vm1, %v7733_v59  ;;  %vm8818_vm13 = vmmov %vm8815_vm0 }
 0x2d4   : > { %4755 = vmatmul.msk.bf16.vlgmr.msrb.gmra.mxu2 %vm3873_vm1, %v7733_v59  ;;  %4756 = vmatmul.msk.bf16.vlgmr.msrb.gmra.mxu3 %vm3873_vm1, %v7733_v59  ;;  %vm8823_vm11 = vmmov %vm8815_vm0 }
 0x2d5   : > { %vm8825_vm7 = vmmov %vm8815_vm0 }
 0x2d7   : > { %v4806_v18 = vld [vmem:[#allocation3 + $0x128] sm:$0xf0] }
 0x2d8   : > { %v4740_v41 = vor.u32 %v4806_v18, %v4739_v22  ;;  %v4805_v23 = vld [vmem:[#allocation3 + $0x120] sm:$0xf0]  ;;  %v4733_v5 = vld [vmem:[#allocation3 + $0x124] sm:$0xf0] }
 0x2d9   : > { %v4732_v57 = vor.u32 %v4805_v23, %v4731_v42  ;;  %v4736_v46 = vor.u32 %v4796_v32, %v4733_v5 }
 0x2da   : > { %4117 = vmatpush.bf16.msra.mxu2 %v4740_v41 }
 0x2db   : > { %4091 = vmatpush.bf16.msra.mxu0 %v4732_v57  ;;  %4104 = vmatpush.bf16.msra.mxu1 %v4736_v46 }
 0x2de   : > { %4118 = vmatpush.bf16.msra.mxu2 %v4664_v17 }
 0x2df   : > { %4092 = vmatpush.bf16.msra.mxu0 %v4656_v49  ;;  %4105 = vmatpush.bf16.msra.mxu1 %v4660_v62 }
 0x2e3   : > { %4757 = vmatmul.msk.bf16.vlgmr.msra.gmra.mxu0 %vm3873_vm1, %v7733_v59  ;;  %4758 = vmatmul.msk.bf16.vlgmr.msra.gmra.mxu1 %vm3873_vm1, %v7733_v59 }
 0x2e4   : > { %4759 = vmatmul.msk.bf16.vlgmr.msra.gmra.mxu2 %vm3873_vm1, %v7733_v59  ;;  %vm8812_vm1 = vcmask 916480  }
 0x2e5   : > { %vm8816_vm9 = vmmov %vm8812_vm1 }
 0x2e6   : > { %vm8817_vm4 = vmmov %vm8812_vm1 }
 0x2e7   : > { %vm8821_vm12 = vmmov %vm8812_vm1 }
 0x2e8   : > { %vm8824_vm6 = vmmov %vm8812_vm1 }
 0x304   : > { %v7950_v60 = vpop.permute.xlu2 %3678 }
 0x317   : > { %v3886_v10 = vpop.f32.mrf.mxu0 }
 0x318   : > { %v7953_v58 = vadd.f32 %v3886_v10, %v7950_v60 }
 0x319   : > { %v3899_v61 = vpop.f32.mrf.mxu1 }
 0x31a   : > { %v4124_v4 = vmax.f32 %v7953_v58, 0.0  ;;  %v7957_v53 = vadd.f32 %v3899_v61, %v7950_v60 }
 0x31c   : > { %v4125_v19 = vmax.f32 %v7957_v53, 0.0 }
 0x31e   : > { %v5117_v55 = vpack.i.bf16 %v4125_v19, %v4124_v4 }
 0x31f   : > { %v3888_v59 = vpop.f32.mrf.mxu0 }
 0x320   : > { %5118 = vrot.lane.b32.xlu0 %v5117_v55, %s5261_s26 }
 0x321   : > { %v3901_v36 = vpop.f32.mrf.mxu1 }
 0x325   : > { %v3912_v6 = vpop.f32.mrf.mxu2  ;;  %v3925_v51 = vpop.f32.mrf.mxu3 }
 0x326   : > { %v3913_v2 = vadd.f32 %v3912_v6, %v7950_v60  ;;  %v3926_v40 = vadd.f32 %v3925_v51, %v7950_v60 }
 0x327   : > { %v3938_v16 = vpop.f32.mrf.mxu0 }
 0x328   : > { %v7967_v12 = vmax.f32 %v3913_v2, 0.0  ;;  %v7969_v45 = vmax.f32 %v3926_v40, 0.0  ;;  %5123 = vrot.lane.b32.xlu0 %v5117_v55, %s5263_s28  ;;  %v3939_v54 = vadd.f32 %v3938_v16, %v7950_v60 }
 0x329   : > { %v3951_v15 = vpop.f32.mrf.mxu1 }
 0x32a   : > { %v5132_v30 = vpack.i.bf16 %v7969_v45, %v7967_v12  ;;  %v7975_v34 = vmax.f32 %v3939_v54, 0.0  ;;  %v3952_v13 = vadd.f32 %v3951_v15, %v7950_v60 }
 0x32c   : > { %5133 = vrot.lane.b32.xlu1 %v5132_v30, %s5261_s26  ;;  %v7979_v43 = vmax.f32 %v3952_v13, 0.0 }
 0x32d   : > { %v3914_v31 = vpop.f32.mrf.mxu2  ;;  %v3927_v27 = vpop.f32.mrf.mxu3 }
 0x32e   : > { %v5147_v20 = vpack.i.bf16 %v7979_v43, %v7975_v34 }
 0x32f   : > { %v3940_v0 = vpop.f32.mrf.mxu0 }
 0x330   : > { %5128 = vrot.lane.b32.xlu0 %v5117_v55, %s5264_s29  ;;  %5148 = vrot.lane.b32.xlu2 %v5147_v20, %s5261_s26 }
 0x331   : > { %v3953_v50 = vpop.f32.mrf.mxu1 }
 0x334   : > { %5138 = vrot.lane.b32.xlu1 %v5132_v30, %s5263_s28 }
 0x335   : > { %v3964_v7 = vpop.f32.mrf.mxu2  ;;  %v3977_v63 = vpop.f32.mrf.mxu3 }
 0x336   : > { %v3965_v44 = vadd.f32 %v3964_v7, %v7950_v60  ;;  %v3978_v9 = vadd.f32 %v3977_v63, %v7950_v60 }
 0x337   : > { %v3990_v3 = vpop.f32.mrf.mxu0 }
 0x338   : > { %v7988_v38 = vmax.f32 %v3965_v44, 0.0  ;;  %v7990_v26 = vmax.f32 %v3978_v9, 0.0  ;;  %5153 = vrot.lane.b32.xlu2 %v5147_v20, %s5263_s28  ;;  %v3991_v14 = vadd.f32 %v3990_v3, %v7950_v60 }
 0x339   : > { %v4003_v56 = vpop.f32.mrf.mxu1 }
 0x33a   : > { %v5162_v29 = vpack.i.bf16 %v7990_v26, %v7988_v38  ;;  %v4004_v35 = vadd.f32 %v4003_v56, %v7950_v60  ;;  %v7999_v21 = vmax.f32 %v3991_v14, 0.0 }
 0x33c   : > { %5143 = vrot.lane.b32.xlu1 %v5132_v30, %s5264_s29  ;;  %5163 = vrot.lane.b32.xlu0 %v5162_v29, %s5261_s26  ;;  %v8001_v24 = vmax.f32 %v4004_v35, 0.0 }
 0x33d   : > { %v3966_v47 = vpop.f32.mrf.mxu2  ;;  %v3979_v37 = vpop.f32.mrf.mxu3 }
 0x33e   : > { %v5177_v25 = vpack.i.bf16 %v8001_v24, %v7999_v21 }
 0x33f   : > { %v3992_v48 = vpop.f32.mrf.mxu0 }
 0x340   : > { %5158 = vrot.lane.b32.xlu2 %v5147_v20, %s5264_s29 }
 0x341   : > { %v4005_v8 = vpop.f32.mrf.mxu1 }
 0x344   : > { %5178 = vrot.lane.b32.xlu1 %v5177_v25, %s5261_s26  ;;  %5168 = vrot.lane.b32.xlu0 %v5162_v29, %s5263_s28 }
 0x345   : > { %v4016_v22 = vpop.f32.mrf.mxu2  ;;  %v4029_v42 = vpop.f32.mrf.mxu3 }
 0x346   : > { %v4017_v32 = vadd.f32 %v4016_v22, %v7950_v60  ;;  %v4030_v18 = vadd.f32 %v4029_v42, %v7950_v60 }
 0x348   : > { %v8010_v41 = vmax.f32 %v4017_v32, 0.0  ;;  %v8012_v23 = vmax.f32 %v4030_v18, 0.0 }
 0x34a   : > { %v5192_v5 = vpack.i.bf16 %v8012_v23, %v8010_v41 }
 0x34c   : > { %5183 = vrot.lane.b32.xlu1 %v5177_v25, %s5263_s28  ;;  %5193 = vrot.lane.b32.xlu2 %v5192_v5, %s5261_s26 }
 0x34d   : > { %5173 = vrot.lane.b32.xlu0 %v5162_v29, %s5264_s29  ;;  %v4018_v57 = vpop.f32.mrf.mxu2  ;;  %v4031_v46 = vpop.f32.mrf.mxu3 }
 0x350   : > { %v4042_v52 = vpop.f32.mrf.mxu0  ;;  %v4055_v1 = vpop.f32.mrf.mxu1 }
 0x351   : > { %v4043_v28 = vadd.f32 %v4042_v52, %v7950_v60  ;;  %v4056_v39 = vadd.f32 %v4055_v1, %v7950_v60 }
 0x353   : > { %v8021_v17 = vmax.f32 %v4043_v28, 0.0  ;;  %v8023_v33 = vmax.f32 %v4056_v39, 0.0 }
 0x354   : > { %5188 = vrot.lane.b32.xlu1 %v5177_v25, %s5264_s29  ;;  %5198 = vrot.lane.b32.xlu2 %v5192_v5, %s5263_s28 }
 0x355   : > { %v5207_v11 = vpack.i.bf16 %v8023_v33, %v8021_v17 }
 0x357   : > { %5208 = vrot.lane.b32.xlu0 %v5207_v11, %s5261_s26  ;;  %v4068_v49 = vpop.f32.mrf.mxu2  ;;  %v4081_v62 = vpop.f32.mrf.mxu3 }
 0x358   : > { %v4044_v10 = vpop.f32.mrf.mxu0  ;;  %v4057_v61 = vpop.f32.mrf.mxu1  ;;  %v4069_v55 = vadd.f32 %v4068_v49, %v7950_v60  ;;  %v4082_v59 = vadd.f32 %v4081_v62, %v7950_v60 }
 0x35a   : > { %v8032_v36 = vmax.f32 %v4069_v55, 0.0  ;;  %v8034_v6 = vmax.f32 %v4082_v59, 0.0 }
 0x35c   : > { %5203 = vrot.lane.b32.xlu2 %v5192_v5, %s5264_s29  ;;  %v5222_v51 = vpack.i.bf16 %v8034_v6, %v8032_v36 }
 0x35e   : > { %5223 = vrot.lane.b32.xlu1 %v5222_v51, %s5261_s26 }
 0x35f   : > { %5213 = vrot.lane.b32.xlu0 %v5207_v11, %s5263_s28  ;;  %v4070_v2 = vpop.f32.mrf.mxu2  ;;  %v4083_v40 = vpop.f32.mrf.mxu3 }
 0x360   : > { %v4094_v16 = vpop.f32.mrf.mxu0  ;;  %v4107_v54 = vpop.f32.mrf.mxu1 }
 0x361   : > { %v4095_v15 = vadd.f32 %v4094_v16, %v7950_v60  ;;  %v4108_v30 = vadd.f32 %v4107_v54, %v7950_v60 }
 0x363   : > { %v8043_v13 = vmax.f32 %v4095_v15, 0.0  ;;  %v8045_v31 = vmax.f32 %v4108_v30, 0.0 }
 0x365   : > { %v5237_v27 = vpack.i.bf16 %v8045_v31, %v8043_v13 }
 0x366   : > { %5228 = vrot.lane.b32.xlu1 %v5222_v51, %s5263_s28 }
 0x367   : > { %5218 = vrot.lane.b32.xlu0 %v5207_v11, %s5264_s29  ;;  %5238 = vrot.lane.b32.xlu2 %v5237_v27, %s5261_s26  ;;  %v4120_v20 = vpop.f32.mrf.mxu2 }
 0x368   : > { %v4121_v0 = vadd.f32 %v4120_v20, %v7950_v60  ;;  %v4096_v50 = vpop.f32.mrf.mxu0  ;;  %v4109_v7 = vpop.f32.mrf.mxu1 }
 0x36a   : > { %v4142_v63 = vmax.f32 %v4121_v0, 0.0 }
 0x36c   : > { %v5247_v9 = vpack.i.bf16 %v4142_v63, %v8045_v31 }
 0x36e   : > { %5233 = vrot.lane.b32.xlu1 %v5222_v51, %s5264_s29 }
 0x36f   : > { %5243 = vrot.lane.b32.xlu2 %v5237_v27, %s5263_s28  ;;  %4429 = vrot.lane.b32.xlu0 %v4142_v63, %s5261_s26  ;;  %v4122_v44 = vpop.f32.mrf.mxu2 }
 0x376   : > { %4453 = vrot.lane.b32.xlu1 %v4142_v63, %s5263_s28 }
 0x377   : > { %4358 = vrot.lane.b32.xlu2 %v8043_v13, %s5264_s29 }
 0x37f   : > { %5248 = vrot.lane.b32.xlu2 %v5247_v9, %s5264_s29 }
 0x38a   : > { %v8061_v60 = vpop.permute.xlu2 %5148 }
 0x392   : > { %v5119_v3 = vpop.permute.xlu0 %5118  ;;  %v8063_v14 = vpop.permute.xlu2 %5153 }
 0x393   : > { %v5121_v47 = vunpack.i.h.bf16 %v5119_v3  ;;  %v5120_v37 = vunpack.i.l.bf16 %v5119_v3  ;;  %v5155_v30 = vunpack.i.l.bf16 %v8063_v14 }
 0x395   : > { %v4195_v22 = vsel %vm8811_vm3, %v5120_v37, %v5121_v47  ;;  %vm8827_vm3 = vmmov %vm8815_vm0 }
 0x396   : > { %v4227_v5 = vmax.f32 %v4124_v4, %v4195_v22  ;;  %v5150_v4 = vunpack.i.l.bf16 %v8061_v60 }
 0x39a   : > { %v5124_v56 = vpop.permute.xlu0 %5123  ;;  %v8065_v35 = vpop.permute.xlu2 %5158 }
 0x39b   : > { %v5126_v48 = vunpack.i.h.bf16 %v5124_v56  ;;  %v5125_v25 = vunpack.i.l.bf16 %v5124_v56  ;;  %v5160_v53 = vunpack.i.l.bf16 %v8065_v35 }
 0x39d   : > { %v4278_v18 = vsel %vm8812_vm1, %v5125_v25, %v5126_v48 }
 0x39e   : > { %v5134_v29 = vpop.permute.xlu1 %5133  ;;  %v4310_v28 = vmax.f32 %v4227_v5, %v4278_v18 }
 0x39f   : > { %v5136_v46 = vunpack.i.h.bf16 %v5134_v29  ;;  %v5135_v52 = vunpack.i.l.bf16 %v5134_v29 }
 0x3a1   : > { %v4196_v10 = vsel %vm8814_vm10, %v5121_v47, %v5135_v52  ;;  %v4197_v61 = vsel %vm8815_vm0, %v5135_v52, %v5136_v46  ;;  %v4198_v27 = vsel %vm8818_vm13, %v5136_v46, %v5150_v4  ;;  %v5151_v47 = vunpack.i.h.bf16 %v8061_v60  ;;  %vm8829_vm10 = vmmov %vm8815_vm0 }
 0x3a2   : > { %v5129_v8 = vpop.permute.xlu0 %5128  ;;  %v4228_v59 = vmax.f32 %v4125_v19, %v4196_v10  ;;  %v4229_v51 = vmax.f32 %v7967_v12, %v4197_v61  ;;  %v4230_v3 = vmax.f32 %v7969_v45, %v4198_v27  ;;  %vm8830_vm0 = vmmov %vm8826_vm2 }
 0x3a3   : > { %v5131_v42 = vunpack.i.h.bf16 %v5129_v8  ;;  %v5130_v32 = vunpack.i.l.bf16 %v5129_v8  ;;  %v4199_v46 = vsel %vm8823_vm11, %v5150_v4, %v5151_v47  ;;  %vm8833_vm13 = vmmov %vm8812_vm1 }
 0x3a4   : > { %v4231_v10 = vmax.f32 %v7975_v34, %v4199_v46  ;;  %vm8838_vm11 = vmmov %vm8812_vm1 }
 0x3a5   : > { %v4361_v1 = vsel %vm8813_vm5, %v5130_v32, %v5131_v42  ;;  %vm8828_vm5 = vmmov %vm8812_vm1 }
 0x3a6   : > { %v5139_v57 = vpop.permute.xlu1 %5138  ;;  %v8072_v39 = vpop.permute.xlu2 %5193  ;;  %v4393_v62 = vmax.f32 %v4310_v28, %v4361_v1 }
 0x3a7   : > { %v5141_v11 = vunpack.i.h.bf16 %v5139_v57  ;;  %v5140_v49 = vunpack.i.l.bf16 %v5139_v57 }
 0x3a8   : > { %v4409_v2 = vmax.f32 %v4393_v62, %v7967_v12 }
 0x3a9   : > { %v4279_v55 = vsel %vm8816_vm9, %v5126_v48, %v5140_v49  ;;  %v4280_v58 = vsel %vm8817_vm4, %v5140_v49, %v5141_v11  ;;  %v4281_v12 = vsel %vm8821_vm12, %v5141_v11, %v5155_v30  ;;  %vm8831_vm9 = vmmov %vm8830_vm0 }
 0x3aa   : > { %v4311_v20 = vmax.f32 %v4228_v59, %v4279_v55  ;;  %v4312_v0 = vmax.f32 %v4229_v51, %v4280_v58  ;;  %v4435_v44 = vmax.f32 %v4409_v2, %v4197_v61  ;;  %v4313_v37 = vmax.f32 %v4230_v3, %v4281_v12  ;;  %vm8832_vm4 = vmmov %vm8827_vm3 }
 0x3ab   : > { %vm8836_vm12 = vmmov %vm8830_vm0 }
 0x3ac   : > { %v4459_v8 = vmax.f32 %v4435_v44, %v4280_v58 }
 0x3ae   : > { %v5144_v40 = vpop.permute.xlu1 %5143  ;;  %v8083_v15 = vpop.permute.xlu0 %5163 }
 0x3af   : > { %v5146_v16 = vunpack.i.h.bf16 %v5144_v40  ;;  %v5145_v54 = vunpack.i.l.bf16 %v5144_v40  ;;  %v8092_v9 = vpop.permute.xlu2 %5198  ;;  %v5165_v57 = vunpack.i.l.bf16 %v8083_v15  ;;  %v5166_v60 = vunpack.i.h.bf16 %v8083_v15 }
 0x3b1   : > { %v4362_v19 = vsel %vm8819_vm8, %v5131_v42, %v5145_v54  ;;  %v4363_v50 = vsel %vm8820_vm15, %v5145_v54, %v5146_v16  ;;  %v4364_v56 = vsel %vm8822_vm14, %v5146_v16, %v5160_v53  ;;  %v5156_v42 = vunpack.i.h.bf16 %v8063_v14  ;;  %vm8834_vm8 = vmmov %vm8812_vm1 }
 0x3b2   : > { %v4394_v7 = vmax.f32 %v4311_v20, %v4362_v19  ;;  %v4395_v63 = vmax.f32 %v4312_v0, %v4363_v50  ;;  %v4396_v32 = vmax.f32 %v4313_v37, %v4364_v56  ;;  %v4483_v1 = vmax.f32 %v4459_v8, %v4363_v50  ;;  %vm8835_vm15 = vmmov %vm8830_vm0 }
 0x3b3   : > { %v4282_v49 = vsel %vm8824_vm6, %v5155_v30, %v5156_v42  ;;  %v4200_v61 = vsel %vm8825_vm7, %v5151_v47, %v5165_v57  ;;  %v4201_v4 = vsel %vm8827_vm3, %v5165_v57, %v5166_v60  ;;  %vm8837_vm14 = vmmov %vm8827_vm3 }
 0x3b4   : > { %v4410_v29 = vmax.f32 %v4394_v7, %v7969_v45  ;;  %v4411_v48 = vmax.f32 %v4395_v63, %v7975_v34  ;;  %v5161_v45 = vunpack.i.h.bf16 %v8065_v35  ;;  %v4412_v14 = vmax.f32 %v4396_v32, %v7979_v43  ;;  %vm8839_vm6 = vmmov %vm8827_vm3 }
 0x3b5   : > { %v4314_v59 = vmax.f32 %v4231_v10, %v4282_v49  ;;  %v4232_v54 = vmax.f32 %v7979_v43, %v4200_v61  ;;  %v4233_v20 = vmax.f32 %v7988_v38, %v4201_v4  ;;  %vm8840_vm7 = vmmov %vm8830_vm0 }
 0x3b6   : > { %v4436_v25 = vmax.f32 %v4410_v29, %v4198_v27  ;;  %v8100_v22 = vpop.permute.xlu1 %5178  ;;  %v5169_v18 = vpop.permute.xlu0 %5168  ;;  %v4437_v52 = vmax.f32 %v4411_v48, %v4199_v46  ;;  %v4365_v58 = vsel %vm8826_vm2, %v5160_v53, %v5161_v45  ;;  %v4438_v34 = vmax.f32 %v4412_v14, %v4200_v61  ;;  %vm8841_vm2 = vmmov %vm8812_vm1 }
 0x3b7   : > { %v5170_v11 = vunpack.i.l.bf16 %v5169_v18  ;;  %v5171_v62 = vunpack.i.h.bf16 %v5169_v18  ;;  %v8116_v55 = vpop.permute.xlu2 %5203  ;;  %v5180_v51 = vunpack.i.l.bf16 %v8100_v22  ;;  %v4397_v27 = vmax.f32 %v4314_v59, %v4365_v58  ;;  %vm8842_vm3 = vmmov %vm8830_vm0 }
 0x3b8   : > { %v4460_v5 = vmax.f32 %v4436_v25, %v4281_v12  ;;  %v4461_v16 = vmax.f32 %v4437_v52, %v4282_v49  ;;  %v5181_v19 = vunpack.i.h.bf16 %v8100_v22  ;;  %v5196_v18 = vunpack.i.h.bf16 %v8072_v39 }
 0x3b9   : > { %v4283_v2 = vsel %vm8812_vm1, %v5156_v42, %v5170_v11  ;;  %v4284_v15 = vsel %vm8828_vm5, %v5170_v11, %v5171_v62  ;;  %v4202_v63 = vsel %vm8829_vm10, %v5166_v60, %v5180_v51  ;;  %v4413_v48 = vmax.f32 %v4397_v27, %v7988_v38  ;;  %vm8843_vm1 = vmmov %vm8832_vm4 }
 0x3ba   : > { %v4484_v28 = vmax.f32 %v4460_v5, %v4364_v56  ;;  %v4315_v50 = vmax.f32 %v4232_v54, %v4283_v2  ;;  %v4462_v12 = vmax.f32 %v4438_v34, %v4283_v2  ;;  %v4316_v44 = vmax.f32 %v4233_v20, %v4284_v15  ;;  %vm8844_vm5 = vmmov %vm8843_vm1 }
 0x3bb   : > { %v4485_v3 = vmax.f32 %v4461_v16, %v4365_v58  ;;  %v4203_v8 = vsel %vm8832_vm4, %v5180_v51, %v5181_v19  ;;  %v4439_v5 = vmax.f32 %v4413_v48, %v4201_v4  ;;  %v4234_v57 = vmax.f32 %v7990_v26, %v4202_v63  ;;  %vm8845_vm10 = vmmov %vm8841_vm2 }
 0x3bc   : > { %v4499_v35 = vpack.c.bf16 %v4484_v28, %v4483_v1  ;;  %v5195_v11 = vunpack.i.l.bf16 %v8072_v39  ;;  %v5200_v49 = vunpack.i.l.bf16 %v8092_v9  ;;  %v4235_v14 = vmax.f32 %v7999_v21, %v4203_v8  ;;  %vm8848_vm4 = vmmov %vm8842_vm3 }
 0x3bd   : > { %v4463_v10 = vmax.f32 %v4439_v5, %v4284_v15  ;;  %v5201_v39 = vunpack.i.h.bf16 %v8092_v9  ;;  %v5206_v20 = vunpack.i.h.bf16 %v8116_v55 }
 0x3be   : > { %4507 = vst [vmem:[%s8111_s16] sm:$0xff] %v4499_v35  ;;  %v5184_v40 = vpop.permute.xlu1 %5183  ;;  %v4204_v4 = vsel %vm8837_vm14, %v5181_v19, %v5195_v11 }
 0x3bf   : > { %v5174_v30 = vpop.permute.xlu0 %5173  ;;  %v5185_v7 = vunpack.i.l.bf16 %v5184_v40  ;;  %v5186_v56 = vunpack.i.h.bf16 %v5184_v40  ;;  %v4236_v27 = vmax.f32 %v8001_v24, %v4204_v4 }
 0x3c0   : > { %v5176_v0 = vunpack.i.h.bf16 %v5174_v30  ;;  %v5175_v53 = vunpack.i.l.bf16 %v5174_v30  ;;  %v4205_v30 = vsel %vm8839_vm6, %v5195_v11, %v5196_v18  ;;  %vm8855_vm6 = vmmov %vm8842_vm3 }
 0x3c1   : > { %v4285_v22 = vsel %vm8833_vm13, %v5171_v62, %v5185_v7  ;;  %v4286_v38 = vsel %vm8834_vm8, %v5185_v7, %v5186_v56  ;;  %v4287_v54 = vsel %vm8838_vm11, %v5186_v56, %v5200_v49  ;;  %v4237_v7 = vmax.f32 %v8010_v41, %v4205_v30  ;;  %vm8849_vm13 = vmmov %vm8843_vm1 }
 0x3c2   : > { %v4366_v43 = vsel %vm8830_vm0, %v5161_v45, %v5175_v53  ;;  %v4367_v29 = vsel %vm8831_vm9, %v5175_v53, %v5176_v0  ;;  %v8137_v45 = vpop.permute.xlu2 %5238  ;;  %v4317_v62 = vmax.f32 %v4234_v57, %v4285_v22  ;;  %v4318_v59 = vmax.f32 %v4235_v14, %v4286_v38  ;;  %vm8846_vm0 = vmmov %vm8841_vm2 }
 0x3c3   : > { %v4398_v47 = vmax.f32 %v4315_v50, %v4366_v43  ;;  %v4486_v37 = vmax.f32 %v4462_v12, %v4366_v43  ;;  %v4399_v25 = vmax.f32 %v4316_v44, %v4367_v29  ;;  %v4487_v40 = vmax.f32 %v4463_v10, %v4367_v29  ;;  %vm8847_vm9 = vmmov %vm8842_vm3 }
 0x3c4   : > { %v4288_v50 = vsel %vm8841_vm2, %v5200_v49, %v5201_v39  ;;  %v4319_v12 = vmax.f32 %v4236_v27, %v4287_v54  ;;  %vm8850_vm8 = vmmov %vm8843_vm1 }
 0x3c5   : > { %v4414_v42 = vmax.f32 %v4398_v47, %v7990_v26  ;;  %v4500_v32 = vpack.c.bf16 %v4486_v37, %v4485_v3  ;;  %v4415_v46 = vmax.f32 %v4399_v25, %v7999_v21  ;;  %v5205_v21 = vunpack.i.l.bf16 %v8116_v55  ;;  %vm8853_vm14 = vmmov %vm8846_vm0 }
 0x3c6   : > { %v5189_v60 = vpop.permute.xlu1 %5188  ;;  %v4320_v47 = vmax.f32 %v4237_v7, %v4288_v50  ;;  %vm8854_vm11 = vmmov %vm8846_vm0 }
 0x3c7   : > { %4508 = vst [vmem:[%s8111_s16 + $0x8] sm:$0xff] %v4500_v32  ;;  %v5191_v52 = vunpack.i.h.bf16 %v5189_v60  ;;  %v5190_v1 = vunpack.i.l.bf16 %v5189_v60  ;;  %v4440_v28 = vmax.f32 %v4414_v42, %v4202_v63  ;;  %v4441_v2 = vmax.f32 %v4415_v46, %v4203_v8  ;;  %vm8857_vm2 = vmmov %vm8842_vm3 }
 0x3c9   : > { %v4368_v26 = vsel %vm8835_vm15, %v5176_v0, %v5190_v1  ;;  %v4369_v35 = vsel %vm8836_vm12, %v5190_v1, %v5191_v52  ;;  %v4464_v61 = vmax.f32 %v4440_v28, %v4285_v22  ;;  %v8146_v58 = vpop.permute.xlu0 %5208  ;;  %v4370_v53 = vsel %vm8840_vm7, %v5191_v52, %v5205_v21  ;;  %vm8851_vm15 = vmmov %vm8843_vm1 }
 0x3ca   : > { %v4400_v51 = vmax.f32 %v4317_v62, %v4368_v26  ;;  %v4401_v34 = vmax.f32 %v4318_v59, %v4369_v35  ;;  %v4465_v19 = vmax.f32 %v4441_v2, %v4286_v38  ;;  %v8161_v3 = vpop.permute.xlu2 %5243  ;;  %v4402_v55 = vmax.f32 %v4319_v12, %v4370_v53  ;;  %vm8852_vm12 = vmmov %vm8846_vm0 }
 0x3cb   : > { %v4488_v16 = vmax.f32 %v4464_v61, %v4368_v26  ;;  %v5210_v56 = vunpack.i.l.bf16 %v8146_v58  ;;  %v5211_v25 = vunpack.i.h.bf16 %v8146_v58  ;;  %vm8856_vm7 = vmmov %vm8842_vm3 }
 0x3cc   : > { %v4416_v15 = vmax.f32 %v4400_v51, %v8001_v24  ;;  %v4417_v63 = vmax.f32 %v4401_v34, %v8010_v41  ;;  %v4371_v24 = vsel %vm8842_vm3, %v5205_v21, %v5206_v20  ;;  %v4489_v37 = vmax.f32 %v4465_v19, %v4369_v35  ;;  %vm8858_vm3 = vmmov %vm8843_vm1 }
 0x3cd   : > { %v4501_v0 = vpack.c.bf16 %v4488_v16, %v4487_v40  ;;  %v4403_v8 = vmax.f32 %v4320_v47, %v4371_v24  ;;  %v4418_v32 = vmax.f32 %v4402_v55, %v8012_v23  ;;  %v4206_v5 = vsel %vm8843_vm1, %v5196_v18, %v5210_v56 }
 0x3ce   : > { %v4442_v9 = vmax.f32 %v4416_v15, %v4204_v4  ;;  %v4443_v22 = vmax.f32 %v4417_v63, %v4205_v30  ;;  %v4207_v46 = vsel %vm8844_vm5, %v5210_v56, %v5211_v25  ;;  %v4238_v38 = vmax.f32 %v8012_v23, %v4206_v5  ;;  %vm8859_vm5 = vmmov %vm8846_vm0 }
 0x3cf   : > { %4509 = vst [vmem:[%s8111_s16 + $0x10] sm:$0xff] %v4501_v0  ;;  %v4419_v60 = vmax.f32 %v4403_v8, %v8021_v17  ;;  %v4444_v11 = vmax.f32 %v4418_v32, %v4206_v5  ;;  %v5240_v18 = vunpack.i.l.bf16 %v8137_v45  ;;  %v4239_v26 = vmax.f32 %v8021_v17, %v4207_v46 }
 0x3d0   : > { %v4466_v44 = vmax.f32 %v4442_v9, %v4287_v54  ;;  %v5224_v43 = vpop.permute.xlu1 %5223  ;;  %v4467_v1 = vmax.f32 %v4443_v22, %v4288_v50  ;;  %v5241_v15 = vunpack.i.h.bf16 %v8137_v45  ;;  %v5245_v30 = vunpack.i.l.bf16 %v8161_v3 }
 0x3d1   : > { %v5214_v29 = vpop.permute.xlu0 %5213  ;;  %v5226_v14 = vunpack.i.h.bf16 %v5224_v43  ;;  %v5225_v62 = vunpack.i.l.bf16 %v5224_v43  ;;  %v4445_v50 = vmax.f32 %v4419_v60, %v4207_v46  ;;  %v5246_v5 = vunpack.i.h.bf16 %v8161_v3 }
 0x3d2   : > { %v4490_v48 = vmax.f32 %v4466_v44, %v4370_v53  ;;  %v5215_v41 = vunpack.i.l.bf16 %v5214_v29  ;;  %v5216_v57 = vunpack.i.h.bf16 %v5214_v29  ;;  %v8176_v35 = vpop.permute.xlu2 %4358 }
 0x3d3   : > { %v4208_v21 = vsel %vm8849_vm13, %v5211_v25, %v5225_v62  ;;  %v4209_v54 = vsel %vm8850_vm8, %v5225_v62, %v5226_v14  ;;  %v4210_v27 = vsel %vm8851_vm15, %v5226_v14, %v5240_v18 }
 0x3d4   : > { %v4502_v42 = vpack.c.bf16 %v4490_v48, %v4489_v37  ;;  %v4289_v52 = vsel %vm8845_vm10, %v5201_v39, %v5215_v41  ;;  %v4290_v49 = vsel %vm8846_vm0, %v5215_v41, %v5216_v57  ;;  %v4491_v39 = vmax.f32 %v4467_v1, %v4371_v24  ;;  %vm8860_vm10 = vmmov %vm8846_vm0 }
 0x3d5   : > { %v4321_v4 = vmax.f32 %v4238_v38, %v4289_v52  ;;  %v4468_v23 = vmax.f32 %v4444_v11, %v4289_v52  ;;  %v4322_v2 = vmax.f32 %v4239_v26, %v4290_v49  ;;  %v4240_v12 = vmax.f32 %v8023_v33, %v4208_v21  ;;  %vm8861_vm0 = vmmov %vm8857_vm2 }
 0x3d6   : > { %4510 = vst [vmem:[%s8111_s16 + $0x18] sm:$0xff] %v4502_v42  ;;  %v4241_v7 = vmax.f32 %v8032_v36, %v4209_v54  ;;  %v4242_v44 = vmax.f32 %v8034_v6, %v4210_v27  ;;  %v4469_v56 = vmax.f32 %v4445_v50, %v4290_v49 }
 0x3d8   : > { %v5229_v28 = vpop.permute.xlu1 %5228 }
 0x3d9   : > { %v5219_v10 = vpop.permute.xlu0 %5218  ;;  %v5231_v59 = vunpack.i.h.bf16 %v5229_v28  ;;  %v5230_v51 = vunpack.i.l.bf16 %v5229_v28  ;;  %v4431_v28 = vsel %vm8858_vm3, %v5240_v18, %v5241_v15 }
 0x3da   : > { %v5221_v61 = vunpack.i.h.bf16 %v5219_v10  ;;  %v5220_v58 = vunpack.i.l.bf16 %v5219_v10  ;;  %v5249_v22 = vpop.permute.xlu2 %5248 }
 0x3db   : > { %v4292_v19 = vsel %vm8853_vm14, %v5230_v51, %v5231_v59  ;;  %v4293_v63 = vsel %vm8854_vm11, %v5231_v59, %v5245_v30  ;;  %v5250_v11 = vunpack.i.l.bf16 %v5249_v22  ;;  %v5251_v62 = vunpack.i.h.bf16 %v5249_v22 }
 0x3dc   : > { %v4372_v40 = vsel %vm8847_vm9, %v5206_v20, %v5220_v58  ;;  %v4373_v16 = vsel %vm8848_vm4, %v5220_v58, %v5221_v61  ;;  %v4291_v20 = vsel %vm8852_vm12, %v5216_v57, %v5230_v51  ;;  %v4324_v37 = vmax.f32 %v4241_v7, %v4292_v19  ;;  %vm8862_vm9 = vmmov %vm8861_vm0 }
 0x3dd   : > { %v4404_v34 = vmax.f32 %v4321_v4, %v4372_v40  ;;  %v4492_v17 = vmax.f32 %v4468_v23, %v4372_v40  ;;  %v4405_v0 = vmax.f32 %v4322_v2, %v4373_v16  ;;  %v4323_v47 = vmax.f32 %v4240_v12, %v4291_v20 }
 0x3de   : > { %v4325_v48 = vmax.f32 %v4242_v44, %v4293_v63  ;;  %v4493_v57 = vmax.f32 %v4469_v56, %v4373_v16  ;;  %v4455_v58 = vsel %vm8859_vm5, %v5245_v30, %v5246_v5  ;;  %v4480_v51 = vsel %vm8862_vm9, %v5250_v11, %v5251_v62 }
 0x3df   : > { %v4420_v53 = vmax.f32 %v4404_v34, %v8023_v33  ;;  %v4503_v9 = vpack.c.bf16 %v4492_v17, %v4491_v39  ;;  %v4421_v29 = vmax.f32 %v4405_v0, %v8032_v36 }
 0x3e0   : > { %v5234_v45 = vpop.permute.xlu1 %5233 }
 0x3e1   : > { %4511 = vst [vmem:[%s8111_s16 + $0x20] sm:$0xff] %v4503_v9  ;;  %v4446_v43 = vmax.f32 %v4420_v53, %v4208_v21  ;;  %v5236_v24 = vunpack.i.h.bf16 %v5234_v45  ;;  %v5235_v55 = vunpack.i.l.bf16 %v5234_v45  ;;  %v4430_v46 = vpop.permute.xlu0 %4429  ;;  %v4447_v38 = vmax.f32 %v4421_v29, %v4209_v54 }
 0x3e2   : > { %v4432_v10 = vsel %vm8843_vm1, %v5241_v15, %v4430_v46 }
 0x3e3   : > { %v4470_v25 = vmax.f32 %v4446_v43, %v4291_v20  ;;  %v4374_v33 = vsel %vm8855_vm6, %v5221_v61, %v5235_v55  ;;  %v4375_v8 = vsel %vm8856_vm7, %v5235_v55, %v5236_v24  ;;  %v4376_v42 = vsel %vm8857_vm2, %v5236_v24, %v8176_v35 }
 0x3e4   : > { %v4406_v41 = vmax.f32 %v4323_v47, %v4374_v33  ;;  %v4407_v32 = vmax.f32 %v4324_v37, %v4375_v8  ;;  %v4408_v36 = vmax.f32 %v4325_v48, %v4376_v42  ;;  %v4471_v4 = vmax.f32 %v4447_v38, %v4292_v19 }
 0x3e5   : > { %v4494_v60 = vmax.f32 %v4470_v25, %v4374_v33 }
 0x3e6   : > { %v4422_v52 = vmax.f32 %v4406_v41, %v8034_v6  ;;  %v4423_v1 = vmax.f32 %v4407_v32, %v8043_v13  ;;  %v4424_v14 = vmax.f32 %v4408_v36, %v8045_v31  ;;  %v4479_v31 = vsel %vm8861_vm0, %v8176_v35, %v5250_v11 }
 0x3e7   : > { %v4504_v49 = vpack.c.bf16 %v4494_v60, %v4493_v57  ;;  %v4495_v2 = vmax.f32 %v4471_v4, %v4375_v8 }
 0x3e8   : > { %v4448_v3 = vmax.f32 %v4422_v52, %v4210_v27  ;;  %v4449_v26 = vmax.f32 %v4423_v1, %v4431_v28  ;;  %v4454_v61 = vpop.permute.xlu1 %4453  ;;  %v4450_v6 = vmax.f32 %v4424_v14, %v4432_v10 }
 0x3e9   : > { %4512 = vst [vmem:[%s8111_s16 + $0x28] sm:$0xff] %v4504_v49  ;;  %v4456_v13 = vsel %vm8860_vm10, %v5246_v5, %v4454_v61 }
 0x3ea   : > { %v4472_v18 = vmax.f32 %v4448_v3, %v4293_v63  ;;  %v4473_v23 = vmax.f32 %v4449_v26, %v4455_v58  ;;  %v4474_v59 = vmax.f32 %v4450_v6, %v4456_v13 }
 0x3ec   : > { %v4496_v39 = vmax.f32 %v4472_v18, %v4376_v42  ;;  %v4497_v40 = vmax.f32 %v4473_v23, %v4479_v31  ;;  %v4498_v16 = vmax.f32 %v4474_v59, %v4480_v51 }
 0x3ee   : > { %v4505_v21 = vpack.c.bf16 %v4496_v39, %v4495_v2  ;;  %v4506_v54 = vpack.c.bf16 %v4498_v16, %v4497_v40 }
 0x3f0   : > { %4513 = vst [vmem:[%s8111_s16 + $0x30] sm:$0xff] %v4505_v21 }
 0x3f1   : > { %4514 = vst [vmem:[%s8111_s16 + $0x38] sm:$0xff] %v4506_v54 }
 0x3f2 PF: > { %s14_s15 = sadd.s32 1, %s5259_s15  }
 0x3f3   : > { %p11_p6 = scmp.ge.s32.totalorder %s14_s15, 6  }
 0x3f5   :  { %13 = sbr.rel (!%p11_p6) target bundleno = 1 (0x1), region = 106 }

</bundles_post_ra>
